<compile_context>
chip_gen: v6e
topology: v6e:2x2x1
jax: 0.10.0
libtpu: 0.0.40
codegen_flags: <defaults>
</compile_context>

<pallas_src>
import functools

import jax
import jax.numpy as jnp
from jax.experimental import pallas as pl
from jax.experimental.pallas import tpu as pltpu

# MXU operand dtype (accumulation is always f32 via preferred_element_type).
MATMUL_DTYPE = jnp.bfloat16


# ----------------------------------------------------------------------------
# Fused forward kernel: one grid step == `bt` images.
#   conv3x3(+bias,ReLU) -> Im2Seq (mean over H) -> neck Linear(+ReLU) -> head Linear
# ----------------------------------------------------------------------------
def _fused_forward_kernel(xp_ref, cw_ref, cb_ref, nw_ref, nb_ref, hw_ref,
                          hb_ref, out_ref, col_ref, *, bt, H, W, C_pad):
    C_bb = cb_ref.shape[1]
    K = 9 * C_pad
    M = bt * H * W

    # ---- im2col in VMEM (never materialized in HBM) -------------------------
    # Write the 9 shifted (bt, H, W, C_pad) taps side by side along the lane
    # axis of a VMEM scratch.  Static slices, fully unrolled Python loops:
    # no loop-carried dependency, no dynamic row loads, and the conv becomes a
    # single wide-contraction MXU dot (K = 72 lanes instead of 8).
    for dh in range(3):
        for dw in range(3):
            t = dh * 3 + dw
            col_ref[:, :, :, t * C_pad:(t + 1) * C_pad] = \
                xp_ref[:, dh:dh + H, dw:dw + W, :]

    col = col_ref[...].reshape(M, K).astype(MATMUL_DTYPE)      # (M, 72) bf16

    # ---- backbone: conv3x3 + bias + ReLU as ONE matmul ----------------------
    feat = jnp.dot(col, cw_ref[...], preferred_element_type=jnp.float32)
    feat = jnp.maximum(feat + cb_ref[...], 0.0)                # (M, C_bb) f32

    # ---- Im2Seq: mean over H (W becomes the sequence axis) ------------------
    seq = feat.reshape(bt, H, W, C_bb).sum(axis=1) * (1.0 / H)  # (bt, W, C_bb)

    # ---- neck: Linear + ReLU -------------------------------------------------
    seq2 = seq.reshape(bt * W, C_bb).astype(MATMUL_DTYPE)
    neck = jnp.dot(seq2, nw_ref[...], preferred_element_type=jnp.float32)
    neck = jnp.maximum(neck + nb_ref[...], 0.0)                # (bt*W, C_nk) f32

    # ---- head: Linear classifier (classes zero-padded to 128 lanes) ---------
    logits = jnp.dot(neck.astype(MATMUL_DTYPE), hw_ref[...],
                     preferred_element_type=jnp.float32) + hb_ref[...]
    out_ref[...] = logits.reshape(bt, W, -1).astype(out_ref.dtype)


# ----------------------------------------------------------------------------
# BaseModel.forward wrapper
# ----------------------------------------------------------------------------
@functools.partial(jax.jit, static_argnames=("num_classes", "bt"))
def base_model_forward(x_nchw, params, *, num_classes, bt=8):
    """x (B, C, H, W) -> backbone -> neck -> head -> (B, W, num_classes)."""
    B, C, H, W = x_nchw.shape
    K, C_bb = params["conv_w"].shape
    C_pad = K // 9
    C_nk = params["neck_w"].shape[1]
    NC_pad = params["head_w"].shape[1]
    assert C <= C_pad and K == 9 * C_pad

    bt = max(1, min(bt, B))
    n_blk = pl.cdiv(B, bt)
    B_pad = n_blk * bt

    # NCHW -> NHWC, pad batch to a bt multiple, SAME halo pad, channel pad.
    # TODO(synk): fuse this relayout/halo pad into the kernel DMA (needs an
    # in-kernel NCHW transpose); left as a single fused XLA producer since its
    # bytes are negligible vs. the in-kernel matmul work at these shapes.
    x_nhwc = jnp.transpose(x_nchw, (0, 2, 3, 1)).astype(jnp.float32)
    xp = jnp.pad(x_nhwc, ((0, B_pad - B), (1, 1), (1, 1), (0, C_pad - C)))

    flops = 2 * B_pad * W * (H * K * C_bb + C_bb * C_nk + C_nk * NC_pad)
    bytes_accessed = (4 * xp.size + 4 * B_pad * W * NC_pad
                      + 2 * (params["conv_w"].size + params["neck_w"].size
                             + params["head_w"].size)
                      + 4 * (params["conv_b"].size + params["neck_b"].size
                             + params["head_b"].size))

    out = pl.pallas_call(
        functools.partial(_fused_forward_kernel, bt=bt, H=H, W=W, C_pad=C_pad),
        out_shape=jax.ShapeDtypeStruct((B_pad, W, NC_pad), jnp.float32),
        grid=(n_blk,),
        in_specs=[
            pl.BlockSpec((bt, H + 2, W + 2, C_pad), lambda b: (b, 0, 0, 0)),  # images
            pl.BlockSpec((K, C_bb), lambda b: (0, 0)),                        # conv_w
            pl.BlockSpec((1, C_bb), lambda b: (0, 0)),                        # conv_b
            pl.BlockSpec((C_bb, C_nk), lambda b: (0, 0)),                     # neck_w
            pl.BlockSpec((1, C_nk), lambda b: (0, 0)),                        # neck_b
            pl.BlockSpec((C_nk, NC_pad), lambda b: (0, 0)),                   # head_w
            pl.BlockSpec((1, NC_pad), lambda b: (0, 0)),                      # head_b
        ],
        out_specs=pl.BlockSpec((bt, W, NC_pad), lambda b: (b, 0, 0)),
        scratch_shapes=[pltpu.VMEM((bt, H, W, K), jnp.float32)],              # im2col
        compiler_params=pltpu.CompilerParams(
            dimension_semantics=("parallel",),      # batch blocks shard across TCs
            vmem_limit_bytes=32 * 1024 * 1024,      # safe on v5e/v6e/v7x
        ),
        cost_estimate=pl.CostEstimate(flops=flops, transcendentals=0,
                                      bytes_accessed=bytes_accessed),
    )(xp, params["conv_w"], params["conv_b"], params["neck_w"],
      params["neck_b"], params["head_w"], params["head_b"])

    return out[:B, :, :num_classes]                 # drop batch + class padding


# ----------------------------------------------------------------------------
# Parameter construction (deterministic, kernel-friendly padded layouts).
# Porting real PyTorch weights: conv OIHW -> permute to (kh, kw, in, out), pad
# in-channels to C_pad, reshape (9*C_pad, out); nn.Linear weight (out, in) ->
# transpose.  Pad extra class columns with zeros as below.  Weights bf16.
# ----------------------------------------------------------------------------
def init_params(key, in_channels=3, backbone_out=16, neck_out=32, num_classes=37):
    C_pad = ((max(in_channels, 1) + 7) // 8) * 8
    NC_pad = ((num_classes + 127) // 128) * 128
    k1, k2, k3, k4, k5, k6 = jax.random.split(key, 6)

    cw = jax.random.normal(k1, (3, 3, in_channels, backbone_out), jnp.float32) * 0.1
    cw_pad = jnp.zeros((3, 3, C_pad, backbone_out), jnp.float32
                       ).at[:, :, :in_channels, :].set(cw)
    conv_w = cw_pad.reshape(9 * C_pad, backbone_out).astype(jnp.bfloat16)
    conv_b = jax.random.normal(k2, (1, backbone_out), jnp.float32) * 0.01

    neck_w = (jax.random.normal(k3, (backbone_out, neck_out), jnp.float32) * 0.1
              ).astype(jnp.bfloat16)
    neck_b = jax.random.normal(k4, (1, neck_out), jnp.float32) * 0.01

    hw = jax.random.normal(k5, (neck_out, num_classes), jnp.float32) * 0.1
    head_w = jnp.zeros((neck_out, NC_pad), jnp.float32
                       ).at[:, :num_classes].set(hw).astype(jnp.bfloat16)
    hb = jax.random.normal(k6, (1, num_classes), jnp.float32) * 0.01
    head_b = jnp.zeros((1, NC_pad), jnp.float32).at[:, :num_classes].set(hb)

    return dict(conv_w=conv_w, conv_b=conv_b, neck_w=neck_w, neck_b=neck_b,
                head_w=head_w, head_b=head_b)


# ----------------------------------------------------------------------------
# Pure-JAX f32 reference of the same forward (sanity check only).
# ----------------------------------------------------------------------------
def reference_forward(x_nchw, params, num_classes):
    B, C, H, W = x_nchw.shape
    cw = params["conv_w"].astype(jnp.float32)            # (9*C_pad, C_bb)
    C_pad = cw.shape[0] // 9
    x = jnp.transpose(x_nchw, (0, 2, 3, 1)).astype(jnp.float32)
    xp = jnp.pad(x, ((0, 0), (1, 1), (1, 1), (0, C_pad - C)))
    col = jnp.concatenate([xp[:, dh:dh + H, dw:dw + W, :]
                           for dh in range(3) for dw in range(3)], axis=-1)
    feat = jnp.maximum(jnp.einsum("bhwk,kd->bhwd", col, cw)
                       + params["conv_b"][0], 0.0)
    seq = feat.mean(axis=1)                               # (B, W, C_bb)
    neck = jnp.maximum(seq @ params["neck_w"].astype(jnp.float32)
                       + params["neck_b"][0], 0.0)
    logits = neck @ params["head_w"].astype(jnp.float32) + params["head_b"][0]
    return logits[:, :, :num_classes]


if __name__ == "__main__":
    key = jax.random.PRNGKey(0)
    pkey, xkey = jax.random.split(key)

    B, C, H, W = 6, 3, 16, 16            # B=6 with bt=4 exercises batch padding
    NUM_CLASSES = 37
    params = init_params(pkey, in_channels=C, backbone_out=16,
                         neck_out=32, num_classes=NUM_CLASSES)
    x = jax.random.normal(xkey, (B, C, H, W), jnp.float32)   # PyTorch NCHW input

    out = base_model_forward(x, params, num_classes=NUM_CLASSES, bt=4)
    jax.block_until_ready(out)

    assert out.shape == (B, W, NUM_CLASSES), out.shape
    assert out.dtype == jnp.float32

    ref = reference_forward(x, params, NUM_CLASSES)
    err = float(jnp.max(jnp.abs(out - ref)))
    assert err < 5e-2, f"max abs error vs reference: {err}"   # bf16 matmul tolerance

    print("KERNEL_OK")
</pallas_src>

<mosaic_0001>
module attributes {stable_mosaic.version = 11 : i64} {
  func.func @_fused_forward_kernel(%arg0: i32, %arg1: memref<4x18x18x8xf32, #tpu.memory_space<vmem>>, %arg2: memref<72x16xbf16, #tpu.memory_space<vmem>>, %arg3: memref<1x16xf32, #tpu.memory_space<vmem>>, %arg4: memref<16x32xbf16, #tpu.memory_space<vmem>>, %arg5: memref<1x32xf32, #tpu.memory_space<vmem>>, %arg6: memref<32x128xbf16, #tpu.memory_space<vmem>>, %arg7: memref<1x128xf32, #tpu.memory_space<vmem>>, %arg8: memref<4x16x128xf32, #tpu.memory_space<vmem>>, %arg9: memref<4x16x16x72xf32, #tpu.memory_space<vmem>>) attributes {dimension_semantics = [#tpu.dimension_semantics<parallel>], iteration_bounds = array<i64: 2>, scalar_prefetch = 0 : i64, scratch_operands = 1 : i64, tpu.core_type = #tpu.core_type<tc>, window_params = [{transform_indices = @transform_0, window_bounds = array<i64: 4, 18, 18, 8>}, {pipeline_mode = #tpu.pipeline_mode<synchronous>, transform_indices = @transform_1, window_bounds = array<i64: 72, 16>}, {pipeline_mode = #tpu.pipeline_mode<synchronous>, transform_indices = @transform_2, window_bounds = array<i64: 1, 16>}, {pipeline_mode = #tpu.pipeline_mode<synchronous>, transform_indices = @transform_3, window_bounds = array<i64: 16, 32>}, {pipeline_mode = #tpu.pipeline_mode<synchronous>, transform_indices = @transform_4, window_bounds = array<i64: 1, 32>}, {pipeline_mode = #tpu.pipeline_mode<synchronous>, transform_indices = @transform_5, window_bounds = array<i64: 32, 128>}, {pipeline_mode = #tpu.pipeline_mode<synchronous>, transform_indices = @transform_6, window_bounds = array<i64: 1, 128>}, {transform_indices = @transform_7, window_bounds = array<i64: 4, 16, 128>}]} {
    %c0 = arith.constant 0 : index
    %c0_0 = arith.constant 0 : index
    %c0_1 = arith.constant 0 : index
    %c0_2 = arith.constant 0 : index
    %0 = vector.load %arg1[%c0, %c0_0, %c0_1, %c0_2] : memref<4x18x18x8xf32, #tpu.memory_space<vmem>>, vector<4x16x16x8xf32>
    %c0_3 = arith.constant 0 : index
    %c0_4 = arith.constant 0 : index
    %c0_5 = arith.constant 0 : index
    %c0_6 = arith.constant 0 : index
    %1 = vector.load %arg9[%c0_3, %c0_4, %c0_5, %c0_6] : memref<4x16x16x72xf32, #tpu.memory_space<vmem>>, vector<4x16x16x8xf32>
    tpu.vector_store %arg9[%c0_3, %c0_4, %c0_5, %c0_6], %0 {strides = array<i32>} : memref<4x16x16x72xf32, #tpu.memory_space<vmem>>, vector<4x16x16x8xf32>,
    %c0_7 = arith.constant 0 : index
    %c0_8 = arith.constant 0 : index
    %c1 = arith.constant 1 : index
    %c0_9 = arith.constant 0 : index
    %2 = vector.load %arg1[%c0_7, %c0_8, %c1, %c0_9] : memref<4x18x18x8xf32, #tpu.memory_space<vmem>>, vector<4x16x16x8xf32>
    %c0_10 = arith.constant 0 : index
    %c0_11 = arith.constant 0 : index
    %c0_12 = arith.constant 0 : index
    %c8 = arith.constant 8 : index
    %3 = vector.load %arg9[%c0_10, %c0_11, %c0_12, %c8] : memref<4x16x16x72xf32, #tpu.memory_space<vmem>>, vector<4x16x16x8xf32>
    tpu.vector_store %arg9[%c0_10, %c0_11, %c0_12, %c8], %2 {strides = array<i32>} : memref<4x16x16x72xf32, #tpu.memory_space<vmem>>, vector<4x16x16x8xf32>,
    %c0_13 = arith.constant 0 : index
    %c0_14 = arith.constant 0 : index
    %c2 = arith.constant 2 : index
    %c0_15 = arith.constant 0 : index
    %4 = vector.load %arg1[%c0_13, %c0_14, %c2, %c0_15] : memref<4x18x18x8xf32, #tpu.memory_space<vmem>>, vector<4x16x16x8xf32>
    %c0_16 = arith.constant 0 : index
    %c0_17 = arith.constant 0 : index
    %c0_18 = arith.constant 0 : index
    %c16 = arith.constant 16 : index
    %5 = vector.load %arg9[%c0_16, %c0_17, %c0_18, %c16] : memref<4x16x16x72xf32, #tpu.memory_space<vmem>>, vector<4x16x16x8xf32>
    tpu.vector_store %arg9[%c0_16, %c0_17, %c0_18, %c16], %4 {strides = array<i32>} : memref<4x16x16x72xf32, #tpu.memory_space<vmem>>, vector<4x16x16x8xf32>,
    %c0_19 = arith.constant 0 : index
    %c1_20 = arith.constant 1 : index
    %c0_21 = arith.constant 0 : index
    %c0_22 = arith.constant 0 : index
    %6 = vector.load %arg1[%c0_19, %c1_20, %c0_21, %c0_22] : memref<4x18x18x8xf32, #tpu.memory_space<vmem>>, vector<4x16x16x8xf32>
    %c0_23 = arith.constant 0 : index
    %c0_24 = arith.constant 0 : index
    %c0_25 = arith.constant 0 : index
    %c24 = arith.constant 24 : index
    %7 = vector.load %arg9[%c0_23, %c0_24, %c0_25, %c24] : memref<4x16x16x72xf32, #tpu.memory_space<vmem>>, vector<4x16x16x8xf32>
    tpu.vector_store %arg9[%c0_23, %c0_24, %c0_25, %c24], %6 {strides = array<i32>} : memref<4x16x16x72xf32, #tpu.memory_space<vmem>>, vector<4x16x16x8xf32>,
    %c0_26 = arith.constant 0 : index
    %c1_27 = arith.constant 1 : index
    %c1_28 = arith.constant 1 : index
    %c0_29 = arith.constant 0 : index
    %8 = vector.load %arg1[%c0_26, %c1_27, %c1_28, %c0_29] : memref<4x18x18x8xf32, #tpu.memory_space<vmem>>, vector<4x16x16x8xf32>
    %c0_30 = arith.constant 0 : index
    %c0_31 = arith.constant 0 : index
    %c0_32 = arith.constant 0 : index
    %c32 = arith.constant 32 : index
    %9 = vector.load %arg9[%c0_30, %c0_31, %c0_32, %c32] : memref<4x16x16x72xf32, #tpu.memory_space<vmem>>, vector<4x16x16x8xf32>
    tpu.vector_store %arg9[%c0_30, %c0_31, %c0_32, %c32], %8 {strides = array<i32>} : memref<4x16x16x72xf32, #tpu.memory_space<vmem>>, vector<4x16x16x8xf32>,
    %c0_33 = arith.constant 0 : index
    %c1_34 = arith.constant 1 : index
    %c2_35 = arith.constant 2 : index
    %c0_36 = arith.constant 0 : index
    %10 = vector.load %arg1[%c0_33, %c1_34, %c2_35, %c0_36] : memref<4x18x18x8xf32, #tpu.memory_space<vmem>>, vector<4x16x16x8xf32>
    %c0_37 = arith.constant 0 : index
    %c0_38 = arith.constant 0 : index
    %c0_39 = arith.constant 0 : index
    %c40 = arith.constant 40 : index
    %11 = vector.load %arg9[%c0_37, %c0_38, %c0_39, %c40] : memref<4x16x16x72xf32, #tpu.memory_space<vmem>>, vector<4x16x16x8xf32>
    tpu.vector_store %arg9[%c0_37, %c0_38, %c0_39, %c40], %10 {strides = array<i32>} : memref<4x16x16x72xf32, #tpu.memory_space<vmem>>, vector<4x16x16x8xf32>,
    %c0_40 = arith.constant 0 : index
    %c2_41 = arith.constant 2 : index
    %c0_42 = arith.constant 0 : index
    %c0_43 = arith.constant 0 : index
    %12 = vector.load %arg1[%c0_40, %c2_41, %c0_42, %c0_43] : memref<4x18x18x8xf32, #tpu.memory_space<vmem>>, vector<4x16x16x8xf32>
    %c0_44 = arith.constant 0 : index
    %c0_45 = arith.constant 0 : index
    %c0_46 = arith.constant 0 : index
    %c48 = arith.constant 48 : index
    %13 = vector.load %arg9[%c0_44, %c0_45, %c0_46, %c48] : memref<4x16x16x72xf32, #tpu.memory_space<vmem>>, vector<4x16x16x8xf32>
    tpu.vector_store %arg9[%c0_44, %c0_45, %c0_46, %c48], %12 {strides = array<i32>} : memref<4x16x16x72xf32, #tpu.memory_space<vmem>>, vector<4x16x16x8xf32>,
    %c0_47 = arith.constant 0 : index
    %c2_48 = arith.constant 2 : index
    %c1_49 = arith.constant 1 : index
    %c0_50 = arith.constant 0 : index
    %14 = vector.load %arg1[%c0_47, %c2_48, %c1_49, %c0_50] : memref<4x18x18x8xf32, #tpu.memory_space<vmem>>, vector<4x16x16x8xf32>
    %c0_51 = arith.constant 0 : index
    %c0_52 = arith.constant 0 : index
    %c0_53 = arith.constant 0 : index
    %c56 = arith.constant 56 : index
    %15 = vector.load %arg9[%c0_51, %c0_52, %c0_53, %c56] : memref<4x16x16x72xf32, #tpu.memory_space<vmem>>, vector<4x16x16x8xf32>
    tpu.vector_store %arg9[%c0_51, %c0_52, %c0_53, %c56], %14 {strides = array<i32>} : memref<4x16x16x72xf32, #tpu.memory_space<vmem>>, vector<4x16x16x8xf32>,
    %c0_54 = arith.constant 0 : index
    %c2_55 = arith.constant 2 : index
    %c2_56 = arith.constant 2 : index
    %c0_57 = arith.constant 0 : index
    %16 = vector.load %arg1[%c0_54, %c2_55, %c2_56, %c0_57] : memref<4x18x18x8xf32, #tpu.memory_space<vmem>>, vector<4x16x16x8xf32>
    %c0_58 = arith.constant 0 : index
    %c0_59 = arith.constant 0 : index
    %c0_60 = arith.constant 0 : index
    %c64 = arith.constant 64 : index
    %17 = vector.load %arg9[%c0_58, %c0_59, %c0_60, %c64] : memref<4x16x16x72xf32, #tpu.memory_space<vmem>>, vector<4x16x16x8xf32>
    tpu.vector_store %arg9[%c0_58, %c0_59, %c0_60, %c64], %16 {strides = array<i32>} : memref<4x16x16x72xf32, #tpu.memory_space<vmem>>, vector<4x16x16x8xf32>,
    %c0_61 = arith.constant 0 : index
    %c0_62 = arith.constant 0 : index
    %c0_63 = arith.constant 0 : index
    %c0_64 = arith.constant 0 : index
    %18 = vector.load %arg9[%c0_61, %c0_62, %c0_63, %c0_64] : memref<4x16x16x72xf32, #tpu.memory_space<vmem>>, vector<4x16x16x72xf32>
    %19 = vector.shape_cast %18 : vector<4x16x16x72xf32> to vector<1024x72xf32>
    %20 = arith.truncf %19 : vector<1024x72xf32> to vector<1024x72xbf16>
    %c0_65 = arith.constant 0 : index
    %c0_66 = arith.constant 0 : index
    %21 = vector.load %arg2[%c0_65, %c0_66] : memref<72x16xbf16, #tpu.memory_space<vmem>>, vector<72x16xbf16>
    %cst = arith.constant dense<0.000000e+00> : vector<1024x16xf32>
    %22 = tpu.matmul %20, %21, %cst {dimension_numbers = #tpu.dot_dimension_numbers<[1], [0], [0], [1], [0, 0, 1, 1], [], []>} : vector<1024x72xbf16>, vector<72x16xbf16>, vector<1024x16xf32> -> vector<1024x16xf32>
    %c0_67 = arith.constant 0 : index
    %c0_68 = arith.constant 0 : index
    %23 = vector.load %arg3[%c0_67, %c0_68] : memref<1x16xf32, #tpu.memory_space<vmem>>, vector<1x16xf32>
    %24 = vector.broadcast %23 : vector<1x16xf32> to vector<1024x16xf32>
    %25 = arith.addf %22, %24 : vector<1024x16xf32>
    %cst_69 = arith.constant 0.000000e+00 : f32
    %26 = vector.broadcast %cst_69 : f32 to vector<1024x16xf32>
    %27 = arith.maximumf %25, %26 : vector<1024x16xf32>
    %28 = vector.shape_cast %27 : vector<1024x16xf32> to vector<4x16x16x16xf32>
    %cst_70 = arith.constant dense<0.000000e+00> : vector<4x16x16xf32>
    %29 = vector.multi_reduction <add>, %28, %cst_70 [1] : vector<4x16x16x16xf32> to vector<4x16x16xf32>
    %cst_71 = arith.constant 6.250000e-02 : f32
    %30 = vector.broadcast %cst_71 : f32 to vector<4x16x16xf32>
    %31 = arith.mulf %29, %30 : vector<4x16x16xf32>
    %32 = vector.shape_cast %31 : vector<4x16x16xf32> to vector<64x16xf32>
    %33 = arith.truncf %32 : vector<64x16xf32> to vector<64x16xbf16>
    %c0_72 = arith.constant 0 : index
    %c0_73 = arith.constant 0 : index
    %34 = vector.load %arg4[%c0_72, %c0_73] : memref<16x32xbf16, #tpu.memory_space<vmem>>, vector<16x32xbf16>
    %cst_74 = arith.constant dense<0.000000e+00> : vector<64x32xf32>
    %35 = tpu.matmul %33, %34, %cst_74 {dimension_numbers = #tpu.dot_dimension_numbers<[1], [0], [0], [1], [0, 0, 1, 1], [], []>} : vector<64x16xbf16>, vector<16x32xbf16>, vector<64x32xf32> -> vector<64x32xf32>
    %c0_75 = arith.constant 0 : index
    %c0_76 = arith.constant 0 : index
    %36 = vector.load %arg5[%c0_75, %c0_76] : memref<1x32xf32, #tpu.memory_space<vmem>>, vector<1x32xf32>
    %37 = vector.broadcast %36 : vector<1x32xf32> to vector<64x32xf32>
    %38 = arith.addf %35, %37 : vector<64x32xf32>
    %cst_77 = arith.constant 0.000000e+00 : f32
    %39 = vector.broadcast %cst_77 : f32 to vector<64x32xf32>
    %40 = arith.maximumf %38, %39 : vector<64x32xf32>
    %41 = arith.truncf %40 : vector<64x32xf32> to vector<64x32xbf16>
    %c0_78 = arith.constant 0 : index
    %c0_79 = arith.constant 0 : index
    %42 = vector.load %arg6[%c0_78, %c0_79] : memref<32x128xbf16, #tpu.memory_space<vmem>>, vector<32x128xbf16>
    %cst_80 = arith.constant dense<0.000000e+00> : vector<64x128xf32>
    %43 = tpu.matmul %41, %42, %cst_80 {dimension_numbers = #tpu.dot_dimension_numbers<[1], [0], [0], [1], [0, 0, 1, 1], [], []>} : vector<64x32xbf16>, vector<32x128xbf16>, vector<64x128xf32> -> vector<64x128xf32>
    %c0_81 = arith.constant 0 : index
    %c0_82 = arith.constant 0 : index
    %44 = vector.load %arg7[%c0_81, %c0_82] : memref<1x128xf32, #tpu.memory_space<vmem>>, vector<1x128xf32>
    %45 = vector.broadcast %44 : vector<1x128xf32> to vector<64x128xf32>
    %46 = arith.addf %43, %45 : vector<64x128xf32>
    %47 = vector.shape_cast %46 : vector<64x128xf32> to vector<4x16x128xf32>
    %c0_83 = arith.constant 0 : index
    %c0_84 = arith.constant 0 : index
    %c0_85 = arith.constant 0 : index
    %48 = vector.load %arg8[%c0_83, %c0_84, %c0_85] : memref<4x16x128xf32, #tpu.memory_space<vmem>>, vector<4x16x128xf32>
    tpu.vector_store %arg8[%c0_83, %c0_84, %c0_85], %47 {strides = array<i32>} : memref<4x16x128xf32, #tpu.memory_space<vmem>>, vector<4x16x128xf32>,
    return
  }
  func.func @transform_0(%arg0: i32) -> (i32, i32, i32, i32) {
    %c0_i32 = arith.constant 0 : i32
    %c0_i32_0 = arith.constant 0 : i32
    %c0_i32_1 = arith.constant 0 : i32
    %c0_i32_2 = arith.constant 0 : i32
    return %arg0, %c0_i32, %c0_i32_0, %c0_i32_1 : i32, i32, i32, i32
  }
  func.func @transform_1(%arg0: i32) -> (i32, i32) {
    %c0_i32 = arith.constant 0 : i32
    %c0_i32_0 = arith.constant 0 : i32
    %c0_i32_1 = arith.constant 0 : i32
    return %c0_i32, %c0_i32_0 : i32, i32
  }
  func.func @transform_2(%arg0: i32) -> (i32, i32) {
    %c0_i32 = arith.constant 0 : i32
    %c0_i32_0 = arith.constant 0 : i32
    %c0_i32_1 = arith.constant 0 : i32
    return %c0_i32, %c0_i32_0 : i32, i32
  }
  func.func @transform_3(%arg0: i32) -> (i32, i32) {
    %c0_i32 = arith.constant 0 : i32
    %c0_i32_0 = arith.constant 0 : i32
    %c0_i32_1 = arith.constant 0 : i32
    return %c0_i32, %c0_i32_0 : i32, i32
  }
  func.func @transform_4(%arg0: i32) -> (i32, i32) {
    %c0_i32 = arith.constant 0 : i32
    %c0_i32_0 = arith.constant 0 : i32
    %c0_i32_1 = arith.constant 0 : i32
    return %c0_i32, %c0_i32_0 : i32, i32
  }
  func.func @transform_5(%arg0: i32) -> (i32, i32) {
    %c0_i32 = arith.constant 0 : i32
    %c0_i32_0 = arith.constant 0 : i32
    %c0_i32_1 = arith.constant 0 : i32
    return %c0_i32, %c0_i32_0 : i32, i32
  }
  func.func @transform_6(%arg0: i32) -> (i32, i32) {
    %c0_i32 = arith.constant 0 : i32
    %c0_i32_0 = arith.constant 0 : i32
    %c0_i32_1 = arith.constant 0 : i32
    return %c0_i32, %c0_i32_0 : i32, i32
  }
  func.func @transform_7(%arg0: i32) -> (i32, i32, i32) {
    %c0_i32 = arith.constant 0 : i32
    %c0_i32_0 = arith.constant 0 : i32
    %c0_i32_1 = arith.constant 0 : i32
    return %arg0, %c0_i32, %c0_i32_0 : i32, i32, i32
  }
}

</mosaic_0001>

<bundles_post_ra>
// kernel: base_model_forward.1
= control target key start
LH: loop header
LB: loop body
LE: loop exit
PB: predicated region body
PF: predicated region fallthrough
CT: control target
= control target key end

     0   :  { %s9540_s24 = smov 0   ;;  %s13535_s0 = inlined_call_operand.vmem [shape: f32[8,18,18,8], index: 0, kind: input, shape index: {}]   ;;  %s13536_s1 = inlined_call_operand.vmem [shape: bf16[72,16], index: 1, kind: input, shape index: {}]   ;;  %s13537_s2 = inlined_call_operand.vmem [shape: f32[1,16], index: 2, kind: input, shape index: {}]   ;;  %s13538_s3 = inlined_call_operand.vmem [shape: bf16[16,32], index: 3, kind: input, shape index: {}]   ;;  %s13539_s4 = inlined_call_operand.vmem [shape: f32[1,32], index: 4, kind: input, shape index: {}]   ;;  %s13540_s5 = inlined_call_operand.vmem [shape: bf16[32,128], index: 5, kind: input, shape index: {}]   ;;  %s13541_s6 = inlined_call_operand.vmem [shape: f32[1,128], index: 6, kind: input, shape index: {}]   ;;  %s13542_s7 = inlined_call_operand.vmem [shape: f32[8,16,128], index: 7, kind: output, shape index: {}]  }
   0x1 LB: > { %s8336_s25 = sadd.s32 4294967295, %s9490_s24   ;;  %p8340_p0 = scmp.ge.s32.totalorder %s9490_s24, 1  ;;  %s9490_s24 = sphi %s9540_s24, %s17_s24  }
   0x2   : > { %p239_p1 = scmp.lt.s32.totalorder %s9490_s24, 3 }
   0x4   : > { %p240_p2 = pnand %p8340_p0, %p239_p1 }
   0x5   : > { %s8341_s26 = sshll.u32 (!%p240_p2), %s8336_s25, 2  ;;  %s9492_s8 = smov (!%p240_p2), 8  }
   0x6   : > { %243 = sbr.rel (%p240_p2) target bundleno = 2805 (0xaf5), region = 48  ;;  %p274_p3 = scmp.lt.s32.totalorder (!%p240_p2), %s8341_s26, 7 }
   0x7   : > { %s9493_s9 = smov (!%p240_p2), 16   ;;  %s9494_s10 = smov (!%p240_p2), 24  }
   0x8   : > { %s9495_s11 = smov (!%p240_p2), 32   ;;  %s9496_s12 = smov (!%p240_p2), 40  }
   0x9   : > { %s9497_s17 = smov (!%p240_p2), 48   ;;  %s9498_s22 = smov (!%p240_p2), 56  }
   0xb   : > { %s13544_s26 = smov (!%p274_p3, %s8341_s26), 7  ;;  %vm416_vm0 = vcmask 64512   ;;  %vm1185_vm1 = vcmask 130112   ;;  %vm1954_vm2 = vcmask 195712   ;;  %vm2724_vm3 = vcmask 261312  }
   0xc   : > { %s9452_s27 = smul.u32 432, %s13544_s26  ;;  %vm3493_vm4 = vcmask 326912   ;;  %vm4262_vm5 = vcmask 392512   ;;  %vm7127_vm6 = vcmask 1043456   ;;  %vm5032_vm7 = vcmask 458112   ;;  %s9199_s21 = sshll.u32 %s13544_s26, 4 }
   0xd   : > { %vm5801_vm8 = vcmask 523712   ;;  %vm6570_vm9 = vcmask 589312   ;;  %vm6934_vm10 = vcmask 588800   ;;  %vm7804_vm11 = vcmask 130048   ;;  %s285_s28 = scalar_lea.vmem %s13542_s7, %s9199_s21 }
   0xe   : > { %s9554_s30 = scalar_lea.vmem %s13535_s0, %s9452_s27  ;;  %s9499_s27 = smov 64   ;;  %vm8192_vm12 = vcmask 261120  }
   0xf   : > { %v547_v0 = vld [vmem:[%s9554_s30 + $0x19] sm:$0xff]  ;;  %v545_v1 = vld [vmem:[%s9554_s30 + $0x1] sm:$0xff]  ;;  %v546_v3 = vld [vmem:[%s9554_s30 + $0x9] sm:$0xff] }
  0x10   : > { %805 = vrot.lane.b32.xlu1 %v547_v0, %s9492_s8  ;;  %801 = vrot.lane.b32.xlu0 %v545_v1, %s9492_s8  ;;  %v548_v2 = vld [vmem:[%s9554_s30 + $0x21] sm:$0xff]  ;;  %v550_v4 = vld [vmem:[%s9554_s30 + $0x39] sm:$0xff] }
  0x11   : > { %v549_v5 = vld [vmem:[%s9554_s30 + $0x31] sm:$0xff]  ;;  %v551_v7 = vld [vmem:[%s9554_s30 + $0x49] sm:$0xff]  ;;  %v553_v9 = vld [vmem:[%s9554_s30 + $0x61] sm:$0xff] }
  0x12   : > { %v552_v6 = vld [vmem:[%s9554_s30 + $0x51] sm:$0xff]  ;;  %v554_v8 = vld [vmem:[%s9554_s30 + $0x69] sm:$0xff]  ;;  %v556_v10 = vld [vmem:[%s9554_s30 + $0x81] sm:$0xff] }
  0x13   : > { %v555_v11 = vld [vmem:[%s9554_s30 + $0x79] sm:$0xff]  ;;  %v557_v15 = vld [vmem:[%s9554_s30 + $0x91] sm:$0xff]  ;;  %v289_v17 = vld [vmem:[%s9554_s30 + $0x8] sm:$0xff] }
  0x14   : > { %807 = vrot.lane.b32.xlu1 %v548_v2, %s9492_s8  ;;  %803 = vrot.lane.b32.xlu0 %v546_v3, %s9492_s8  ;;  %v290_v12 = vld [vmem:[%s9554_s30 + $0x18] sm:$0xff]  ;;  %v288_v13 = vld [vmem:[%s9554_s30] sm:$0xff]  ;;  %418 = vst.msk [vmem:[#allocation2 + $0x8] sm:$0xff] %vm416_vm0, %v289_v17 }
  0x15   : > { %v558_v14 = vld [vmem:[%s9554_s30 + $0x99] sm:$0xff]  ;;  %419 = vst.msk [vmem:[#allocation2 + $0x10] sm:$0xff] %vm416_vm0, %v290_v12  ;;  %417 = vst.msk [vmem:[#allocation2] sm:$0xff] %vm416_vm0, %v288_v13  ;;  %v292_v19 = vld [vmem:[%s9554_s30 + $0x30] sm:$0xff] }
  0x16   : > { %v291_v16 = vld [vmem:[%s9554_s30 + $0x20] sm:$0xff]  ;;  %v293_v18 = vld [vmem:[%s9554_s30 + $0x38] sm:$0xff]  ;;  %421 = vst.msk [vmem:[#allocation2 + $0x20] sm:$0xff] %vm416_vm0, %v292_v19  ;;  %v295_v20 = vld [vmem:[%s9554_s30 + $0x50] sm:$0xff] }
  0x17   : > { %420 = vst.msk [vmem:[#allocation2 + $0x18] sm:$0xff] %vm416_vm0, %v291_v16  ;;  %422 = vst.msk [vmem:[#allocation2 + $0x28] sm:$0xff] %vm416_vm0, %v293_v18  ;;  %v560_v21 = vld [vmem:[%s9554_s30 + $0xb1] sm:$0xff]  ;;  %v559_v22 = vld [vmem:[%s9554_s30 + $0xa9] sm:$0xff] }
  0x18   : > { %811 = vrot.lane.b32.xlu1 %v550_v4, %s9492_s8  ;;  %809 = vrot.lane.b32.xlu0 %v549_v5, %s9492_s8  ;;  %424 = vst.msk [vmem:[#allocation2 + $0x38] sm:$0xff] %vm416_vm0, %v295_v20  ;;  %v294_v23 = vld [vmem:[%s9554_s30 + $0x48] sm:$0xff]  ;;  %v296_v25 = vld [vmem:[%s9554_s30 + $0x60] sm:$0xff] }
  0x19   : > { %423 = vst.msk [vmem:[#allocation2 + $0x30] sm:$0xff] %vm416_vm0, %v294_v23  ;;  %v297_v24 = vld [vmem:[%s9554_s30 + $0x68] sm:$0xff]  ;;  %425 = vst.msk [vmem:[#allocation2 + $0x40] sm:$0xff] %vm416_vm0, %v296_v25  ;;  %v299_v26 = vld [vmem:[%s9554_s30 + $0x80] sm:$0xff] }
  0x1a   : > { %426 = vst.msk [vmem:[#allocation2 + $0x48] sm:$0xff] %vm416_vm0, %v297_v24  ;;  %v298_v27 = vld [vmem:[%s9554_s30 + $0x78] sm:$0xff]  ;;  %v562_v28 = vld [vmem:[%s9554_s30 + $0xc9] sm:$0xff]  ;;  %428 = vst.msk [vmem:[#allocation2 + $0x58] sm:$0xff] %vm416_vm0, %v299_v26 }
  0x1b   : > { %427 = vst.msk [vmem:[#allocation2 + $0x50] sm:$0xff] %vm416_vm0, %v298_v27  ;;  %v561_v29 = vld [vmem:[%s9554_s30 + $0xc1] sm:$0xff]  ;;  %v301_v30 = vld [vmem:[%s9554_s30 + $0x98] sm:$0xff]  ;;  %v300_v31 = vld [vmem:[%s9554_s30 + $0x90] sm:$0xff] }
  0x1c   : > { %815 = vrot.lane.b32.xlu1 %v552_v6, %s9492_s8  ;;  %813 = vrot.lane.b32.xlu0 %v551_v7, %s9492_s8  ;;  %430 = vst.msk [vmem:[#allocation2 + $0x68] sm:$0xff] %vm416_vm0, %v301_v30  ;;  %429 = vst.msk [vmem:[#allocation2 + $0x60] sm:$0xff] %vm416_vm0, %v300_v31  ;;  %v303_v32 = vld [vmem:[%s9554_s30 + $0xb0] sm:$0xff]  ;;  %v302_v33 = vld [vmem:[%s9554_s30 + $0xa8] sm:$0xff] }
  0x1d   : > { %432 = vst.msk [vmem:[#allocation2 + $0x78] sm:$0xff] %vm416_vm0, %v303_v32  ;;  %431 = vst.msk [vmem:[#allocation2 + $0x70] sm:$0xff] %vm416_vm0, %v302_v33  ;;  %v305_v34 = vld [vmem:[%s9554_s30 + $0xc8] sm:$0xff]  ;;  %v304_v36 = vld [vmem:[%s9554_s30 + $0xc0] sm:$0xff] }
  0x1e   : > { %v564_v35 = vld [vmem:[%s9554_s30 + $0xe1] sm:$0xff]  ;;  %434 = vst.msk [vmem:[#allocation2 + $0x88] sm:$0xff] %vm416_vm0, %v305_v34  ;;  %v563_v37 = vld [vmem:[%s9554_s30 + $0xd9] sm:$0xff]  ;;  %433 = vst.msk [vmem:[#allocation2 + $0x80] sm:$0xff] %vm416_vm0, %v304_v36 }
  0x1f   : > { %v307_v38 = vld [vmem:[%s9554_s30 + $0xe0] sm:$0xff]  ;;  %v306_v39 = vld [vmem:[%s9554_s30 + $0xd8] sm:$0xff]  ;;  %v308_v41 = vld [vmem:[%s9554_s30 + $0xf0] sm:$0xff] }
  0x20   : > { %819 = vrot.lane.b32.xlu1 %v554_v8, %s9492_s8  ;;  %817 = vrot.lane.b32.xlu0 %v553_v9, %s9492_s8  ;;  %436 = vst.msk [vmem:[#allocation2 + $0x98] sm:$0xff] %vm416_vm0, %v307_v38  ;;  %435 = vst.msk [vmem:[#allocation2 + $0x90] sm:$0xff] %vm416_vm0, %v306_v39  ;;  %v309_v40 = vld [vmem:[%s9554_s30 + $0xf8] sm:$0xff]  ;;  %v311_v42 = vld [vmem:[%s9554_s30 + $0x110] sm:$0xff] }
  0x21   : > { %438 = vst.msk [vmem:[#allocation2 + $0xa8] sm:$0xff] %vm416_vm0, %v309_v40  ;;  %437 = vst.msk [vmem:[#allocation2 + $0xa0] sm:$0xff] %vm416_vm0, %v308_v41  ;;  %v310_v43 = vld [vmem:[%s9554_s30 + $0x108] sm:$0xff]  ;;  %v566_v44 = vld [vmem:[%s9554_s30 + $0xf9] sm:$0xff] }
  0x22   : > { %v565_v45 = vld [vmem:[%s9554_s30 + $0xf1] sm:$0xff]  ;;  %440 = vst.msk [vmem:[#allocation2 + $0xb8] sm:$0xff] %vm416_vm0, %v311_v42  ;;  %439 = vst.msk [vmem:[#allocation2 + $0xb0] sm:$0xff] %vm416_vm0, %v310_v43  ;;  %v313_v46 = vld [vmem:[%s9554_s30 + $0x128] sm:$0xff] }
  0x23   : > { %442 = vst.msk [vmem:[#allocation2 + $0xc8] sm:$0xff] %vm416_vm0, %v313_v46  ;;  %v312_v47 = vld [vmem:[%s9554_s30 + $0x120] sm:$0xff]  ;;  %v314_v49 = vld [vmem:[%s9554_s30 + $0x138] sm:$0xff]  ;;  %v567_v51 = vld [vmem:[%s9554_s30 + $0x109] sm:$0xff] }
  0x24   : > { %823 = vrot.lane.b32.xlu1 %v556_v10, %s9492_s8  ;;  %821 = vrot.lane.b32.xlu0 %v555_v11, %s9492_s8  ;;  %441 = vst.msk [vmem:[#allocation2 + $0xc0] sm:$0xff] %vm416_vm0, %v312_v47  ;;  %v315_v48 = vld [vmem:[%s9554_s30 + $0x140] sm:$0xff]  ;;  %v568_v50 = vld [vmem:[%s9554_s30 + $0x111] sm:$0xff]  ;;  %443 = vst.msk [vmem:[#allocation2 + $0xd0] sm:$0xff] %vm416_vm0, %v314_v49 }
  0x25   : > { %444 = vst.msk [vmem:[#allocation2 + $0xd8] sm:$0xff] %vm416_vm0, %v315_v48  ;;  %v317_v52 = vld [vmem:[%s9554_s30 + $0x158] sm:$0xff]  ;;  %v316_v53 = vld [vmem:[%s9554_s30 + $0x150] sm:$0xff]  ;;  %v569_v55 = vld [vmem:[%s9554_s30 + $0x121] sm:$0xff] }
  0x26   : > { %446 = vst.msk [vmem:[#allocation2 + $0xe8] sm:$0xff] %vm416_vm0, %v317_v52  ;;  %445 = vst.msk [vmem:[#allocation2 + $0xe0] sm:$0xff] %vm416_vm0, %v316_v53  ;;  %v570_v54 = vld [vmem:[%s9554_s30 + $0x129] sm:$0xff]  ;;  %v572_v58 = vld [vmem:[%s9554_s30 + $0x141] sm:$0xff] }
  0x27   : > { %v319_v56 = vld [vmem:[%s9554_s30 + $0x170] sm:$0xff]  ;;  %v318_v57 = vld [vmem:[%s9554_s30 + $0x168] sm:$0xff]  ;;  %v571_v59 = vld [vmem:[%s9554_s30 + $0x139] sm:$0xff] }
  0x28   : > { %827 = vrot.lane.b32.xlu1 %v558_v14, %s9492_s8  ;;  %825 = vrot.lane.b32.xlu0 %v557_v15, %s9492_s8  ;;  %448 = vst.msk [vmem:[#allocation2 + $0xf8] sm:$0xff] %vm416_vm0, %v319_v56  ;;  %447 = vst.msk [vmem:[#allocation2 + $0xf0] sm:$0xff] %vm416_vm0, %v318_v57  ;;  %v321_v60 = vld [vmem:[%s9554_s30 + $0x1b8] sm:$0xff]  ;;  %v320_v61 = vld [vmem:[%s9554_s30 + $0x1b0] sm:$0xff] }
  0x29   : > { %450 = vst.msk [vmem:[#allocation2 + $0x108] sm:$0xff] %vm416_vm0, %v321_v60  ;;  %449 = vst.msk [vmem:[#allocation2 + $0x100] sm:$0xff] %vm416_vm0, %v320_v61  ;;  %v574_v62 = vld [vmem:[%s9554_s30 + $0x159] sm:$0xff]  ;;  %v573_v63 = vld [vmem:[%s9554_s30 + $0x151] sm:$0xff] }
  0x2a   : > { %v323_v0 = vld [vmem:[%s9554_s30 + $0x1d0] sm:$0xff]  ;;  %v322_v1 = vld [vmem:[%s9554_s30 + $0x1c8] sm:$0xff]  ;;  %v324_v5 = vld [vmem:[%s9554_s30 + $0x1e0] sm:$0xff] }
  0x2b   : > { %452 = vst.msk [vmem:[#allocation2 + $0x118] sm:$0xff] %vm416_vm0, %v323_v0  ;;  %451 = vst.msk [vmem:[#allocation2 + $0x110] sm:$0xff] %vm416_vm0, %v322_v1  ;;  %v576_v2 = vld [vmem:[%s9554_s30 + $0x171] sm:$0xff]  ;;  %v575_v3 = vld [vmem:[%s9554_s30 + $0x169] sm:$0xff] }
  0x2c   : > { %831 = vrot.lane.b32.xlu1 %v560_v21, %s9492_s8  ;;  %829 = vrot.lane.b32.xlu0 %v559_v22, %s9492_s8  ;;  %v325_v4 = vld [vmem:[%s9554_s30 + $0x1e8] sm:$0xff]  ;;  %453 = vst.msk [vmem:[#allocation2 + $0x120] sm:$0xff] %vm416_vm0, %v324_v5  ;;  %v578_v6 = vld [vmem:[%s9554_s30 + $0x1b9] sm:$0xff] }
  0x2d   : > { %454 = vst.msk [vmem:[#allocation2 + $0x128] sm:$0xff] %vm416_vm0, %v325_v4  ;;  %v577_v7 = vld [vmem:[%s9554_s30 + $0x1b1] sm:$0xff]  ;;  %v327_v8 = vld [vmem:[%s9554_s30 + $0x200] sm:$0xff]  ;;  %v579_v11 = vld [vmem:[%s9554_s30 + $0x1c9] sm:$0xff] }
  0x2e   : > { %v326_v9 = vld [vmem:[%s9554_s30 + $0x1f8] sm:$0xff]  ;;  %456 = vst.msk [vmem:[#allocation2 + $0x138] sm:$0xff] %vm416_vm0, %v327_v8  ;;  %v328_v13 = vld [vmem:[%s9554_s30 + $0x210] sm:$0xff]  ;;  %v581_v15 = vld [vmem:[%s9554_s30 + $0x1e1] sm:$0xff] }
  0x2f   : > { %455 = vst.msk [vmem:[#allocation2 + $0x130] sm:$0xff] %vm416_vm0, %v326_v9  ;;  %v580_v10 = vld [vmem:[%s9554_s30 + $0x1d1] sm:$0xff]  ;;  %457 = vst.msk [vmem:[#allocation2 + $0x140] sm:$0xff] %vm416_vm0, %v328_v13  ;;  %v582_v14 = vld [vmem:[%s9554_s30 + $0x1e9] sm:$0xff] }
  0x30   : > { %835 = vrot.lane.b32.xlu1 %v562_v28, %s9492_s8  ;;  %833 = vrot.lane.b32.xlu0 %v561_v29, %s9492_s8  ;;  %v329_v12 = vld [vmem:[%s9554_s30 + $0x218] sm:$0xff]  ;;  %v331_v16 = vld [vmem:[%s9554_s30 + $0x230] sm:$0xff] }
  0x31   : > { %458 = vst.msk [vmem:[#allocation2 + $0x148] sm:$0xff] %vm416_vm0, %v329_v12  ;;  %v330_v17 = vld [vmem:[%s9554_s30 + $0x228] sm:$0xff]  ;;  %460 = vst.msk [vmem:[#allocation2 + $0x158] sm:$0xff] %vm416_vm0, %v331_v16  ;;  %v583_v19 = vld [vmem:[%s9554_s30 + $0x1f9] sm:$0xff] }
  0x32   : > { %459 = vst.msk [vmem:[#allocation2 + $0x150] sm:$0xff] %vm416_vm0, %v330_v17  ;;  %v584_v18 = vld [vmem:[%s9554_s30 + $0x201] sm:$0xff]  ;;  %v586_v22 = vld [vmem:[%s9554_s30 + $0x219] sm:$0xff]  ;;  %v585_v23 = vld [vmem:[%s9554_s30 + $0x211] sm:$0xff] }
  0x33   : > { %v333_v20 = vld [vmem:[%s9554_s30 + $0x248] sm:$0xff]  ;;  %v332_v21 = vld [vmem:[%s9554_s30 + $0x240] sm:$0xff]  ;;  %v334_v25 = vld [vmem:[%s9554_s30 + $0x258] sm:$0xff] }
  0x34   : > { %839 = vrot.lane.b32.xlu1 %v564_v35, %s9492_s8  ;;  %837 = vrot.lane.b32.xlu0 %v563_v37, %s9492_s8  ;;  %462 = vst.msk [vmem:[#allocation2 + $0x168] sm:$0xff] %vm416_vm0, %v333_v20  ;;  %461 = vst.msk [vmem:[#allocation2 + $0x160] sm:$0xff] %vm416_vm0, %v332_v21  ;;  %v335_v24 = vld [vmem:[%s9554_s30 + $0x260] sm:$0xff]  ;;  %v588_v26 = vld [vmem:[%s9554_s30 + $0x231] sm:$0xff] }
  0x35   : > { %464 = vst.msk [vmem:[#allocation2 + $0x178] sm:$0xff] %vm416_vm0, %v335_v24  ;;  %463 = vst.msk [vmem:[#allocation2 + $0x170] sm:$0xff] %vm416_vm0, %v334_v25  ;;  %v587_v27 = vld [vmem:[%s9554_s30 + $0x229] sm:$0xff]  ;;  %v337_v28 = vld [vmem:[%s9554_s30 + $0x278] sm:$0xff] }
  0x36   : > { %v336_v29 = vld [vmem:[%s9554_s30 + $0x270] sm:$0xff]  ;;  %466 = vst.msk [vmem:[#allocation2 + $0x188] sm:$0xff] %vm416_vm0, %v337_v28  ;;  %v589_v31 = vld [vmem:[%s9554_s30 + $0x241] sm:$0xff]  ;;  %v591_v35 = vld [vmem:[%s9554_s30 + $0x259] sm:$0xff] }
  0x37   : > { %465 = vst.msk [vmem:[#allocation2 + $0x180] sm:$0xff] %vm416_vm0, %v336_v29  ;;  %v590_v30 = vld [vmem:[%s9554_s30 + $0x249] sm:$0xff]  ;;  %v592_v34 = vld [vmem:[%s9554_s30 + $0x261] sm:$0xff]  ;;  %v594_v38 = vld [vmem:[%s9554_s30 + $0x279] sm:$0xff] }
  0x38   : > { %843 = vrot.lane.b32.xlu1 %v566_v44, %s9492_s8  ;;  %841 = vrot.lane.b32.xlu0 %v565_v45, %s9492_s8  ;;  %v339_v32 = vld [vmem:[%s9554_s30 + $0x290] sm:$0xff]  ;;  %v338_v33 = vld [vmem:[%s9554_s30 + $0x288] sm:$0xff] }
  0x39   : > { %468 = vst.msk [vmem:[#allocation2 + $0x198] sm:$0xff] %vm416_vm0, %v339_v32  ;;  %467 = vst.msk [vmem:[#allocation2 + $0x190] sm:$0xff] %vm416_vm0, %v338_v33  ;;  %v341_v36 = vld [vmem:[%s9554_s30 + $0x2a8] sm:$0xff]  ;;  %v340_v37 = vld [vmem:[%s9554_s30 + $0x2a0] sm:$0xff] }
  0x3a   : > { %470 = vst.msk [vmem:[#allocation2 + $0x1a8] sm:$0xff] %vm416_vm0, %v341_v36  ;;  %469 = vst.msk [vmem:[#allocation2 + $0x1a0] sm:$0xff] %vm416_vm0, %v340_v37  ;;  %v593_v39 = vld [vmem:[%s9554_s30 + $0x271] sm:$0xff]  ;;  %v343_v40 = vld [vmem:[%s9554_s30 + $0x2c0] sm:$0xff] }
  0x3b   : > { %v342_v41 = vld [vmem:[%s9554_s30 + $0x2b8] sm:$0xff]  ;;  %472 = vst.msk [vmem:[#allocation2 + $0x1b8] sm:$0xff] %vm416_vm0, %v343_v40  ;;  %v595_v43 = vld [vmem:[%s9554_s30 + $0x289] sm:$0xff]  ;;  %v597_v47 = vld [vmem:[%s9554_s30 + $0x2a1] sm:$0xff] }
  0x3c   : > { %847 = vrot.lane.b32.xlu1 %v568_v50, %s9492_s8  ;;  %845 = vrot.lane.b32.xlu0 %v567_v51, %s9492_s8  ;;  %471 = vst.msk [vmem:[#allocation2 + $0x1b0] sm:$0xff] %vm416_vm0, %v342_v41  ;;  %v596_v42 = vld [vmem:[%s9554_s30 + $0x291] sm:$0xff]  ;;  %v598_v46 = vld [vmem:[%s9554_s30 + $0x2a9] sm:$0xff] }
  0x3d   : > { %v345_v44 = vld [vmem:[%s9554_s30 + $0x2d8] sm:$0xff]  ;;  %v344_v45 = vld [vmem:[%s9554_s30 + $0x2d0] sm:$0xff]  ;;  %v346_v49 = vld [vmem:[%s9554_s30 + $0x2e8] sm:$0xff] }
  0x3e   : > { %474 = vst.msk [vmem:[#allocation2 + $0x1c8] sm:$0xff] %vm416_vm0, %v345_v44  ;;  %473 = vst.msk [vmem:[#allocation2 + $0x1c0] sm:$0xff] %vm416_vm0, %v344_v45  ;;  %v347_v48 = vld [vmem:[%s9554_s30 + $0x2f0] sm:$0xff]  ;;  %v600_v50 = vld [vmem:[%s9554_s30 + $0x2c1] sm:$0xff] }
  0x3f   : > { %476 = vst.msk [vmem:[#allocation2 + $0x1d8] sm:$0xff] %vm416_vm0, %v347_v48  ;;  %475 = vst.msk [vmem:[#allocation2 + $0x1d0] sm:$0xff] %vm416_vm0, %v346_v49  ;;  %v599_v51 = vld [vmem:[%s9554_s30 + $0x2b9] sm:$0xff]  ;;  %v349_v52 = vld [vmem:[%s9554_s30 + $0x308] sm:$0xff] }
  0x40   : > { %851 = vrot.lane.b32.xlu1 %v570_v54, %s9492_s8  ;;  %849 = vrot.lane.b32.xlu0 %v569_v55, %s9492_s8  ;;  %v348_v53 = vld [vmem:[%s9554_s30 + $0x300] sm:$0xff]  ;;  %478 = vst.msk [vmem:[#allocation2 + $0x1e8] sm:$0xff] %vm416_vm0, %v349_v52  ;;  %v601_v55 = vld [vmem:[%s9554_s30 + $0x2d1] sm:$0xff] }
  0x41   : > { %477 = vst.msk [vmem:[#allocation2 + $0x1e0] sm:$0xff] %vm416_vm0, %v348_v53  ;;  %v602_v54 = vld [vmem:[%s9554_s30 + $0x2d9] sm:$0xff]  ;;  %v353_v60 = vld [vmem:[%s9554_s30 + $0x368] sm:$0xff]  ;;  %v356_v9 = vld [vmem:[%s9554_s30 + $0x390] sm:$0xff] }
  0x42   : > { %v351_v56 = vld [vmem:[%s9554_s30 + $0x320] sm:$0xff]  ;;  %v350_v57 = vld [vmem:[%s9554_s30 + $0x318] sm:$0xff]  ;;  %482 = vst.msk [vmem:[#allocation2 + $0x208] sm:$0xff] %vm416_vm0, %v353_v60  ;;  %v606_v0 = vld [vmem:[%s9554_s30 + $0x309] sm:$0xff] }
  0x43   : > { %480 = vst.msk [vmem:[#allocation2 + $0x1f8] sm:$0xff] %vm416_vm0, %v351_v56  ;;  %479 = vst.msk [vmem:[#allocation2 + $0x1f0] sm:$0xff] %vm416_vm0, %v350_v57  ;;  %v352_v61 = vld [vmem:[%s9554_s30 + $0x360] sm:$0xff]  ;;  %v357_v8 = vld [vmem:[%s9554_s30 + $0x398] sm:$0xff] }
  0x44   : > { %855 = vrot.lane.b32.xlu1 %v572_v58, %s9492_s8  ;;  %853 = vrot.lane.b32.xlu0 %v571_v59, %s9492_s8  ;;  %v604_v58 = vld [vmem:[%s9554_s30 + $0x2f1] sm:$0xff]  ;;  %v603_v59 = vld [vmem:[%s9554_s30 + $0x2e9] sm:$0xff]  ;;  %481 = vst.msk [vmem:[#allocation2 + $0x200] sm:$0xff] %vm416_vm0, %v352_v61  ;;  %486 = vst.msk [vmem:[#allocation2 + $0x228] sm:$0xff] %vm416_vm0, %v357_v8 }
  0x45   : > { %v605_v1 = vld [vmem:[%s9554_s30 + $0x301] sm:$0xff]  ;;  %485 = vst.msk [vmem:[#allocation2 + $0x220] sm:$0xff] %vm416_vm0, %v356_v9  ;;  %v610_v12 = vld [vmem:[%s9554_s30 + $0x369] sm:$0xff]  ;;  %v614_v24 = vld [vmem:[%s9554_s30 + $0x399] sm:$0xff] }
  0x46   : > { %v609_v13 = vld [vmem:[%s9554_s30 + $0x361] sm:$0xff]  ;;  %v613_v25 = vld [vmem:[%s9554_s30 + $0x391] sm:$0xff]  ;;  %v618_v36 = vld [vmem:[%s9554_s30 + $0x3c9] sm:$0xff] }
  0x47   : > { %v361_v20 = vld [vmem:[%s9554_s30 + $0x3c8] sm:$0xff]  ;;  %v360_v21 = vld [vmem:[%s9554_s30 + $0x3c0] sm:$0xff]  ;;  %v365_v32 = vld [vmem:[%s9554_s30 + $0x3f8] sm:$0xff] }
  0x48   : > { %859 = vrot.lane.b32.xlu1 %v574_v62, %s9492_s8  ;;  %857 = vrot.lane.b32.xlu0 %v573_v63, %s9492_s8  ;;  %490 = vst.msk [vmem:[#allocation2 + $0x248] sm:$0xff] %vm416_vm0, %v361_v20  ;;  %489 = vst.msk [vmem:[#allocation2 + $0x240] sm:$0xff] %vm416_vm0, %v360_v21  ;;  %v364_v33 = vld [vmem:[%s9554_s30 + $0x3f0] sm:$0xff]  ;;  %v617_v37 = vld [vmem:[%s9554_s30 + $0x3c1] sm:$0xff] }
  0x49   : > { %494 = vst.msk [vmem:[#allocation2 + $0x268] sm:$0xff] %vm416_vm0, %v365_v32  ;;  %493 = vst.msk [vmem:[#allocation2 + $0x260] sm:$0xff] %vm416_vm0, %v364_v33  ;;  %v369_v44 = vld [vmem:[%s9554_s30 + $0x428] sm:$0xff]  ;;  %v368_v45 = vld [vmem:[%s9554_s30 + $0x420] sm:$0xff] }
  0x4a   : > { %498 = vst.msk [vmem:[#allocation2 + $0x288] sm:$0xff] %vm416_vm0, %v369_v44  ;;  %497 = vst.msk [vmem:[#allocation2 + $0x280] sm:$0xff] %vm416_vm0, %v368_v45  ;;  %v622_v48 = vld [vmem:[%s9554_s30 + $0x3f9] sm:$0xff]  ;;  %v621_v49 = vld [vmem:[%s9554_s30 + $0x3f1] sm:$0xff] }
  0x4b   : > { %v373_v56 = vld [vmem:[%s9554_s30 + $0x458] sm:$0xff]  ;;  %v372_v57 = vld [vmem:[%s9554_s30 + $0x450] sm:$0xff]  ;;  %v625_v61 = vld [vmem:[%s9554_s30 + $0x421] sm:$0xff] }
  0x4c   : > { %863 = vrot.lane.b32.xlu1 %v576_v2, %s9492_s8  ;;  %861 = vrot.lane.b32.xlu0 %v575_v3, %s9492_s8  ;;  %v355_v2 = vld [vmem:[%s9554_s30 + $0x380] sm:$0xff]  ;;  %v354_v3 = vld [vmem:[%s9554_s30 + $0x378] sm:$0xff]  ;;  %502 = vst.msk [vmem:[#allocation2 + $0x2a8] sm:$0xff] %vm416_vm0, %v373_v56  ;;  %501 = vst.msk [vmem:[#allocation2 + $0x2a0] sm:$0xff] %vm416_vm0, %v372_v57 }
  0x4d   : > { %484 = vst.msk [vmem:[#allocation2 + $0x218] sm:$0xff] %vm416_vm0, %v355_v2  ;;  %483 = vst.msk [vmem:[#allocation2 + $0x210] sm:$0xff] %vm416_vm0, %v354_v3  ;;  %v626_v60 = vld [vmem:[%s9554_s30 + $0x429] sm:$0xff]  ;;  %v628_v2 = vld [vmem:[%s9554_s30 + $0x441] sm:$0xff] }
  0x4e   : > { %v627_v3 = vld [vmem:[%s9554_s30 + $0x439] sm:$0xff]  ;;  %v629_v9 = vld [vmem:[%s9554_s30 + $0x451] sm:$0xff]  ;;  %v634_v20 = vld [vmem:[%s9554_s30 + $0x489] sm:$0xff] }
  0x4f   : > { %v630_v8 = vld [vmem:[%s9554_s30 + $0x459] sm:$0xff]  ;;  %v633_v21 = vld [vmem:[%s9554_s30 + $0x481] sm:$0xff]  ;;  %v637_v33 = vld [vmem:[%s9554_s30 + $0x4b1] sm:$0xff] }
  0x50   : > { %867 = vrot.lane.b32.xlu1 %v578_v6, %s9492_s8  ;;  %865 = vrot.lane.b32.xlu0 %v577_v7, %s9492_s8  ;;  %v608_v6 = vld [vmem:[%s9554_s30 + $0x321] sm:$0xff]  ;;  %v607_v7 = vld [vmem:[%s9554_s30 + $0x319] sm:$0xff] }
  0x51   : > { %v638_v32 = vld [vmem:[%s9554_s30 + $0x4b9] sm:$0xff]  ;;  %v641_v45 = vld [vmem:[%s9554_s30 + $0x511] sm:$0xff]  ;;  %v646_v56 = vld [vmem:[%s9554_s30 + $0x549] sm:$0xff] }
  0x52   : > { %v642_v44 = vld [vmem:[%s9554_s30 + $0x519] sm:$0xff]  ;;  %v645_v57 = vld [vmem:[%s9554_s30 + $0x541] sm:$0xff] }
  0x54   : > { %871 = vrot.lane.b32.xlu1 %v580_v10, %s9492_s8  ;;  %869 = vrot.lane.b32.xlu0 %v579_v11, %s9492_s8 }
  0x58   : > { %875 = vrot.lane.b32.xlu1 %v582_v14, %s9492_s8  ;;  %873 = vrot.lane.b32.xlu0 %v581_v15, %s9492_s8  ;;  %v359_v14 = vld [vmem:[%s9554_s30 + $0x3b0] sm:$0xff]  ;;  %v358_v15 = vld [vmem:[%s9554_s30 + $0x3a8] sm:$0xff] }
  0x59   : > { %488 = vst.msk [vmem:[#allocation2 + $0x238] sm:$0xff] %vm416_vm0, %v359_v14  ;;  %487 = vst.msk [vmem:[#allocation2 + $0x230] sm:$0xff] %vm416_vm0, %v358_v15  ;;  %v632_v14 = vld [vmem:[%s9554_s30 + $0x471] sm:$0xff]  ;;  %v631_v15 = vld [vmem:[%s9554_s30 + $0x469] sm:$0xff] }
  0x5c   : > { %879 = vrot.lane.b32.xlu1 %v584_v18, %s9492_s8  ;;  %877 = vrot.lane.b32.xlu0 %v583_v19, %s9492_s8  ;;  %v612_v18 = vld [vmem:[%s9554_s30 + $0x381] sm:$0xff]  ;;  %v611_v19 = vld [vmem:[%s9554_s30 + $0x379] sm:$0xff] }
  0x60   : > { %883 = vrot.lane.b32.xlu1 %v586_v22, %s9492_s8  ;;  %881 = vrot.lane.b32.xlu0 %v585_v23, %s9492_s8 }
  0x64   : > { %887 = vrot.lane.b32.xlu1 %v588_v26, %s9492_s8  ;;  %885 = vrot.lane.b32.xlu0 %v587_v27, %s9492_s8  ;;  %v363_v26 = vld [vmem:[%s9554_s30 + $0x3e0] sm:$0xff]  ;;  %v362_v27 = vld [vmem:[%s9554_s30 + $0x3d8] sm:$0xff] }
  0x65   : > { %492 = vst.msk [vmem:[#allocation2 + $0x258] sm:$0xff] %vm416_vm0, %v363_v26  ;;  %491 = vst.msk [vmem:[#allocation2 + $0x250] sm:$0xff] %vm416_vm0, %v362_v27  ;;  %v636_v26 = vld [vmem:[%s9554_s30 + $0x4a1] sm:$0xff]  ;;  %v635_v27 = vld [vmem:[%s9554_s30 + $0x499] sm:$0xff] }
  0x68   : > { %891 = vrot.lane.b32.xlu1 %v590_v30, %s9492_s8  ;;  %889 = vrot.lane.b32.xlu0 %v589_v31, %s9492_s8  ;;  %v616_v30 = vld [vmem:[%s9554_s30 + $0x3b1] sm:$0xff]  ;;  %v615_v31 = vld [vmem:[%s9554_s30 + $0x3a9] sm:$0xff] }
  0x6c   : > { %895 = vrot.lane.b32.xlu1 %v592_v34, %s9492_s8  ;;  %893 = vrot.lane.b32.xlu0 %v591_v35, %s9492_s8 }
  0x70   : > { %899 = vrot.lane.b32.xlu1 %v594_v38, %s9492_s8  ;;  %897 = vrot.lane.b32.xlu0 %v593_v39, %s9492_s8  ;;  %v367_v38 = vld [vmem:[%s9554_s30 + $0x410] sm:$0xff]  ;;  %v366_v39 = vld [vmem:[%s9554_s30 + $0x408] sm:$0xff] }
  0x71   : > { %496 = vst.msk [vmem:[#allocation2 + $0x278] sm:$0xff] %vm416_vm0, %v367_v38  ;;  %495 = vst.msk [vmem:[#allocation2 + $0x270] sm:$0xff] %vm416_vm0, %v366_v39  ;;  %v640_v38 = vld [vmem:[%s9554_s30 + $0x4d1] sm:$0xff]  ;;  %v639_v39 = vld [vmem:[%s9554_s30 + $0x4c9] sm:$0xff] }
  0x74   : > { %903 = vrot.lane.b32.xlu1 %v596_v42, %s9492_s8  ;;  %901 = vrot.lane.b32.xlu0 %v595_v43, %s9492_s8  ;;  %v620_v42 = vld [vmem:[%s9554_s30 + $0x3e1] sm:$0xff]  ;;  %v619_v43 = vld [vmem:[%s9554_s30 + $0x3d9] sm:$0xff] }
  0x78   : > { %907 = vrot.lane.b32.xlu1 %v598_v46, %s9492_s8  ;;  %905 = vrot.lane.b32.xlu0 %v597_v47, %s9492_s8 }
  0x7c   : > { %911 = vrot.lane.b32.xlu1 %v600_v50, %s9492_s8  ;;  %909 = vrot.lane.b32.xlu0 %v599_v51, %s9492_s8  ;;  %v371_v50 = vld [vmem:[%s9554_s30 + $0x440] sm:$0xff]  ;;  %v370_v51 = vld [vmem:[%s9554_s30 + $0x438] sm:$0xff] }
  0x7d   : > { %500 = vst.msk [vmem:[#allocation2 + $0x298] sm:$0xff] %vm416_vm0, %v371_v50  ;;  %499 = vst.msk [vmem:[#allocation2 + $0x290] sm:$0xff] %vm416_vm0, %v370_v51  ;;  %v644_v50 = vld [vmem:[%s9554_s30 + $0x531] sm:$0xff]  ;;  %v643_v51 = vld [vmem:[%s9554_s30 + $0x529] sm:$0xff] }
  0x80   : > { %915 = vrot.lane.b32.xlu1 %v602_v54, %s9492_s8  ;;  %913 = vrot.lane.b32.xlu0 %v601_v55, %s9492_s8  ;;  %v624_v54 = vld [vmem:[%s9554_s30 + $0x411] sm:$0xff]  ;;  %v623_v55 = vld [vmem:[%s9554_s30 + $0x409] sm:$0xff] }
  0x82   : > { %v806_v62 = vpop.permute.xlu1 %805  ;;  %v802_v63 = vpop.permute.xlu0 %801 }
  0x83   : > { %1188 = vst.msk [vmem:[#allocation2 + $0x10] sm:$0xff] %vm1185_vm1, %v806_v62  ;;  %1186 = vst.msk [vmem:[#allocation2] sm:$0xff] %vm1185_vm1, %v802_v63  ;;  %v375_v62 = vld [vmem:[%s9554_s30 + $0x470] sm:$0xff]  ;;  %v374_v63 = vld [vmem:[%s9554_s30 + $0x468] sm:$0xff] }
  0x84   : > { %919 = vrot.lane.b32.xlu1 %v604_v58, %s9492_s8  ;;  %917 = vrot.lane.b32.xlu0 %v603_v59, %s9492_s8  ;;  %504 = vst.msk [vmem:[#allocation2 + $0x2b8] sm:$0xff] %vm416_vm0, %v375_v62  ;;  %503 = vst.msk [vmem:[#allocation2 + $0x2b0] sm:$0xff] %vm416_vm0, %v374_v63  ;;  %v648_v62 = vld [vmem:[%s9554_s30 + $0x561] sm:$0xff]  ;;  %v647_v63 = vld [vmem:[%s9554_s30 + $0x559] sm:$0xff] }
  0x86   : > { %v808_v4 = vpop.permute.xlu1 %807  ;;  %v804_v5 = vpop.permute.xlu0 %803 }
  0x87   : > { %1189 = vst.msk [vmem:[#allocation2 + $0x18] sm:$0xff] %vm1185_vm1, %v808_v4  ;;  %1187 = vst.msk [vmem:[#allocation2 + $0x8] sm:$0xff] %vm1185_vm1, %v804_v5  ;;  %v377_v4 = vld [vmem:[%s9554_s30 + $0x488] sm:$0xff]  ;;  %v376_v5 = vld [vmem:[%s9554_s30 + $0x480] sm:$0xff] }
  0x88   : > { %923 = vrot.lane.b32.xlu1 %v606_v0, %s9492_s8  ;;  %921 = vrot.lane.b32.xlu0 %v605_v1, %s9492_s8  ;;  %506 = vst.msk [vmem:[#allocation2 + $0x2c8] sm:$0xff] %vm416_vm0, %v377_v4  ;;  %505 = vst.msk [vmem:[#allocation2 + $0x2c0] sm:$0xff] %vm416_vm0, %v376_v5  ;;  %v650_v4 = vld [vmem:[%s9554_s30 + $0x579] sm:$0xff]  ;;  %v649_v5 = vld [vmem:[%s9554_s30 + $0x571] sm:$0xff] }
  0x8a   : > { %v812_v10 = vpop.permute.xlu1 %811  ;;  %v810_v11 = vpop.permute.xlu0 %809 }
  0x8b   : > { %1191 = vst.msk [vmem:[#allocation2 + $0x28] sm:$0xff] %vm1185_vm1, %v812_v10  ;;  %1190 = vst.msk [vmem:[#allocation2 + $0x20] sm:$0xff] %vm1185_vm1, %v810_v11  ;;  %v379_v10 = vld [vmem:[%s9554_s30 + $0x4a0] sm:$0xff]  ;;  %v378_v11 = vld [vmem:[%s9554_s30 + $0x498] sm:$0xff] }
  0x8c   : > { %927 = vrot.lane.b32.xlu1 %v608_v6, %s9492_s8  ;;  %925 = vrot.lane.b32.xlu0 %v607_v7, %s9492_s8  ;;  %508 = vst.msk [vmem:[#allocation2 + $0x2d8] sm:$0xff] %vm416_vm0, %v379_v10  ;;  %507 = vst.msk [vmem:[#allocation2 + $0x2d0] sm:$0xff] %vm416_vm0, %v378_v11  ;;  %v652_v10 = vld [vmem:[%s9554_s30 + $0x591] sm:$0xff]  ;;  %v651_v11 = vld [vmem:[%s9554_s30 + $0x589] sm:$0xff] }
  0x8e   : > { %v816_v16 = vpop.permute.xlu1 %815  ;;  %v814_v17 = vpop.permute.xlu0 %813 }
  0x8f   : > { %1193 = vst.msk [vmem:[#allocation2 + $0x38] sm:$0xff] %vm1185_vm1, %v816_v16  ;;  %1192 = vst.msk [vmem:[#allocation2 + $0x30] sm:$0xff] %vm1185_vm1, %v814_v17  ;;  %v381_v16 = vld [vmem:[%s9554_s30 + $0x4b8] sm:$0xff]  ;;  %v380_v17 = vld [vmem:[%s9554_s30 + $0x4b0] sm:$0xff] }
  0x90   : > { %931 = vrot.lane.b32.xlu1 %v610_v12, %s9492_s8  ;;  %929 = vrot.lane.b32.xlu0 %v609_v13, %s9492_s8  ;;  %510 = vst.msk [vmem:[#allocation2 + $0x2e8] sm:$0xff] %vm416_vm0, %v381_v16  ;;  %509 = vst.msk [vmem:[#allocation2 + $0x2e0] sm:$0xff] %vm416_vm0, %v380_v17  ;;  %v654_v16 = vld [vmem:[%s9554_s30 + $0x5a9] sm:$0xff]  ;;  %v653_v17 = vld [vmem:[%s9554_s30 + $0x5a1] sm:$0xff] }
  0x92   : > { %v820_v22 = vpop.permute.xlu1 %819  ;;  %v818_v23 = vpop.permute.xlu0 %817 }
  0x93   : > { %1195 = vst.msk [vmem:[#allocation2 + $0x48] sm:$0xff] %vm1185_vm1, %v820_v22  ;;  %1194 = vst.msk [vmem:[#allocation2 + $0x40] sm:$0xff] %vm1185_vm1, %v818_v23  ;;  %v383_v22 = vld [vmem:[%s9554_s30 + $0x4d0] sm:$0xff]  ;;  %v382_v23 = vld [vmem:[%s9554_s30 + $0x4c8] sm:$0xff] }
  0x94   : > { %935 = vrot.lane.b32.xlu1 %v612_v18, %s9492_s8  ;;  %933 = vrot.lane.b32.xlu0 %v611_v19, %s9492_s8  ;;  %512 = vst.msk [vmem:[#allocation2 + $0x2f8] sm:$0xff] %vm416_vm0, %v383_v22  ;;  %511 = vst.msk [vmem:[#allocation2 + $0x2f0] sm:$0xff] %vm416_vm0, %v382_v23  ;;  %v656_v22 = vld [vmem:[%s9554_s30 + $0x5c1] sm:$0xff]  ;;  %v655_v23 = vld [vmem:[%s9554_s30 + $0x5b9] sm:$0xff] }
  0x96   : > { %v824_v28 = vpop.permute.xlu1 %823  ;;  %v822_v29 = vpop.permute.xlu0 %821 }
  0x97   : > { %1197 = vst.msk [vmem:[#allocation2 + $0x58] sm:$0xff] %vm1185_vm1, %v824_v28  ;;  %1196 = vst.msk [vmem:[#allocation2 + $0x50] sm:$0xff] %vm1185_vm1, %v822_v29  ;;  %v385_v28 = vld [vmem:[%s9554_s30 + $0x518] sm:$0xff]  ;;  %v384_v29 = vld [vmem:[%s9554_s30 + $0x510] sm:$0xff] }
  0x98   : > { %939 = vrot.lane.b32.xlu1 %v614_v24, %s9492_s8  ;;  %937 = vrot.lane.b32.xlu0 %v613_v25, %s9492_s8  ;;  %514 = vst.msk [vmem:[#allocation2 + $0x308] sm:$0xff] %vm416_vm0, %v385_v28  ;;  %513 = vst.msk [vmem:[#allocation2 + $0x300] sm:$0xff] %vm416_vm0, %v384_v29  ;;  %v658_v28 = vld [vmem:[%s9554_s30 + $0x5d9] sm:$0xff]  ;;  %v657_v29 = vld [vmem:[%s9554_s30 + $0x5d1] sm:$0xff] }
  0x9a   : > { %v828_v34 = vpop.permute.xlu1 %827  ;;  %v826_v35 = vpop.permute.xlu0 %825 }
  0x9b   : > { %1199 = vst.msk [vmem:[#allocation2 + $0x68] sm:$0xff] %vm1185_vm1, %v828_v34  ;;  %1198 = vst.msk [vmem:[#allocation2 + $0x60] sm:$0xff] %vm1185_vm1, %v826_v35  ;;  %v387_v34 = vld [vmem:[%s9554_s30 + $0x530] sm:$0xff]  ;;  %v386_v35 = vld [vmem:[%s9554_s30 + $0x528] sm:$0xff] }
  0x9c   : > { %943 = vrot.lane.b32.xlu1 %v616_v30, %s9492_s8  ;;  %941 = vrot.lane.b32.xlu0 %v615_v31, %s9492_s8  ;;  %516 = vst.msk [vmem:[#allocation2 + $0x318] sm:$0xff] %vm416_vm0, %v387_v34  ;;  %515 = vst.msk [vmem:[#allocation2 + $0x310] sm:$0xff] %vm416_vm0, %v386_v35  ;;  %v660_v34 = vld [vmem:[%s9554_s30 + $0x5f1] sm:$0xff]  ;;  %v659_v35 = vld [vmem:[%s9554_s30 + $0x5e9] sm:$0xff] }
  0x9e   : > { %v832_v40 = vpop.permute.xlu1 %831  ;;  %v830_v41 = vpop.permute.xlu0 %829 }
  0x9f   : > { %1201 = vst.msk [vmem:[#allocation2 + $0x78] sm:$0xff] %vm1185_vm1, %v832_v40  ;;  %1200 = vst.msk [vmem:[#allocation2 + $0x70] sm:$0xff] %vm1185_vm1, %v830_v41  ;;  %v389_v40 = vld [vmem:[%s9554_s30 + $0x548] sm:$0xff]  ;;  %v388_v41 = vld [vmem:[%s9554_s30 + $0x540] sm:$0xff] }
  0xa0   : > { %947 = vrot.lane.b32.xlu1 %v618_v36, %s9492_s8  ;;  %945 = vrot.lane.b32.xlu0 %v617_v37, %s9492_s8  ;;  %518 = vst.msk [vmem:[#allocation2 + $0x328] sm:$0xff] %vm416_vm0, %v389_v40  ;;  %517 = vst.msk [vmem:[#allocation2 + $0x320] sm:$0xff] %vm416_vm0, %v388_v41  ;;  %v662_v40 = vld [vmem:[%s9554_s30 + $0x609] sm:$0xff]  ;;  %v661_v41 = vld [vmem:[%s9554_s30 + $0x601] sm:$0xff] }
  0xa2   : > { %v836_v46 = vpop.permute.xlu1 %835  ;;  %v834_v47 = vpop.permute.xlu0 %833 }
  0xa3   : > { %1203 = vst.msk [vmem:[#allocation2 + $0x88] sm:$0xff] %vm1185_vm1, %v836_v46  ;;  %1202 = vst.msk [vmem:[#allocation2 + $0x80] sm:$0xff] %vm1185_vm1, %v834_v47  ;;  %v391_v46 = vld [vmem:[%s9554_s30 + $0x560] sm:$0xff]  ;;  %v390_v47 = vld [vmem:[%s9554_s30 + $0x558] sm:$0xff] }
  0xa4   : > { %951 = vrot.lane.b32.xlu1 %v620_v42, %s9492_s8  ;;  %949 = vrot.lane.b32.xlu0 %v619_v43, %s9492_s8  ;;  %520 = vst.msk [vmem:[#allocation2 + $0x338] sm:$0xff] %vm416_vm0, %v391_v46  ;;  %519 = vst.msk [vmem:[#allocation2 + $0x330] sm:$0xff] %vm416_vm0, %v390_v47  ;;  %v664_v46 = vld [vmem:[%s9554_s30 + $0x621] sm:$0xff]  ;;  %v663_v47 = vld [vmem:[%s9554_s30 + $0x619] sm:$0xff] }
  0xa6   : > { %v840_v52 = vpop.permute.xlu1 %839  ;;  %v838_v53 = vpop.permute.xlu0 %837 }
  0xa7   : > { %1205 = vst.msk [vmem:[#allocation2 + $0x98] sm:$0xff] %vm1185_vm1, %v840_v52  ;;  %1204 = vst.msk [vmem:[#allocation2 + $0x90] sm:$0xff] %vm1185_vm1, %v838_v53  ;;  %v393_v52 = vld [vmem:[%s9554_s30 + $0x578] sm:$0xff]  ;;  %v392_v53 = vld [vmem:[%s9554_s30 + $0x570] sm:$0xff] }
  0xa8   : > { %955 = vrot.lane.b32.xlu1 %v622_v48, %s9492_s8  ;;  %953 = vrot.lane.b32.xlu0 %v621_v49, %s9492_s8  ;;  %522 = vst.msk [vmem:[#allocation2 + $0x348] sm:$0xff] %vm416_vm0, %v393_v52  ;;  %521 = vst.msk [vmem:[#allocation2 + $0x340] sm:$0xff] %vm416_vm0, %v392_v53  ;;  %v666_v52 = vld [vmem:[%s9554_s30 + $0x639] sm:$0xff]  ;;  %v665_v53 = vld [vmem:[%s9554_s30 + $0x631] sm:$0xff] }
  0xaa   : > { %v844_v58 = vpop.permute.xlu1 %843  ;;  %v842_v59 = vpop.permute.xlu0 %841 }
  0xab   : > { %1207 = vst.msk [vmem:[#allocation2 + $0xa8] sm:$0xff] %vm1185_vm1, %v844_v58  ;;  %1206 = vst.msk [vmem:[#allocation2 + $0xa0] sm:$0xff] %vm1185_vm1, %v842_v59  ;;  %v395_v58 = vld [vmem:[%s9554_s30 + $0x590] sm:$0xff]  ;;  %v394_v59 = vld [vmem:[%s9554_s30 + $0x588] sm:$0xff] }
  0xac   : > { %959 = vrot.lane.b32.xlu1 %v624_v54, %s9492_s8  ;;  %957 = vrot.lane.b32.xlu0 %v623_v55, %s9492_s8  ;;  %524 = vst.msk [vmem:[#allocation2 + $0x358] sm:$0xff] %vm416_vm0, %v395_v58  ;;  %523 = vst.msk [vmem:[#allocation2 + $0x350] sm:$0xff] %vm416_vm0, %v394_v59  ;;  %v668_v58 = vld [vmem:[%s9554_s30 + $0x651] sm:$0xff]  ;;  %v667_v59 = vld [vmem:[%s9554_s30 + $0x649] sm:$0xff] }
  0xae   : > { %v848_v0 = vpop.permute.xlu1 %847  ;;  %v846_v1 = vpop.permute.xlu0 %845 }
  0xaf   : > { %1209 = vst.msk [vmem:[#allocation2 + $0xb8] sm:$0xff] %vm1185_vm1, %v848_v0  ;;  %1208 = vst.msk [vmem:[#allocation2 + $0xb0] sm:$0xff] %vm1185_vm1, %v846_v1  ;;  %v397_v0 = vld [vmem:[%s9554_s30 + $0x5a8] sm:$0xff]  ;;  %v396_v1 = vld [vmem:[%s9554_s30 + $0x5a0] sm:$0xff] }
  0xb0   : > { %963 = vrot.lane.b32.xlu1 %v626_v60, %s9492_s8  ;;  %961 = vrot.lane.b32.xlu0 %v625_v61, %s9492_s8  ;;  %526 = vst.msk [vmem:[#allocation2 + $0x368] sm:$0xff] %vm416_vm0, %v397_v0  ;;  %525 = vst.msk [vmem:[#allocation2 + $0x360] sm:$0xff] %vm416_vm0, %v396_v1 }
  0xb2   : > { %v852_v6 = vpop.permute.xlu1 %851  ;;  %v850_v7 = vpop.permute.xlu0 %849 }
  0xb3   : > { %1211 = vst.msk [vmem:[#allocation2 + $0xc8] sm:$0xff] %vm1185_vm1, %v852_v6  ;;  %1210 = vst.msk [vmem:[#allocation2 + $0xc0] sm:$0xff] %vm1185_vm1, %v850_v7  ;;  %v399_v6 = vld [vmem:[%s9554_s30 + $0x5c0] sm:$0xff]  ;;  %v398_v7 = vld [vmem:[%s9554_s30 + $0x5b8] sm:$0xff] }
  0xb4   : > { %967 = vrot.lane.b32.xlu1 %v628_v2, %s9492_s8  ;;  %965 = vrot.lane.b32.xlu0 %v627_v3, %s9492_s8  ;;  %528 = vst.msk [vmem:[#allocation2 + $0x378] sm:$0xff] %vm416_vm0, %v399_v6  ;;  %527 = vst.msk [vmem:[#allocation2 + $0x370] sm:$0xff] %vm416_vm0, %v398_v7  ;;  %v1315_v6 = vld [vmem:[%s9554_s30 + $0xa] sm:$0xff]  ;;  %v1314_v7 = vld [vmem:[%s9554_s30 + $0x2] sm:$0xff] }
  0xb6   : > { %v856_v12 = vpop.permute.xlu1 %855  ;;  %v854_v13 = vpop.permute.xlu0 %853 }
  0xb7   : > { %1213 = vst.msk [vmem:[#allocation2 + $0xd8] sm:$0xff] %vm1185_vm1, %v856_v12  ;;  %1212 = vst.msk [vmem:[#allocation2 + $0xd0] sm:$0xff] %vm1185_vm1, %v854_v13  ;;  %v401_v12 = vld [vmem:[%s9554_s30 + $0x5d8] sm:$0xff]  ;;  %v400_v13 = vld [vmem:[%s9554_s30 + $0x5d0] sm:$0xff] }
  0xb8   : > { %971 = vrot.lane.b32.xlu1 %v630_v8, %s9492_s8  ;;  %969 = vrot.lane.b32.xlu0 %v629_v9, %s9492_s8  ;;  %530 = vst.msk [vmem:[#allocation2 + $0x388] sm:$0xff] %vm416_vm0, %v401_v12  ;;  %529 = vst.msk [vmem:[#allocation2 + $0x380] sm:$0xff] %vm416_vm0, %v400_v13 }
  0xba   : > { %v860_v18 = vpop.permute.xlu1 %859  ;;  %v858_v19 = vpop.permute.xlu0 %857 }
  0xbb   : > { %1215 = vst.msk [vmem:[#allocation2 + $0xe8] sm:$0xff] %vm1185_vm1, %v860_v18  ;;  %1214 = vst.msk [vmem:[#allocation2 + $0xe0] sm:$0xff] %vm1185_vm1, %v858_v19  ;;  %v403_v18 = vld [vmem:[%s9554_s30 + $0x5f0] sm:$0xff]  ;;  %v402_v19 = vld [vmem:[%s9554_s30 + $0x5e8] sm:$0xff] }
  0xbc   : > { %975 = vrot.lane.b32.xlu1 %v632_v14, %s9492_s8  ;;  %973 = vrot.lane.b32.xlu0 %v631_v15, %s9492_s8  ;;  %532 = vst.msk [vmem:[#allocation2 + $0x398] sm:$0xff] %vm416_vm0, %v403_v18  ;;  %531 = vst.msk [vmem:[#allocation2 + $0x390] sm:$0xff] %vm416_vm0, %v402_v19  ;;  %v1321_v18 = vld [vmem:[%s9554_s30 + $0x52] sm:$0xff]  ;;  %v1320_v19 = vld [vmem:[%s9554_s30 + $0x4a] sm:$0xff] }
  0xbe   : > { %v864_v24 = vpop.permute.xlu1 %863  ;;  %v862_v25 = vpop.permute.xlu0 %861 }
  0xbf   : > { %1217 = vst.msk [vmem:[#allocation2 + $0xf8] sm:$0xff] %vm1185_vm1, %v864_v24  ;;  %1216 = vst.msk [vmem:[#allocation2 + $0xf0] sm:$0xff] %vm1185_vm1, %v862_v25  ;;  %v405_v24 = vld [vmem:[%s9554_s30 + $0x608] sm:$0xff]  ;;  %v404_v25 = vld [vmem:[%s9554_s30 + $0x600] sm:$0xff] }
  0xc0   : > { %979 = vrot.lane.b32.xlu1 %v634_v20, %s9492_s8  ;;  %977 = vrot.lane.b32.xlu0 %v633_v21, %s9492_s8  ;;  %534 = vst.msk [vmem:[#allocation2 + $0x3a8] sm:$0xff] %vm416_vm0, %v405_v24  ;;  %533 = vst.msk [vmem:[#allocation2 + $0x3a0] sm:$0xff] %vm416_vm0, %v404_v25 }
  0xc2   : > { %v868_v30 = vpop.permute.xlu1 %867  ;;  %v866_v31 = vpop.permute.xlu0 %865 }
  0xc3   : > { %1219 = vst.msk [vmem:[#allocation2 + $0x108] sm:$0xff] %vm1185_vm1, %v868_v30  ;;  %1218 = vst.msk [vmem:[#allocation2 + $0x100] sm:$0xff] %vm1185_vm1, %v866_v31  ;;  %v407_v30 = vld [vmem:[%s9554_s30 + $0x620] sm:$0xff]  ;;  %v406_v31 = vld [vmem:[%s9554_s30 + $0x618] sm:$0xff] }
  0xc4   : > { %983 = vrot.lane.b32.xlu1 %v636_v26, %s9492_s8  ;;  %981 = vrot.lane.b32.xlu0 %v635_v27, %s9492_s8  ;;  %536 = vst.msk [vmem:[#allocation2 + $0x3b8] sm:$0xff] %vm416_vm0, %v407_v30  ;;  %535 = vst.msk [vmem:[#allocation2 + $0x3b0] sm:$0xff] %vm416_vm0, %v406_v31  ;;  %v1327_v30 = vld [vmem:[%s9554_s30 + $0x9a] sm:$0xff]  ;;  %v1326_v31 = vld [vmem:[%s9554_s30 + $0x92] sm:$0xff] }
  0xc6   : > { %v872_v36 = vpop.permute.xlu1 %871  ;;  %v870_v37 = vpop.permute.xlu0 %869 }
  0xc7   : > { %1221 = vst.msk [vmem:[#allocation2 + $0x118] sm:$0xff] %vm1185_vm1, %v872_v36  ;;  %1220 = vst.msk [vmem:[#allocation2 + $0x110] sm:$0xff] %vm1185_vm1, %v870_v37  ;;  %v409_v36 = vld [vmem:[%s9554_s30 + $0x638] sm:$0xff]  ;;  %v408_v37 = vld [vmem:[%s9554_s30 + $0x630] sm:$0xff] }
  0xc8   : > { %987 = vrot.lane.b32.xlu1 %v638_v32, %s9492_s8  ;;  %985 = vrot.lane.b32.xlu0 %v637_v33, %s9492_s8  ;;  %538 = vst.msk [vmem:[#allocation2 + $0x3c8] sm:$0xff] %vm416_vm0, %v409_v36  ;;  %537 = vst.msk [vmem:[#allocation2 + $0x3c0] sm:$0xff] %vm416_vm0, %v408_v37 }
  0xca   : > { %v876_v42 = vpop.permute.xlu1 %875  ;;  %v874_v43 = vpop.permute.xlu0 %873 }
  0xcb   : > { %1223 = vst.msk [vmem:[#allocation2 + $0x128] sm:$0xff] %vm1185_vm1, %v876_v42  ;;  %1222 = vst.msk [vmem:[#allocation2 + $0x120] sm:$0xff] %vm1185_vm1, %v874_v43  ;;  %v411_v42 = vld [vmem:[%s9554_s30 + $0x650] sm:$0xff]  ;;  %v410_v43 = vld [vmem:[%s9554_s30 + $0x648] sm:$0xff] }
  0xcc   : > { %991 = vrot.lane.b32.xlu1 %v640_v38, %s9492_s8  ;;  %989 = vrot.lane.b32.xlu0 %v639_v39, %s9492_s8  ;;  %540 = vst.msk [vmem:[#allocation2 + $0x3d8] sm:$0xff] %vm416_vm0, %v411_v42  ;;  %539 = vst.msk [vmem:[#allocation2 + $0x3d0] sm:$0xff] %vm416_vm0, %v410_v43  ;;  %v1333_v42 = vld [vmem:[%s9554_s30 + $0xe2] sm:$0xff]  ;;  %v1332_v43 = vld [vmem:[%s9554_s30 + $0xda] sm:$0xff] }
  0xce   : > { %v880_v48 = vpop.permute.xlu1 %879  ;;  %v878_v49 = vpop.permute.xlu0 %877 }
  0xcf   : > { %1225 = vst.msk [vmem:[#allocation2 + $0x138] sm:$0xff] %vm1185_vm1, %v880_v48  ;;  %1224 = vst.msk [vmem:[#allocation2 + $0x130] sm:$0xff] %vm1185_vm1, %v878_v49  ;;  %v413_v48 = vld [vmem:[%s9554_s30 + $0x668] sm:$0xff]  ;;  %v412_v49 = vld [vmem:[%s9554_s30 + $0x660] sm:$0xff] }
  0xd0   : > { %995 = vrot.lane.b32.xlu1 %v642_v44, %s9492_s8  ;;  %993 = vrot.lane.b32.xlu0 %v641_v45, %s9492_s8  ;;  %542 = vst.msk [vmem:[#allocation2 + $0x3e8] sm:$0xff] %vm416_vm0, %v413_v48  ;;  %541 = vst.msk [vmem:[#allocation2 + $0x3e0] sm:$0xff] %vm416_vm0, %v412_v49 }
  0xd2   : > { %v884_v54 = vpop.permute.xlu1 %883  ;;  %v882_v55 = vpop.permute.xlu0 %881 }
  0xd3   : > { %1227 = vst.msk [vmem:[#allocation2 + $0x148] sm:$0xff] %vm1185_vm1, %v884_v54  ;;  %1226 = vst.msk [vmem:[#allocation2 + $0x140] sm:$0xff] %vm1185_vm1, %v882_v55  ;;  %v415_v54 = vld [vmem:[%s9554_s30 + $0x680] sm:$0xff]  ;;  %v414_v55 = vld [vmem:[%s9554_s30 + $0x678] sm:$0xff] }
  0xd4   : > { %999 = vrot.lane.b32.xlu1 %v644_v50, %s9492_s8  ;;  %997 = vrot.lane.b32.xlu0 %v643_v51, %s9492_s8  ;;  %544 = vst.msk [vmem:[#allocation2 + $0x3f8] sm:$0xff] %vm416_vm0, %v415_v54  ;;  %543 = vst.msk [vmem:[#allocation2 + $0x3f0] sm:$0xff] %vm416_vm0, %v414_v55  ;;  %v1339_v54 = vld [vmem:[%s9554_s30 + $0x12a] sm:$0xff]  ;;  %v1338_v55 = vld [vmem:[%s9554_s30 + $0x122] sm:$0xff] }
  0xd6   : > { %v888_v60 = vpop.permute.xlu1 %887  ;;  %v886_v61 = vpop.permute.xlu0 %885 }
  0xd7   : > { %1229 = vst.msk [vmem:[#allocation2 + $0x158] sm:$0xff] %vm1185_vm1, %v888_v60  ;;  %1228 = vst.msk [vmem:[#allocation2 + $0x150] sm:$0xff] %vm1185_vm1, %v886_v61 }
  0xd8   : > { %1003 = vrot.lane.b32.xlu1 %v646_v56, %s9492_s8  ;;  %1001 = vrot.lane.b32.xlu0 %v645_v57, %s9492_s8 }
  0xda   : > { %v892_v2 = vpop.permute.xlu1 %891  ;;  %v890_v3 = vpop.permute.xlu0 %889 }
  0xdb   : > { %1231 = vst.msk [vmem:[#allocation2 + $0x168] sm:$0xff] %vm1185_vm1, %v892_v2  ;;  %1230 = vst.msk [vmem:[#allocation2 + $0x160] sm:$0xff] %vm1185_vm1, %v890_v3  ;;  %v672_v2 = vld [vmem:[%s9554_s30 + $0x681] sm:$0xff]  ;;  %v671_v3 = vld [vmem:[%s9554_s30 + $0x679] sm:$0xff] }
  0xdc   : > { %1007 = vrot.lane.b32.xlu1 %v648_v62, %s9492_s8  ;;  %1005 = vrot.lane.b32.xlu0 %v647_v63, %s9492_s8  ;;  %v670_v62 = vld [vmem:[%s9554_s30 + $0x669] sm:$0xff]  ;;  %v669_v63 = vld [vmem:[%s9554_s30 + $0x661] sm:$0xff] }
  0xde   : > { %v896_v8 = vpop.permute.xlu1 %895  ;;  %v894_v9 = vpop.permute.xlu0 %893 }
  0xdf   : > { %1233 = vst.msk [vmem:[#allocation2 + $0x178] sm:$0xff] %vm1185_vm1, %v896_v8  ;;  %1232 = vst.msk [vmem:[#allocation2 + $0x170] sm:$0xff] %vm1185_vm1, %v894_v9 }
  0xe0   : > { %1011 = vrot.lane.b32.xlu1 %v650_v4, %s9492_s8  ;;  %1009 = vrot.lane.b32.xlu0 %v649_v5, %s9492_s8 }
  0xe2   : > { %v900_v14 = vpop.permute.xlu1 %899  ;;  %v898_v15 = vpop.permute.xlu0 %897 }
  0xe3   : > { %1235 = vst.msk [vmem:[#allocation2 + $0x188] sm:$0xff] %vm1185_vm1, %v900_v14  ;;  %1234 = vst.msk [vmem:[#allocation2 + $0x180] sm:$0xff] %vm1185_vm1, %v898_v15  ;;  %v1319_v14 = vld [vmem:[%s9554_s30 + $0x3a] sm:$0xff]  ;;  %v1318_v15 = vld [vmem:[%s9554_s30 + $0x32] sm:$0xff] }
  0xe4   : > { %1015 = vrot.lane.b32.xlu1 %v652_v10, %s9492_s8  ;;  %1013 = vrot.lane.b32.xlu0 %v651_v11, %s9492_s8  ;;  %v1317_v10 = vld [vmem:[%s9554_s30 + $0x22] sm:$0xff]  ;;  %v1316_v11 = vld [vmem:[%s9554_s30 + $0x1a] sm:$0xff] }
  0xe6   : > { %v904_v20 = vpop.permute.xlu1 %903  ;;  %v902_v21 = vpop.permute.xlu0 %901 }
  0xe7   : > { %1237 = vst.msk [vmem:[#allocation2 + $0x198] sm:$0xff] %vm1185_vm1, %v904_v20  ;;  %1236 = vst.msk [vmem:[#allocation2 + $0x190] sm:$0xff] %vm1185_vm1, %v902_v21 }
  0xe8   : > { %1019 = vrot.lane.b32.xlu1 %v654_v16, %s9492_s8  ;;  %1017 = vrot.lane.b32.xlu0 %v653_v17, %s9492_s8 }
  0xea   : > { %v908_v26 = vpop.permute.xlu1 %907  ;;  %v906_v27 = vpop.permute.xlu0 %905 }
  0xeb   : > { %1239 = vst.msk [vmem:[#allocation2 + $0x1a8] sm:$0xff] %vm1185_vm1, %v908_v26  ;;  %1238 = vst.msk [vmem:[#allocation2 + $0x1a0] sm:$0xff] %vm1185_vm1, %v906_v27  ;;  %v1325_v26 = vld [vmem:[%s9554_s30 + $0x82] sm:$0xff]  ;;  %v1324_v27 = vld [vmem:[%s9554_s30 + $0x7a] sm:$0xff] }
  0xec   : > { %1023 = vrot.lane.b32.xlu1 %v656_v22, %s9492_s8  ;;  %1021 = vrot.lane.b32.xlu0 %v655_v23, %s9492_s8  ;;  %v1323_v22 = vld [vmem:[%s9554_s30 + $0x6a] sm:$0xff]  ;;  %v1322_v23 = vld [vmem:[%s9554_s30 + $0x62] sm:$0xff] }
  0xee   : > { %v912_v32 = vpop.permute.xlu1 %911  ;;  %v910_v33 = vpop.permute.xlu0 %909 }
  0xef   : > { %1241 = vst.msk [vmem:[#allocation2 + $0x1b8] sm:$0xff] %vm1185_vm1, %v912_v32  ;;  %1240 = vst.msk [vmem:[#allocation2 + $0x1b0] sm:$0xff] %vm1185_vm1, %v910_v33 }
  0xf0   : > { %1027 = vrot.lane.b32.xlu1 %v658_v28, %s9492_s8  ;;  %1025 = vrot.lane.b32.xlu0 %v657_v29, %s9492_s8 }
  0xf2   : > { %v916_v38 = vpop.permute.xlu1 %915  ;;  %v914_v39 = vpop.permute.xlu0 %913 }
  0xf3   : > { %1243 = vst.msk [vmem:[#allocation2 + $0x1c8] sm:$0xff] %vm1185_vm1, %v916_v38  ;;  %1242 = vst.msk [vmem:[#allocation2 + $0x1c0] sm:$0xff] %vm1185_vm1, %v914_v39  ;;  %v1331_v38 = vld [vmem:[%s9554_s30 + $0xca] sm:$0xff]  ;;  %v1330_v39 = vld [vmem:[%s9554_s30 + $0xc2] sm:$0xff] }
  0xf4   : > { %1031 = vrot.lane.b32.xlu1 %v660_v34, %s9492_s8  ;;  %1029 = vrot.lane.b32.xlu0 %v659_v35, %s9492_s8  ;;  %v1329_v34 = vld [vmem:[%s9554_s30 + $0xb2] sm:$0xff]  ;;  %v1328_v35 = vld [vmem:[%s9554_s30 + $0xaa] sm:$0xff] }
  0xf6   : > { %v920_v44 = vpop.permute.xlu1 %919  ;;  %v918_v45 = vpop.permute.xlu0 %917 }
  0xf7   : > { %1245 = vst.msk [vmem:[#allocation2 + $0x1d8] sm:$0xff] %vm1185_vm1, %v920_v44  ;;  %1244 = vst.msk [vmem:[#allocation2 + $0x1d0] sm:$0xff] %vm1185_vm1, %v918_v45 }
  0xf8   : > { %1035 = vrot.lane.b32.xlu1 %v662_v40, %s9492_s8  ;;  %1033 = vrot.lane.b32.xlu0 %v661_v41, %s9492_s8 }
  0xfa   : > { %v924_v50 = vpop.permute.xlu1 %923  ;;  %v922_v51 = vpop.permute.xlu0 %921 }
  0xfb   : > { %1247 = vst.msk [vmem:[#allocation2 + $0x1e8] sm:$0xff] %vm1185_vm1, %v924_v50  ;;  %1246 = vst.msk [vmem:[#allocation2 + $0x1e0] sm:$0xff] %vm1185_vm1, %v922_v51  ;;  %v1337_v50 = vld [vmem:[%s9554_s30 + $0x112] sm:$0xff]  ;;  %v1336_v51 = vld [vmem:[%s9554_s30 + $0x10a] sm:$0xff] }
  0xfc   : > { %1039 = vrot.lane.b32.xlu1 %v664_v46, %s9492_s8  ;;  %1037 = vrot.lane.b32.xlu0 %v663_v47, %s9492_s8  ;;  %v1335_v46 = vld [vmem:[%s9554_s30 + $0xfa] sm:$0xff]  ;;  %v1334_v47 = vld [vmem:[%s9554_s30 + $0xf2] sm:$0xff] }
  0xfe   : > { %v928_v56 = vpop.permute.xlu1 %927  ;;  %v926_v57 = vpop.permute.xlu0 %925 }
  0xff   : > { %1249 = vst.msk [vmem:[#allocation2 + $0x1f8] sm:$0xff] %vm1185_vm1, %v928_v56  ;;  %1248 = vst.msk [vmem:[#allocation2 + $0x1f0] sm:$0xff] %vm1185_vm1, %v926_v57 }
 0x100   : > { %1043 = vrot.lane.b32.xlu1 %v666_v52, %s9492_s8  ;;  %1041 = vrot.lane.b32.xlu0 %v665_v53, %s9492_s8 }
 0x102   : > { %v932_v60 = vpop.permute.xlu1 %931  ;;  %v930_v61 = vpop.permute.xlu0 %929 }
 0x103   : > { %1251 = vst.msk [vmem:[#allocation2 + $0x208] sm:$0xff] %vm1185_vm1, %v932_v60  ;;  %1250 = vst.msk [vmem:[#allocation2 + $0x200] sm:$0xff] %vm1185_vm1, %v930_v61 }
 0x104   : > { %1047 = vrot.lane.b32.xlu1 %v668_v58, %s9492_s8  ;;  %1045 = vrot.lane.b32.xlu0 %v667_v59, %s9492_s8  ;;  %v1341_v58 = vld [vmem:[%s9554_s30 + $0x142] sm:$0xff]  ;;  %v1340_v59 = vld [vmem:[%s9554_s30 + $0x13a] sm:$0xff] }
 0x106   : > { %v936_v0 = vpop.permute.xlu1 %935  ;;  %v934_v1 = vpop.permute.xlu0 %933 }
 0x107   : > { %1253 = vst.msk [vmem:[#allocation2 + $0x218] sm:$0xff] %vm1185_vm1, %v936_v0  ;;  %1252 = vst.msk [vmem:[#allocation2 + $0x210] sm:$0xff] %vm1185_vm1, %v934_v1 }
 0x108   : > { %1051 = vrot.lane.b32.xlu1 %v670_v62, %s9492_s8  ;;  %1049 = vrot.lane.b32.xlu0 %v669_v63, %s9492_s8  ;;  %v1343_v62 = vld [vmem:[%s9554_s30 + $0x15a] sm:$0xff]  ;;  %v1342_v63 = vld [vmem:[%s9554_s30 + $0x152] sm:$0xff] }
 0x10a   : > { %v940_v4 = vpop.permute.xlu1 %939  ;;  %v938_v5 = vpop.permute.xlu0 %937 }
 0x10b   : > { %1255 = vst.msk [vmem:[#allocation2 + $0x228] sm:$0xff] %vm1185_vm1, %v940_v4  ;;  %1254 = vst.msk [vmem:[#allocation2 + $0x220] sm:$0xff] %vm1185_vm1, %v938_v5 }
 0x10c   : > { %1055 = vrot.lane.b32.xlu1 %v672_v2, %s9492_s8  ;;  %1053 = vrot.lane.b32.xlu0 %v671_v3, %s9492_s8  ;;  %v1345_v2 = vld [vmem:[%s9554_s30 + $0x172] sm:$0xff]  ;;  %v1344_v3 = vld [vmem:[%s9554_s30 + $0x16a] sm:$0xff] }
 0x10e   : > { %v944_v8 = vpop.permute.xlu1 %943  ;;  %v942_v9 = vpop.permute.xlu0 %941 }
 0x10f   : > { %1257 = vst.msk [vmem:[#allocation2 + $0x238] sm:$0xff] %vm1185_vm1, %v944_v8  ;;  %1256 = vst.msk [vmem:[#allocation2 + $0x230] sm:$0xff] %vm1185_vm1, %v942_v9 }
 0x110   : > { %1572 = vrot.lane.b32.xlu1 %v1315_v6, %s9493_s9  ;;  %1570 = vrot.lane.b32.xlu0 %v1314_v7, %s9493_s9  ;;  %v1347_v6 = vld [vmem:[%s9554_s30 + $0x1ba] sm:$0xff]  ;;  %v1346_v7 = vld [vmem:[%s9554_s30 + $0x1b2] sm:$0xff] }
 0x112   : > { %v948_v12 = vpop.permute.xlu1 %947  ;;  %v946_v13 = vpop.permute.xlu0 %945 }
 0x113   : > { %1259 = vst.msk [vmem:[#allocation2 + $0x248] sm:$0xff] %vm1185_vm1, %v948_v12  ;;  %1258 = vst.msk [vmem:[#allocation2 + $0x240] sm:$0xff] %vm1185_vm1, %v946_v13 }
 0x114   : > { %1576 = vrot.lane.b32.xlu1 %v1317_v10, %s9493_s9  ;;  %1574 = vrot.lane.b32.xlu0 %v1316_v11, %s9493_s9  ;;  %v1349_v10 = vld [vmem:[%s9554_s30 + $0x1d2] sm:$0xff]  ;;  %v1348_v11 = vld [vmem:[%s9554_s30 + $0x1ca] sm:$0xff] }
 0x116   : > { %v952_v16 = vpop.permute.xlu1 %951  ;;  %v950_v17 = vpop.permute.xlu0 %949 }
 0x117   : > { %1261 = vst.msk [vmem:[#allocation2 + $0x258] sm:$0xff] %vm1185_vm1, %v952_v16  ;;  %1260 = vst.msk [vmem:[#allocation2 + $0x250] sm:$0xff] %vm1185_vm1, %v950_v17 }
 0x118   : > { %1580 = vrot.lane.b32.xlu1 %v1319_v14, %s9493_s9  ;;  %1578 = vrot.lane.b32.xlu0 %v1318_v15, %s9493_s9  ;;  %v1351_v14 = vld [vmem:[%s9554_s30 + $0x1ea] sm:$0xff]  ;;  %v1350_v15 = vld [vmem:[%s9554_s30 + $0x1e2] sm:$0xff] }
 0x11a   : > { %v956_v20 = vpop.permute.xlu1 %955  ;;  %v954_v21 = vpop.permute.xlu0 %953 }
 0x11b   : > { %1263 = vst.msk [vmem:[#allocation2 + $0x268] sm:$0xff] %vm1185_vm1, %v956_v20  ;;  %1262 = vst.msk [vmem:[#allocation2 + $0x260] sm:$0xff] %vm1185_vm1, %v954_v21 }
 0x11c   : > { %1584 = vrot.lane.b32.xlu1 %v1321_v18, %s9493_s9  ;;  %1582 = vrot.lane.b32.xlu0 %v1320_v19, %s9493_s9  ;;  %v1353_v18 = vld [vmem:[%s9554_s30 + $0x202] sm:$0xff]  ;;  %v1352_v19 = vld [vmem:[%s9554_s30 + $0x1fa] sm:$0xff] }
 0x11e   : > { %v960_v24 = vpop.permute.xlu1 %959  ;;  %v958_v25 = vpop.permute.xlu0 %957 }
 0x11f   : > { %1265 = vst.msk [vmem:[#allocation2 + $0x278] sm:$0xff] %vm1185_vm1, %v960_v24  ;;  %1264 = vst.msk [vmem:[#allocation2 + $0x270] sm:$0xff] %vm1185_vm1, %v958_v25 }
 0x120   : > { %1588 = vrot.lane.b32.xlu1 %v1323_v22, %s9493_s9  ;;  %1586 = vrot.lane.b32.xlu0 %v1322_v23, %s9493_s9  ;;  %v1355_v22 = vld [vmem:[%s9554_s30 + $0x21a] sm:$0xff]  ;;  %v1354_v23 = vld [vmem:[%s9554_s30 + $0x212] sm:$0xff] }
 0x122   : > { %v964_v28 = vpop.permute.xlu1 %963  ;;  %v962_v29 = vpop.permute.xlu0 %961 }
 0x123   : > { %1267 = vst.msk [vmem:[#allocation2 + $0x288] sm:$0xff] %vm1185_vm1, %v964_v28  ;;  %1266 = vst.msk [vmem:[#allocation2 + $0x280] sm:$0xff] %vm1185_vm1, %v962_v29 }
 0x124   : > { %1592 = vrot.lane.b32.xlu1 %v1325_v26, %s9493_s9  ;;  %1590 = vrot.lane.b32.xlu0 %v1324_v27, %s9493_s9  ;;  %v1357_v26 = vld [vmem:[%s9554_s30 + $0x232] sm:$0xff]  ;;  %v1356_v27 = vld [vmem:[%s9554_s30 + $0x22a] sm:$0xff] }
 0x126   : > { %v968_v32 = vpop.permute.xlu1 %967  ;;  %v966_v33 = vpop.permute.xlu0 %965 }
 0x127   : > { %1269 = vst.msk [vmem:[#allocation2 + $0x298] sm:$0xff] %vm1185_vm1, %v968_v32  ;;  %1268 = vst.msk [vmem:[#allocation2 + $0x290] sm:$0xff] %vm1185_vm1, %v966_v33 }
 0x128   : > { %1596 = vrot.lane.b32.xlu1 %v1327_v30, %s9493_s9  ;;  %1594 = vrot.lane.b32.xlu0 %v1326_v31, %s9493_s9  ;;  %v1359_v30 = vld [vmem:[%s9554_s30 + $0x24a] sm:$0xff]  ;;  %v1358_v31 = vld [vmem:[%s9554_s30 + $0x242] sm:$0xff] }
 0x12a   : > { %v972_v36 = vpop.permute.xlu1 %971  ;;  %v970_v37 = vpop.permute.xlu0 %969 }
 0x12b   : > { %1271 = vst.msk [vmem:[#allocation2 + $0x2a8] sm:$0xff] %vm1185_vm1, %v972_v36  ;;  %1270 = vst.msk [vmem:[#allocation2 + $0x2a0] sm:$0xff] %vm1185_vm1, %v970_v37 }
 0x12c   : > { %1600 = vrot.lane.b32.xlu1 %v1329_v34, %s9493_s9  ;;  %1598 = vrot.lane.b32.xlu0 %v1328_v35, %s9493_s9  ;;  %v1361_v34 = vld [vmem:[%s9554_s30 + $0x262] sm:$0xff]  ;;  %v1360_v35 = vld [vmem:[%s9554_s30 + $0x25a] sm:$0xff] }
 0x12e   : > { %v976_v40 = vpop.permute.xlu1 %975  ;;  %v974_v41 = vpop.permute.xlu0 %973 }
 0x12f   : > { %1273 = vst.msk [vmem:[#allocation2 + $0x2b8] sm:$0xff] %vm1185_vm1, %v976_v40  ;;  %1272 = vst.msk [vmem:[#allocation2 + $0x2b0] sm:$0xff] %vm1185_vm1, %v974_v41 }
 0x130   : > { %1604 = vrot.lane.b32.xlu1 %v1331_v38, %s9493_s9  ;;  %1602 = vrot.lane.b32.xlu0 %v1330_v39, %s9493_s9  ;;  %v1363_v38 = vld [vmem:[%s9554_s30 + $0x27a] sm:$0xff]  ;;  %v1362_v39 = vld [vmem:[%s9554_s30 + $0x272] sm:$0xff] }
 0x132   : > { %v980_v44 = vpop.permute.xlu1 %979  ;;  %v978_v45 = vpop.permute.xlu0 %977 }
 0x133   : > { %1275 = vst.msk [vmem:[#allocation2 + $0x2c8] sm:$0xff] %vm1185_vm1, %v980_v44  ;;  %1274 = vst.msk [vmem:[#allocation2 + $0x2c0] sm:$0xff] %vm1185_vm1, %v978_v45 }
 0x134   : > { %1608 = vrot.lane.b32.xlu1 %v1333_v42, %s9493_s9  ;;  %1606 = vrot.lane.b32.xlu0 %v1332_v43, %s9493_s9  ;;  %v1365_v42 = vld [vmem:[%s9554_s30 + $0x292] sm:$0xff]  ;;  %v1364_v43 = vld [vmem:[%s9554_s30 + $0x28a] sm:$0xff] }
 0x136   : > { %v984_v48 = vpop.permute.xlu1 %983  ;;  %v982_v49 = vpop.permute.xlu0 %981 }
 0x137   : > { %1277 = vst.msk [vmem:[#allocation2 + $0x2d8] sm:$0xff] %vm1185_vm1, %v984_v48  ;;  %1276 = vst.msk [vmem:[#allocation2 + $0x2d0] sm:$0xff] %vm1185_vm1, %v982_v49 }
 0x138   : > { %1612 = vrot.lane.b32.xlu1 %v1335_v46, %s9493_s9  ;;  %1610 = vrot.lane.b32.xlu0 %v1334_v47, %s9493_s9  ;;  %v1367_v46 = vld [vmem:[%s9554_s30 + $0x2aa] sm:$0xff]  ;;  %v1366_v47 = vld [vmem:[%s9554_s30 + $0x2a2] sm:$0xff] }
 0x13a   : > { %v988_v52 = vpop.permute.xlu1 %987  ;;  %v986_v53 = vpop.permute.xlu0 %985 }
 0x13b   : > { %1279 = vst.msk [vmem:[#allocation2 + $0x2e8] sm:$0xff] %vm1185_vm1, %v988_v52  ;;  %1278 = vst.msk [vmem:[#allocation2 + $0x2e0] sm:$0xff] %vm1185_vm1, %v986_v53 }
 0x13c   : > { %1616 = vrot.lane.b32.xlu1 %v1337_v50, %s9493_s9  ;;  %1614 = vrot.lane.b32.xlu0 %v1336_v51, %s9493_s9  ;;  %v1369_v50 = vld [vmem:[%s9554_s30 + $0x2c2] sm:$0xff]  ;;  %v1368_v51 = vld [vmem:[%s9554_s30 + $0x2ba] sm:$0xff] }
 0x13e   : > { %v992_v56 = vpop.permute.xlu1 %991  ;;  %v990_v57 = vpop.permute.xlu0 %989 }
 0x13f   : > { %1281 = vst.msk [vmem:[#allocation2 + $0x2f8] sm:$0xff] %vm1185_vm1, %v992_v56  ;;  %1280 = vst.msk [vmem:[#allocation2 + $0x2f0] sm:$0xff] %vm1185_vm1, %v990_v57 }
 0x140   : > { %1620 = vrot.lane.b32.xlu1 %v1339_v54, %s9493_s9  ;;  %1618 = vrot.lane.b32.xlu0 %v1338_v55, %s9493_s9  ;;  %v1371_v54 = vld [vmem:[%s9554_s30 + $0x2da] sm:$0xff]  ;;  %v1370_v55 = vld [vmem:[%s9554_s30 + $0x2d2] sm:$0xff] }
 0x142   : > { %v996_v60 = vpop.permute.xlu1 %995  ;;  %v994_v61 = vpop.permute.xlu0 %993 }
 0x143   : > { %1283 = vst.msk [vmem:[#allocation2 + $0x308] sm:$0xff] %vm1185_vm1, %v996_v60  ;;  %1282 = vst.msk [vmem:[#allocation2 + $0x300] sm:$0xff] %vm1185_vm1, %v994_v61 }
 0x144   : > { %1624 = vrot.lane.b32.xlu1 %v1341_v58, %s9493_s9  ;;  %1622 = vrot.lane.b32.xlu0 %v1340_v59, %s9493_s9  ;;  %v1373_v58 = vld [vmem:[%s9554_s30 + $0x2f2] sm:$0xff]  ;;  %v1372_v59 = vld [vmem:[%s9554_s30 + $0x2ea] sm:$0xff] }
 0x146   : > { %v1000_v0 = vpop.permute.xlu1 %999  ;;  %v998_v1 = vpop.permute.xlu0 %997 }
 0x147   : > { %1285 = vst.msk [vmem:[#allocation2 + $0x318] sm:$0xff] %vm1185_vm1, %v1000_v0  ;;  %1284 = vst.msk [vmem:[#allocation2 + $0x310] sm:$0xff] %vm1185_vm1, %v998_v1 }
 0x148   : > { %1628 = vrot.lane.b32.xlu1 %v1343_v62, %s9493_s9  ;;  %1626 = vrot.lane.b32.xlu0 %v1342_v63, %s9493_s9  ;;  %v1375_v62 = vld [vmem:[%s9554_s30 + $0x30a] sm:$0xff]  ;;  %v1374_v63 = vld [vmem:[%s9554_s30 + $0x302] sm:$0xff] }
 0x14a   : > { %v1004_v4 = vpop.permute.xlu1 %1003  ;;  %v1002_v5 = vpop.permute.xlu0 %1001 }
 0x14b   : > { %1287 = vst.msk [vmem:[#allocation2 + $0x328] sm:$0xff] %vm1185_vm1, %v1004_v4  ;;  %1286 = vst.msk [vmem:[#allocation2 + $0x320] sm:$0xff] %vm1185_vm1, %v1002_v5 }
 0x14c   : > { %1632 = vrot.lane.b32.xlu1 %v1345_v2, %s9493_s9  ;;  %1630 = vrot.lane.b32.xlu0 %v1344_v3, %s9493_s9  ;;  %v1377_v2 = vld [vmem:[%s9554_s30 + $0x322] sm:$0xff]  ;;  %v1376_v3 = vld [vmem:[%s9554_s30 + $0x31a] sm:$0xff] }
 0x14e   : > { %v1008_v8 = vpop.permute.xlu1 %1007  ;;  %v1006_v9 = vpop.permute.xlu0 %1005 }
 0x14f   : > { %1289 = vst.msk [vmem:[#allocation2 + $0x338] sm:$0xff] %vm1185_vm1, %v1008_v8  ;;  %1288 = vst.msk [vmem:[#allocation2 + $0x330] sm:$0xff] %vm1185_vm1, %v1006_v9 }
 0x150   : > { %1636 = vrot.lane.b32.xlu1 %v1347_v6, %s9493_s9  ;;  %1634 = vrot.lane.b32.xlu0 %v1346_v7, %s9493_s9  ;;  %v1379_v6 = vld [vmem:[%s9554_s30 + $0x36a] sm:$0xff]  ;;  %v1378_v7 = vld [vmem:[%s9554_s30 + $0x362] sm:$0xff] }
 0x152   : > { %v1012_v12 = vpop.permute.xlu1 %1011  ;;  %v1010_v13 = vpop.permute.xlu0 %1009 }
 0x153   : > { %1291 = vst.msk [vmem:[#allocation2 + $0x348] sm:$0xff] %vm1185_vm1, %v1012_v12  ;;  %1290 = vst.msk [vmem:[#allocation2 + $0x340] sm:$0xff] %vm1185_vm1, %v1010_v13 }
 0x154   : > { %1640 = vrot.lane.b32.xlu1 %v1349_v10, %s9493_s9  ;;  %1638 = vrot.lane.b32.xlu0 %v1348_v11, %s9493_s9  ;;  %v1381_v10 = vld [vmem:[%s9554_s30 + $0x382] sm:$0xff]  ;;  %v1380_v11 = vld [vmem:[%s9554_s30 + $0x37a] sm:$0xff] }
 0x156   : > { %v1016_v16 = vpop.permute.xlu1 %1015  ;;  %v1014_v17 = vpop.permute.xlu0 %1013 }
 0x157   : > { %1293 = vst.msk [vmem:[#allocation2 + $0x358] sm:$0xff] %vm1185_vm1, %v1016_v16  ;;  %1292 = vst.msk [vmem:[#allocation2 + $0x350] sm:$0xff] %vm1185_vm1, %v1014_v17 }
 0x158   : > { %1644 = vrot.lane.b32.xlu1 %v1351_v14, %s9493_s9  ;;  %1642 = vrot.lane.b32.xlu0 %v1350_v15, %s9493_s9  ;;  %v1383_v14 = vld [vmem:[%s9554_s30 + $0x39a] sm:$0xff]  ;;  %v1382_v15 = vld [vmem:[%s9554_s30 + $0x392] sm:$0xff] }
 0x15a   : > { %v1020_v20 = vpop.permute.xlu1 %1019  ;;  %v1018_v21 = vpop.permute.xlu0 %1017 }
 0x15b   : > { %1295 = vst.msk [vmem:[#allocation2 + $0x368] sm:$0xff] %vm1185_vm1, %v1020_v20  ;;  %1294 = vst.msk [vmem:[#allocation2 + $0x360] sm:$0xff] %vm1185_vm1, %v1018_v21 }
 0x15c   : > { %1648 = vrot.lane.b32.xlu1 %v1353_v18, %s9493_s9  ;;  %1646 = vrot.lane.b32.xlu0 %v1352_v19, %s9493_s9  ;;  %v1385_v18 = vld [vmem:[%s9554_s30 + $0x3b2] sm:$0xff]  ;;  %v1384_v19 = vld [vmem:[%s9554_s30 + $0x3aa] sm:$0xff] }
 0x15e   : > { %v1024_v24 = vpop.permute.xlu1 %1023  ;;  %v1022_v25 = vpop.permute.xlu0 %1021 }
 0x15f   : > { %1297 = vst.msk [vmem:[#allocation2 + $0x378] sm:$0xff] %vm1185_vm1, %v1024_v24  ;;  %1296 = vst.msk [vmem:[#allocation2 + $0x370] sm:$0xff] %vm1185_vm1, %v1022_v25 }
 0x160   : > { %1652 = vrot.lane.b32.xlu1 %v1355_v22, %s9493_s9  ;;  %1650 = vrot.lane.b32.xlu0 %v1354_v23, %s9493_s9  ;;  %v1387_v22 = vld [vmem:[%s9554_s30 + $0x3ca] sm:$0xff]  ;;  %v1386_v23 = vld [vmem:[%s9554_s30 + $0x3c2] sm:$0xff] }
 0x162   : > { %v1028_v28 = vpop.permute.xlu1 %1027  ;;  %v1026_v29 = vpop.permute.xlu0 %1025 }
 0x163   : > { %1299 = vst.msk [vmem:[#allocation2 + $0x388] sm:$0xff] %vm1185_vm1, %v1028_v28  ;;  %1298 = vst.msk [vmem:[#allocation2 + $0x380] sm:$0xff] %vm1185_vm1, %v1026_v29 }
 0x164   : > { %1656 = vrot.lane.b32.xlu1 %v1357_v26, %s9493_s9  ;;  %1654 = vrot.lane.b32.xlu0 %v1356_v27, %s9493_s9  ;;  %v1389_v26 = vld [vmem:[%s9554_s30 + $0x3e2] sm:$0xff]  ;;  %v1388_v27 = vld [vmem:[%s9554_s30 + $0x3da] sm:$0xff] }
 0x166   : > { %v1032_v32 = vpop.permute.xlu1 %1031  ;;  %v1030_v33 = vpop.permute.xlu0 %1029 }
 0x167   : > { %1301 = vst.msk [vmem:[#allocation2 + $0x398] sm:$0xff] %vm1185_vm1, %v1032_v32  ;;  %1300 = vst.msk [vmem:[#allocation2 + $0x390] sm:$0xff] %vm1185_vm1, %v1030_v33 }
 0x168   : > { %1660 = vrot.lane.b32.xlu1 %v1359_v30, %s9493_s9  ;;  %1658 = vrot.lane.b32.xlu0 %v1358_v31, %s9493_s9  ;;  %v1391_v30 = vld [vmem:[%s9554_s30 + $0x3fa] sm:$0xff]  ;;  %v1390_v31 = vld [vmem:[%s9554_s30 + $0x3f2] sm:$0xff] }
 0x16a   : > { %v1036_v36 = vpop.permute.xlu1 %1035  ;;  %v1034_v37 = vpop.permute.xlu0 %1033 }
 0x16b   : > { %1303 = vst.msk [vmem:[#allocation2 + $0x3a8] sm:$0xff] %vm1185_vm1, %v1036_v36  ;;  %1302 = vst.msk [vmem:[#allocation2 + $0x3a0] sm:$0xff] %vm1185_vm1, %v1034_v37 }
 0x16c   : > { %1664 = vrot.lane.b32.xlu1 %v1361_v34, %s9493_s9  ;;  %1662 = vrot.lane.b32.xlu0 %v1360_v35, %s9493_s9  ;;  %v1393_v34 = vld [vmem:[%s9554_s30 + $0x412] sm:$0xff]  ;;  %v1392_v35 = vld [vmem:[%s9554_s30 + $0x40a] sm:$0xff] }
 0x16e   : > { %v1040_v40 = vpop.permute.xlu1 %1039  ;;  %v1038_v41 = vpop.permute.xlu0 %1037 }
 0x16f   : > { %1305 = vst.msk [vmem:[#allocation2 + $0x3b8] sm:$0xff] %vm1185_vm1, %v1040_v40  ;;  %1304 = vst.msk [vmem:[#allocation2 + $0x3b0] sm:$0xff] %vm1185_vm1, %v1038_v41 }
 0x170   : > { %1668 = vrot.lane.b32.xlu1 %v1363_v38, %s9493_s9  ;;  %1666 = vrot.lane.b32.xlu0 %v1362_v39, %s9493_s9  ;;  %v1395_v38 = vld [vmem:[%s9554_s30 + $0x42a] sm:$0xff]  ;;  %v1394_v39 = vld [vmem:[%s9554_s30 + $0x422] sm:$0xff] }
 0x172   : > { %v1044_v44 = vpop.permute.xlu1 %1043  ;;  %v1042_v45 = vpop.permute.xlu0 %1041 }
 0x173   : > { %1307 = vst.msk [vmem:[#allocation2 + $0x3c8] sm:$0xff] %vm1185_vm1, %v1044_v44  ;;  %1306 = vst.msk [vmem:[#allocation2 + $0x3c0] sm:$0xff] %vm1185_vm1, %v1042_v45 }
 0x174   : > { %1672 = vrot.lane.b32.xlu1 %v1365_v42, %s9493_s9  ;;  %1670 = vrot.lane.b32.xlu0 %v1364_v43, %s9493_s9  ;;  %v1397_v42 = vld [vmem:[%s9554_s30 + $0x442] sm:$0xff]  ;;  %v1396_v43 = vld [vmem:[%s9554_s30 + $0x43a] sm:$0xff] }
 0x176   : > { %v1048_v48 = vpop.permute.xlu1 %1047  ;;  %v1046_v49 = vpop.permute.xlu0 %1045 }
 0x177   : > { %1309 = vst.msk [vmem:[#allocation2 + $0x3d8] sm:$0xff] %vm1185_vm1, %v1048_v48  ;;  %1308 = vst.msk [vmem:[#allocation2 + $0x3d0] sm:$0xff] %vm1185_vm1, %v1046_v49 }
 0x178   : > { %1676 = vrot.lane.b32.xlu1 %v1367_v46, %s9493_s9  ;;  %1674 = vrot.lane.b32.xlu0 %v1366_v47, %s9493_s9  ;;  %v1399_v46 = vld [vmem:[%s9554_s30 + $0x45a] sm:$0xff]  ;;  %v1398_v47 = vld [vmem:[%s9554_s30 + $0x452] sm:$0xff] }
 0x17a   : > { %v1052_v52 = vpop.permute.xlu1 %1051  ;;  %v1050_v53 = vpop.permute.xlu0 %1049 }
 0x17b   : > { %1311 = vst.msk [vmem:[#allocation2 + $0x3e8] sm:$0xff] %vm1185_vm1, %v1052_v52  ;;  %1310 = vst.msk [vmem:[#allocation2 + $0x3e0] sm:$0xff] %vm1185_vm1, %v1050_v53 }
 0x17c   : > { %1680 = vrot.lane.b32.xlu1 %v1369_v50, %s9493_s9  ;;  %1678 = vrot.lane.b32.xlu0 %v1368_v51, %s9493_s9  ;;  %v1401_v50 = vld [vmem:[%s9554_s30 + $0x472] sm:$0xff]  ;;  %v1400_v51 = vld [vmem:[%s9554_s30 + $0x46a] sm:$0xff] }
 0x17e   : > { %v1056_v56 = vpop.permute.xlu1 %1055  ;;  %v1054_v57 = vpop.permute.xlu0 %1053 }
 0x17f   : > { %1313 = vst.msk [vmem:[#allocation2 + $0x3f8] sm:$0xff] %vm1185_vm1, %v1056_v56  ;;  %1312 = vst.msk [vmem:[#allocation2 + $0x3f0] sm:$0xff] %vm1185_vm1, %v1054_v57 }
 0x180   : > { %1684 = vrot.lane.b32.xlu1 %v1371_v54, %s9493_s9  ;;  %1682 = vrot.lane.b32.xlu0 %v1370_v55, %s9493_s9  ;;  %v1403_v54 = vld [vmem:[%s9554_s30 + $0x48a] sm:$0xff]  ;;  %v1402_v55 = vld [vmem:[%s9554_s30 + $0x482] sm:$0xff] }
 0x182   : > { %v1573_v60 = vpop.permute.xlu1 %1572  ;;  %v1571_v61 = vpop.permute.xlu0 %1570 }
 0x183   : > { %1956 = vst.msk [vmem:[#allocation2 + $0x8] sm:$0xff] %vm1954_vm2, %v1573_v60  ;;  %1955 = vst.msk [vmem:[#allocation2] sm:$0xff] %vm1954_vm2, %v1571_v61 }
 0x184   : > { %1688 = vrot.lane.b32.xlu1 %v1373_v58, %s9493_s9  ;;  %1686 = vrot.lane.b32.xlu0 %v1372_v59, %s9493_s9  ;;  %v1405_v58 = vld [vmem:[%s9554_s30 + $0x4a2] sm:$0xff]  ;;  %v1404_v59 = vld [vmem:[%s9554_s30 + $0x49a] sm:$0xff] }
 0x186   : > { %v1577_v0 = vpop.permute.xlu1 %1576  ;;  %v1575_v1 = vpop.permute.xlu0 %1574 }
 0x187   : > { %1958 = vst.msk [vmem:[#allocation2 + $0x18] sm:$0xff] %vm1954_vm2, %v1577_v0  ;;  %1957 = vst.msk [vmem:[#allocation2 + $0x10] sm:$0xff] %vm1954_vm2, %v1575_v1 }
 0x188   : > { %1692 = vrot.lane.b32.xlu1 %v1375_v62, %s9493_s9  ;;  %1690 = vrot.lane.b32.xlu0 %v1374_v63, %s9493_s9  ;;  %v1407_v62 = vld [vmem:[%s9554_s30 + $0x4ba] sm:$0xff]  ;;  %v1406_v63 = vld [vmem:[%s9554_s30 + $0x4b2] sm:$0xff] }
 0x18a   : > { %v1581_v4 = vpop.permute.xlu1 %1580  ;;  %v1579_v5 = vpop.permute.xlu0 %1578 }
 0x18b   : > { %1960 = vst.msk [vmem:[#allocation2 + $0x28] sm:$0xff] %vm1954_vm2, %v1581_v4  ;;  %1959 = vst.msk [vmem:[#allocation2 + $0x20] sm:$0xff] %vm1954_vm2, %v1579_v5 }
 0x18c   : > { %1696 = vrot.lane.b32.xlu1 %v1377_v2, %s9493_s9  ;;  %1694 = vrot.lane.b32.xlu0 %v1376_v3, %s9493_s9  ;;  %v1409_v2 = vld [vmem:[%s9554_s30 + $0x4d2] sm:$0xff]  ;;  %v1408_v3 = vld [vmem:[%s9554_s30 + $0x4ca] sm:$0xff] }
 0x18e   : > { %v1585_v8 = vpop.permute.xlu1 %1584  ;;  %v1583_v9 = vpop.permute.xlu0 %1582 }
 0x18f   : > { %1962 = vst.msk [vmem:[#allocation2 + $0x38] sm:$0xff] %vm1954_vm2, %v1585_v8  ;;  %1961 = vst.msk [vmem:[#allocation2 + $0x30] sm:$0xff] %vm1954_vm2, %v1583_v9 }
 0x190   : > { %1700 = vrot.lane.b32.xlu1 %v1379_v6, %s9493_s9  ;;  %1698 = vrot.lane.b32.xlu0 %v1378_v7, %s9493_s9  ;;  %v1411_v6 = vld [vmem:[%s9554_s30 + $0x51a] sm:$0xff]  ;;  %v1410_v7 = vld [vmem:[%s9554_s30 + $0x512] sm:$0xff] }
 0x192   : > { %v1589_v12 = vpop.permute.xlu1 %1588  ;;  %v1587_v13 = vpop.permute.xlu0 %1586 }
 0x193   : > { %1964 = vst.msk [vmem:[#allocation2 + $0x48] sm:$0xff] %vm1954_vm2, %v1589_v12  ;;  %1963 = vst.msk [vmem:[#allocation2 + $0x40] sm:$0xff] %vm1954_vm2, %v1587_v13 }
 0x194   : > { %1704 = vrot.lane.b32.xlu1 %v1381_v10, %s9493_s9  ;;  %1702 = vrot.lane.b32.xlu0 %v1380_v11, %s9493_s9  ;;  %v1413_v10 = vld [vmem:[%s9554_s30 + $0x532] sm:$0xff]  ;;  %v1412_v11 = vld [vmem:[%s9554_s30 + $0x52a] sm:$0xff] }
 0x196   : > { %v1593_v16 = vpop.permute.xlu1 %1592  ;;  %v1591_v17 = vpop.permute.xlu0 %1590 }
 0x197   : > { %1966 = vst.msk [vmem:[#allocation2 + $0x58] sm:$0xff] %vm1954_vm2, %v1593_v16  ;;  %1965 = vst.msk [vmem:[#allocation2 + $0x50] sm:$0xff] %vm1954_vm2, %v1591_v17 }
 0x198   : > { %1708 = vrot.lane.b32.xlu1 %v1383_v14, %s9493_s9  ;;  %1706 = vrot.lane.b32.xlu0 %v1382_v15, %s9493_s9  ;;  %v1415_v14 = vld [vmem:[%s9554_s30 + $0x54a] sm:$0xff]  ;;  %v1414_v15 = vld [vmem:[%s9554_s30 + $0x542] sm:$0xff] }
 0x19a   : > { %v1597_v20 = vpop.permute.xlu1 %1596  ;;  %v1595_v21 = vpop.permute.xlu0 %1594 }
 0x19b   : > { %1968 = vst.msk [vmem:[#allocation2 + $0x68] sm:$0xff] %vm1954_vm2, %v1597_v20  ;;  %1967 = vst.msk [vmem:[#allocation2 + $0x60] sm:$0xff] %vm1954_vm2, %v1595_v21 }
 0x19c   : > { %1712 = vrot.lane.b32.xlu1 %v1385_v18, %s9493_s9  ;;  %1710 = vrot.lane.b32.xlu0 %v1384_v19, %s9493_s9  ;;  %v1417_v18 = vld [vmem:[%s9554_s30 + $0x562] sm:$0xff]  ;;  %v1416_v19 = vld [vmem:[%s9554_s30 + $0x55a] sm:$0xff] }
 0x19e   : > { %v1601_v24 = vpop.permute.xlu1 %1600  ;;  %v1599_v25 = vpop.permute.xlu0 %1598 }
 0x19f   : > { %1970 = vst.msk [vmem:[#allocation2 + $0x78] sm:$0xff] %vm1954_vm2, %v1601_v24  ;;  %1969 = vst.msk [vmem:[#allocation2 + $0x70] sm:$0xff] %vm1954_vm2, %v1599_v25 }
 0x1a0   : > { %1716 = vrot.lane.b32.xlu1 %v1387_v22, %s9493_s9  ;;  %1714 = vrot.lane.b32.xlu0 %v1386_v23, %s9493_s9  ;;  %v1419_v22 = vld [vmem:[%s9554_s30 + $0x57a] sm:$0xff]  ;;  %v1418_v23 = vld [vmem:[%s9554_s30 + $0x572] sm:$0xff] }
 0x1a2   : > { %v1605_v28 = vpop.permute.xlu1 %1604  ;;  %v1603_v29 = vpop.permute.xlu0 %1602 }
 0x1a3   : > { %1972 = vst.msk [vmem:[#allocation2 + $0x88] sm:$0xff] %vm1954_vm2, %v1605_v28  ;;  %1971 = vst.msk [vmem:[#allocation2 + $0x80] sm:$0xff] %vm1954_vm2, %v1603_v29 }
 0x1a4   : > { %1720 = vrot.lane.b32.xlu1 %v1389_v26, %s9493_s9  ;;  %1718 = vrot.lane.b32.xlu0 %v1388_v27, %s9493_s9  ;;  %v1421_v26 = vld [vmem:[%s9554_s30 + $0x592] sm:$0xff]  ;;  %v1420_v27 = vld [vmem:[%s9554_s30 + $0x58a] sm:$0xff] }
 0x1a6   : > { %v1609_v32 = vpop.permute.xlu1 %1608  ;;  %v1607_v33 = vpop.permute.xlu0 %1606 }
 0x1a7   : > { %1974 = vst.msk [vmem:[#allocation2 + $0x98] sm:$0xff] %vm1954_vm2, %v1609_v32  ;;  %1973 = vst.msk [vmem:[#allocation2 + $0x90] sm:$0xff] %vm1954_vm2, %v1607_v33 }
 0x1a8   : > { %1724 = vrot.lane.b32.xlu1 %v1391_v30, %s9493_s9  ;;  %1722 = vrot.lane.b32.xlu0 %v1390_v31, %s9493_s9  ;;  %v1423_v30 = vld [vmem:[%s9554_s30 + $0x5aa] sm:$0xff]  ;;  %v1422_v31 = vld [vmem:[%s9554_s30 + $0x5a2] sm:$0xff] }
 0x1aa   : > { %v1613_v36 = vpop.permute.xlu1 %1612  ;;  %v1611_v37 = vpop.permute.xlu0 %1610 }
 0x1ab   : > { %1976 = vst.msk [vmem:[#allocation2 + $0xa8] sm:$0xff] %vm1954_vm2, %v1613_v36  ;;  %1975 = vst.msk [vmem:[#allocation2 + $0xa0] sm:$0xff] %vm1954_vm2, %v1611_v37 }
 0x1ac   : > { %1728 = vrot.lane.b32.xlu1 %v1393_v34, %s9493_s9  ;;  %1726 = vrot.lane.b32.xlu0 %v1392_v35, %s9493_s9  ;;  %v1425_v34 = vld [vmem:[%s9554_s30 + $0x5c2] sm:$0xff]  ;;  %v1424_v35 = vld [vmem:[%s9554_s30 + $0x5ba] sm:$0xff] }
 0x1ae   : > { %v1617_v40 = vpop.permute.xlu1 %1616  ;;  %v1615_v41 = vpop.permute.xlu0 %1614 }
 0x1af   : > { %1978 = vst.msk [vmem:[#allocation2 + $0xb8] sm:$0xff] %vm1954_vm2, %v1617_v40  ;;  %1977 = vst.msk [vmem:[#allocation2 + $0xb0] sm:$0xff] %vm1954_vm2, %v1615_v41 }
 0x1b0   : > { %1732 = vrot.lane.b32.xlu1 %v1395_v38, %s9493_s9  ;;  %1730 = vrot.lane.b32.xlu0 %v1394_v39, %s9493_s9  ;;  %v1427_v38 = vld [vmem:[%s9554_s30 + $0x5da] sm:$0xff]  ;;  %v1426_v39 = vld [vmem:[%s9554_s30 + $0x5d2] sm:$0xff] }
 0x1b2   : > { %v1621_v44 = vpop.permute.xlu1 %1620  ;;  %v1619_v45 = vpop.permute.xlu0 %1618 }
 0x1b3   : > { %1980 = vst.msk [vmem:[#allocation2 + $0xc8] sm:$0xff] %vm1954_vm2, %v1621_v44  ;;  %1979 = vst.msk [vmem:[#allocation2 + $0xc0] sm:$0xff] %vm1954_vm2, %v1619_v45 }
 0x1b4   : > { %1736 = vrot.lane.b32.xlu1 %v1397_v42, %s9493_s9  ;;  %1734 = vrot.lane.b32.xlu0 %v1396_v43, %s9493_s9  ;;  %v1429_v42 = vld [vmem:[%s9554_s30 + $0x5f2] sm:$0xff]  ;;  %v1428_v43 = vld [vmem:[%s9554_s30 + $0x5ea] sm:$0xff] }
 0x1b6   : > { %v1625_v48 = vpop.permute.xlu1 %1624  ;;  %v1623_v49 = vpop.permute.xlu0 %1622 }
 0x1b7   : > { %1982 = vst.msk [vmem:[#allocation2 + $0xd8] sm:$0xff] %vm1954_vm2, %v1625_v48  ;;  %1981 = vst.msk [vmem:[#allocation2 + $0xd0] sm:$0xff] %vm1954_vm2, %v1623_v49 }
 0x1b8   : > { %1740 = vrot.lane.b32.xlu1 %v1399_v46, %s9493_s9  ;;  %1738 = vrot.lane.b32.xlu0 %v1398_v47, %s9493_s9  ;;  %v1431_v46 = vld [vmem:[%s9554_s30 + $0x60a] sm:$0xff]  ;;  %v1430_v47 = vld [vmem:[%s9554_s30 + $0x602] sm:$0xff] }
 0x1ba   : > { %v1629_v52 = vpop.permute.xlu1 %1628  ;;  %v1627_v53 = vpop.permute.xlu0 %1626 }
 0x1bb   : > { %1984 = vst.msk [vmem:[#allocation2 + $0xe8] sm:$0xff] %vm1954_vm2, %v1629_v52  ;;  %1983 = vst.msk [vmem:[#allocation2 + $0xe0] sm:$0xff] %vm1954_vm2, %v1627_v53 }
 0x1bc   : > { %1744 = vrot.lane.b32.xlu1 %v1401_v50, %s9493_s9  ;;  %1742 = vrot.lane.b32.xlu0 %v1400_v51, %s9493_s9  ;;  %v1433_v50 = vld [vmem:[%s9554_s30 + $0x622] sm:$0xff]  ;;  %v1432_v51 = vld [vmem:[%s9554_s30 + $0x61a] sm:$0xff] }
 0x1be   : > { %v1633_v56 = vpop.permute.xlu1 %1632  ;;  %v1631_v57 = vpop.permute.xlu0 %1630 }
 0x1bf   : > { %1986 = vst.msk [vmem:[#allocation2 + $0xf8] sm:$0xff] %vm1954_vm2, %v1633_v56  ;;  %1985 = vst.msk [vmem:[#allocation2 + $0xf0] sm:$0xff] %vm1954_vm2, %v1631_v57 }
 0x1c0   : > { %1748 = vrot.lane.b32.xlu1 %v1403_v54, %s9493_s9  ;;  %1746 = vrot.lane.b32.xlu0 %v1402_v55, %s9493_s9  ;;  %v1435_v54 = vld [vmem:[%s9554_s30 + $0x63a] sm:$0xff]  ;;  %v1434_v55 = vld [vmem:[%s9554_s30 + $0x632] sm:$0xff] }
 0x1c2   : > { %v1637_v60 = vpop.permute.xlu1 %1636  ;;  %v1635_v61 = vpop.permute.xlu0 %1634 }
 0x1c3   : > { %1988 = vst.msk [vmem:[#allocation2 + $0x108] sm:$0xff] %vm1954_vm2, %v1637_v60  ;;  %1987 = vst.msk [vmem:[#allocation2 + $0x100] sm:$0xff] %vm1954_vm2, %v1635_v61 }
 0x1c4   : > { %1752 = vrot.lane.b32.xlu1 %v1405_v58, %s9493_s9  ;;  %1750 = vrot.lane.b32.xlu0 %v1404_v59, %s9493_s9  ;;  %v1437_v58 = vld [vmem:[%s9554_s30 + $0x652] sm:$0xff]  ;;  %v1436_v59 = vld [vmem:[%s9554_s30 + $0x64a] sm:$0xff] }
 0x1c6   : > { %v1641_v0 = vpop.permute.xlu1 %1640  ;;  %v1639_v1 = vpop.permute.xlu0 %1638 }
 0x1c7   : > { %1990 = vst.msk [vmem:[#allocation2 + $0x118] sm:$0xff] %vm1954_vm2, %v1641_v0  ;;  %1989 = vst.msk [vmem:[#allocation2 + $0x110] sm:$0xff] %vm1954_vm2, %v1639_v1 }
 0x1c8   : > { %1756 = vrot.lane.b32.xlu1 %v1407_v62, %s9493_s9  ;;  %1754 = vrot.lane.b32.xlu0 %v1406_v63, %s9493_s9  ;;  %v1439_v62 = vld [vmem:[%s9554_s30 + $0x66a] sm:$0xff]  ;;  %v1438_v63 = vld [vmem:[%s9554_s30 + $0x662] sm:$0xff] }
 0x1ca   : > { %v1645_v4 = vpop.permute.xlu1 %1644  ;;  %v1643_v5 = vpop.permute.xlu0 %1642 }
 0x1cb   : > { %1992 = vst.msk [vmem:[#allocation2 + $0x128] sm:$0xff] %vm1954_vm2, %v1645_v4  ;;  %1991 = vst.msk [vmem:[#allocation2 + $0x120] sm:$0xff] %vm1954_vm2, %v1643_v5 }
 0x1cc   : > { %1760 = vrot.lane.b32.xlu1 %v1409_v2, %s9493_s9  ;;  %1758 = vrot.lane.b32.xlu0 %v1408_v3, %s9493_s9  ;;  %v1441_v2 = vld [vmem:[%s9554_s30 + $0x682] sm:$0xff]  ;;  %v1440_v3 = vld [vmem:[%s9554_s30 + $0x67a] sm:$0xff] }
 0x1ce   : > { %v1649_v8 = vpop.permute.xlu1 %1648  ;;  %v1647_v9 = vpop.permute.xlu0 %1646 }
 0x1cf   : > { %1994 = vst.msk [vmem:[#allocation2 + $0x138] sm:$0xff] %vm1954_vm2, %v1649_v8  ;;  %1993 = vst.msk [vmem:[#allocation2 + $0x130] sm:$0xff] %vm1954_vm2, %v1647_v9 }
 0x1d0   : > { %1764 = vrot.lane.b32.xlu1 %v1411_v6, %s9493_s9  ;;  %1762 = vrot.lane.b32.xlu0 %v1410_v7, %s9493_s9  ;;  %v8347_v6 = vld [vmem:[%s9554_s30 + $0x20] sm:$0xff]  ;;  %v8346_v7 = vld [vmem:[%s9554_s30 + $0x18] sm:$0xff] }
 0x1d2   : > { %v1653_v12 = vpop.permute.xlu1 %1652  ;;  %v1651_v13 = vpop.permute.xlu0 %1650 }
 0x1d3   : > { %1996 = vst.msk [vmem:[#allocation2 + $0x148] sm:$0xff] %vm1954_vm2, %v1653_v12  ;;  %1995 = vst.msk [vmem:[#allocation2 + $0x140] sm:$0xff] %vm1954_vm2, %v1651_v13 }
 0x1d4   : > { %1768 = vrot.lane.b32.xlu1 %v1413_v10, %s9493_s9  ;;  %1766 = vrot.lane.b32.xlu0 %v1412_v11, %s9493_s9  ;;  %v8349_v10 = vld [vmem:[%s9554_s30 + $0x38] sm:$0xff]  ;;  %v8348_v11 = vld [vmem:[%s9554_s30 + $0x30] sm:$0xff] }
 0x1d6   : > { %v1657_v16 = vpop.permute.xlu1 %1656  ;;  %v1655_v17 = vpop.permute.xlu0 %1654 }
 0x1d7   : > { %1998 = vst.msk [vmem:[#allocation2 + $0x158] sm:$0xff] %vm1954_vm2, %v1657_v16  ;;  %1997 = vst.msk [vmem:[#allocation2 + $0x150] sm:$0xff] %vm1954_vm2, %v1655_v17 }
 0x1d8   : > { %1772 = vrot.lane.b32.xlu1 %v1415_v14, %s9493_s9  ;;  %1770 = vrot.lane.b32.xlu0 %v1414_v15, %s9493_s9  ;;  %v8351_v14 = vld [vmem:[%s9554_s30 + $0x50] sm:$0xff]  ;;  %v8350_v15 = vld [vmem:[%s9554_s30 + $0x48] sm:$0xff] }
 0x1da   : > { %v1661_v20 = vpop.permute.xlu1 %1660  ;;  %v1659_v21 = vpop.permute.xlu0 %1658 }
 0x1db   : > { %2000 = vst.msk [vmem:[#allocation2 + $0x168] sm:$0xff] %vm1954_vm2, %v1661_v20  ;;  %1999 = vst.msk [vmem:[#allocation2 + $0x160] sm:$0xff] %vm1954_vm2, %v1659_v21 }
 0x1dc   : > { %1776 = vrot.lane.b32.xlu1 %v1417_v18, %s9493_s9  ;;  %1774 = vrot.lane.b32.xlu0 %v1416_v19, %s9493_s9  ;;  %v8353_v18 = vld [vmem:[%s9554_s30 + $0x68] sm:$0xff]  ;;  %v8352_v19 = vld [vmem:[%s9554_s30 + $0x60] sm:$0xff] }
 0x1de   : > { %v1665_v24 = vpop.permute.xlu1 %1664  ;;  %v1663_v25 = vpop.permute.xlu0 %1662 }
 0x1df   : > { %2002 = vst.msk [vmem:[#allocation2 + $0x178] sm:$0xff] %vm1954_vm2, %v1665_v24  ;;  %2001 = vst.msk [vmem:[#allocation2 + $0x170] sm:$0xff] %vm1954_vm2, %v1663_v25 }
 0x1e0   : > { %1780 = vrot.lane.b32.xlu1 %v1419_v22, %s9493_s9  ;;  %1778 = vrot.lane.b32.xlu0 %v1418_v23, %s9493_s9  ;;  %v8355_v22 = vld [vmem:[%s9554_s30 + $0x80] sm:$0xff]  ;;  %v8354_v23 = vld [vmem:[%s9554_s30 + $0x78] sm:$0xff] }
 0x1e2   : > { %v1669_v28 = vpop.permute.xlu1 %1668  ;;  %v1667_v29 = vpop.permute.xlu0 %1666 }
 0x1e3   : > { %2004 = vst.msk [vmem:[#allocation2 + $0x188] sm:$0xff] %vm1954_vm2, %v1669_v28  ;;  %2003 = vst.msk [vmem:[#allocation2 + $0x180] sm:$0xff] %vm1954_vm2, %v1667_v29 }
 0x1e4   : > { %1784 = vrot.lane.b32.xlu1 %v1421_v26, %s9493_s9  ;;  %1782 = vrot.lane.b32.xlu0 %v1420_v27, %s9493_s9  ;;  %v8357_v26 = vld [vmem:[%s9554_s30 + $0x98] sm:$0xff]  ;;  %v8356_v27 = vld [vmem:[%s9554_s30 + $0x90] sm:$0xff] }
 0x1e6   : > { %v1673_v32 = vpop.permute.xlu1 %1672  ;;  %v1671_v33 = vpop.permute.xlu0 %1670 }
 0x1e7   : > { %2006 = vst.msk [vmem:[#allocation2 + $0x198] sm:$0xff] %vm1954_vm2, %v1673_v32  ;;  %2005 = vst.msk [vmem:[#allocation2 + $0x190] sm:$0xff] %vm1954_vm2, %v1671_v33 }
 0x1e8   : > { %1788 = vrot.lane.b32.xlu1 %v1423_v30, %s9493_s9  ;;  %1786 = vrot.lane.b32.xlu0 %v1422_v31, %s9493_s9  ;;  %v8359_v30 = vld [vmem:[%s9554_s30 + $0xb0] sm:$0xff]  ;;  %v8358_v31 = vld [vmem:[%s9554_s30 + $0xa8] sm:$0xff] }
 0x1ea   : > { %v1677_v36 = vpop.permute.xlu1 %1676  ;;  %v1675_v37 = vpop.permute.xlu0 %1674 }
 0x1eb   : > { %2008 = vst.msk [vmem:[#allocation2 + $0x1a8] sm:$0xff] %vm1954_vm2, %v1677_v36  ;;  %2007 = vst.msk [vmem:[#allocation2 + $0x1a0] sm:$0xff] %vm1954_vm2, %v1675_v37 }
 0x1ec   : > { %1792 = vrot.lane.b32.xlu1 %v1425_v34, %s9493_s9  ;;  %1790 = vrot.lane.b32.xlu0 %v1424_v35, %s9493_s9  ;;  %v8361_v34 = vld [vmem:[%s9554_s30 + $0xc8] sm:$0xff]  ;;  %v8360_v35 = vld [vmem:[%s9554_s30 + $0xc0] sm:$0xff] }
 0x1ee   : > { %v1681_v40 = vpop.permute.xlu1 %1680  ;;  %v1679_v41 = vpop.permute.xlu0 %1678 }
 0x1ef   : > { %2010 = vst.msk [vmem:[#allocation2 + $0x1b8] sm:$0xff] %vm1954_vm2, %v1681_v40  ;;  %2009 = vst.msk [vmem:[#allocation2 + $0x1b0] sm:$0xff] %vm1954_vm2, %v1679_v41 }
 0x1f0   : > { %1796 = vrot.lane.b32.xlu1 %v1427_v38, %s9493_s9  ;;  %1794 = vrot.lane.b32.xlu0 %v1426_v39, %s9493_s9  ;;  %v8363_v38 = vld [vmem:[%s9554_s30 + $0xe0] sm:$0xff]  ;;  %v8362_v39 = vld [vmem:[%s9554_s30 + $0xd8] sm:$0xff] }
 0x1f2   : > { %v1685_v44 = vpop.permute.xlu1 %1684  ;;  %v1683_v45 = vpop.permute.xlu0 %1682 }
 0x1f3   : > { %2012 = vst.msk [vmem:[#allocation2 + $0x1c8] sm:$0xff] %vm1954_vm2, %v1685_v44  ;;  %2011 = vst.msk [vmem:[#allocation2 + $0x1c0] sm:$0xff] %vm1954_vm2, %v1683_v45 }
 0x1f4   : > { %1800 = vrot.lane.b32.xlu1 %v1429_v42, %s9493_s9  ;;  %1798 = vrot.lane.b32.xlu0 %v1428_v43, %s9493_s9  ;;  %v8365_v42 = vld [vmem:[%s9554_s30 + $0xf8] sm:$0xff]  ;;  %v8364_v43 = vld [vmem:[%s9554_s30 + $0xf0] sm:$0xff] }
 0x1f6   : > { %v1689_v48 = vpop.permute.xlu1 %1688  ;;  %v1687_v49 = vpop.permute.xlu0 %1686 }
 0x1f7   : > { %2014 = vst.msk [vmem:[#allocation2 + $0x1d8] sm:$0xff] %vm1954_vm2, %v1689_v48  ;;  %2013 = vst.msk [vmem:[#allocation2 + $0x1d0] sm:$0xff] %vm1954_vm2, %v1687_v49 }
 0x1f8   : > { %1804 = vrot.lane.b32.xlu1 %v1431_v46, %s9493_s9  ;;  %1802 = vrot.lane.b32.xlu0 %v1430_v47, %s9493_s9  ;;  %v8367_v46 = vld [vmem:[%s9554_s30 + $0x110] sm:$0xff]  ;;  %v8366_v47 = vld [vmem:[%s9554_s30 + $0x108] sm:$0xff] }
 0x1fa   : > { %v1693_v52 = vpop.permute.xlu1 %1692  ;;  %v1691_v53 = vpop.permute.xlu0 %1690 }
 0x1fb   : > { %2016 = vst.msk [vmem:[#allocation2 + $0x1e8] sm:$0xff] %vm1954_vm2, %v1693_v52  ;;  %2015 = vst.msk [vmem:[#allocation2 + $0x1e0] sm:$0xff] %vm1954_vm2, %v1691_v53 }
 0x1fc   : > { %1808 = vrot.lane.b32.xlu1 %v1433_v50, %s9493_s9  ;;  %1806 = vrot.lane.b32.xlu0 %v1432_v51, %s9493_s9  ;;  %v8369_v50 = vld [vmem:[%s9554_s30 + $0x128] sm:$0xff]  ;;  %v8368_v51 = vld [vmem:[%s9554_s30 + $0x120] sm:$0xff] }
 0x1fe   : > { %v1697_v56 = vpop.permute.xlu1 %1696  ;;  %v1695_v57 = vpop.permute.xlu0 %1694 }
 0x1ff   : > { %2018 = vst.msk [vmem:[#allocation2 + $0x1f8] sm:$0xff] %vm1954_vm2, %v1697_v56  ;;  %2017 = vst.msk [vmem:[#allocation2 + $0x1f0] sm:$0xff] %vm1954_vm2, %v1695_v57 }
 0x200   : > { %1812 = vrot.lane.b32.xlu1 %v1435_v54, %s9493_s9  ;;  %1810 = vrot.lane.b32.xlu0 %v1434_v55, %s9493_s9  ;;  %v8371_v54 = vld [vmem:[%s9554_s30 + $0x140] sm:$0xff]  ;;  %v8370_v55 = vld [vmem:[%s9554_s30 + $0x138] sm:$0xff] }
 0x202   : > { %v1701_v60 = vpop.permute.xlu1 %1700  ;;  %v1699_v61 = vpop.permute.xlu0 %1698 }
 0x203   : > { %2020 = vst.msk [vmem:[#allocation2 + $0x208] sm:$0xff] %vm1954_vm2, %v1701_v60  ;;  %2019 = vst.msk [vmem:[#allocation2 + $0x200] sm:$0xff] %vm1954_vm2, %v1699_v61 }
 0x204   : > { %1816 = vrot.lane.b32.xlu1 %v1437_v58, %s9493_s9  ;;  %1814 = vrot.lane.b32.xlu0 %v1436_v59, %s9493_s9  ;;  %v8373_v58 = vld [vmem:[%s9554_s30 + $0x158] sm:$0xff]  ;;  %v8372_v59 = vld [vmem:[%s9554_s30 + $0x150] sm:$0xff] }
 0x206   : > { %v1705_v0 = vpop.permute.xlu1 %1704  ;;  %v1703_v1 = vpop.permute.xlu0 %1702 }
 0x207   : > { %2022 = vst.msk [vmem:[#allocation2 + $0x218] sm:$0xff] %vm1954_vm2, %v1705_v0  ;;  %2021 = vst.msk [vmem:[#allocation2 + $0x210] sm:$0xff] %vm1954_vm2, %v1703_v1 }
 0x208   : > { %1820 = vrot.lane.b32.xlu1 %v1439_v62, %s9493_s9  ;;  %1818 = vrot.lane.b32.xlu0 %v1438_v63, %s9493_s9  ;;  %v8375_v62 = vld [vmem:[%s9554_s30 + $0x170] sm:$0xff]  ;;  %v8374_v63 = vld [vmem:[%s9554_s30 + $0x168] sm:$0xff] }
 0x20a   : > { %v1709_v4 = vpop.permute.xlu1 %1708  ;;  %v1707_v5 = vpop.permute.xlu0 %1706 }
 0x20b   : > { %2024 = vst.msk [vmem:[#allocation2 + $0x228] sm:$0xff] %vm1954_vm2, %v1709_v4  ;;  %2023 = vst.msk [vmem:[#allocation2 + $0x220] sm:$0xff] %vm1954_vm2, %v1707_v5 }
 0x20c   : > { %1824 = vrot.lane.b32.xlu1 %v1441_v2, %s9493_s9  ;;  %1822 = vrot.lane.b32.xlu0 %v1440_v3, %s9493_s9  ;;  %v8377_v2 = vld [vmem:[%s9554_s30 + $0x188] sm:$0xff]  ;;  %v8376_v3 = vld [vmem:[%s9554_s30 + $0x180] sm:$0xff] }
 0x20e   : > { %v1713_v8 = vpop.permute.xlu1 %1712  ;;  %v1711_v9 = vpop.permute.xlu0 %1710 }
 0x20f   : > { %2026 = vst.msk [vmem:[#allocation2 + $0x238] sm:$0xff] %vm1954_vm2, %v1713_v8  ;;  %2025 = vst.msk [vmem:[#allocation2 + $0x230] sm:$0xff] %vm1954_vm2, %v1711_v9 }
 0x210   : > { %2342 = vrot.lane.b32.xlu1 %v8347_v6, %s9494_s10  ;;  %2340 = vrot.lane.b32.xlu0 %v8346_v7, %s9494_s10  ;;  %v8379_v6 = vld [vmem:[%s9554_s30 + $0x1d0] sm:$0xff]  ;;  %v8378_v7 = vld [vmem:[%s9554_s30 + $0x1c8] sm:$0xff] }
 0x212   : > { %v1717_v12 = vpop.permute.xlu1 %1716  ;;  %v1715_v13 = vpop.permute.xlu0 %1714 }
 0x213   : > { %2028 = vst.msk [vmem:[#allocation2 + $0x248] sm:$0xff] %vm1954_vm2, %v1717_v12  ;;  %2027 = vst.msk [vmem:[#allocation2 + $0x240] sm:$0xff] %vm1954_vm2, %v1715_v13 }
 0x214   : > { %2346 = vrot.lane.b32.xlu1 %v8349_v10, %s9494_s10  ;;  %2344 = vrot.lane.b32.xlu0 %v8348_v11, %s9494_s10  ;;  %v8381_v10 = vld [vmem:[%s9554_s30 + $0x1e8] sm:$0xff]  ;;  %v8380_v11 = vld [vmem:[%s9554_s30 + $0x1e0] sm:$0xff] }
 0x216   : > { %v1721_v16 = vpop.permute.xlu1 %1720  ;;  %v1719_v17 = vpop.permute.xlu0 %1718 }
 0x217   : > { %2030 = vst.msk [vmem:[#allocation2 + $0x258] sm:$0xff] %vm1954_vm2, %v1721_v16  ;;  %2029 = vst.msk [vmem:[#allocation2 + $0x250] sm:$0xff] %vm1954_vm2, %v1719_v17 }
 0x218   : > { %2350 = vrot.lane.b32.xlu1 %v8351_v14, %s9494_s10  ;;  %2348 = vrot.lane.b32.xlu0 %v8350_v15, %s9494_s10  ;;  %v8383_v14 = vld [vmem:[%s9554_s30 + $0x200] sm:$0xff]  ;;  %v8382_v15 = vld [vmem:[%s9554_s30 + $0x1f8] sm:$0xff] }
 0x21a   : > { %v1725_v20 = vpop.permute.xlu1 %1724  ;;  %v1723_v21 = vpop.permute.xlu0 %1722 }
 0x21b   : > { %2032 = vst.msk [vmem:[#allocation2 + $0x268] sm:$0xff] %vm1954_vm2, %v1725_v20  ;;  %2031 = vst.msk [vmem:[#allocation2 + $0x260] sm:$0xff] %vm1954_vm2, %v1723_v21 }
 0x21c   : > { %2354 = vrot.lane.b32.xlu1 %v8353_v18, %s9494_s10  ;;  %2352 = vrot.lane.b32.xlu0 %v8352_v19, %s9494_s10  ;;  %v8385_v18 = vld [vmem:[%s9554_s30 + $0x218] sm:$0xff]  ;;  %v8384_v19 = vld [vmem:[%s9554_s30 + $0x210] sm:$0xff] }
 0x21e   : > { %v1729_v24 = vpop.permute.xlu1 %1728  ;;  %v1727_v25 = vpop.permute.xlu0 %1726 }
 0x21f   : > { %2034 = vst.msk [vmem:[#allocation2 + $0x278] sm:$0xff] %vm1954_vm2, %v1729_v24  ;;  %2033 = vst.msk [vmem:[#allocation2 + $0x270] sm:$0xff] %vm1954_vm2, %v1727_v25 }
 0x220   : > { %2358 = vrot.lane.b32.xlu1 %v8355_v22, %s9494_s10  ;;  %2356 = vrot.lane.b32.xlu0 %v8354_v23, %s9494_s10  ;;  %v8387_v22 = vld [vmem:[%s9554_s30 + $0x230] sm:$0xff]  ;;  %v8386_v23 = vld [vmem:[%s9554_s30 + $0x228] sm:$0xff] }
 0x222   : > { %v1733_v28 = vpop.permute.xlu1 %1732  ;;  %v1731_v29 = vpop.permute.xlu0 %1730 }
 0x223   : > { %2036 = vst.msk [vmem:[#allocation2 + $0x288] sm:$0xff] %vm1954_vm2, %v1733_v28  ;;  %2035 = vst.msk [vmem:[#allocation2 + $0x280] sm:$0xff] %vm1954_vm2, %v1731_v29 }
 0x224   : > { %2362 = vrot.lane.b32.xlu1 %v8357_v26, %s9494_s10  ;;  %2360 = vrot.lane.b32.xlu0 %v8356_v27, %s9494_s10  ;;  %v8389_v26 = vld [vmem:[%s9554_s30 + $0x248] sm:$0xff]  ;;  %v8388_v27 = vld [vmem:[%s9554_s30 + $0x240] sm:$0xff] }
 0x226   : > { %v1737_v32 = vpop.permute.xlu1 %1736  ;;  %v1735_v33 = vpop.permute.xlu0 %1734 }
 0x227   : > { %2038 = vst.msk [vmem:[#allocation2 + $0x298] sm:$0xff] %vm1954_vm2, %v1737_v32  ;;  %2037 = vst.msk [vmem:[#allocation2 + $0x290] sm:$0xff] %vm1954_vm2, %v1735_v33 }
 0x228   : > { %2366 = vrot.lane.b32.xlu1 %v8359_v30, %s9494_s10  ;;  %2364 = vrot.lane.b32.xlu0 %v8358_v31, %s9494_s10  ;;  %v8391_v30 = vld [vmem:[%s9554_s30 + $0x260] sm:$0xff]  ;;  %v8390_v31 = vld [vmem:[%s9554_s30 + $0x258] sm:$0xff] }
 0x22a   : > { %v1741_v36 = vpop.permute.xlu1 %1740  ;;  %v1739_v37 = vpop.permute.xlu0 %1738 }
 0x22b   : > { %2040 = vst.msk [vmem:[#allocation2 + $0x2a8] sm:$0xff] %vm1954_vm2, %v1741_v36  ;;  %2039 = vst.msk [vmem:[#allocation2 + $0x2a0] sm:$0xff] %vm1954_vm2, %v1739_v37 }
 0x22c   : > { %2370 = vrot.lane.b32.xlu1 %v8361_v34, %s9494_s10  ;;  %2368 = vrot.lane.b32.xlu0 %v8360_v35, %s9494_s10  ;;  %v8393_v34 = vld [vmem:[%s9554_s30 + $0x278] sm:$0xff]  ;;  %v8392_v35 = vld [vmem:[%s9554_s30 + $0x270] sm:$0xff] }
 0x22e   : > { %v1745_v40 = vpop.permute.xlu1 %1744  ;;  %v1743_v41 = vpop.permute.xlu0 %1742 }
 0x22f   : > { %2042 = vst.msk [vmem:[#allocation2 + $0x2b8] sm:$0xff] %vm1954_vm2, %v1745_v40  ;;  %2041 = vst.msk [vmem:[#allocation2 + $0x2b0] sm:$0xff] %vm1954_vm2, %v1743_v41 }
 0x230   : > { %2374 = vrot.lane.b32.xlu1 %v8363_v38, %s9494_s10  ;;  %2372 = vrot.lane.b32.xlu0 %v8362_v39, %s9494_s10  ;;  %v8395_v38 = vld [vmem:[%s9554_s30 + $0x290] sm:$0xff]  ;;  %v8394_v39 = vld [vmem:[%s9554_s30 + $0x288] sm:$0xff] }
 0x232   : > { %v1749_v44 = vpop.permute.xlu1 %1748  ;;  %v1747_v45 = vpop.permute.xlu0 %1746 }
 0x233   : > { %2044 = vst.msk [vmem:[#allocation2 + $0x2c8] sm:$0xff] %vm1954_vm2, %v1749_v44  ;;  %2043 = vst.msk [vmem:[#allocation2 + $0x2c0] sm:$0xff] %vm1954_vm2, %v1747_v45 }
 0x234   : > { %2378 = vrot.lane.b32.xlu1 %v8365_v42, %s9494_s10  ;;  %2376 = vrot.lane.b32.xlu0 %v8364_v43, %s9494_s10  ;;  %v8397_v42 = vld [vmem:[%s9554_s30 + $0x2a8] sm:$0xff]  ;;  %v8396_v43 = vld [vmem:[%s9554_s30 + $0x2a0] sm:$0xff] }
 0x236   : > { %v1753_v48 = vpop.permute.xlu1 %1752  ;;  %v1751_v49 = vpop.permute.xlu0 %1750 }
 0x237   : > { %2046 = vst.msk [vmem:[#allocation2 + $0x2d8] sm:$0xff] %vm1954_vm2, %v1753_v48  ;;  %2045 = vst.msk [vmem:[#allocation2 + $0x2d0] sm:$0xff] %vm1954_vm2, %v1751_v49 }
 0x238   : > { %2382 = vrot.lane.b32.xlu1 %v8367_v46, %s9494_s10  ;;  %2380 = vrot.lane.b32.xlu0 %v8366_v47, %s9494_s10  ;;  %v8399_v46 = vld [vmem:[%s9554_s30 + $0x2c0] sm:$0xff]  ;;  %v8398_v47 = vld [vmem:[%s9554_s30 + $0x2b8] sm:$0xff] }
 0x23a   : > { %v1757_v52 = vpop.permute.xlu1 %1756  ;;  %v1755_v53 = vpop.permute.xlu0 %1754 }
 0x23b   : > { %2048 = vst.msk [vmem:[#allocation2 + $0x2e8] sm:$0xff] %vm1954_vm2, %v1757_v52  ;;  %2047 = vst.msk [vmem:[#allocation2 + $0x2e0] sm:$0xff] %vm1954_vm2, %v1755_v53 }
 0x23c   : > { %2386 = vrot.lane.b32.xlu1 %v8369_v50, %s9494_s10  ;;  %2384 = vrot.lane.b32.xlu0 %v8368_v51, %s9494_s10  ;;  %v8401_v50 = vld [vmem:[%s9554_s30 + $0x2d8] sm:$0xff]  ;;  %v8400_v51 = vld [vmem:[%s9554_s30 + $0x2d0] sm:$0xff] }
 0x23e   : > { %v1761_v56 = vpop.permute.xlu1 %1760  ;;  %v1759_v57 = vpop.permute.xlu0 %1758 }
 0x23f   : > { %2050 = vst.msk [vmem:[#allocation2 + $0x2f8] sm:$0xff] %vm1954_vm2, %v1761_v56  ;;  %2049 = vst.msk [vmem:[#allocation2 + $0x2f0] sm:$0xff] %vm1954_vm2, %v1759_v57 }
 0x240   : > { %2390 = vrot.lane.b32.xlu1 %v8371_v54, %s9494_s10  ;;  %2388 = vrot.lane.b32.xlu0 %v8370_v55, %s9494_s10  ;;  %v8403_v54 = vld [vmem:[%s9554_s30 + $0x2f0] sm:$0xff]  ;;  %v8402_v55 = vld [vmem:[%s9554_s30 + $0x2e8] sm:$0xff] }
 0x242   : > { %v1765_v60 = vpop.permute.xlu1 %1764  ;;  %v1763_v61 = vpop.permute.xlu0 %1762 }
 0x243   : > { %2052 = vst.msk [vmem:[#allocation2 + $0x308] sm:$0xff] %vm1954_vm2, %v1765_v60  ;;  %2051 = vst.msk [vmem:[#allocation2 + $0x300] sm:$0xff] %vm1954_vm2, %v1763_v61 }
 0x244   : > { %2394 = vrot.lane.b32.xlu1 %v8373_v58, %s9494_s10  ;;  %2392 = vrot.lane.b32.xlu0 %v8372_v59, %s9494_s10  ;;  %v8405_v58 = vld [vmem:[%s9554_s30 + $0x308] sm:$0xff]  ;;  %v8404_v59 = vld [vmem:[%s9554_s30 + $0x300] sm:$0xff] }
 0x246   : > { %v1769_v0 = vpop.permute.xlu1 %1768  ;;  %v1767_v1 = vpop.permute.xlu0 %1766 }
 0x247   : > { %2054 = vst.msk [vmem:[#allocation2 + $0x318] sm:$0xff] %vm1954_vm2, %v1769_v0  ;;  %2053 = vst.msk [vmem:[#allocation2 + $0x310] sm:$0xff] %vm1954_vm2, %v1767_v1 }
 0x248   : > { %2398 = vrot.lane.b32.xlu1 %v8375_v62, %s9494_s10  ;;  %2396 = vrot.lane.b32.xlu0 %v8374_v63, %s9494_s10  ;;  %v8407_v62 = vld [vmem:[%s9554_s30 + $0x320] sm:$0xff]  ;;  %v8406_v63 = vld [vmem:[%s9554_s30 + $0x318] sm:$0xff] }
 0x24a   : > { %v1773_v4 = vpop.permute.xlu1 %1772  ;;  %v1771_v5 = vpop.permute.xlu0 %1770 }
 0x24b   : > { %2056 = vst.msk [vmem:[#allocation2 + $0x328] sm:$0xff] %vm1954_vm2, %v1773_v4  ;;  %2055 = vst.msk [vmem:[#allocation2 + $0x320] sm:$0xff] %vm1954_vm2, %v1771_v5 }
 0x24c   : > { %2402 = vrot.lane.b32.xlu1 %v8377_v2, %s9494_s10  ;;  %2400 = vrot.lane.b32.xlu0 %v8376_v3, %s9494_s10  ;;  %v8409_v2 = vld [vmem:[%s9554_s30 + $0x338] sm:$0xff]  ;;  %v8408_v3 = vld [vmem:[%s9554_s30 + $0x330] sm:$0xff] }
 0x24e   : > { %v1777_v8 = vpop.permute.xlu1 %1776  ;;  %v1775_v9 = vpop.permute.xlu0 %1774 }
 0x24f   : > { %2058 = vst.msk [vmem:[#allocation2 + $0x338] sm:$0xff] %vm1954_vm2, %v1777_v8  ;;  %2057 = vst.msk [vmem:[#allocation2 + $0x330] sm:$0xff] %vm1954_vm2, %v1775_v9 }
 0x250   : > { %2406 = vrot.lane.b32.xlu1 %v8379_v6, %s9494_s10  ;;  %2404 = vrot.lane.b32.xlu0 %v8378_v7, %s9494_s10  ;;  %v8411_v6 = vld [vmem:[%s9554_s30 + $0x380] sm:$0xff]  ;;  %v8410_v7 = vld [vmem:[%s9554_s30 + $0x378] sm:$0xff] }
 0x252   : > { %v1781_v12 = vpop.permute.xlu1 %1780  ;;  %v1779_v13 = vpop.permute.xlu0 %1778 }
 0x253   : > { %2060 = vst.msk [vmem:[#allocation2 + $0x348] sm:$0xff] %vm1954_vm2, %v1781_v12  ;;  %2059 = vst.msk [vmem:[#allocation2 + $0x340] sm:$0xff] %vm1954_vm2, %v1779_v13 }
 0x254   : > { %2410 = vrot.lane.b32.xlu1 %v8381_v10, %s9494_s10  ;;  %2408 = vrot.lane.b32.xlu0 %v8380_v11, %s9494_s10  ;;  %v8413_v10 = vld [vmem:[%s9554_s30 + $0x398] sm:$0xff]  ;;  %v8412_v11 = vld [vmem:[%s9554_s30 + $0x390] sm:$0xff] }
 0x256   : > { %v1785_v16 = vpop.permute.xlu1 %1784  ;;  %v1783_v17 = vpop.permute.xlu0 %1782 }
 0x257   : > { %2062 = vst.msk [vmem:[#allocation2 + $0x358] sm:$0xff] %vm1954_vm2, %v1785_v16  ;;  %2061 = vst.msk [vmem:[#allocation2 + $0x350] sm:$0xff] %vm1954_vm2, %v1783_v17 }
 0x258   : > { %2414 = vrot.lane.b32.xlu1 %v8383_v14, %s9494_s10  ;;  %2412 = vrot.lane.b32.xlu0 %v8382_v15, %s9494_s10  ;;  %v8415_v14 = vld [vmem:[%s9554_s30 + $0x3b0] sm:$0xff]  ;;  %v8414_v15 = vld [vmem:[%s9554_s30 + $0x3a8] sm:$0xff] }
 0x25a   : > { %v1789_v20 = vpop.permute.xlu1 %1788  ;;  %v1787_v21 = vpop.permute.xlu0 %1786 }
 0x25b   : > { %2064 = vst.msk [vmem:[#allocation2 + $0x368] sm:$0xff] %vm1954_vm2, %v1789_v20  ;;  %2063 = vst.msk [vmem:[#allocation2 + $0x360] sm:$0xff] %vm1954_vm2, %v1787_v21 }
 0x25c   : > { %2418 = vrot.lane.b32.xlu1 %v8385_v18, %s9494_s10  ;;  %2416 = vrot.lane.b32.xlu0 %v8384_v19, %s9494_s10  ;;  %v8417_v18 = vld [vmem:[%s9554_s30 + $0x3c8] sm:$0xff]  ;;  %v8416_v19 = vld [vmem:[%s9554_s30 + $0x3c0] sm:$0xff] }
 0x25e   : > { %v1793_v24 = vpop.permute.xlu1 %1792  ;;  %v1791_v25 = vpop.permute.xlu0 %1790 }
 0x25f   : > { %2066 = vst.msk [vmem:[#allocation2 + $0x378] sm:$0xff] %vm1954_vm2, %v1793_v24  ;;  %2065 = vst.msk [vmem:[#allocation2 + $0x370] sm:$0xff] %vm1954_vm2, %v1791_v25 }
 0x260   : > { %2422 = vrot.lane.b32.xlu1 %v8387_v22, %s9494_s10  ;;  %2420 = vrot.lane.b32.xlu0 %v8386_v23, %s9494_s10  ;;  %v8419_v22 = vld [vmem:[%s9554_s30 + $0x3e0] sm:$0xff]  ;;  %v8418_v23 = vld [vmem:[%s9554_s30 + $0x3d8] sm:$0xff] }
 0x262   : > { %v1797_v28 = vpop.permute.xlu1 %1796  ;;  %v1795_v29 = vpop.permute.xlu0 %1794 }
 0x263   : > { %2068 = vst.msk [vmem:[#allocation2 + $0x388] sm:$0xff] %vm1954_vm2, %v1797_v28  ;;  %2067 = vst.msk [vmem:[#allocation2 + $0x380] sm:$0xff] %vm1954_vm2, %v1795_v29 }
 0x264   : > { %2426 = vrot.lane.b32.xlu1 %v8389_v26, %s9494_s10  ;;  %2424 = vrot.lane.b32.xlu0 %v8388_v27, %s9494_s10  ;;  %v8421_v26 = vld [vmem:[%s9554_s30 + $0x3f8] sm:$0xff]  ;;  %v8420_v27 = vld [vmem:[%s9554_s30 + $0x3f0] sm:$0xff] }
 0x266   : > { %v1801_v32 = vpop.permute.xlu1 %1800  ;;  %v1799_v33 = vpop.permute.xlu0 %1798 }
 0x267   : > { %2070 = vst.msk [vmem:[#allocation2 + $0x398] sm:$0xff] %vm1954_vm2, %v1801_v32  ;;  %2069 = vst.msk [vmem:[#allocation2 + $0x390] sm:$0xff] %vm1954_vm2, %v1799_v33 }
 0x268   : > { %2430 = vrot.lane.b32.xlu1 %v8391_v30, %s9494_s10  ;;  %2428 = vrot.lane.b32.xlu0 %v8390_v31, %s9494_s10  ;;  %v8423_v30 = vld [vmem:[%s9554_s30 + $0x410] sm:$0xff]  ;;  %v8422_v31 = vld [vmem:[%s9554_s30 + $0x408] sm:$0xff] }
 0x26a   : > { %v1805_v36 = vpop.permute.xlu1 %1804  ;;  %v1803_v37 = vpop.permute.xlu0 %1802 }
 0x26b   : > { %2072 = vst.msk [vmem:[#allocation2 + $0x3a8] sm:$0xff] %vm1954_vm2, %v1805_v36  ;;  %2071 = vst.msk [vmem:[#allocation2 + $0x3a0] sm:$0xff] %vm1954_vm2, %v1803_v37 }
 0x26c   : > { %2434 = vrot.lane.b32.xlu1 %v8393_v34, %s9494_s10  ;;  %2432 = vrot.lane.b32.xlu0 %v8392_v35, %s9494_s10  ;;  %v8425_v34 = vld [vmem:[%s9554_s30 + $0x428] sm:$0xff]  ;;  %v8424_v35 = vld [vmem:[%s9554_s30 + $0x420] sm:$0xff] }
 0x26e   : > { %v1809_v40 = vpop.permute.xlu1 %1808  ;;  %v1807_v41 = vpop.permute.xlu0 %1806 }
 0x26f   : > { %2074 = vst.msk [vmem:[#allocation2 + $0x3b8] sm:$0xff] %vm1954_vm2, %v1809_v40  ;;  %2073 = vst.msk [vmem:[#allocation2 + $0x3b0] sm:$0xff] %vm1954_vm2, %v1807_v41 }
 0x270   : > { %2438 = vrot.lane.b32.xlu1 %v8395_v38, %s9494_s10  ;;  %2436 = vrot.lane.b32.xlu0 %v8394_v39, %s9494_s10  ;;  %v8427_v38 = vld [vmem:[%s9554_s30 + $0x440] sm:$0xff]  ;;  %v8426_v39 = vld [vmem:[%s9554_s30 + $0x438] sm:$0xff] }
 0x272   : > { %v1813_v44 = vpop.permute.xlu1 %1812  ;;  %v1811_v45 = vpop.permute.xlu0 %1810 }
 0x273   : > { %2076 = vst.msk [vmem:[#allocation2 + $0x3c8] sm:$0xff] %vm1954_vm2, %v1813_v44  ;;  %2075 = vst.msk [vmem:[#allocation2 + $0x3c0] sm:$0xff] %vm1954_vm2, %v1811_v45 }
 0x274   : > { %2442 = vrot.lane.b32.xlu1 %v8397_v42, %s9494_s10  ;;  %2440 = vrot.lane.b32.xlu0 %v8396_v43, %s9494_s10  ;;  %v8429_v42 = vld [vmem:[%s9554_s30 + $0x458] sm:$0xff]  ;;  %v8428_v43 = vld [vmem:[%s9554_s30 + $0x450] sm:$0xff] }
 0x276   : > { %v1817_v48 = vpop.permute.xlu1 %1816  ;;  %v1815_v49 = vpop.permute.xlu0 %1814 }
 0x277   : > { %2078 = vst.msk [vmem:[#allocation2 + $0x3d8] sm:$0xff] %vm1954_vm2, %v1817_v48  ;;  %2077 = vst.msk [vmem:[#allocation2 + $0x3d0] sm:$0xff] %vm1954_vm2, %v1815_v49 }
 0x278   : > { %2446 = vrot.lane.b32.xlu1 %v8399_v46, %s9494_s10  ;;  %2444 = vrot.lane.b32.xlu0 %v8398_v47, %s9494_s10  ;;  %v8431_v46 = vld [vmem:[%s9554_s30 + $0x470] sm:$0xff]  ;;  %v8430_v47 = vld [vmem:[%s9554_s30 + $0x468] sm:$0xff] }
 0x27a   : > { %v1821_v52 = vpop.permute.xlu1 %1820  ;;  %v1819_v53 = vpop.permute.xlu0 %1818 }
 0x27b   : > { %2080 = vst.msk [vmem:[#allocation2 + $0x3e8] sm:$0xff] %vm1954_vm2, %v1821_v52  ;;  %2079 = vst.msk [vmem:[#allocation2 + $0x3e0] sm:$0xff] %vm1954_vm2, %v1819_v53 }
 0x27c   : > { %2450 = vrot.lane.b32.xlu1 %v8401_v50, %s9494_s10  ;;  %2448 = vrot.lane.b32.xlu0 %v8400_v51, %s9494_s10  ;;  %v8433_v50 = vld [vmem:[%s9554_s30 + $0x488] sm:$0xff]  ;;  %v8432_v51 = vld [vmem:[%s9554_s30 + $0x480] sm:$0xff] }
 0x27e   : > { %v1825_v56 = vpop.permute.xlu1 %1824  ;;  %v1823_v57 = vpop.permute.xlu0 %1822 }
 0x27f   : > { %2082 = vst.msk [vmem:[#allocation2 + $0x3f8] sm:$0xff] %vm1954_vm2, %v1825_v56  ;;  %2081 = vst.msk [vmem:[#allocation2 + $0x3f0] sm:$0xff] %vm1954_vm2, %v1823_v57 }
 0x280   : > { %2454 = vrot.lane.b32.xlu1 %v8403_v54, %s9494_s10  ;;  %2452 = vrot.lane.b32.xlu0 %v8402_v55, %s9494_s10  ;;  %v8435_v54 = vld [vmem:[%s9554_s30 + $0x4a0] sm:$0xff]  ;;  %v8434_v55 = vld [vmem:[%s9554_s30 + $0x498] sm:$0xff] }
 0x282   : > { %v2343_v60 = vpop.permute.xlu1 %2342  ;;  %v2341_v61 = vpop.permute.xlu0 %2340 }
 0x283   : > { %2726 = vst.msk [vmem:[#allocation2 + $0x8] sm:$0xff] %vm2724_vm3, %v2343_v60  ;;  %2725 = vst.msk [vmem:[#allocation2] sm:$0xff] %vm2724_vm3, %v2341_v61 }
 0x284   : > { %2458 = vrot.lane.b32.xlu1 %v8405_v58, %s9494_s10  ;;  %2456 = vrot.lane.b32.xlu0 %v8404_v59, %s9494_s10  ;;  %v8437_v58 = vld [vmem:[%s9554_s30 + $0x4b8] sm:$0xff]  ;;  %v8436_v59 = vld [vmem:[%s9554_s30 + $0x4b0] sm:$0xff] }
 0x286   : > { %v2347_v0 = vpop.permute.xlu1 %2346  ;;  %v2345_v1 = vpop.permute.xlu0 %2344 }
 0x287   : > { %2728 = vst.msk [vmem:[#allocation2 + $0x18] sm:$0xff] %vm2724_vm3, %v2347_v0  ;;  %2727 = vst.msk [vmem:[#allocation2 + $0x10] sm:$0xff] %vm2724_vm3, %v2345_v1 }
 0x288   : > { %2462 = vrot.lane.b32.xlu1 %v8407_v62, %s9494_s10  ;;  %2460 = vrot.lane.b32.xlu0 %v8406_v63, %s9494_s10  ;;  %v8439_v62 = vld [vmem:[%s9554_s30 + $0x4d0] sm:$0xff]  ;;  %v8438_v63 = vld [vmem:[%s9554_s30 + $0x4c8] sm:$0xff] }
 0x28a   : > { %v2351_v4 = vpop.permute.xlu1 %2350  ;;  %v2349_v5 = vpop.permute.xlu0 %2348 }
 0x28b   : > { %2730 = vst.msk [vmem:[#allocation2 + $0x28] sm:$0xff] %vm2724_vm3, %v2351_v4  ;;  %2729 = vst.msk [vmem:[#allocation2 + $0x20] sm:$0xff] %vm2724_vm3, %v2349_v5 }
 0x28c   : > { %2466 = vrot.lane.b32.xlu1 %v8409_v2, %s9494_s10  ;;  %2464 = vrot.lane.b32.xlu0 %v8408_v3, %s9494_s10  ;;  %v8441_v2 = vld [vmem:[%s9554_s30 + $0x4e8] sm:$0xff]  ;;  %v8440_v3 = vld [vmem:[%s9554_s30 + $0x4e0] sm:$0xff] }
 0x28e   : > { %v2355_v8 = vpop.permute.xlu1 %2354  ;;  %v2353_v9 = vpop.permute.xlu0 %2352 }
 0x28f   : > { %2732 = vst.msk [vmem:[#allocation2 + $0x38] sm:$0xff] %vm2724_vm3, %v2355_v8  ;;  %2731 = vst.msk [vmem:[#allocation2 + $0x30] sm:$0xff] %vm2724_vm3, %v2353_v9 }
 0x290   : > { %2470 = vrot.lane.b32.xlu1 %v8411_v6, %s9494_s10  ;;  %2468 = vrot.lane.b32.xlu0 %v8410_v7, %s9494_s10  ;;  %v8443_v6 = vld [vmem:[%s9554_s30 + $0x530] sm:$0xff]  ;;  %v8442_v7 = vld [vmem:[%s9554_s30 + $0x528] sm:$0xff] }
 0x292   : > { %v2359_v12 = vpop.permute.xlu1 %2358  ;;  %v2357_v13 = vpop.permute.xlu0 %2356 }
 0x293   : > { %2734 = vst.msk [vmem:[#allocation2 + $0x48] sm:$0xff] %vm2724_vm3, %v2359_v12  ;;  %2733 = vst.msk [vmem:[#allocation2 + $0x40] sm:$0xff] %vm2724_vm3, %v2357_v13 }
 0x294   : > { %2474 = vrot.lane.b32.xlu1 %v8413_v10, %s9494_s10  ;;  %2472 = vrot.lane.b32.xlu0 %v8412_v11, %s9494_s10  ;;  %v8445_v10 = vld [vmem:[%s9554_s30 + $0x548] sm:$0xff]  ;;  %v8444_v11 = vld [vmem:[%s9554_s30 + $0x540] sm:$0xff] }
 0x296   : > { %v2363_v16 = vpop.permute.xlu1 %2362  ;;  %v2361_v17 = vpop.permute.xlu0 %2360 }
 0x297   : > { %2736 = vst.msk [vmem:[#allocation2 + $0x58] sm:$0xff] %vm2724_vm3, %v2363_v16  ;;  %2735 = vst.msk [vmem:[#allocation2 + $0x50] sm:$0xff] %vm2724_vm3, %v2361_v17 }
 0x298   : > { %2478 = vrot.lane.b32.xlu1 %v8415_v14, %s9494_s10  ;;  %2476 = vrot.lane.b32.xlu0 %v8414_v15, %s9494_s10  ;;  %v8447_v14 = vld [vmem:[%s9554_s30 + $0x560] sm:$0xff]  ;;  %v8446_v15 = vld [vmem:[%s9554_s30 + $0x558] sm:$0xff] }
 0x29a   : > { %v2367_v20 = vpop.permute.xlu1 %2366  ;;  %v2365_v21 = vpop.permute.xlu0 %2364 }
 0x29b   : > { %2738 = vst.msk [vmem:[#allocation2 + $0x68] sm:$0xff] %vm2724_vm3, %v2367_v20  ;;  %2737 = vst.msk [vmem:[#allocation2 + $0x60] sm:$0xff] %vm2724_vm3, %v2365_v21 }
 0x29c   : > { %2482 = vrot.lane.b32.xlu1 %v8417_v18, %s9494_s10  ;;  %2480 = vrot.lane.b32.xlu0 %v8416_v19, %s9494_s10  ;;  %v8449_v18 = vld [vmem:[%s9554_s30 + $0x578] sm:$0xff]  ;;  %v8448_v19 = vld [vmem:[%s9554_s30 + $0x570] sm:$0xff] }
 0x29e   : > { %v2371_v24 = vpop.permute.xlu1 %2370  ;;  %v2369_v25 = vpop.permute.xlu0 %2368 }
 0x29f   : > { %2740 = vst.msk [vmem:[#allocation2 + $0x78] sm:$0xff] %vm2724_vm3, %v2371_v24  ;;  %2739 = vst.msk [vmem:[#allocation2 + $0x70] sm:$0xff] %vm2724_vm3, %v2369_v25 }
 0x2a0   : > { %2486 = vrot.lane.b32.xlu1 %v8419_v22, %s9494_s10  ;;  %2484 = vrot.lane.b32.xlu0 %v8418_v23, %s9494_s10  ;;  %v8451_v22 = vld [vmem:[%s9554_s30 + $0x590] sm:$0xff]  ;;  %v8450_v23 = vld [vmem:[%s9554_s30 + $0x588] sm:$0xff] }
 0x2a2   : > { %v2375_v28 = vpop.permute.xlu1 %2374  ;;  %v2373_v29 = vpop.permute.xlu0 %2372 }
 0x2a3   : > { %2742 = vst.msk [vmem:[#allocation2 + $0x88] sm:$0xff] %vm2724_vm3, %v2375_v28  ;;  %2741 = vst.msk [vmem:[#allocation2 + $0x80] sm:$0xff] %vm2724_vm3, %v2373_v29 }
 0x2a4   : > { %2490 = vrot.lane.b32.xlu1 %v8421_v26, %s9494_s10  ;;  %2488 = vrot.lane.b32.xlu0 %v8420_v27, %s9494_s10  ;;  %v8453_v26 = vld [vmem:[%s9554_s30 + $0x5a8] sm:$0xff]  ;;  %v8452_v27 = vld [vmem:[%s9554_s30 + $0x5a0] sm:$0xff] }
 0x2a6   : > { %v2379_v32 = vpop.permute.xlu1 %2378  ;;  %v2377_v33 = vpop.permute.xlu0 %2376 }
 0x2a7   : > { %2744 = vst.msk [vmem:[#allocation2 + $0x98] sm:$0xff] %vm2724_vm3, %v2379_v32  ;;  %2743 = vst.msk [vmem:[#allocation2 + $0x90] sm:$0xff] %vm2724_vm3, %v2377_v33 }
 0x2a8   : > { %2494 = vrot.lane.b32.xlu1 %v8423_v30, %s9494_s10  ;;  %2492 = vrot.lane.b32.xlu0 %v8422_v31, %s9494_s10  ;;  %v8455_v30 = vld [vmem:[%s9554_s30 + $0x5c0] sm:$0xff]  ;;  %v8454_v31 = vld [vmem:[%s9554_s30 + $0x5b8] sm:$0xff] }
 0x2aa   : > { %v2383_v36 = vpop.permute.xlu1 %2382  ;;  %v2381_v37 = vpop.permute.xlu0 %2380 }
 0x2ab   : > { %2746 = vst.msk [vmem:[#allocation2 + $0xa8] sm:$0xff] %vm2724_vm3, %v2383_v36  ;;  %2745 = vst.msk [vmem:[#allocation2 + $0xa0] sm:$0xff] %vm2724_vm3, %v2381_v37 }
 0x2ac   : > { %2498 = vrot.lane.b32.xlu1 %v8425_v34, %s9494_s10  ;;  %2496 = vrot.lane.b32.xlu0 %v8424_v35, %s9494_s10  ;;  %v8457_v34 = vld [vmem:[%s9554_s30 + $0x5d8] sm:$0xff]  ;;  %v8456_v35 = vld [vmem:[%s9554_s30 + $0x5d0] sm:$0xff] }
 0x2ae   : > { %v2387_v40 = vpop.permute.xlu1 %2386  ;;  %v2385_v41 = vpop.permute.xlu0 %2384 }
 0x2af   : > { %2748 = vst.msk [vmem:[#allocation2 + $0xb8] sm:$0xff] %vm2724_vm3, %v2387_v40  ;;  %2747 = vst.msk [vmem:[#allocation2 + $0xb0] sm:$0xff] %vm2724_vm3, %v2385_v41 }
 0x2b0   : > { %2502 = vrot.lane.b32.xlu1 %v8427_v38, %s9494_s10  ;;  %2500 = vrot.lane.b32.xlu0 %v8426_v39, %s9494_s10  ;;  %v8459_v38 = vld [vmem:[%s9554_s30 + $0x5f0] sm:$0xff]  ;;  %v8458_v39 = vld [vmem:[%s9554_s30 + $0x5e8] sm:$0xff] }
 0x2b2   : > { %v2391_v44 = vpop.permute.xlu1 %2390  ;;  %v2389_v45 = vpop.permute.xlu0 %2388 }
 0x2b3   : > { %2750 = vst.msk [vmem:[#allocation2 + $0xc8] sm:$0xff] %vm2724_vm3, %v2391_v44  ;;  %2749 = vst.msk [vmem:[#allocation2 + $0xc0] sm:$0xff] %vm2724_vm3, %v2389_v45 }
 0x2b4   : > { %2506 = vrot.lane.b32.xlu1 %v8429_v42, %s9494_s10  ;;  %2504 = vrot.lane.b32.xlu0 %v8428_v43, %s9494_s10  ;;  %v8461_v42 = vld [vmem:[%s9554_s30 + $0x608] sm:$0xff]  ;;  %v8460_v43 = vld [vmem:[%s9554_s30 + $0x600] sm:$0xff] }
 0x2b6   : > { %v2395_v48 = vpop.permute.xlu1 %2394  ;;  %v2393_v49 = vpop.permute.xlu0 %2392 }
 0x2b7   : > { %2752 = vst.msk [vmem:[#allocation2 + $0xd8] sm:$0xff] %vm2724_vm3, %v2395_v48  ;;  %2751 = vst.msk [vmem:[#allocation2 + $0xd0] sm:$0xff] %vm2724_vm3, %v2393_v49 }
 0x2b8   : > { %2510 = vrot.lane.b32.xlu1 %v8431_v46, %s9494_s10  ;;  %2508 = vrot.lane.b32.xlu0 %v8430_v47, %s9494_s10  ;;  %v8463_v46 = vld [vmem:[%s9554_s30 + $0x620] sm:$0xff]  ;;  %v8462_v47 = vld [vmem:[%s9554_s30 + $0x618] sm:$0xff] }
 0x2ba   : > { %v2399_v52 = vpop.permute.xlu1 %2398  ;;  %v2397_v53 = vpop.permute.xlu0 %2396 }
 0x2bb   : > { %2754 = vst.msk [vmem:[#allocation2 + $0xe8] sm:$0xff] %vm2724_vm3, %v2399_v52  ;;  %2753 = vst.msk [vmem:[#allocation2 + $0xe0] sm:$0xff] %vm2724_vm3, %v2397_v53 }
 0x2bc   : > { %2514 = vrot.lane.b32.xlu1 %v8433_v50, %s9494_s10  ;;  %2512 = vrot.lane.b32.xlu0 %v8432_v51, %s9494_s10  ;;  %v8465_v50 = vld [vmem:[%s9554_s30 + $0x638] sm:$0xff]  ;;  %v8464_v51 = vld [vmem:[%s9554_s30 + $0x630] sm:$0xff] }
 0x2be   : > { %v2403_v56 = vpop.permute.xlu1 %2402  ;;  %v2401_v57 = vpop.permute.xlu0 %2400 }
 0x2bf   : > { %2756 = vst.msk [vmem:[#allocation2 + $0xf8] sm:$0xff] %vm2724_vm3, %v2403_v56  ;;  %2755 = vst.msk [vmem:[#allocation2 + $0xf0] sm:$0xff] %vm2724_vm3, %v2401_v57 }
 0x2c0   : > { %2518 = vrot.lane.b32.xlu1 %v8435_v54, %s9494_s10  ;;  %2516 = vrot.lane.b32.xlu0 %v8434_v55, %s9494_s10  ;;  %v8467_v54 = vld [vmem:[%s9554_s30 + $0x650] sm:$0xff]  ;;  %v8466_v55 = vld [vmem:[%s9554_s30 + $0x648] sm:$0xff] }
 0x2c2   : > { %v2407_v60 = vpop.permute.xlu1 %2406  ;;  %v2405_v61 = vpop.permute.xlu0 %2404 }
 0x2c3   : > { %2758 = vst.msk [vmem:[#allocation2 + $0x108] sm:$0xff] %vm2724_vm3, %v2407_v60  ;;  %2757 = vst.msk [vmem:[#allocation2 + $0x100] sm:$0xff] %vm2724_vm3, %v2405_v61 }
 0x2c4   : > { %2522 = vrot.lane.b32.xlu1 %v8437_v58, %s9494_s10  ;;  %2520 = vrot.lane.b32.xlu0 %v8436_v59, %s9494_s10  ;;  %v8469_v58 = vld [vmem:[%s9554_s30 + $0x668] sm:$0xff]  ;;  %v8468_v59 = vld [vmem:[%s9554_s30 + $0x660] sm:$0xff] }
 0x2c6   : > { %v2411_v0 = vpop.permute.xlu1 %2410  ;;  %v2409_v1 = vpop.permute.xlu0 %2408 }
 0x2c7   : > { %2760 = vst.msk [vmem:[#allocation2 + $0x118] sm:$0xff] %vm2724_vm3, %v2411_v0  ;;  %2759 = vst.msk [vmem:[#allocation2 + $0x110] sm:$0xff] %vm2724_vm3, %v2409_v1 }
 0x2c8   : > { %2526 = vrot.lane.b32.xlu1 %v8439_v62, %s9494_s10  ;;  %2524 = vrot.lane.b32.xlu0 %v8438_v63, %s9494_s10  ;;  %v8471_v62 = vld [vmem:[%s9554_s30 + $0x680] sm:$0xff]  ;;  %v8470_v63 = vld [vmem:[%s9554_s30 + $0x678] sm:$0xff] }
 0x2ca   : > { %v2415_v4 = vpop.permute.xlu1 %2414  ;;  %v2413_v5 = vpop.permute.xlu0 %2412 }
 0x2cb   : > { %2762 = vst.msk [vmem:[#allocation2 + $0x128] sm:$0xff] %vm2724_vm3, %v2415_v4  ;;  %2761 = vst.msk [vmem:[#allocation2 + $0x120] sm:$0xff] %vm2724_vm3, %v2413_v5 }
 0x2cc   : > { %2530 = vrot.lane.b32.xlu1 %v8441_v2, %s9494_s10  ;;  %2528 = vrot.lane.b32.xlu0 %v8440_v3, %s9494_s10  ;;  %v8473_v2 = vld [vmem:[%s9554_s30 + $0x698] sm:$0xff]  ;;  %v8472_v3 = vld [vmem:[%s9554_s30 + $0x690] sm:$0xff] }
 0x2ce   : > { %v2419_v8 = vpop.permute.xlu1 %2418  ;;  %v2417_v9 = vpop.permute.xlu0 %2416 }
 0x2cf   : > { %2764 = vst.msk [vmem:[#allocation2 + $0x138] sm:$0xff] %vm2724_vm3, %v2419_v8  ;;  %2763 = vst.msk [vmem:[#allocation2 + $0x130] sm:$0xff] %vm2724_vm3, %v2417_v9 }
 0x2d0   : > { %2534 = vrot.lane.b32.xlu1 %v8443_v6, %s9494_s10  ;;  %2532 = vrot.lane.b32.xlu0 %v8442_v7, %s9494_s10  ;;  %v8475_v6 = vld [vmem:[%s9554_s30 + $0x21] sm:$0xff]  ;;  %v8474_v7 = vld [vmem:[%s9554_s30 + $0x19] sm:$0xff] }
 0x2d2   : > { %v2423_v12 = vpop.permute.xlu1 %2422  ;;  %v2421_v13 = vpop.permute.xlu0 %2420 }
 0x2d3   : > { %2766 = vst.msk [vmem:[#allocation2 + $0x148] sm:$0xff] %vm2724_vm3, %v2423_v12  ;;  %2765 = vst.msk [vmem:[#allocation2 + $0x140] sm:$0xff] %vm2724_vm3, %v2421_v13 }
 0x2d4   : > { %2538 = vrot.lane.b32.xlu1 %v8445_v10, %s9494_s10  ;;  %2536 = vrot.lane.b32.xlu0 %v8444_v11, %s9494_s10  ;;  %v8477_v10 = vld [vmem:[%s9554_s30 + $0x39] sm:$0xff]  ;;  %v8476_v11 = vld [vmem:[%s9554_s30 + $0x31] sm:$0xff] }
 0x2d6   : > { %v2427_v16 = vpop.permute.xlu1 %2426  ;;  %v2425_v17 = vpop.permute.xlu0 %2424 }
 0x2d7   : > { %2768 = vst.msk [vmem:[#allocation2 + $0x158] sm:$0xff] %vm2724_vm3, %v2427_v16  ;;  %2767 = vst.msk [vmem:[#allocation2 + $0x150] sm:$0xff] %vm2724_vm3, %v2425_v17 }
 0x2d8   : > { %2542 = vrot.lane.b32.xlu1 %v8447_v14, %s9494_s10  ;;  %2540 = vrot.lane.b32.xlu0 %v8446_v15, %s9494_s10  ;;  %v8479_v14 = vld [vmem:[%s9554_s30 + $0x51] sm:$0xff]  ;;  %v8478_v15 = vld [vmem:[%s9554_s30 + $0x49] sm:$0xff] }
 0x2da   : > { %v2431_v20 = vpop.permute.xlu1 %2430  ;;  %v2429_v21 = vpop.permute.xlu0 %2428 }
 0x2db   : > { %2770 = vst.msk [vmem:[#allocation2 + $0x168] sm:$0xff] %vm2724_vm3, %v2431_v20  ;;  %2769 = vst.msk [vmem:[#allocation2 + $0x160] sm:$0xff] %vm2724_vm3, %v2429_v21 }
 0x2dc   : > { %2546 = vrot.lane.b32.xlu1 %v8449_v18, %s9494_s10  ;;  %2544 = vrot.lane.b32.xlu0 %v8448_v19, %s9494_s10  ;;  %v8481_v18 = vld [vmem:[%s9554_s30 + $0x69] sm:$0xff]  ;;  %v8480_v19 = vld [vmem:[%s9554_s30 + $0x61] sm:$0xff] }
 0x2de   : > { %v2435_v24 = vpop.permute.xlu1 %2434  ;;  %v2433_v25 = vpop.permute.xlu0 %2432 }
 0x2df   : > { %2772 = vst.msk [vmem:[#allocation2 + $0x178] sm:$0xff] %vm2724_vm3, %v2435_v24  ;;  %2771 = vst.msk [vmem:[#allocation2 + $0x170] sm:$0xff] %vm2724_vm3, %v2433_v25 }
 0x2e0   : > { %2550 = vrot.lane.b32.xlu1 %v8451_v22, %s9494_s10  ;;  %2548 = vrot.lane.b32.xlu0 %v8450_v23, %s9494_s10  ;;  %v8483_v22 = vld [vmem:[%s9554_s30 + $0x81] sm:$0xff]  ;;  %v8482_v23 = vld [vmem:[%s9554_s30 + $0x79] sm:$0xff] }
 0x2e2   : > { %v2439_v28 = vpop.permute.xlu1 %2438  ;;  %v2437_v29 = vpop.permute.xlu0 %2436 }
 0x2e3   : > { %2774 = vst.msk [vmem:[#allocation2 + $0x188] sm:$0xff] %vm2724_vm3, %v2439_v28  ;;  %2773 = vst.msk [vmem:[#allocation2 + $0x180] sm:$0xff] %vm2724_vm3, %v2437_v29 }
 0x2e4   : > { %2554 = vrot.lane.b32.xlu1 %v8453_v26, %s9494_s10  ;;  %2552 = vrot.lane.b32.xlu0 %v8452_v27, %s9494_s10  ;;  %v8485_v26 = vld [vmem:[%s9554_s30 + $0x99] sm:$0xff]  ;;  %v8484_v27 = vld [vmem:[%s9554_s30 + $0x91] sm:$0xff] }
 0x2e6   : > { %v2443_v32 = vpop.permute.xlu1 %2442  ;;  %v2441_v33 = vpop.permute.xlu0 %2440 }
 0x2e7   : > { %2776 = vst.msk [vmem:[#allocation2 + $0x198] sm:$0xff] %vm2724_vm3, %v2443_v32  ;;  %2775 = vst.msk [vmem:[#allocation2 + $0x190] sm:$0xff] %vm2724_vm3, %v2441_v33 }
 0x2e8   : > { %2558 = vrot.lane.b32.xlu1 %v8455_v30, %s9494_s10  ;;  %2556 = vrot.lane.b32.xlu0 %v8454_v31, %s9494_s10  ;;  %v8487_v30 = vld [vmem:[%s9554_s30 + $0xb1] sm:$0xff]  ;;  %v8486_v31 = vld [vmem:[%s9554_s30 + $0xa9] sm:$0xff] }
 0x2ea   : > { %v2447_v36 = vpop.permute.xlu1 %2446  ;;  %v2445_v37 = vpop.permute.xlu0 %2444 }
 0x2eb   : > { %2778 = vst.msk [vmem:[#allocation2 + $0x1a8] sm:$0xff] %vm2724_vm3, %v2447_v36  ;;  %2777 = vst.msk [vmem:[#allocation2 + $0x1a0] sm:$0xff] %vm2724_vm3, %v2445_v37 }
 0x2ec   : > { %2562 = vrot.lane.b32.xlu1 %v8457_v34, %s9494_s10  ;;  %2560 = vrot.lane.b32.xlu0 %v8456_v35, %s9494_s10  ;;  %v8489_v34 = vld [vmem:[%s9554_s30 + $0xc9] sm:$0xff]  ;;  %v8488_v35 = vld [vmem:[%s9554_s30 + $0xc1] sm:$0xff] }
 0x2ee   : > { %v2451_v40 = vpop.permute.xlu1 %2450  ;;  %v2449_v41 = vpop.permute.xlu0 %2448 }
 0x2ef   : > { %2780 = vst.msk [vmem:[#allocation2 + $0x1b8] sm:$0xff] %vm2724_vm3, %v2451_v40  ;;  %2779 = vst.msk [vmem:[#allocation2 + $0x1b0] sm:$0xff] %vm2724_vm3, %v2449_v41 }
 0x2f0   : > { %2566 = vrot.lane.b32.xlu1 %v8459_v38, %s9494_s10  ;;  %2564 = vrot.lane.b32.xlu0 %v8458_v39, %s9494_s10  ;;  %v8491_v38 = vld [vmem:[%s9554_s30 + $0xe1] sm:$0xff]  ;;  %v8490_v39 = vld [vmem:[%s9554_s30 + $0xd9] sm:$0xff] }
 0x2f2   : > { %v2455_v44 = vpop.permute.xlu1 %2454  ;;  %v2453_v45 = vpop.permute.xlu0 %2452 }
 0x2f3   : > { %2782 = vst.msk [vmem:[#allocation2 + $0x1c8] sm:$0xff] %vm2724_vm3, %v2455_v44  ;;  %2781 = vst.msk [vmem:[#allocation2 + $0x1c0] sm:$0xff] %vm2724_vm3, %v2453_v45 }
 0x2f4   : > { %2570 = vrot.lane.b32.xlu1 %v8461_v42, %s9494_s10  ;;  %2568 = vrot.lane.b32.xlu0 %v8460_v43, %s9494_s10  ;;  %v8493_v42 = vld [vmem:[%s9554_s30 + $0xf9] sm:$0xff]  ;;  %v8492_v43 = vld [vmem:[%s9554_s30 + $0xf1] sm:$0xff] }
 0x2f6   : > { %v2459_v48 = vpop.permute.xlu1 %2458  ;;  %v2457_v49 = vpop.permute.xlu0 %2456 }
 0x2f7   : > { %2784 = vst.msk [vmem:[#allocation2 + $0x1d8] sm:$0xff] %vm2724_vm3, %v2459_v48  ;;  %2783 = vst.msk [vmem:[#allocation2 + $0x1d0] sm:$0xff] %vm2724_vm3, %v2457_v49 }
 0x2f8   : > { %2574 = vrot.lane.b32.xlu1 %v8463_v46, %s9494_s10  ;;  %2572 = vrot.lane.b32.xlu0 %v8462_v47, %s9494_s10  ;;  %v8495_v46 = vld [vmem:[%s9554_s30 + $0x111] sm:$0xff]  ;;  %v8494_v47 = vld [vmem:[%s9554_s30 + $0x109] sm:$0xff] }
 0x2fa   : > { %v2463_v52 = vpop.permute.xlu1 %2462  ;;  %v2461_v53 = vpop.permute.xlu0 %2460 }
 0x2fb   : > { %2786 = vst.msk [vmem:[#allocation2 + $0x1e8] sm:$0xff] %vm2724_vm3, %v2463_v52  ;;  %2785 = vst.msk [vmem:[#allocation2 + $0x1e0] sm:$0xff] %vm2724_vm3, %v2461_v53 }
 0x2fc   : > { %2578 = vrot.lane.b32.xlu1 %v8465_v50, %s9494_s10  ;;  %2576 = vrot.lane.b32.xlu0 %v8464_v51, %s9494_s10  ;;  %v8497_v50 = vld [vmem:[%s9554_s30 + $0x129] sm:$0xff]  ;;  %v8496_v51 = vld [vmem:[%s9554_s30 + $0x121] sm:$0xff] }
 0x2fe   : > { %v2467_v56 = vpop.permute.xlu1 %2466  ;;  %v2465_v57 = vpop.permute.xlu0 %2464 }
 0x2ff   : > { %2788 = vst.msk [vmem:[#allocation2 + $0x1f8] sm:$0xff] %vm2724_vm3, %v2467_v56  ;;  %2787 = vst.msk [vmem:[#allocation2 + $0x1f0] sm:$0xff] %vm2724_vm3, %v2465_v57 }
 0x300   : > { %2582 = vrot.lane.b32.xlu1 %v8467_v54, %s9494_s10  ;;  %2580 = vrot.lane.b32.xlu0 %v8466_v55, %s9494_s10  ;;  %v8499_v54 = vld [vmem:[%s9554_s30 + $0x141] sm:$0xff]  ;;  %v8498_v55 = vld [vmem:[%s9554_s30 + $0x139] sm:$0xff] }
 0x302   : > { %v2471_v60 = vpop.permute.xlu1 %2470  ;;  %v2469_v61 = vpop.permute.xlu0 %2468 }
 0x303   : > { %2790 = vst.msk [vmem:[#allocation2 + $0x208] sm:$0xff] %vm2724_vm3, %v2471_v60  ;;  %2789 = vst.msk [vmem:[#allocation2 + $0x200] sm:$0xff] %vm2724_vm3, %v2469_v61 }
 0x304   : > { %2586 = vrot.lane.b32.xlu1 %v8469_v58, %s9494_s10  ;;  %2584 = vrot.lane.b32.xlu0 %v8468_v59, %s9494_s10  ;;  %v8501_v58 = vld [vmem:[%s9554_s30 + $0x159] sm:$0xff]  ;;  %v8500_v59 = vld [vmem:[%s9554_s30 + $0x151] sm:$0xff] }
 0x306   : > { %v2475_v0 = vpop.permute.xlu1 %2474  ;;  %v2473_v1 = vpop.permute.xlu0 %2472 }
 0x307   : > { %2792 = vst.msk [vmem:[#allocation2 + $0x218] sm:$0xff] %vm2724_vm3, %v2475_v0  ;;  %2791 = vst.msk [vmem:[#allocation2 + $0x210] sm:$0xff] %vm2724_vm3, %v2473_v1 }
 0x308   : > { %2590 = vrot.lane.b32.xlu1 %v8471_v62, %s9494_s10  ;;  %2588 = vrot.lane.b32.xlu0 %v8470_v63, %s9494_s10  ;;  %v8503_v62 = vld [vmem:[%s9554_s30 + $0x171] sm:$0xff]  ;;  %v8502_v63 = vld [vmem:[%s9554_s30 + $0x169] sm:$0xff] }
 0x30a   : > { %v2479_v4 = vpop.permute.xlu1 %2478  ;;  %v2477_v5 = vpop.permute.xlu0 %2476 }
 0x30b   : > { %2794 = vst.msk [vmem:[#allocation2 + $0x228] sm:$0xff] %vm2724_vm3, %v2479_v4  ;;  %2793 = vst.msk [vmem:[#allocation2 + $0x220] sm:$0xff] %vm2724_vm3, %v2477_v5 }
 0x30c   : > { %2594 = vrot.lane.b32.xlu1 %v8473_v2, %s9494_s10  ;;  %2592 = vrot.lane.b32.xlu0 %v8472_v3, %s9494_s10  ;;  %v8505_v2 = vld [vmem:[%s9554_s30 + $0x189] sm:$0xff]  ;;  %v8504_v3 = vld [vmem:[%s9554_s30 + $0x181] sm:$0xff] }
 0x30e   : > { %v2483_v8 = vpop.permute.xlu1 %2482  ;;  %v2481_v9 = vpop.permute.xlu0 %2480 }
 0x30f   : > { %2796 = vst.msk [vmem:[#allocation2 + $0x238] sm:$0xff] %vm2724_vm3, %v2483_v8  ;;  %2795 = vst.msk [vmem:[#allocation2 + $0x230] sm:$0xff] %vm2724_vm3, %v2481_v9 }
 0x310   : > { %3111 = vrot.lane.b32.xlu1 %v8475_v6, %s9495_s11  ;;  %3109 = vrot.lane.b32.xlu0 %v8474_v7, %s9495_s11  ;;  %v8507_v6 = vld [vmem:[%s9554_s30 + $0x1d1] sm:$0xff]  ;;  %v8506_v7 = vld [vmem:[%s9554_s30 + $0x1c9] sm:$0xff] }
 0x312   : > { %v2487_v12 = vpop.permute.xlu1 %2486  ;;  %v2485_v13 = vpop.permute.xlu0 %2484 }
 0x313   : > { %2798 = vst.msk [vmem:[#allocation2 + $0x248] sm:$0xff] %vm2724_vm3, %v2487_v12  ;;  %2797 = vst.msk [vmem:[#allocation2 + $0x240] sm:$0xff] %vm2724_vm3, %v2485_v13 }
 0x314   : > { %3115 = vrot.lane.b32.xlu1 %v8477_v10, %s9495_s11  ;;  %3113 = vrot.lane.b32.xlu0 %v8476_v11, %s9495_s11  ;;  %v8509_v10 = vld [vmem:[%s9554_s30 + $0x1e9] sm:$0xff]  ;;  %v8508_v11 = vld [vmem:[%s9554_s30 + $0x1e1] sm:$0xff] }
 0x316   : > { %v2491_v16 = vpop.permute.xlu1 %2490  ;;  %v2489_v17 = vpop.permute.xlu0 %2488 }
 0x317   : > { %2800 = vst.msk [vmem:[#allocation2 + $0x258] sm:$0xff] %vm2724_vm3, %v2491_v16  ;;  %2799 = vst.msk [vmem:[#allocation2 + $0x250] sm:$0xff] %vm2724_vm3, %v2489_v17 }
 0x318   : > { %3119 = vrot.lane.b32.xlu1 %v8479_v14, %s9495_s11  ;;  %3117 = vrot.lane.b32.xlu0 %v8478_v15, %s9495_s11  ;;  %v8511_v14 = vld [vmem:[%s9554_s30 + $0x201] sm:$0xff]  ;;  %v8510_v15 = vld [vmem:[%s9554_s30 + $0x1f9] sm:$0xff] }
 0x31a   : > { %v2495_v20 = vpop.permute.xlu1 %2494  ;;  %v2493_v21 = vpop.permute.xlu0 %2492 }
 0x31b   : > { %2802 = vst.msk [vmem:[#allocation2 + $0x268] sm:$0xff] %vm2724_vm3, %v2495_v20  ;;  %2801 = vst.msk [vmem:[#allocation2 + $0x260] sm:$0xff] %vm2724_vm3, %v2493_v21 }
 0x31c   : > { %3123 = vrot.lane.b32.xlu1 %v8481_v18, %s9495_s11  ;;  %3121 = vrot.lane.b32.xlu0 %v8480_v19, %s9495_s11  ;;  %v8513_v18 = vld [vmem:[%s9554_s30 + $0x219] sm:$0xff]  ;;  %v8512_v19 = vld [vmem:[%s9554_s30 + $0x211] sm:$0xff] }
 0x31e   : > { %v2499_v24 = vpop.permute.xlu1 %2498  ;;  %v2497_v25 = vpop.permute.xlu0 %2496 }
 0x31f   : > { %2804 = vst.msk [vmem:[#allocation2 + $0x278] sm:$0xff] %vm2724_vm3, %v2499_v24  ;;  %2803 = vst.msk [vmem:[#allocation2 + $0x270] sm:$0xff] %vm2724_vm3, %v2497_v25 }
 0x320   : > { %3127 = vrot.lane.b32.xlu1 %v8483_v22, %s9495_s11  ;;  %3125 = vrot.lane.b32.xlu0 %v8482_v23, %s9495_s11  ;;  %v8515_v22 = vld [vmem:[%s9554_s30 + $0x231] sm:$0xff]  ;;  %v8514_v23 = vld [vmem:[%s9554_s30 + $0x229] sm:$0xff] }
 0x322   : > { %v2503_v28 = vpop.permute.xlu1 %2502  ;;  %v2501_v29 = vpop.permute.xlu0 %2500 }
 0x323   : > { %2806 = vst.msk [vmem:[#allocation2 + $0x288] sm:$0xff] %vm2724_vm3, %v2503_v28  ;;  %2805 = vst.msk [vmem:[#allocation2 + $0x280] sm:$0xff] %vm2724_vm3, %v2501_v29 }
 0x324   : > { %3131 = vrot.lane.b32.xlu1 %v8485_v26, %s9495_s11  ;;  %3129 = vrot.lane.b32.xlu0 %v8484_v27, %s9495_s11  ;;  %v8517_v26 = vld [vmem:[%s9554_s30 + $0x249] sm:$0xff]  ;;  %v8516_v27 = vld [vmem:[%s9554_s30 + $0x241] sm:$0xff] }
 0x326   : > { %v2507_v32 = vpop.permute.xlu1 %2506  ;;  %v2505_v33 = vpop.permute.xlu0 %2504 }
 0x327   : > { %2808 = vst.msk [vmem:[#allocation2 + $0x298] sm:$0xff] %vm2724_vm3, %v2507_v32  ;;  %2807 = vst.msk [vmem:[#allocation2 + $0x290] sm:$0xff] %vm2724_vm3, %v2505_v33 }
 0x328   : > { %3135 = vrot.lane.b32.xlu1 %v8487_v30, %s9495_s11  ;;  %3133 = vrot.lane.b32.xlu0 %v8486_v31, %s9495_s11  ;;  %v8519_v30 = vld [vmem:[%s9554_s30 + $0x261] sm:$0xff]  ;;  %v8518_v31 = vld [vmem:[%s9554_s30 + $0x259] sm:$0xff] }
 0x32a   : > { %v2511_v36 = vpop.permute.xlu1 %2510  ;;  %v2509_v37 = vpop.permute.xlu0 %2508 }
 0x32b   : > { %2810 = vst.msk [vmem:[#allocation2 + $0x2a8] sm:$0xff] %vm2724_vm3, %v2511_v36  ;;  %2809 = vst.msk [vmem:[#allocation2 + $0x2a0] sm:$0xff] %vm2724_vm3, %v2509_v37 }
 0x32c   : > { %3139 = vrot.lane.b32.xlu1 %v8489_v34, %s9495_s11  ;;  %3137 = vrot.lane.b32.xlu0 %v8488_v35, %s9495_s11  ;;  %v8521_v34 = vld [vmem:[%s9554_s30 + $0x279] sm:$0xff]  ;;  %v8520_v35 = vld [vmem:[%s9554_s30 + $0x271] sm:$0xff] }
 0x32e   : > { %v2515_v40 = vpop.permute.xlu1 %2514  ;;  %v2513_v41 = vpop.permute.xlu0 %2512 }
 0x32f   : > { %2812 = vst.msk [vmem:[#allocation2 + $0x2b8] sm:$0xff] %vm2724_vm3, %v2515_v40  ;;  %2811 = vst.msk [vmem:[#allocation2 + $0x2b0] sm:$0xff] %vm2724_vm3, %v2513_v41 }
 0x330   : > { %3143 = vrot.lane.b32.xlu1 %v8491_v38, %s9495_s11  ;;  %3141 = vrot.lane.b32.xlu0 %v8490_v39, %s9495_s11  ;;  %v8523_v38 = vld [vmem:[%s9554_s30 + $0x291] sm:$0xff]  ;;  %v8522_v39 = vld [vmem:[%s9554_s30 + $0x289] sm:$0xff] }
 0x332   : > { %v2519_v44 = vpop.permute.xlu1 %2518  ;;  %v2517_v45 = vpop.permute.xlu0 %2516 }
 0x333   : > { %2814 = vst.msk [vmem:[#allocation2 + $0x2c8] sm:$0xff] %vm2724_vm3, %v2519_v44  ;;  %2813 = vst.msk [vmem:[#allocation2 + $0x2c0] sm:$0xff] %vm2724_vm3, %v2517_v45 }
 0x334   : > { %3147 = vrot.lane.b32.xlu1 %v8493_v42, %s9495_s11  ;;  %3145 = vrot.lane.b32.xlu0 %v8492_v43, %s9495_s11  ;;  %v8525_v42 = vld [vmem:[%s9554_s30 + $0x2a9] sm:$0xff]  ;;  %v8524_v43 = vld [vmem:[%s9554_s30 + $0x2a1] sm:$0xff] }
 0x336   : > { %v2523_v48 = vpop.permute.xlu1 %2522  ;;  %v2521_v49 = vpop.permute.xlu0 %2520 }
 0x337   : > { %2816 = vst.msk [vmem:[#allocation2 + $0x2d8] sm:$0xff] %vm2724_vm3, %v2523_v48  ;;  %2815 = vst.msk [vmem:[#allocation2 + $0x2d0] sm:$0xff] %vm2724_vm3, %v2521_v49 }
 0x338   : > { %3151 = vrot.lane.b32.xlu1 %v8495_v46, %s9495_s11  ;;  %3149 = vrot.lane.b32.xlu0 %v8494_v47, %s9495_s11  ;;  %v8527_v46 = vld [vmem:[%s9554_s30 + $0x2c1] sm:$0xff]  ;;  %v8526_v47 = vld [vmem:[%s9554_s30 + $0x2b9] sm:$0xff] }
 0x33a   : > { %v2527_v52 = vpop.permute.xlu1 %2526  ;;  %v2525_v53 = vpop.permute.xlu0 %2524 }
 0x33b   : > { %2818 = vst.msk [vmem:[#allocation2 + $0x2e8] sm:$0xff] %vm2724_vm3, %v2527_v52  ;;  %2817 = vst.msk [vmem:[#allocation2 + $0x2e0] sm:$0xff] %vm2724_vm3, %v2525_v53 }
 0x33c   : > { %3155 = vrot.lane.b32.xlu1 %v8497_v50, %s9495_s11  ;;  %3153 = vrot.lane.b32.xlu0 %v8496_v51, %s9495_s11  ;;  %v8529_v50 = vld [vmem:[%s9554_s30 + $0x2d9] sm:$0xff]  ;;  %v8528_v51 = vld [vmem:[%s9554_s30 + $0x2d1] sm:$0xff] }
 0x33e   : > { %v2531_v56 = vpop.permute.xlu1 %2530  ;;  %v2529_v57 = vpop.permute.xlu0 %2528 }
 0x33f   : > { %2820 = vst.msk [vmem:[#allocation2 + $0x2f8] sm:$0xff] %vm2724_vm3, %v2531_v56  ;;  %2819 = vst.msk [vmem:[#allocation2 + $0x2f0] sm:$0xff] %vm2724_vm3, %v2529_v57 }
 0x340   : > { %3159 = vrot.lane.b32.xlu1 %v8499_v54, %s9495_s11  ;;  %3157 = vrot.lane.b32.xlu0 %v8498_v55, %s9495_s11  ;;  %v8531_v54 = vld [vmem:[%s9554_s30 + $0x2f1] sm:$0xff]  ;;  %v8530_v55 = vld [vmem:[%s9554_s30 + $0x2e9] sm:$0xff] }
 0x342   : > { %v2535_v60 = vpop.permute.xlu1 %2534  ;;  %v2533_v61 = vpop.permute.xlu0 %2532 }
 0x343   : > { %2822 = vst.msk [vmem:[#allocation2 + $0x308] sm:$0xff] %vm2724_vm3, %v2535_v60  ;;  %2821 = vst.msk [vmem:[#allocation2 + $0x300] sm:$0xff] %vm2724_vm3, %v2533_v61 }
 0x344   : > { %3163 = vrot.lane.b32.xlu1 %v8501_v58, %s9495_s11  ;;  %3161 = vrot.lane.b32.xlu0 %v8500_v59, %s9495_s11  ;;  %v8533_v58 = vld [vmem:[%s9554_s30 + $0x309] sm:$0xff]  ;;  %v8532_v59 = vld [vmem:[%s9554_s30 + $0x301] sm:$0xff] }
 0x346   : > { %v2539_v0 = vpop.permute.xlu1 %2538  ;;  %v2537_v1 = vpop.permute.xlu0 %2536 }
 0x347   : > { %2824 = vst.msk [vmem:[#allocation2 + $0x318] sm:$0xff] %vm2724_vm3, %v2539_v0  ;;  %2823 = vst.msk [vmem:[#allocation2 + $0x310] sm:$0xff] %vm2724_vm3, %v2537_v1 }
 0x348   : > { %3167 = vrot.lane.b32.xlu1 %v8503_v62, %s9495_s11  ;;  %3165 = vrot.lane.b32.xlu0 %v8502_v63, %s9495_s11  ;;  %v8535_v62 = vld [vmem:[%s9554_s30 + $0x321] sm:$0xff]  ;;  %v8534_v63 = vld [vmem:[%s9554_s30 + $0x319] sm:$0xff] }
 0x34a   : > { %v2543_v4 = vpop.permute.xlu1 %2542  ;;  %v2541_v5 = vpop.permute.xlu0 %2540 }
 0x34b   : > { %2826 = vst.msk [vmem:[#allocation2 + $0x328] sm:$0xff] %vm2724_vm3, %v2543_v4  ;;  %2825 = vst.msk [vmem:[#allocation2 + $0x320] sm:$0xff] %vm2724_vm3, %v2541_v5 }
 0x34c   : > { %3171 = vrot.lane.b32.xlu1 %v8505_v2, %s9495_s11  ;;  %3169 = vrot.lane.b32.xlu0 %v8504_v3, %s9495_s11  ;;  %v8537_v2 = vld [vmem:[%s9554_s30 + $0x339] sm:$0xff]  ;;  %v8536_v3 = vld [vmem:[%s9554_s30 + $0x331] sm:$0xff] }
 0x34e   : > { %v2547_v8 = vpop.permute.xlu1 %2546  ;;  %v2545_v9 = vpop.permute.xlu0 %2544 }
 0x34f   : > { %2828 = vst.msk [vmem:[#allocation2 + $0x338] sm:$0xff] %vm2724_vm3, %v2547_v8  ;;  %2827 = vst.msk [vmem:[#allocation2 + $0x330] sm:$0xff] %vm2724_vm3, %v2545_v9 }
 0x350   : > { %3175 = vrot.lane.b32.xlu1 %v8507_v6, %s9495_s11  ;;  %3173 = vrot.lane.b32.xlu0 %v8506_v7, %s9495_s11  ;;  %v8539_v6 = vld [vmem:[%s9554_s30 + $0x381] sm:$0xff]  ;;  %v8538_v7 = vld [vmem:[%s9554_s30 + $0x379] sm:$0xff] }
 0x352   : > { %v2551_v12 = vpop.permute.xlu1 %2550  ;;  %v2549_v13 = vpop.permute.xlu0 %2548 }
 0x353   : > { %2830 = vst.msk [vmem:[#allocation2 + $0x348] sm:$0xff] %vm2724_vm3, %v2551_v12  ;;  %2829 = vst.msk [vmem:[#allocation2 + $0x340] sm:$0xff] %vm2724_vm3, %v2549_v13 }
 0x354   : > { %3179 = vrot.lane.b32.xlu1 %v8509_v10, %s9495_s11  ;;  %3177 = vrot.lane.b32.xlu0 %v8508_v11, %s9495_s11  ;;  %v8541_v10 = vld [vmem:[%s9554_s30 + $0x399] sm:$0xff]  ;;  %v8540_v11 = vld [vmem:[%s9554_s30 + $0x391] sm:$0xff] }
 0x356   : > { %v2555_v16 = vpop.permute.xlu1 %2554  ;;  %v2553_v17 = vpop.permute.xlu0 %2552 }
 0x357   : > { %2832 = vst.msk [vmem:[#allocation2 + $0x358] sm:$0xff] %vm2724_vm3, %v2555_v16  ;;  %2831 = vst.msk [vmem:[#allocation2 + $0x350] sm:$0xff] %vm2724_vm3, %v2553_v17 }
 0x358   : > { %3183 = vrot.lane.b32.xlu1 %v8511_v14, %s9495_s11  ;;  %3181 = vrot.lane.b32.xlu0 %v8510_v15, %s9495_s11  ;;  %v8543_v14 = vld [vmem:[%s9554_s30 + $0x3b1] sm:$0xff]  ;;  %v8542_v15 = vld [vmem:[%s9554_s30 + $0x3a9] sm:$0xff] }
 0x35a   : > { %v2559_v20 = vpop.permute.xlu1 %2558  ;;  %v2557_v21 = vpop.permute.xlu0 %2556 }
 0x35b   : > { %2834 = vst.msk [vmem:[#allocation2 + $0x368] sm:$0xff] %vm2724_vm3, %v2559_v20  ;;  %2833 = vst.msk [vmem:[#allocation2 + $0x360] sm:$0xff] %vm2724_vm3, %v2557_v21 }
 0x35c   : > { %3187 = vrot.lane.b32.xlu1 %v8513_v18, %s9495_s11  ;;  %3185 = vrot.lane.b32.xlu0 %v8512_v19, %s9495_s11  ;;  %v8545_v18 = vld [vmem:[%s9554_s30 + $0x3c9] sm:$0xff]  ;;  %v8544_v19 = vld [vmem:[%s9554_s30 + $0x3c1] sm:$0xff] }
 0x35e   : > { %v2563_v24 = vpop.permute.xlu1 %2562  ;;  %v2561_v25 = vpop.permute.xlu0 %2560 }
 0x35f   : > { %2836 = vst.msk [vmem:[#allocation2 + $0x378] sm:$0xff] %vm2724_vm3, %v2563_v24  ;;  %2835 = vst.msk [vmem:[#allocation2 + $0x370] sm:$0xff] %vm2724_vm3, %v2561_v25 }
 0x360   : > { %3191 = vrot.lane.b32.xlu1 %v8515_v22, %s9495_s11  ;;  %3189 = vrot.lane.b32.xlu0 %v8514_v23, %s9495_s11  ;;  %v8547_v22 = vld [vmem:[%s9554_s30 + $0x3e1] sm:$0xff]  ;;  %v8546_v23 = vld [vmem:[%s9554_s30 + $0x3d9] sm:$0xff] }
 0x362   : > { %v2567_v28 = vpop.permute.xlu1 %2566  ;;  %v2565_v29 = vpop.permute.xlu0 %2564 }
 0x363   : > { %2838 = vst.msk [vmem:[#allocation2 + $0x388] sm:$0xff] %vm2724_vm3, %v2567_v28  ;;  %2837 = vst.msk [vmem:[#allocation2 + $0x380] sm:$0xff] %vm2724_vm3, %v2565_v29 }
 0x364   : > { %3195 = vrot.lane.b32.xlu1 %v8517_v26, %s9495_s11  ;;  %3193 = vrot.lane.b32.xlu0 %v8516_v27, %s9495_s11  ;;  %v8549_v26 = vld [vmem:[%s9554_s30 + $0x3f9] sm:$0xff]  ;;  %v8548_v27 = vld [vmem:[%s9554_s30 + $0x3f1] sm:$0xff] }
 0x366   : > { %v2571_v32 = vpop.permute.xlu1 %2570  ;;  %v2569_v33 = vpop.permute.xlu0 %2568 }
 0x367   : > { %2840 = vst.msk [vmem:[#allocation2 + $0x398] sm:$0xff] %vm2724_vm3, %v2571_v32  ;;  %2839 = vst.msk [vmem:[#allocation2 + $0x390] sm:$0xff] %vm2724_vm3, %v2569_v33 }
 0x368   : > { %3199 = vrot.lane.b32.xlu1 %v8519_v30, %s9495_s11  ;;  %3197 = vrot.lane.b32.xlu0 %v8518_v31, %s9495_s11  ;;  %v8551_v30 = vld [vmem:[%s9554_s30 + $0x411] sm:$0xff]  ;;  %v8550_v31 = vld [vmem:[%s9554_s30 + $0x409] sm:$0xff] }
 0x36a   : > { %v2575_v36 = vpop.permute.xlu1 %2574  ;;  %v2573_v37 = vpop.permute.xlu0 %2572 }
 0x36b   : > { %2842 = vst.msk [vmem:[#allocation2 + $0x3a8] sm:$0xff] %vm2724_vm3, %v2575_v36  ;;  %2841 = vst.msk [vmem:[#allocation2 + $0x3a0] sm:$0xff] %vm2724_vm3, %v2573_v37 }
 0x36c   : > { %3203 = vrot.lane.b32.xlu1 %v8521_v34, %s9495_s11  ;;  %3201 = vrot.lane.b32.xlu0 %v8520_v35, %s9495_s11  ;;  %v8553_v34 = vld [vmem:[%s9554_s30 + $0x429] sm:$0xff]  ;;  %v8552_v35 = vld [vmem:[%s9554_s30 + $0x421] sm:$0xff] }
 0x36e   : > { %v2579_v40 = vpop.permute.xlu1 %2578  ;;  %v2577_v41 = vpop.permute.xlu0 %2576 }
 0x36f   : > { %2844 = vst.msk [vmem:[#allocation2 + $0x3b8] sm:$0xff] %vm2724_vm3, %v2579_v40  ;;  %2843 = vst.msk [vmem:[#allocation2 + $0x3b0] sm:$0xff] %vm2724_vm3, %v2577_v41 }
 0x370   : > { %3207 = vrot.lane.b32.xlu1 %v8523_v38, %s9495_s11  ;;  %3205 = vrot.lane.b32.xlu0 %v8522_v39, %s9495_s11  ;;  %v8555_v38 = vld [vmem:[%s9554_s30 + $0x441] sm:$0xff]  ;;  %v8554_v39 = vld [vmem:[%s9554_s30 + $0x439] sm:$0xff] }
 0x372   : > { %v2583_v44 = vpop.permute.xlu1 %2582  ;;  %v2581_v45 = vpop.permute.xlu0 %2580 }
 0x373   : > { %2846 = vst.msk [vmem:[#allocation2 + $0x3c8] sm:$0xff] %vm2724_vm3, %v2583_v44  ;;  %2845 = vst.msk [vmem:[#allocation2 + $0x3c0] sm:$0xff] %vm2724_vm3, %v2581_v45 }
 0x374   : > { %3211 = vrot.lane.b32.xlu1 %v8525_v42, %s9495_s11  ;;  %3209 = vrot.lane.b32.xlu0 %v8524_v43, %s9495_s11  ;;  %v8557_v42 = vld [vmem:[%s9554_s30 + $0x459] sm:$0xff]  ;;  %v8556_v43 = vld [vmem:[%s9554_s30 + $0x451] sm:$0xff] }
 0x376   : > { %v2587_v48 = vpop.permute.xlu1 %2586  ;;  %v2585_v49 = vpop.permute.xlu0 %2584 }
 0x377   : > { %2848 = vst.msk [vmem:[#allocation2 + $0x3d8] sm:$0xff] %vm2724_vm3, %v2587_v48  ;;  %2847 = vst.msk [vmem:[#allocation2 + $0x3d0] sm:$0xff] %vm2724_vm3, %v2585_v49 }
 0x378   : > { %3215 = vrot.lane.b32.xlu1 %v8527_v46, %s9495_s11  ;;  %3213 = vrot.lane.b32.xlu0 %v8526_v47, %s9495_s11  ;;  %v8559_v46 = vld [vmem:[%s9554_s30 + $0x471] sm:$0xff]  ;;  %v8558_v47 = vld [vmem:[%s9554_s30 + $0x469] sm:$0xff] }
 0x37a   : > { %v2591_v52 = vpop.permute.xlu1 %2590  ;;  %v2589_v53 = vpop.permute.xlu0 %2588 }
 0x37b   : > { %2850 = vst.msk [vmem:[#allocation2 + $0x3e8] sm:$0xff] %vm2724_vm3, %v2591_v52  ;;  %2849 = vst.msk [vmem:[#allocation2 + $0x3e0] sm:$0xff] %vm2724_vm3, %v2589_v53 }
 0x37c   : > { %3219 = vrot.lane.b32.xlu1 %v8529_v50, %s9495_s11  ;;  %3217 = vrot.lane.b32.xlu0 %v8528_v51, %s9495_s11  ;;  %v8561_v50 = vld [vmem:[%s9554_s30 + $0x489] sm:$0xff]  ;;  %v8560_v51 = vld [vmem:[%s9554_s30 + $0x481] sm:$0xff] }
 0x37e   : > { %v2595_v56 = vpop.permute.xlu1 %2594  ;;  %v2593_v57 = vpop.permute.xlu0 %2592 }
 0x37f   : > { %2852 = vst.msk [vmem:[#allocation2 + $0x3f8] sm:$0xff] %vm2724_vm3, %v2595_v56  ;;  %2851 = vst.msk [vmem:[#allocation2 + $0x3f0] sm:$0xff] %vm2724_vm3, %v2593_v57 }
 0x380   : > { %3223 = vrot.lane.b32.xlu1 %v8531_v54, %s9495_s11  ;;  %3221 = vrot.lane.b32.xlu0 %v8530_v55, %s9495_s11  ;;  %v8563_v54 = vld [vmem:[%s9554_s30 + $0x4a1] sm:$0xff]  ;;  %v8562_v55 = vld [vmem:[%s9554_s30 + $0x499] sm:$0xff] }
 0x382   : > { %v3112_v60 = vpop.permute.xlu1 %3111  ;;  %v3110_v61 = vpop.permute.xlu0 %3109 }
 0x383   : > { %3495 = vst.msk [vmem:[#allocation2 + $0x8] sm:$0xff] %vm3493_vm4, %v3112_v60  ;;  %3494 = vst.msk [vmem:[#allocation2] sm:$0xff] %vm3493_vm4, %v3110_v61 }
 0x384   : > { %3227 = vrot.lane.b32.xlu1 %v8533_v58, %s9495_s11  ;;  %3225 = vrot.lane.b32.xlu0 %v8532_v59, %s9495_s11  ;;  %v8565_v58 = vld [vmem:[%s9554_s30 + $0x4b9] sm:$0xff]  ;;  %v8564_v59 = vld [vmem:[%s9554_s30 + $0x4b1] sm:$0xff] }
 0x386   : > { %v3116_v0 = vpop.permute.xlu1 %3115  ;;  %v3114_v1 = vpop.permute.xlu0 %3113 }
 0x387   : > { %3497 = vst.msk [vmem:[#allocation2 + $0x18] sm:$0xff] %vm3493_vm4, %v3116_v0  ;;  %3496 = vst.msk [vmem:[#allocation2 + $0x10] sm:$0xff] %vm3493_vm4, %v3114_v1 }
 0x388   : > { %3231 = vrot.lane.b32.xlu1 %v8535_v62, %s9495_s11  ;;  %3229 = vrot.lane.b32.xlu0 %v8534_v63, %s9495_s11  ;;  %v8567_v62 = vld [vmem:[%s9554_s30 + $0x4d1] sm:$0xff]  ;;  %v8566_v63 = vld [vmem:[%s9554_s30 + $0x4c9] sm:$0xff] }
 0x38a   : > { %v3120_v4 = vpop.permute.xlu1 %3119  ;;  %v3118_v5 = vpop.permute.xlu0 %3117 }
 0x38b   : > { %3499 = vst.msk [vmem:[#allocation2 + $0x28] sm:$0xff] %vm3493_vm4, %v3120_v4  ;;  %3498 = vst.msk [vmem:[#allocation2 + $0x20] sm:$0xff] %vm3493_vm4, %v3118_v5 }
 0x38c   : > { %3235 = vrot.lane.b32.xlu1 %v8537_v2, %s9495_s11  ;;  %3233 = vrot.lane.b32.xlu0 %v8536_v3, %s9495_s11  ;;  %v8569_v2 = vld [vmem:[%s9554_s30 + $0x4e9] sm:$0xff]  ;;  %v8568_v3 = vld [vmem:[%s9554_s30 + $0x4e1] sm:$0xff] }
 0x38e   : > { %v3124_v8 = vpop.permute.xlu1 %3123  ;;  %v3122_v9 = vpop.permute.xlu0 %3121 }
 0x38f   : > { %3501 = vst.msk [vmem:[#allocation2 + $0x38] sm:$0xff] %vm3493_vm4, %v3124_v8  ;;  %3500 = vst.msk [vmem:[#allocation2 + $0x30] sm:$0xff] %vm3493_vm4, %v3122_v9 }
 0x390   : > { %3239 = vrot.lane.b32.xlu1 %v8539_v6, %s9495_s11  ;;  %3237 = vrot.lane.b32.xlu0 %v8538_v7, %s9495_s11  ;;  %v8571_v6 = vld [vmem:[%s9554_s30 + $0x531] sm:$0xff]  ;;  %v8570_v7 = vld [vmem:[%s9554_s30 + $0x529] sm:$0xff] }
 0x392   : > { %v3128_v12 = vpop.permute.xlu1 %3127  ;;  %v3126_v13 = vpop.permute.xlu0 %3125 }
 0x393   : > { %3503 = vst.msk [vmem:[#allocation2 + $0x48] sm:$0xff] %vm3493_vm4, %v3128_v12  ;;  %3502 = vst.msk [vmem:[#allocation2 + $0x40] sm:$0xff] %vm3493_vm4, %v3126_v13 }
 0x394   : > { %3243 = vrot.lane.b32.xlu1 %v8541_v10, %s9495_s11  ;;  %3241 = vrot.lane.b32.xlu0 %v8540_v11, %s9495_s11  ;;  %v8573_v10 = vld [vmem:[%s9554_s30 + $0x549] sm:$0xff]  ;;  %v8572_v11 = vld [vmem:[%s9554_s30 + $0x541] sm:$0xff] }
 0x396   : > { %v3132_v16 = vpop.permute.xlu1 %3131  ;;  %v3130_v17 = vpop.permute.xlu0 %3129 }
 0x397   : > { %3505 = vst.msk [vmem:[#allocation2 + $0x58] sm:$0xff] %vm3493_vm4, %v3132_v16  ;;  %3504 = vst.msk [vmem:[#allocation2 + $0x50] sm:$0xff] %vm3493_vm4, %v3130_v17 }
 0x398   : > { %3247 = vrot.lane.b32.xlu1 %v8543_v14, %s9495_s11  ;;  %3245 = vrot.lane.b32.xlu0 %v8542_v15, %s9495_s11  ;;  %v8575_v14 = vld [vmem:[%s9554_s30 + $0x561] sm:$0xff]  ;;  %v8574_v15 = vld [vmem:[%s9554_s30 + $0x559] sm:$0xff] }
 0x39a   : > { %v3136_v20 = vpop.permute.xlu1 %3135  ;;  %v3134_v21 = vpop.permute.xlu0 %3133 }
 0x39b   : > { %3507 = vst.msk [vmem:[#allocation2 + $0x68] sm:$0xff] %vm3493_vm4, %v3136_v20  ;;  %3506 = vst.msk [vmem:[#allocation2 + $0x60] sm:$0xff] %vm3493_vm4, %v3134_v21 }
 0x39c   : > { %3251 = vrot.lane.b32.xlu1 %v8545_v18, %s9495_s11  ;;  %3249 = vrot.lane.b32.xlu0 %v8544_v19, %s9495_s11  ;;  %v8577_v18 = vld [vmem:[%s9554_s30 + $0x579] sm:$0xff]  ;;  %v8576_v19 = vld [vmem:[%s9554_s30 + $0x571] sm:$0xff] }
 0x39e   : > { %v3140_v24 = vpop.permute.xlu1 %3139  ;;  %v3138_v25 = vpop.permute.xlu0 %3137 }
 0x39f   : > { %3509 = vst.msk [vmem:[#allocation2 + $0x78] sm:$0xff] %vm3493_vm4, %v3140_v24  ;;  %3508 = vst.msk [vmem:[#allocation2 + $0x70] sm:$0xff] %vm3493_vm4, %v3138_v25 }
 0x3a0   : > { %3255 = vrot.lane.b32.xlu1 %v8547_v22, %s9495_s11  ;;  %3253 = vrot.lane.b32.xlu0 %v8546_v23, %s9495_s11  ;;  %v8579_v22 = vld [vmem:[%s9554_s30 + $0x591] sm:$0xff]  ;;  %v8578_v23 = vld [vmem:[%s9554_s30 + $0x589] sm:$0xff] }
 0x3a2   : > { %v3144_v28 = vpop.permute.xlu1 %3143  ;;  %v3142_v29 = vpop.permute.xlu0 %3141 }
 0x3a3   : > { %3511 = vst.msk [vmem:[#allocation2 + $0x88] sm:$0xff] %vm3493_vm4, %v3144_v28  ;;  %3510 = vst.msk [vmem:[#allocation2 + $0x80] sm:$0xff] %vm3493_vm4, %v3142_v29 }
 0x3a4   : > { %3259 = vrot.lane.b32.xlu1 %v8549_v26, %s9495_s11  ;;  %3257 = vrot.lane.b32.xlu0 %v8548_v27, %s9495_s11  ;;  %v8581_v26 = vld [vmem:[%s9554_s30 + $0x5a9] sm:$0xff]  ;;  %v8580_v27 = vld [vmem:[%s9554_s30 + $0x5a1] sm:$0xff] }
 0x3a6   : > { %v3148_v32 = vpop.permute.xlu1 %3147  ;;  %v3146_v33 = vpop.permute.xlu0 %3145 }
 0x3a7   : > { %3513 = vst.msk [vmem:[#allocation2 + $0x98] sm:$0xff] %vm3493_vm4, %v3148_v32  ;;  %3512 = vst.msk [vmem:[#allocation2 + $0x90] sm:$0xff] %vm3493_vm4, %v3146_v33 }
 0x3a8   : > { %3263 = vrot.lane.b32.xlu1 %v8551_v30, %s9495_s11  ;;  %3261 = vrot.lane.b32.xlu0 %v8550_v31, %s9495_s11  ;;  %v8583_v30 = vld [vmem:[%s9554_s30 + $0x5c1] sm:$0xff]  ;;  %v8582_v31 = vld [vmem:[%s9554_s30 + $0x5b9] sm:$0xff] }
 0x3aa   : > { %v3152_v36 = vpop.permute.xlu1 %3151  ;;  %v3150_v37 = vpop.permute.xlu0 %3149 }
 0x3ab   : > { %3515 = vst.msk [vmem:[#allocation2 + $0xa8] sm:$0xff] %vm3493_vm4, %v3152_v36  ;;  %3514 = vst.msk [vmem:[#allocation2 + $0xa0] sm:$0xff] %vm3493_vm4, %v3150_v37 }
 0x3ac   : > { %3267 = vrot.lane.b32.xlu1 %v8553_v34, %s9495_s11  ;;  %3265 = vrot.lane.b32.xlu0 %v8552_v35, %s9495_s11  ;;  %v8585_v34 = vld [vmem:[%s9554_s30 + $0x5d9] sm:$0xff]  ;;  %v8584_v35 = vld [vmem:[%s9554_s30 + $0x5d1] sm:$0xff] }
 0x3ae   : > { %v3156_v40 = vpop.permute.xlu1 %3155  ;;  %v3154_v41 = vpop.permute.xlu0 %3153 }
 0x3af   : > { %3517 = vst.msk [vmem:[#allocation2 + $0xb8] sm:$0xff] %vm3493_vm4, %v3156_v40  ;;  %3516 = vst.msk [vmem:[#allocation2 + $0xb0] sm:$0xff] %vm3493_vm4, %v3154_v41 }
 0x3b0   : > { %3271 = vrot.lane.b32.xlu1 %v8555_v38, %s9495_s11  ;;  %3269 = vrot.lane.b32.xlu0 %v8554_v39, %s9495_s11  ;;  %v8587_v38 = vld [vmem:[%s9554_s30 + $0x5f1] sm:$0xff]  ;;  %v8586_v39 = vld [vmem:[%s9554_s30 + $0x5e9] sm:$0xff] }
 0x3b2   : > { %v3160_v44 = vpop.permute.xlu1 %3159  ;;  %v3158_v45 = vpop.permute.xlu0 %3157 }
 0x3b3   : > { %3519 = vst.msk [vmem:[#allocation2 + $0xc8] sm:$0xff] %vm3493_vm4, %v3160_v44  ;;  %3518 = vst.msk [vmem:[#allocation2 + $0xc0] sm:$0xff] %vm3493_vm4, %v3158_v45 }
 0x3b4   : > { %3275 = vrot.lane.b32.xlu1 %v8557_v42, %s9495_s11  ;;  %3273 = vrot.lane.b32.xlu0 %v8556_v43, %s9495_s11  ;;  %v8589_v42 = vld [vmem:[%s9554_s30 + $0x609] sm:$0xff]  ;;  %v8588_v43 = vld [vmem:[%s9554_s30 + $0x601] sm:$0xff] }
 0x3b6   : > { %v3164_v48 = vpop.permute.xlu1 %3163  ;;  %v3162_v49 = vpop.permute.xlu0 %3161 }
 0x3b7   : > { %3521 = vst.msk [vmem:[#allocation2 + $0xd8] sm:$0xff] %vm3493_vm4, %v3164_v48  ;;  %3520 = vst.msk [vmem:[#allocation2 + $0xd0] sm:$0xff] %vm3493_vm4, %v3162_v49 }
 0x3b8   : > { %3279 = vrot.lane.b32.xlu1 %v8559_v46, %s9495_s11  ;;  %3277 = vrot.lane.b32.xlu0 %v8558_v47, %s9495_s11  ;;  %v8591_v46 = vld [vmem:[%s9554_s30 + $0x621] sm:$0xff]  ;;  %v8590_v47 = vld [vmem:[%s9554_s30 + $0x619] sm:$0xff] }
 0x3ba   : > { %v3168_v52 = vpop.permute.xlu1 %3167  ;;  %v3166_v53 = vpop.permute.xlu0 %3165 }
 0x3bb   : > { %3523 = vst.msk [vmem:[#allocation2 + $0xe8] sm:$0xff] %vm3493_vm4, %v3168_v52  ;;  %3522 = vst.msk [vmem:[#allocation2 + $0xe0] sm:$0xff] %vm3493_vm4, %v3166_v53 }
 0x3bc   : > { %3283 = vrot.lane.b32.xlu1 %v8561_v50, %s9495_s11  ;;  %3281 = vrot.lane.b32.xlu0 %v8560_v51, %s9495_s11  ;;  %v8593_v50 = vld [vmem:[%s9554_s30 + $0x639] sm:$0xff]  ;;  %v8592_v51 = vld [vmem:[%s9554_s30 + $0x631] sm:$0xff] }
 0x3be   : > { %v3172_v56 = vpop.permute.xlu1 %3171  ;;  %v3170_v57 = vpop.permute.xlu0 %3169 }
 0x3bf   : > { %3525 = vst.msk [vmem:[#allocation2 + $0xf8] sm:$0xff] %vm3493_vm4, %v3172_v56  ;;  %3524 = vst.msk [vmem:[#allocation2 + $0xf0] sm:$0xff] %vm3493_vm4, %v3170_v57 }
 0x3c0   : > { %3287 = vrot.lane.b32.xlu1 %v8563_v54, %s9495_s11  ;;  %3285 = vrot.lane.b32.xlu0 %v8562_v55, %s9495_s11  ;;  %v8595_v54 = vld [vmem:[%s9554_s30 + $0x651] sm:$0xff]  ;;  %v8594_v55 = vld [vmem:[%s9554_s30 + $0x649] sm:$0xff] }
 0x3c2   : > { %v3176_v60 = vpop.permute.xlu1 %3175  ;;  %v3174_v61 = vpop.permute.xlu0 %3173 }
 0x3c3   : > { %3527 = vst.msk [vmem:[#allocation2 + $0x108] sm:$0xff] %vm3493_vm4, %v3176_v60  ;;  %3526 = vst.msk [vmem:[#allocation2 + $0x100] sm:$0xff] %vm3493_vm4, %v3174_v61 }
 0x3c4   : > { %3291 = vrot.lane.b32.xlu1 %v8565_v58, %s9495_s11  ;;  %3289 = vrot.lane.b32.xlu0 %v8564_v59, %s9495_s11  ;;  %v8597_v58 = vld [vmem:[%s9554_s30 + $0x669] sm:$0xff]  ;;  %v8596_v59 = vld [vmem:[%s9554_s30 + $0x661] sm:$0xff] }
 0x3c6   : > { %v3180_v0 = vpop.permute.xlu1 %3179  ;;  %v3178_v1 = vpop.permute.xlu0 %3177 }
 0x3c7   : > { %3529 = vst.msk [vmem:[#allocation2 + $0x118] sm:$0xff] %vm3493_vm4, %v3180_v0  ;;  %3528 = vst.msk [vmem:[#allocation2 + $0x110] sm:$0xff] %vm3493_vm4, %v3178_v1 }
 0x3c8   : > { %3295 = vrot.lane.b32.xlu1 %v8567_v62, %s9495_s11  ;;  %3293 = vrot.lane.b32.xlu0 %v8566_v63, %s9495_s11  ;;  %v8599_v62 = vld [vmem:[%s9554_s30 + $0x681] sm:$0xff]  ;;  %v8598_v63 = vld [vmem:[%s9554_s30 + $0x679] sm:$0xff] }
 0x3ca   : > { %v3184_v4 = vpop.permute.xlu1 %3183  ;;  %v3182_v5 = vpop.permute.xlu0 %3181 }
 0x3cb   : > { %3531 = vst.msk [vmem:[#allocation2 + $0x128] sm:$0xff] %vm3493_vm4, %v3184_v4  ;;  %3530 = vst.msk [vmem:[#allocation2 + $0x120] sm:$0xff] %vm3493_vm4, %v3182_v5 }
 0x3cc   : > { %3299 = vrot.lane.b32.xlu1 %v8569_v2, %s9495_s11  ;;  %3297 = vrot.lane.b32.xlu0 %v8568_v3, %s9495_s11  ;;  %v8601_v2 = vld [vmem:[%s9554_s30 + $0x699] sm:$0xff]  ;;  %v8600_v3 = vld [vmem:[%s9554_s30 + $0x691] sm:$0xff] }
 0x3ce   : > { %v3188_v8 = vpop.permute.xlu1 %3187  ;;  %v3186_v9 = vpop.permute.xlu0 %3185 }
 0x3cf   : > { %3533 = vst.msk [vmem:[#allocation2 + $0x138] sm:$0xff] %vm3493_vm4, %v3188_v8  ;;  %3532 = vst.msk [vmem:[#allocation2 + $0x130] sm:$0xff] %vm3493_vm4, %v3186_v9 }
 0x3d0   : > { %3303 = vrot.lane.b32.xlu1 %v8571_v6, %s9495_s11  ;;  %3301 = vrot.lane.b32.xlu0 %v8570_v7, %s9495_s11  ;;  %v8603_v6 = vld [vmem:[%s9554_s30 + $0x22] sm:$0xff]  ;;  %v8602_v7 = vld [vmem:[%s9554_s30 + $0x1a] sm:$0xff] }
 0x3d2   : > { %v3192_v12 = vpop.permute.xlu1 %3191  ;;  %v3190_v13 = vpop.permute.xlu0 %3189 }
 0x3d3   : > { %3535 = vst.msk [vmem:[#allocation2 + $0x148] sm:$0xff] %vm3493_vm4, %v3192_v12  ;;  %3534 = vst.msk [vmem:[#allocation2 + $0x140] sm:$0xff] %vm3493_vm4, %v3190_v13 }
 0x3d4   : > { %3307 = vrot.lane.b32.xlu1 %v8573_v10, %s9495_s11  ;;  %3305 = vrot.lane.b32.xlu0 %v8572_v11, %s9495_s11  ;;  %v11297_v10 = vld [vmem:[%s9554_s30 + $0x3a] sm:$0xff]  ;;  %v11300_v11 = vld [vmem:[%s9554_s30 + $0x32] sm:$0xff] }
 0x3d6   : > { %v3196_v16 = vpop.permute.xlu1 %3195  ;;  %v3194_v17 = vpop.permute.xlu0 %3193 }
 0x3d7   : > { %3537 = vst.msk [vmem:[#allocation2 + $0x158] sm:$0xff] %vm3493_vm4, %v3196_v16  ;;  %3536 = vst.msk [vmem:[#allocation2 + $0x150] sm:$0xff] %vm3493_vm4, %v3194_v17 }
 0x3d8   : > { %3311 = vrot.lane.b32.xlu1 %v8575_v14, %s9495_s11  ;;  %3309 = vrot.lane.b32.xlu0 %v8574_v15, %s9495_s11  ;;  %v11309_v14 = vld [vmem:[%s9554_s30 + $0x52] sm:$0xff]  ;;  %v11312_v15 = vld [vmem:[%s9554_s30 + $0x4a] sm:$0xff] }
 0x3da   : > { %v3200_v20 = vpop.permute.xlu1 %3199  ;;  %v3198_v21 = vpop.permute.xlu0 %3197 }
 0x3db   : > { %3539 = vst.msk [vmem:[#allocation2 + $0x168] sm:$0xff] %vm3493_vm4, %v3200_v20  ;;  %3538 = vst.msk [vmem:[#allocation2 + $0x160] sm:$0xff] %vm3493_vm4, %v3198_v21 }
 0x3dc   : > { %3315 = vrot.lane.b32.xlu1 %v8577_v18, %s9495_s11  ;;  %3313 = vrot.lane.b32.xlu0 %v8576_v19, %s9495_s11  ;;  %v11321_v18 = vld [vmem:[%s9554_s30 + $0x6a] sm:$0xff]  ;;  %v11324_v19 = vld [vmem:[%s9554_s30 + $0x62] sm:$0xff] }
 0x3de   : > { %v3204_v24 = vpop.permute.xlu1 %3203  ;;  %v3202_v25 = vpop.permute.xlu0 %3201 }
 0x3df   : > { %3541 = vst.msk [vmem:[#allocation2 + $0x178] sm:$0xff] %vm3493_vm4, %v3204_v24  ;;  %3540 = vst.msk [vmem:[#allocation2 + $0x170] sm:$0xff] %vm3493_vm4, %v3202_v25 }
 0x3e0   : > { %3319 = vrot.lane.b32.xlu1 %v8579_v22, %s9495_s11  ;;  %3317 = vrot.lane.b32.xlu0 %v8578_v23, %s9495_s11  ;;  %v11333_v22 = vld [vmem:[%s9554_s30 + $0x82] sm:$0xff]  ;;  %v11336_v23 = vld [vmem:[%s9554_s30 + $0x7a] sm:$0xff] }
 0x3e2   : > { %v3208_v28 = vpop.permute.xlu1 %3207  ;;  %v3206_v29 = vpop.permute.xlu0 %3205 }
 0x3e3   : > { %3543 = vst.msk [vmem:[#allocation2 + $0x188] sm:$0xff] %vm3493_vm4, %v3208_v28  ;;  %3542 = vst.msk [vmem:[#allocation2 + $0x180] sm:$0xff] %vm3493_vm4, %v3206_v29 }
 0x3e4   : > { %3323 = vrot.lane.b32.xlu1 %v8581_v26, %s9495_s11  ;;  %3321 = vrot.lane.b32.xlu0 %v8580_v27, %s9495_s11  ;;  %v11345_v26 = vld [vmem:[%s9554_s30 + $0x9a] sm:$0xff]  ;;  %v11348_v27 = vld [vmem:[%s9554_s30 + $0x92] sm:$0xff] }
 0x3e6   : > { %v3212_v32 = vpop.permute.xlu1 %3211  ;;  %v3210_v33 = vpop.permute.xlu0 %3209 }
 0x3e7   : > { %3545 = vst.msk [vmem:[#allocation2 + $0x198] sm:$0xff] %vm3493_vm4, %v3212_v32  ;;  %3544 = vst.msk [vmem:[#allocation2 + $0x190] sm:$0xff] %vm3493_vm4, %v3210_v33 }
 0x3e8   : > { %3327 = vrot.lane.b32.xlu1 %v8583_v30, %s9495_s11  ;;  %3325 = vrot.lane.b32.xlu0 %v8582_v31, %s9495_s11  ;;  %v11357_v30 = vld [vmem:[%s9554_s30 + $0xb2] sm:$0xff]  ;;  %v11360_v31 = vld [vmem:[%s9554_s30 + $0xaa] sm:$0xff] }
 0x3ea   : > { %v3216_v36 = vpop.permute.xlu1 %3215  ;;  %v3214_v37 = vpop.permute.xlu0 %3213 }
 0x3eb   : > { %3547 = vst.msk [vmem:[#allocation2 + $0x1a8] sm:$0xff] %vm3493_vm4, %v3216_v36  ;;  %3546 = vst.msk [vmem:[#allocation2 + $0x1a0] sm:$0xff] %vm3493_vm4, %v3214_v37 }
 0x3ec   : > { %3331 = vrot.lane.b32.xlu1 %v8585_v34, %s9495_s11  ;;  %3329 = vrot.lane.b32.xlu0 %v8584_v35, %s9495_s11  ;;  %v11369_v34 = vld [vmem:[%s9554_s30 + $0xca] sm:$0xff]  ;;  %v11372_v35 = vld [vmem:[%s9554_s30 + $0xc2] sm:$0xff] }
 0x3ee   : > { %v3220_v40 = vpop.permute.xlu1 %3219  ;;  %v3218_v41 = vpop.permute.xlu0 %3217 }
 0x3ef   : > { %3549 = vst.msk [vmem:[#allocation2 + $0x1b8] sm:$0xff] %vm3493_vm4, %v3220_v40  ;;  %3548 = vst.msk [vmem:[#allocation2 + $0x1b0] sm:$0xff] %vm3493_vm4, %v3218_v41 }
 0x3f0   : > { %3335 = vrot.lane.b32.xlu1 %v8587_v38, %s9495_s11  ;;  %3333 = vrot.lane.b32.xlu0 %v8586_v39, %s9495_s11  ;;  %v11381_v38 = vld [vmem:[%s9554_s30 + $0xe2] sm:$0xff]  ;;  %v11384_v39 = vld [vmem:[%s9554_s30 + $0xda] sm:$0xff] }
 0x3f2   : > { %v3224_v44 = vpop.permute.xlu1 %3223  ;;  %v3222_v45 = vpop.permute.xlu0 %3221 }
 0x3f3   : > { %3551 = vst.msk [vmem:[#allocation2 + $0x1c8] sm:$0xff] %vm3493_vm4, %v3224_v44  ;;  %3550 = vst.msk [vmem:[#allocation2 + $0x1c0] sm:$0xff] %vm3493_vm4, %v3222_v45 }
 0x3f4   : > { %3339 = vrot.lane.b32.xlu1 %v8589_v42, %s9495_s11  ;;  %3337 = vrot.lane.b32.xlu0 %v8588_v43, %s9495_s11  ;;  %v8621_v42 = vld [vmem:[%s9554_s30 + $0xfa] sm:$0xff]  ;;  %v8620_v43 = vld [vmem:[%s9554_s30 + $0xf2] sm:$0xff] }
 0x3f6   : > { %v3228_v48 = vpop.permute.xlu1 %3227  ;;  %v3226_v49 = vpop.permute.xlu0 %3225 }
 0x3f7   : > { %3553 = vst.msk [vmem:[#allocation2 + $0x1d8] sm:$0xff] %vm3493_vm4, %v3228_v48  ;;  %3552 = vst.msk [vmem:[#allocation2 + $0x1d0] sm:$0xff] %vm3493_vm4, %v3226_v49 }
 0x3f8   : > { %3343 = vrot.lane.b32.xlu1 %v8591_v46, %s9495_s11  ;;  %3341 = vrot.lane.b32.xlu0 %v8590_v47, %s9495_s11  ;;  %v8623_v46 = vld [vmem:[%s9554_s30 + $0x112] sm:$0xff]  ;;  %v8622_v47 = vld [vmem:[%s9554_s30 + $0x10a] sm:$0xff] }
 0x3fa   : > { %v3232_v52 = vpop.permute.xlu1 %3231  ;;  %v3230_v53 = vpop.permute.xlu0 %3229 }
 0x3fb   : > { %3555 = vst.msk [vmem:[#allocation2 + $0x1e8] sm:$0xff] %vm3493_vm4, %v3232_v52  ;;  %3554 = vst.msk [vmem:[#allocation2 + $0x1e0] sm:$0xff] %vm3493_vm4, %v3230_v53 }
 0x3fc   : > { %3347 = vrot.lane.b32.xlu1 %v8593_v50, %s9495_s11  ;;  %3345 = vrot.lane.b32.xlu0 %v8592_v51, %s9495_s11  ;;  %v8625_v50 = vld [vmem:[%s9554_s30 + $0x12a] sm:$0xff]  ;;  %v8624_v51 = vld [vmem:[%s9554_s30 + $0x122] sm:$0xff] }
 0x3fe   : > { %v3236_v56 = vpop.permute.xlu1 %3235  ;;  %v3234_v57 = vpop.permute.xlu0 %3233 }
 0x3ff   : > { %3557 = vst.msk [vmem:[#allocation2 + $0x1f8] sm:$0xff] %vm3493_vm4, %v3236_v56  ;;  %3556 = vst.msk [vmem:[#allocation2 + $0x1f0] sm:$0xff] %vm3493_vm4, %v3234_v57 }
 0x400   : > { %3351 = vrot.lane.b32.xlu1 %v8595_v54, %s9495_s11  ;;  %3349 = vrot.lane.b32.xlu0 %v8594_v55, %s9495_s11  ;;  %v8627_v54 = vld [vmem:[%s9554_s30 + $0x142] sm:$0xff]  ;;  %v8626_v55 = vld [vmem:[%s9554_s30 + $0x13a] sm:$0xff] }
 0x402   : > { %v3240_v60 = vpop.permute.xlu1 %3239  ;;  %v3238_v61 = vpop.permute.xlu0 %3237 }
 0x403   : > { %3559 = vst.msk [vmem:[#allocation2 + $0x208] sm:$0xff] %vm3493_vm4, %v3240_v60  ;;  %3558 = vst.msk [vmem:[#allocation2 + $0x200] sm:$0xff] %vm3493_vm4, %v3238_v61 }
 0x404   : > { %3355 = vrot.lane.b32.xlu1 %v8597_v58, %s9495_s11  ;;  %3353 = vrot.lane.b32.xlu0 %v8596_v59, %s9495_s11  ;;  %v8629_v58 = vld [vmem:[%s9554_s30 + $0x15a] sm:$0xff]  ;;  %v8628_v59 = vld [vmem:[%s9554_s30 + $0x152] sm:$0xff] }
 0x406   : > { %v3244_v0 = vpop.permute.xlu1 %3243  ;;  %v3242_v1 = vpop.permute.xlu0 %3241 }
 0x407   : > { %3561 = vst.msk [vmem:[#allocation2 + $0x218] sm:$0xff] %vm3493_vm4, %v3244_v0  ;;  %3560 = vst.msk [vmem:[#allocation2 + $0x210] sm:$0xff] %vm3493_vm4, %v3242_v1 }
 0x408   : > { %3359 = vrot.lane.b32.xlu1 %v8599_v62, %s9495_s11  ;;  %3357 = vrot.lane.b32.xlu0 %v8598_v63, %s9495_s11  ;;  %v8631_v62 = vld [vmem:[%s9554_s30 + $0x172] sm:$0xff]  ;;  %v8630_v63 = vld [vmem:[%s9554_s30 + $0x16a] sm:$0xff] }
 0x40a   : > { %v3248_v4 = vpop.permute.xlu1 %3247  ;;  %v3246_v5 = vpop.permute.xlu0 %3245 }
 0x40b   : > { %3563 = vst.msk [vmem:[#allocation2 + $0x228] sm:$0xff] %vm3493_vm4, %v3248_v4  ;;  %3562 = vst.msk [vmem:[#allocation2 + $0x220] sm:$0xff] %vm3493_vm4, %v3246_v5 }
 0x40c   : > { %3363 = vrot.lane.b32.xlu1 %v8601_v2, %s9495_s11  ;;  %3361 = vrot.lane.b32.xlu0 %v8600_v3, %s9495_s11  ;;  %v8633_v2 = vld [vmem:[%s9554_s30 + $0x18a] sm:$0xff]  ;;  %v8632_v3 = vld [vmem:[%s9554_s30 + $0x182] sm:$0xff] }
 0x40e   : > { %v3252_v8 = vpop.permute.xlu1 %3251  ;;  %v3250_v9 = vpop.permute.xlu0 %3249 }
 0x40f   : > { %3565 = vst.msk [vmem:[#allocation2 + $0x238] sm:$0xff] %vm3493_vm4, %v3252_v8  ;;  %3564 = vst.msk [vmem:[#allocation2 + $0x230] sm:$0xff] %vm3493_vm4, %v3250_v9 }
 0x410   : > { %3880 = vrot.lane.b32.xlu1 %v8603_v6, %s9496_s12  ;;  %3878 = vrot.lane.b32.xlu0 %v8602_v7, %s9496_s12  ;;  %v8635_v6 = vld [vmem:[%s9554_s30 + $0x1d2] sm:$0xff]  ;;  %v8634_v7 = vld [vmem:[%s9554_s30 + $0x1ca] sm:$0xff] }
 0x412   : > { %v3256_v12 = vpop.permute.xlu1 %3255  ;;  %v3254_v13 = vpop.permute.xlu0 %3253 }
 0x413   : > { %3567 = vst.msk [vmem:[#allocation2 + $0x248] sm:$0xff] %vm3493_vm4, %v3256_v12  ;;  %3566 = vst.msk [vmem:[#allocation2 + $0x240] sm:$0xff] %vm3493_vm4, %v3254_v13  ;;  %v8637_v12 = vld [vmem:[%s9554_s30 + $0x1ea] sm:$0xff]  ;;  %v8636_v13 = vld [vmem:[%s9554_s30 + $0x1e2] sm:$0xff] }
 0x414   : > { %3884 = vrot.lane.b32.xlu1 %v11297_v10, %s9496_s12  ;;  %3882 = vrot.lane.b32.xlu0 %v11300_v11, %s9496_s12 }
 0x416   : > { %v3260_v16 = vpop.permute.xlu1 %3259  ;;  %v3258_v17 = vpop.permute.xlu0 %3257 }
 0x417   : > { %3569 = vst.msk [vmem:[#allocation2 + $0x258] sm:$0xff] %vm3493_vm4, %v3260_v16  ;;  %3568 = vst.msk [vmem:[#allocation2 + $0x250] sm:$0xff] %vm3493_vm4, %v3258_v17 }
 0x418   : > { %3888 = vrot.lane.b32.xlu1 %v11309_v14, %s9496_s12  ;;  %3886 = vrot.lane.b32.xlu0 %v11312_v15, %s9496_s12 }
 0x41a   : > { %v3264_v20 = vpop.permute.xlu1 %3263  ;;  %v3262_v21 = vpop.permute.xlu0 %3261 }
 0x41b   : > { %3571 = vst.msk [vmem:[#allocation2 + $0x268] sm:$0xff] %vm3493_vm4, %v3264_v20  ;;  %3570 = vst.msk [vmem:[#allocation2 + $0x260] sm:$0xff] %vm3493_vm4, %v3262_v21  ;;  %v8639_v20 = vld [vmem:[%s9554_s30 + $0x202] sm:$0xff]  ;;  %v8638_v21 = vld [vmem:[%s9554_s30 + $0x1fa] sm:$0xff] }
 0x41c   : > { %3892 = vrot.lane.b32.xlu1 %v11321_v18, %s9496_s12  ;;  %3890 = vrot.lane.b32.xlu0 %v11324_v19, %s9496_s12 }
 0x41e   : > { %v3268_v24 = vpop.permute.xlu1 %3267  ;;  %v3266_v25 = vpop.permute.xlu0 %3265 }
 0x41f   : > { %3573 = vst.msk [vmem:[#allocation2 + $0x278] sm:$0xff] %vm3493_vm4, %v3268_v24  ;;  %3572 = vst.msk [vmem:[#allocation2 + $0x270] sm:$0xff] %vm3493_vm4, %v3266_v25 }
 0x420   : > { %3896 = vrot.lane.b32.xlu1 %v11333_v22, %s9496_s12  ;;  %3894 = vrot.lane.b32.xlu0 %v11336_v23, %s9496_s12 }
 0x422   : > { %v3272_v28 = vpop.permute.xlu1 %3271  ;;  %v3270_v29 = vpop.permute.xlu0 %3269 }
 0x423   : > { %3575 = vst.msk [vmem:[#allocation2 + $0x288] sm:$0xff] %vm3493_vm4, %v3272_v28  ;;  %3574 = vst.msk [vmem:[#allocation2 + $0x280] sm:$0xff] %vm3493_vm4, %v3270_v29  ;;  %v8641_v28 = vld [vmem:[%s9554_s30 + $0x21a] sm:$0xff]  ;;  %v8640_v29 = vld [vmem:[%s9554_s30 + $0x212] sm:$0xff] }
 0x424   : > { %3900 = vrot.lane.b32.xlu1 %v11345_v26, %s9496_s12  ;;  %3898 = vrot.lane.b32.xlu0 %v11348_v27, %s9496_s12 }
 0x426   : > { %v3276_v32 = vpop.permute.xlu1 %3275  ;;  %v3274_v33 = vpop.permute.xlu0 %3273 }
 0x427   : > { %3577 = vst.msk [vmem:[#allocation2 + $0x298] sm:$0xff] %vm3493_vm4, %v3276_v32  ;;  %3576 = vst.msk [vmem:[#allocation2 + $0x290] sm:$0xff] %vm3493_vm4, %v3274_v33 }
 0x428   : > { %3904 = vrot.lane.b32.xlu1 %v11357_v30, %s9496_s12  ;;  %3902 = vrot.lane.b32.xlu0 %v11360_v31, %s9496_s12 }
 0x42a   : > { %v3280_v36 = vpop.permute.xlu1 %3279  ;;  %v3278_v37 = vpop.permute.xlu0 %3277 }
 0x42b   : > { %3579 = vst.msk [vmem:[#allocation2 + $0x2a8] sm:$0xff] %vm3493_vm4, %v3280_v36  ;;  %3578 = vst.msk [vmem:[#allocation2 + $0x2a0] sm:$0xff] %vm3493_vm4, %v3278_v37  ;;  %v8643_v36 = vld [vmem:[%s9554_s30 + $0x232] sm:$0xff]  ;;  %v8642_v37 = vld [vmem:[%s9554_s30 + $0x22a] sm:$0xff] }
 0x42c   : > { %3908 = vrot.lane.b32.xlu1 %v11369_v34, %s9496_s12  ;;  %3906 = vrot.lane.b32.xlu0 %v11372_v35, %s9496_s12 }
 0x42e   : > { %v3284_v40 = vpop.permute.xlu1 %3283  ;;  %v3282_v41 = vpop.permute.xlu0 %3281 }
 0x42f   : > { %3581 = vst.msk [vmem:[#allocation2 + $0x2b8] sm:$0xff] %vm3493_vm4, %v3284_v40  ;;  %3580 = vst.msk [vmem:[#allocation2 + $0x2b0] sm:$0xff] %vm3493_vm4, %v3282_v41 }
 0x430   : > { %3912 = vrot.lane.b32.xlu1 %v11381_v38, %s9496_s12  ;;  %3910 = vrot.lane.b32.xlu0 %v11384_v39, %s9496_s12 }
 0x432   : > { %v3288_v44 = vpop.permute.xlu1 %3287  ;;  %v3286_v45 = vpop.permute.xlu0 %3285 }
 0x433   : > { %3583 = vst.msk [vmem:[#allocation2 + $0x2c8] sm:$0xff] %vm3493_vm4, %v3288_v44  ;;  %3582 = vst.msk [vmem:[#allocation2 + $0x2c0] sm:$0xff] %vm3493_vm4, %v3286_v45 }
 0x434   : > { %3916 = vrot.lane.b32.xlu1 %v8621_v42, %s9496_s12  ;;  %3914 = vrot.lane.b32.xlu0 %v8620_v43, %s9496_s12  ;;  %v8645_v42 = vld [vmem:[%s9554_s30 + $0x24a] sm:$0xff]  ;;  %v8644_v43 = vld [vmem:[%s9554_s30 + $0x242] sm:$0xff] }
 0x436   : > { %v3292_v48 = vpop.permute.xlu1 %3291  ;;  %v3290_v49 = vpop.permute.xlu0 %3289 }
 0x437   : > { %3585 = vst.msk [vmem:[#allocation2 + $0x2d8] sm:$0xff] %vm3493_vm4, %v3292_v48  ;;  %3584 = vst.msk [vmem:[#allocation2 + $0x2d0] sm:$0xff] %vm3493_vm4, %v3290_v49 }
 0x438   : > { %3920 = vrot.lane.b32.xlu1 %v8623_v46, %s9496_s12  ;;  %3918 = vrot.lane.b32.xlu0 %v8622_v47, %s9496_s12  ;;  %v8647_v46 = vld [vmem:[%s9554_s30 + $0x262] sm:$0xff]  ;;  %v8646_v47 = vld [vmem:[%s9554_s30 + $0x25a] sm:$0xff] }
 0x43a   : > { %v3296_v52 = vpop.permute.xlu1 %3295  ;;  %v3294_v53 = vpop.permute.xlu0 %3293 }
 0x43b   : > { %3587 = vst.msk [vmem:[#allocation2 + $0x2e8] sm:$0xff] %vm3493_vm4, %v3296_v52  ;;  %3586 = vst.msk [vmem:[#allocation2 + $0x2e0] sm:$0xff] %vm3493_vm4, %v3294_v53 }
 0x43c   : > { %3924 = vrot.lane.b32.xlu1 %v8625_v50, %s9496_s12  ;;  %3922 = vrot.lane.b32.xlu0 %v8624_v51, %s9496_s12  ;;  %v8649_v50 = vld [vmem:[%s9554_s30 + $0x27a] sm:$0xff]  ;;  %v8648_v51 = vld [vmem:[%s9554_s30 + $0x272] sm:$0xff] }
 0x43e   : > { %v3300_v56 = vpop.permute.xlu1 %3299  ;;  %v3298_v57 = vpop.permute.xlu0 %3297 }
 0x43f   : > { %3589 = vst.msk [vmem:[#allocation2 + $0x2f8] sm:$0xff] %vm3493_vm4, %v3300_v56  ;;  %3588 = vst.msk [vmem:[#allocation2 + $0x2f0] sm:$0xff] %vm3493_vm4, %v3298_v57 }
 0x440   : > { %3928 = vrot.lane.b32.xlu1 %v8627_v54, %s9496_s12  ;;  %3926 = vrot.lane.b32.xlu0 %v8626_v55, %s9496_s12  ;;  %v8651_v54 = vld [vmem:[%s9554_s30 + $0x292] sm:$0xff]  ;;  %v8650_v55 = vld [vmem:[%s9554_s30 + $0x28a] sm:$0xff] }
 0x442   : > { %v3304_v60 = vpop.permute.xlu1 %3303  ;;  %v3302_v61 = vpop.permute.xlu0 %3301 }
 0x443   : > { %3591 = vst.msk [vmem:[#allocation2 + $0x308] sm:$0xff] %vm3493_vm4, %v3304_v60  ;;  %3590 = vst.msk [vmem:[#allocation2 + $0x300] sm:$0xff] %vm3493_vm4, %v3302_v61 }
 0x444   : > { %3932 = vrot.lane.b32.xlu1 %v8629_v58, %s9496_s12  ;;  %3930 = vrot.lane.b32.xlu0 %v8628_v59, %s9496_s12  ;;  %v8653_v58 = vld [vmem:[%s9554_s30 + $0x2aa] sm:$0xff]  ;;  %v8652_v59 = vld [vmem:[%s9554_s30 + $0x2a2] sm:$0xff] }
 0x446   : > { %v3308_v0 = vpop.permute.xlu1 %3307  ;;  %v3306_v1 = vpop.permute.xlu0 %3305 }
 0x447   : > { %3593 = vst.msk [vmem:[#allocation2 + $0x318] sm:$0xff] %vm3493_vm4, %v3308_v0  ;;  %3592 = vst.msk [vmem:[#allocation2 + $0x310] sm:$0xff] %vm3493_vm4, %v3306_v1 }
 0x448   : > { %3936 = vrot.lane.b32.xlu1 %v8631_v62, %s9496_s12  ;;  %3934 = vrot.lane.b32.xlu0 %v8630_v63, %s9496_s12  ;;  %v8655_v62 = vld [vmem:[%s9554_s30 + $0x2c2] sm:$0xff]  ;;  %v8654_v63 = vld [vmem:[%s9554_s30 + $0x2ba] sm:$0xff] }
 0x44a   : > { %v3312_v4 = vpop.permute.xlu1 %3311  ;;  %v3310_v5 = vpop.permute.xlu0 %3309 }
 0x44b   : > { %3595 = vst.msk [vmem:[#allocation2 + $0x328] sm:$0xff] %vm3493_vm4, %v3312_v4  ;;  %3594 = vst.msk [vmem:[#allocation2 + $0x320] sm:$0xff] %vm3493_vm4, %v3310_v5 }
 0x44c   : > { %3940 = vrot.lane.b32.xlu1 %v8633_v2, %s9496_s12  ;;  %3938 = vrot.lane.b32.xlu0 %v8632_v3, %s9496_s12  ;;  %v8657_v2 = vld [vmem:[%s9554_s30 + $0x2da] sm:$0xff]  ;;  %v8656_v3 = vld [vmem:[%s9554_s30 + $0x2d2] sm:$0xff] }
 0x44e   : > { %v3316_v8 = vpop.permute.xlu1 %3315  ;;  %v3314_v9 = vpop.permute.xlu0 %3313 }
 0x44f   : > { %3597 = vst.msk [vmem:[#allocation2 + $0x338] sm:$0xff] %vm3493_vm4, %v3316_v8  ;;  %3596 = vst.msk [vmem:[#allocation2 + $0x330] sm:$0xff] %vm3493_vm4, %v3314_v9 }
 0x450   : > { %3944 = vrot.lane.b32.xlu1 %v8635_v6, %s9496_s12  ;;  %3942 = vrot.lane.b32.xlu0 %v8634_v7, %s9496_s12  ;;  %v8659_v6 = vld [vmem:[%s9554_s30 + $0x2f2] sm:$0xff]  ;;  %v8658_v7 = vld [vmem:[%s9554_s30 + $0x2ea] sm:$0xff] }
 0x452   : > { %v3320_v16 = vpop.permute.xlu1 %3319  ;;  %v3318_v17 = vpop.permute.xlu0 %3317 }
 0x453   : > { %3599 = vst.msk [vmem:[#allocation2 + $0x348] sm:$0xff] %vm3493_vm4, %v3320_v16  ;;  %3598 = vst.msk [vmem:[#allocation2 + $0x340] sm:$0xff] %vm3493_vm4, %v3318_v17 }
 0x454   : > { %3948 = vrot.lane.b32.xlu1 %v8637_v12, %s9496_s12  ;;  %3946 = vrot.lane.b32.xlu0 %v8636_v13, %s9496_s12  ;;  %v8661_v12 = vld [vmem:[%s9554_s30 + $0x30a] sm:$0xff]  ;;  %v8660_v13 = vld [vmem:[%s9554_s30 + $0x302] sm:$0xff] }
 0x456   : > { %v3324_v24 = vpop.permute.xlu1 %3323  ;;  %v3322_v25 = vpop.permute.xlu0 %3321 }
 0x457   : > { %3601 = vst.msk [vmem:[#allocation2 + $0x358] sm:$0xff] %vm3493_vm4, %v3324_v24  ;;  %3600 = vst.msk [vmem:[#allocation2 + $0x350] sm:$0xff] %vm3493_vm4, %v3322_v25 }
 0x458   : > { %3952 = vrot.lane.b32.xlu1 %v8639_v20, %s9496_s12  ;;  %3950 = vrot.lane.b32.xlu0 %v8638_v21, %s9496_s12  ;;  %v8663_v20 = vld [vmem:[%s9554_s30 + $0x322] sm:$0xff]  ;;  %v8662_v21 = vld [vmem:[%s9554_s30 + $0x31a] sm:$0xff] }
 0x45a   : > { %v3328_v32 = vpop.permute.xlu1 %3327  ;;  %v3326_v33 = vpop.permute.xlu0 %3325 }
 0x45b   : > { %3603 = vst.msk [vmem:[#allocation2 + $0x368] sm:$0xff] %vm3493_vm4, %v3328_v32  ;;  %3602 = vst.msk [vmem:[#allocation2 + $0x360] sm:$0xff] %vm3493_vm4, %v3326_v33 }
 0x45c   : > { %3956 = vrot.lane.b32.xlu1 %v8641_v28, %s9496_s12  ;;  %3954 = vrot.lane.b32.xlu0 %v8640_v29, %s9496_s12  ;;  %v8665_v28 = vld [vmem:[%s9554_s30 + $0x33a] sm:$0xff]  ;;  %v8664_v29 = vld [vmem:[%s9554_s30 + $0x332] sm:$0xff] }
 0x45e   : > { %v3332_v40 = vpop.permute.xlu1 %3331  ;;  %v3330_v41 = vpop.permute.xlu0 %3329 }
 0x45f   : > { %3605 = vst.msk [vmem:[#allocation2 + $0x378] sm:$0xff] %vm3493_vm4, %v3332_v40  ;;  %3604 = vst.msk [vmem:[#allocation2 + $0x370] sm:$0xff] %vm3493_vm4, %v3330_v41 }
 0x460   : > { %3960 = vrot.lane.b32.xlu1 %v8643_v36, %s9496_s12  ;;  %3958 = vrot.lane.b32.xlu0 %v8642_v37, %s9496_s12  ;;  %v8667_v36 = vld [vmem:[%s9554_s30 + $0x382] sm:$0xff]  ;;  %v8666_v37 = vld [vmem:[%s9554_s30 + $0x37a] sm:$0xff] }
 0x462   : > { %v3336_v44 = vpop.permute.xlu1 %3335  ;;  %v3334_v45 = vpop.permute.xlu0 %3333 }
 0x463   : > { %3607 = vst.msk [vmem:[#allocation2 + $0x388] sm:$0xff] %vm3493_vm4, %v3336_v44  ;;  %3606 = vst.msk [vmem:[#allocation2 + $0x380] sm:$0xff] %vm3493_vm4, %v3334_v45 }
 0x464   : > { %3964 = vrot.lane.b32.xlu1 %v8645_v42, %s9496_s12  ;;  %3962 = vrot.lane.b32.xlu0 %v8644_v43, %s9496_s12  ;;  %v8669_v42 = vld [vmem:[%s9554_s30 + $0x39a] sm:$0xff]  ;;  %v8668_v43 = vld [vmem:[%s9554_s30 + $0x392] sm:$0xff] }
 0x466   : > { %v3340_v48 = vpop.permute.xlu1 %3339  ;;  %v3338_v49 = vpop.permute.xlu0 %3337 }
 0x467   : > { %3609 = vst.msk [vmem:[#allocation2 + $0x398] sm:$0xff] %vm3493_vm4, %v3340_v48  ;;  %3608 = vst.msk [vmem:[#allocation2 + $0x390] sm:$0xff] %vm3493_vm4, %v3338_v49 }
 0x468   : > { %3968 = vrot.lane.b32.xlu1 %v8647_v46, %s9496_s12  ;;  %3966 = vrot.lane.b32.xlu0 %v8646_v47, %s9496_s12  ;;  %v8671_v46 = vld [vmem:[%s9554_s30 + $0x3b2] sm:$0xff]  ;;  %v8670_v47 = vld [vmem:[%s9554_s30 + $0x3aa] sm:$0xff] }
 0x46a   : > { %v3344_v52 = vpop.permute.xlu1 %3343  ;;  %v3342_v53 = vpop.permute.xlu0 %3341 }
 0x46b   : > { %3611 = vst.msk [vmem:[#allocation2 + $0x3a8] sm:$0xff] %vm3493_vm4, %v3344_v52  ;;  %3610 = vst.msk [vmem:[#allocation2 + $0x3a0] sm:$0xff] %vm3493_vm4, %v3342_v53 }
 0x46c   : > { %3972 = vrot.lane.b32.xlu1 %v8649_v50, %s9496_s12  ;;  %3970 = vrot.lane.b32.xlu0 %v8648_v51, %s9496_s12  ;;  %v8673_v50 = vld [vmem:[%s9554_s30 + $0x3ca] sm:$0xff]  ;;  %v8672_v51 = vld [vmem:[%s9554_s30 + $0x3c2] sm:$0xff] }
 0x46e   : > { %v3348_v56 = vpop.permute.xlu1 %3347  ;;  %v3346_v57 = vpop.permute.xlu0 %3345 }
 0x46f   : > { %3613 = vst.msk [vmem:[#allocation2 + $0x3b8] sm:$0xff] %vm3493_vm4, %v3348_v56  ;;  %3612 = vst.msk [vmem:[#allocation2 + $0x3b0] sm:$0xff] %vm3493_vm4, %v3346_v57 }
 0x470   : > { %3976 = vrot.lane.b32.xlu1 %v8651_v54, %s9496_s12  ;;  %3974 = vrot.lane.b32.xlu0 %v8650_v55, %s9496_s12  ;;  %v8675_v54 = vld [vmem:[%s9554_s30 + $0x3e2] sm:$0xff]  ;;  %v8674_v55 = vld [vmem:[%s9554_s30 + $0x3da] sm:$0xff] }
 0x472   : > { %v3352_v60 = vpop.permute.xlu1 %3351  ;;  %v3350_v61 = vpop.permute.xlu0 %3349 }
 0x473   : > { %3615 = vst.msk [vmem:[#allocation2 + $0x3c8] sm:$0xff] %vm3493_vm4, %v3352_v60  ;;  %3614 = vst.msk [vmem:[#allocation2 + $0x3c0] sm:$0xff] %vm3493_vm4, %v3350_v61 }
 0x474   : > { %3980 = vrot.lane.b32.xlu1 %v8653_v58, %s9496_s12  ;;  %3978 = vrot.lane.b32.xlu0 %v8652_v59, %s9496_s12  ;;  %v8677_v58 = vld [vmem:[%s9554_s30 + $0x3fa] sm:$0xff]  ;;  %v8676_v59 = vld [vmem:[%s9554_s30 + $0x3f2] sm:$0xff] }
 0x476   : > { %v3356_v0 = vpop.permute.xlu1 %3355  ;;  %v3354_v1 = vpop.permute.xlu0 %3353 }
 0x477   : > { %3617 = vst.msk [vmem:[#allocation2 + $0x3d8] sm:$0xff] %vm3493_vm4, %v3356_v0  ;;  %3616 = vst.msk [vmem:[#allocation2 + $0x3d0] sm:$0xff] %vm3493_vm4, %v3354_v1 }
 0x478   : > { %3984 = vrot.lane.b32.xlu1 %v8655_v62, %s9496_s12  ;;  %3982 = vrot.lane.b32.xlu0 %v8654_v63, %s9496_s12  ;;  %v8679_v62 = vld [vmem:[%s9554_s30 + $0x412] sm:$0xff]  ;;  %v8678_v63 = vld [vmem:[%s9554_s30 + $0x40a] sm:$0xff] }
 0x47a   : > { %v3360_v4 = vpop.permute.xlu1 %3359  ;;  %v3358_v5 = vpop.permute.xlu0 %3357 }
 0x47b   : > { %3619 = vst.msk [vmem:[#allocation2 + $0x3e8] sm:$0xff] %vm3493_vm4, %v3360_v4  ;;  %3618 = vst.msk [vmem:[#allocation2 + $0x3e0] sm:$0xff] %vm3493_vm4, %v3358_v5 }
 0x47c   : > { %3988 = vrot.lane.b32.xlu1 %v8657_v2, %s9496_s12  ;;  %3986 = vrot.lane.b32.xlu0 %v8656_v3, %s9496_s12  ;;  %v8681_v2 = vld [vmem:[%s9554_s30 + $0x42a] sm:$0xff]  ;;  %v8680_v3 = vld [vmem:[%s9554_s30 + $0x422] sm:$0xff] }
 0x47e   : > { %v3364_v8 = vpop.permute.xlu1 %3363  ;;  %v3362_v9 = vpop.permute.xlu0 %3361 }
 0x47f   : > { %3621 = vst.msk [vmem:[#allocation2 + $0x3f8] sm:$0xff] %vm3493_vm4, %v3364_v8  ;;  %3620 = vst.msk [vmem:[#allocation2 + $0x3f0] sm:$0xff] %vm3493_vm4, %v3362_v9 }
 0x480   : > { %3992 = vrot.lane.b32.xlu1 %v8659_v6, %s9496_s12  ;;  %3990 = vrot.lane.b32.xlu0 %v8658_v7, %s9496_s12  ;;  %v8683_v6 = vld [vmem:[%s9554_s30 + $0x442] sm:$0xff]  ;;  %v8682_v7 = vld [vmem:[%s9554_s30 + $0x43a] sm:$0xff] }
 0x482   : > { %v3881_v16 = vpop.permute.xlu1 %3880  ;;  %v3879_v17 = vpop.permute.xlu0 %3878 }
 0x483   : > { %4264 = vst.msk [vmem:[#allocation2 + $0x8] sm:$0xff] %vm4262_vm5, %v3881_v16  ;;  %4263 = vst.msk [vmem:[#allocation2] sm:$0xff] %vm4262_vm5, %v3879_v17 }
 0x484   : > { %3996 = vrot.lane.b32.xlu1 %v8661_v12, %s9496_s12  ;;  %3994 = vrot.lane.b32.xlu0 %v8660_v13, %s9496_s12  ;;  %v8685_v12 = vld [vmem:[%s9554_s30 + $0x45a] sm:$0xff]  ;;  %v8684_v13 = vld [vmem:[%s9554_s30 + $0x452] sm:$0xff] }
 0x486   : > { %v3885_v24 = vpop.permute.xlu1 %3884  ;;  %v3883_v25 = vpop.permute.xlu0 %3882 }
 0x487   : > { %4266 = vst.msk [vmem:[#allocation2 + $0x18] sm:$0xff] %vm4262_vm5, %v3885_v24  ;;  %4265 = vst.msk [vmem:[#allocation2 + $0x10] sm:$0xff] %vm4262_vm5, %v3883_v25 }
 0x488   : > { %4000 = vrot.lane.b32.xlu1 %v8663_v20, %s9496_s12  ;;  %3998 = vrot.lane.b32.xlu0 %v8662_v21, %s9496_s12  ;;  %v8687_v20 = vld [vmem:[%s9554_s30 + $0x472] sm:$0xff]  ;;  %v8686_v21 = vld [vmem:[%s9554_s30 + $0x46a] sm:$0xff] }
 0x48a   : > { %v3889_v32 = vpop.permute.xlu1 %3888  ;;  %v3887_v33 = vpop.permute.xlu0 %3886 }
 0x48b   : > { %4268 = vst.msk [vmem:[#allocation2 + $0x28] sm:$0xff] %vm4262_vm5, %v3889_v32  ;;  %4267 = vst.msk [vmem:[#allocation2 + $0x20] sm:$0xff] %vm4262_vm5, %v3887_v33  ;;  %v8730_v32 = vld [vmem:[%s9554_s30 + $0x30] sm:$0xff] }
 0x48c   : > { %4004 = vrot.lane.b32.xlu1 %v8665_v28, %s9496_s12  ;;  %4002 = vrot.lane.b32.xlu0 %v8664_v29, %s9496_s12  ;;  %v9469_v28 = vld [vmem:[%s13536_s1 + $0x20] ss:$0 sps:$4 sm:$0xff]   ;;  %v8731_v29 = vld [vmem:[%s9554_s30 + $0x38] sm:$0xff] }
 0x48d   : > { %9450 = vmatprep.subr.msk.bf16.mxu0 %vm7127_vm6, %v9469_v28  ;;  %v7129_v33 = vsel %vm7127_vm6, %v9469_v28, 0  ;;  %9451 = vmatprep.subr.msk.bf16.mxu1 %vm7127_vm6, %v9469_v28 }
 0x48e   : > { %v3893_v40 = vpop.permute.xlu1 %3892  ;;  %v3891_v41 = vpop.permute.xlu0 %3890  ;;  %9281 = vmatpush3.bf16.msra.mxu0 %v7129_v33  ;;  %9445 = vmatpush3.bf16.msra.mxu1 %v7129_v33  ;;  %v8868_v33 = vld [vmem:[%s9554_s30 + $0xa9] sm:$0xff] }
 0x48f   : > { %4270 = vst.msk [vmem:[#allocation2 + $0x38] sm:$0xff] %vm4262_vm5, %v3893_v40  ;;  %4269 = vst.msk [vmem:[#allocation2 + $0x30] sm:$0xff] %vm4262_vm5, %v3891_v41  ;;  %v9470_v40 = vld [vmem:[%s13536_s1 + $0x18] sm:$0xff]   ;;  %v8733_v41 = vld [vmem:[%s9554_s30 + $0x50] sm:$0xff] }
 0x490   : > { %4008 = vrot.lane.b32.xlu1 %v8667_v36, %s9496_s12  ;;  %4006 = vrot.lane.b32.xlu0 %v8666_v37, %s9496_s12 }
 0x491   : > { %9282 = vmatprep.subr.bf16.mxu0 %v9470_v40  ;;  %9441 = vmatprep.subr.bf16.mxu1 %v9470_v40 }
 0x492   : > { %v3897_v44 = vpop.permute.xlu1 %3896  ;;  %v3895_v45 = vpop.permute.xlu0 %3894  ;;  %9283 = vmatpush3.bf16.msra.mxu0 %v9470_v40  ;;  %9446 = vmatpush3.bf16.msra.mxu1 %v9470_v40 }
 0x493   : > { %4272 = vst.msk [vmem:[#allocation2 + $0x48] sm:$0xff] %vm4262_vm5, %v3897_v44  ;;  %4271 = vst.msk [vmem:[#allocation2 + $0x40] sm:$0xff] %vm4262_vm5, %v3895_v45  ;;  %v9471_v45 = vld [vmem:[%s13536_s1 + $0x10] sm:$0xff]  }
 0x494   : > { %4012 = vrot.lane.b32.xlu1 %v8669_v42, %s9496_s12  ;;  %4010 = vrot.lane.b32.xlu0 %v8668_v43, %s9496_s12  ;;  %v8732_v42 = vld [vmem:[%s9554_s30 + $0x48] sm:$0xff] }
 0x495   : > { %9284 = vmatprep.subr.bf16.mxu0 %v9471_v45  ;;  %9442 = vmatprep.subr.bf16.mxu1 %v9471_v45 }
 0x496   : > { %v3901_v48 = vpop.permute.xlu1 %3900  ;;  %v3899_v49 = vpop.permute.xlu0 %3898  ;;  %9285 = vmatpush3.bf16.msra.mxu0 %v9471_v45  ;;  %9447 = vmatpush3.bf16.msra.mxu1 %v9471_v45 }
 0x497   : > { %4274 = vst.msk [vmem:[#allocation2 + $0x58] sm:$0xff] %vm4262_vm5, %v3901_v48  ;;  %4273 = vst.msk [vmem:[#allocation2 + $0x50] sm:$0xff] %vm4262_vm5, %v3899_v49 }
 0x498   : > { %4016 = vrot.lane.b32.xlu1 %v8671_v46, %s9496_s12  ;;  %4014 = vrot.lane.b32.xlu0 %v8670_v47, %s9496_s12  ;;  %v8859_v46 = vld [vmem:[%s9554_s30 + $0x39] sm:$0xff]  ;;  %v8858_v47 = vld [vmem:[%s9554_s30 + $0x31] sm:$0xff] }
 0x49a   : > { %v3905_v52 = vpop.permute.xlu1 %3904  ;;  %v3903_v53 = vpop.permute.xlu0 %3902 }
 0x49b   : > { %4276 = vst.msk [vmem:[#allocation2 + $0x68] sm:$0xff] %vm4262_vm5, %v3905_v52  ;;  %4275 = vst.msk [vmem:[#allocation2 + $0x60] sm:$0xff] %vm4262_vm5, %v3903_v53  ;;  %v8860_v52 = vld [vmem:[%s9554_s30 + $0x49] sm:$0xff] }
 0x49c   : > { %4020 = vrot.lane.b32.xlu1 %v8673_v50, %s9496_s12  ;;  %4018 = vrot.lane.b32.xlu0 %v8672_v51, %s9496_s12  ;;  %v9472_v50 = vld [vmem:[%s13536_s1 + $0x8] sm:$0xff]   ;;  %v8861_v51 = vld [vmem:[%s9554_s30 + $0x51] sm:$0xff] }
 0x49d   : > { %9286 = vmatprep.subr.bf16.mxu0 %v9472_v50  ;;  %9443 = vmatprep.subr.bf16.mxu1 %v9472_v50 }
 0x49e   : > { %v3909_v56 = vpop.permute.xlu1 %3908  ;;  %v3907_v57 = vpop.permute.xlu0 %3906  ;;  %9287 = vmatpush3.bf16.msra.mxu0 %v9472_v50  ;;  %9448 = vmatpush3.bf16.msra.mxu1 %v9472_v50 }
 0x49f   : > { %4278 = vst.msk [vmem:[#allocation2 + $0x78] sm:$0xff] %vm4262_vm5, %v3909_v56  ;;  %4277 = vst.msk [vmem:[#allocation2 + $0x70] sm:$0xff] %vm4262_vm5, %v3907_v57 }
 0x4a0   : > { %4024 = vrot.lane.b32.xlu1 %v8675_v54, %s9496_s12  ;;  %4022 = vrot.lane.b32.xlu0 %v8674_v55, %s9496_s12  ;;  %v9473_v55 = vld [vmem:[%s13536_s1] sm:$0xff]  }
 0x4a1   : > { %9288 = vmatprep.subr.bf16.mxu0 %v9473_v55  ;;  %9444 = vmatprep.subr.bf16.mxu1 %v9473_v55 }
 0x4a2   : > { %v3913_v60 = vpop.permute.xlu1 %3912  ;;  %v3911_v61 = vpop.permute.xlu0 %3910  ;;  %9289 = vmatpush3.bf16.msra.mxu0 %v9473_v55  ;;  %9449 = vmatpush3.bf16.msra.mxu1 %v9473_v55 }
 0x4a3   : > { %4280 = vst.msk [vmem:[#allocation2 + $0x88] sm:$0xff] %vm4262_vm5, %v3913_v60  ;;  %4279 = vst.msk [vmem:[#allocation2 + $0x80] sm:$0xff] %vm4262_vm5, %v3911_v61  ;;  %v8735_v60 = vld [vmem:[%s9554_s30 + $0x68] sm:$0xff] }
 0x4a4   : > { %4028 = vrot.lane.b32.xlu1 %v8677_v58, %s9496_s12  ;;  %4026 = vrot.lane.b32.xlu0 %v8676_v59, %s9496_s12 }
 0x4a6   : > { %v3917_v0 = vpop.permute.xlu1 %3916  ;;  %v3915_v1 = vpop.permute.xlu0 %3914 }
 0x4a7   : > { %4282 = vst.msk [vmem:[#allocation2 + $0x98] sm:$0xff] %vm4262_vm5, %v3917_v0  ;;  %4281 = vst.msk [vmem:[#allocation2 + $0x90] sm:$0xff] %vm4262_vm5, %v3915_v1  ;;  %v8863_v0 = vld [vmem:[%s9554_s30 + $0x69] sm:$0xff]  ;;  %v8862_v1 = vld [vmem:[%s9554_s30 + $0x61] sm:$0xff] }
 0x4a8   : > { %4032 = vrot.lane.b32.xlu1 %v8679_v62, %s9496_s12  ;;  %4030 = vrot.lane.b32.xlu0 %v8678_v63, %s9496_s12 }
 0x4aa   : > { %v3921_v4 = vpop.permute.xlu1 %3920  ;;  %v3919_v5 = vpop.permute.xlu0 %3918 }
 0x4ab   : > { %4284 = vst.msk [vmem:[#allocation2 + $0xa8] sm:$0xff] %vm4262_vm5, %v3921_v4  ;;  %4283 = vst.msk [vmem:[#allocation2 + $0xa0] sm:$0xff] %vm4262_vm5, %v3919_v5  ;;  %v8865_v4 = vld [vmem:[%s9554_s30 + $0x81] sm:$0xff]  ;;  %v8864_v5 = vld [vmem:[%s9554_s30 + $0x79] sm:$0xff] }
 0x4ac   : > { %4036 = vrot.lane.b32.xlu1 %v8681_v2, %s9496_s12  ;;  %4034 = vrot.lane.b32.xlu0 %v8680_v3, %s9496_s12 }
 0x4ae   : > { %v3925_v8 = vpop.permute.xlu1 %3924  ;;  %v3923_v9 = vpop.permute.xlu0 %3922 }
 0x4af   : > { %4286 = vst.msk [vmem:[#allocation2 + $0xb8] sm:$0xff] %vm4262_vm5, %v3925_v8  ;;  %4285 = vst.msk [vmem:[#allocation2 + $0xb0] sm:$0xff] %vm4262_vm5, %v3923_v9 }
 0x4b0   : > { %4040 = vrot.lane.b32.xlu1 %v8683_v6, %s9496_s12  ;;  %4038 = vrot.lane.b32.xlu0 %v8682_v7, %s9496_s12 }
 0x4b2   : > { %v3929_v16 = vpop.permute.xlu1 %3928  ;;  %v3927_v17 = vpop.permute.xlu0 %3926 }
 0x4b3   : > { %4288 = vst.msk [vmem:[#allocation2 + $0xc8] sm:$0xff] %vm4262_vm5, %v3929_v16  ;;  %4287 = vst.msk [vmem:[#allocation2 + $0xc0] sm:$0xff] %vm4262_vm5, %v3927_v17  ;;  %v8739_v16 = vld [vmem:[%s9554_s30 + $0x98] sm:$0xff] }
 0x4b4   : > { %4044 = vrot.lane.b32.xlu1 %v8685_v12, %s9496_s12  ;;  %4042 = vrot.lane.b32.xlu0 %v8684_v13, %s9496_s12 }
 0x4b6   : > { %v3933_v24 = vpop.permute.xlu1 %3932  ;;  %v3931_v25 = vpop.permute.xlu0 %3930 }
 0x4b7   : > { %4290 = vst.msk [vmem:[#allocation2 + $0xd8] sm:$0xff] %vm4262_vm5, %v3933_v24  ;;  %4289 = vst.msk [vmem:[#allocation2 + $0xd0] sm:$0xff] %vm4262_vm5, %v3931_v25  ;;  %v8867_v24 = vld [vmem:[%s9554_s30 + $0x99] sm:$0xff]  ;;  %v8866_v25 = vld [vmem:[%s9554_s30 + $0x91] sm:$0xff] }
 0x4b8   : > { %4048 = vrot.lane.b32.xlu1 %v8687_v20, %s9496_s12  ;;  %4046 = vrot.lane.b32.xlu0 %v8686_v21, %s9496_s12 }
 0x4ba   : > { %v3937_v36 = vpop.permute.xlu1 %3936  ;;  %v3935_v37 = vpop.permute.xlu0 %3934 }
 0x4bb   : > { %4292 = vst.msk [vmem:[#allocation2 + $0xe8] sm:$0xff] %vm4262_vm5, %v3937_v36  ;;  %4291 = vst.msk [vmem:[#allocation2 + $0xe0] sm:$0xff] %vm4262_vm5, %v3935_v37 }
 0x4bc   : > { %4650 = vrot.lane.b32.xlu1 %v8731_v29, %s9497_s17  ;;  %4648 = vrot.lane.b32.xlu0 %v8730_v32, %s9497_s17  ;;  %v8869_v32 = vld [vmem:[%s9554_s30 + $0xb1] sm:$0xff] }
 0x4be   : > { %v3941_v43 = vpop.permute.xlu1 %3940  ;;  %v3939_v44 = vpop.permute.xlu0 %3938 }
 0x4bf   : > { %4294 = vst.msk [vmem:[#allocation2 + $0xf8] sm:$0xff] %vm4262_vm5, %v3941_v43  ;;  %4293 = vst.msk [vmem:[#allocation2 + $0xf0] sm:$0xff] %vm4262_vm5, %v3939_v44  ;;  %v8743_v44 = vld [vmem:[%s9554_s30 + $0xc8] sm:$0xff] }
 0x4c0   : > { %4654 = vrot.lane.b32.xlu1 %v8733_v41, %s9497_s17  ;;  %4652 = vrot.lane.b32.xlu0 %v8732_v42, %s9497_s17 }
 0x4c2   : > { %v3945_v48 = vpop.permute.xlu1 %3944  ;;  %v3943_v49 = vpop.permute.xlu0 %3942 }
 0x4c3   : > { %4296 = vst.msk [vmem:[#allocation2 + $0x108] sm:$0xff] %vm4262_vm5, %v3945_v48  ;;  %4295 = vst.msk [vmem:[#allocation2 + $0x100] sm:$0xff] %vm4262_vm5, %v3943_v49  ;;  %v8871_v48 = vld [vmem:[%s9554_s30 + $0xc9] sm:$0xff]  ;;  %v8870_v49 = vld [vmem:[%s9554_s30 + $0xc1] sm:$0xff] }
 0x4c4   : > { %5419 = vrot.lane.b32.xlu1 %v8859_v46, %s9498_s22  ;;  %5417 = vrot.lane.b32.xlu0 %v8858_v47, %s9498_s22 }
 0x4c6   : > { %v3949_v53 = vpop.permute.xlu1 %3948  ;;  %v3947_v54 = vpop.permute.xlu0 %3946 }
 0x4c7   : > { %4298 = vst.msk [vmem:[#allocation2 + $0x118] sm:$0xff] %vm4262_vm5, %v3949_v53  ;;  %4297 = vst.msk [vmem:[#allocation2 + $0x110] sm:$0xff] %vm4262_vm5, %v3947_v54  ;;  %v8872_v53 = vld [vmem:[%s9554_s30 + $0xd9] sm:$0xff] }
 0x4c8   : > { %5423 = vrot.lane.b32.xlu1 %v8861_v51, %s9498_s22  ;;  %5421 = vrot.lane.b32.xlu0 %v8860_v52, %s9498_s22  ;;  %v8873_v52 = vld [vmem:[%s9554_s30 + $0xe1] sm:$0xff] }
 0x4ca   : > { %v3953_v56 = vpop.permute.xlu1 %3952  ;;  %v3951_v57 = vpop.permute.xlu0 %3950 }
 0x4cb   : > { %4300 = vst.msk [vmem:[#allocation2 + $0x128] sm:$0xff] %vm4262_vm5, %v3953_v56  ;;  %4299 = vst.msk [vmem:[#allocation2 + $0x120] sm:$0xff] %vm4262_vm5, %v3951_v57 }
 0x4cc   : > { %6188 = vrot.lane.b32.xlu1 %v11297_v10, %s9499_s27  ;;  %6186 = vrot.lane.b32.xlu0 %v11300_v11, %s9499_s27  ;;  %v8734_v10 = vld [vmem:[%s9554_s30 + $0x60] sm:$0xff] }
 0x4cd   : > { %v8737_v11 = vld [vmem:[%s9554_s30 + $0x80] sm:$0xff] }
 0x4ce   : > { %v3957_v58 = vpop.permute.xlu1 %3956  ;;  %v3955_v59 = vpop.permute.xlu0 %3954 }
 0x4cf   : > { %4302 = vst.msk [vmem:[#allocation2 + $0x138] sm:$0xff] %vm4262_vm5, %v3957_v58  ;;  %4301 = vst.msk [vmem:[#allocation2 + $0x130] sm:$0xff] %vm4262_vm5, %v3955_v59 }
 0x4d0   : > { %6192 = vrot.lane.b32.xlu1 %v11309_v14, %s9499_s27  ;;  %6190 = vrot.lane.b32.xlu0 %v11312_v15, %s9499_s27  ;;  %v8736_v14 = vld [vmem:[%s9554_s30 + $0x78] sm:$0xff] }
 0x4d2   : > { %v3961_v61 = vpop.permute.xlu1 %3960  ;;  %v3959_v62 = vpop.permute.xlu0 %3958 }
 0x4d3   : > { %4304 = vst.msk [vmem:[#allocation2 + $0x148] sm:$0xff] %vm4262_vm5, %v3961_v61  ;;  %4303 = vst.msk [vmem:[#allocation2 + $0x140] sm:$0xff] %vm4262_vm5, %v3959_v62 }
 0x4d4   : > { %4658 = vrot.lane.b32.xlu1 %v8735_v60, %s9497_s17  ;;  %4656 = vrot.lane.b32.xlu0 %v8734_v10, %s9497_s17  ;;  %v8747_v60 = vld [vmem:[%s9554_s30 + $0xf8] sm:$0xff] }
 0x4d6   : > { %v3965_v63 = vpop.permute.xlu1 %3964  ;;  %v3963_v15 = vpop.permute.xlu0 %3962 }
 0x4d7   : > { %4306 = vst.msk [vmem:[#allocation2 + $0x158] sm:$0xff] %vm4262_vm5, %v3965_v63  ;;  %4305 = vst.msk [vmem:[#allocation2 + $0x150] sm:$0xff] %vm4262_vm5, %v3963_v15 }
 0x4d8   : > { %4662 = vrot.lane.b32.xlu1 %v8737_v11, %s9497_s17  ;;  %4660 = vrot.lane.b32.xlu0 %v8736_v14, %s9497_s17  ;;  %v8875_v11 = vld [vmem:[%s9554_s30 + $0xf9] sm:$0xff]  ;;  %v8874_v14 = vld [vmem:[%s9554_s30 + $0xf1] sm:$0xff] }
 0x4da   : > { %v3969_v2 = vpop.permute.xlu1 %3968  ;;  %v3967_v3 = vpop.permute.xlu0 %3966 }
 0x4db   : > { %4308 = vst.msk [vmem:[#allocation2 + $0x168] sm:$0xff] %vm4262_vm5, %v3969_v2  ;;  %4307 = vst.msk [vmem:[#allocation2 + $0x160] sm:$0xff] %vm4262_vm5, %v3967_v3 }
 0x4dc   : > { %5427 = vrot.lane.b32.xlu1 %v8863_v0, %s9498_s22  ;;  %5425 = vrot.lane.b32.xlu0 %v8862_v1, %s9498_s22  ;;  %v8877_v0 = vld [vmem:[%s9554_s30 + $0x111] sm:$0xff]  ;;  %v8876_v1 = vld [vmem:[%s9554_s30 + $0x109] sm:$0xff] }
 0x4de   : > { %v3973_v6 = vpop.permute.xlu1 %3972  ;;  %v3971_v7 = vpop.permute.xlu0 %3970 }
 0x4df   : > { %4310 = vst.msk [vmem:[#allocation2 + $0x178] sm:$0xff] %vm4262_vm5, %v3973_v6  ;;  %4309 = vst.msk [vmem:[#allocation2 + $0x170] sm:$0xff] %vm4262_vm5, %v3971_v7  ;;  %v9477_v6 = vld [vmem:[%s9554_s30 + $0xfa] sm:$0xff]  ;;  %v9478_v7 = vld [vmem:[%s9554_s30 + $0xf2] sm:$0xff] }
 0x4e0   : > { %5431 = vrot.lane.b32.xlu1 %v8865_v4, %s9498_s22  ;;  %5429 = vrot.lane.b32.xlu0 %v8864_v5, %s9498_s22 }
 0x4e2   : > { %v3977_v8 = vpop.permute.xlu1 %3976  ;;  %v3975_v9 = vpop.permute.xlu0 %3974 }
 0x4e3   : > { %4312 = vst.msk [vmem:[#allocation2 + $0x188] sm:$0xff] %vm4262_vm5, %v3977_v8  ;;  %4311 = vst.msk [vmem:[#allocation2 + $0x180] sm:$0xff] %vm4262_vm5, %v3975_v9 }
 0x4e4   : > { %6196 = vrot.lane.b32.xlu1 %v11321_v18, %s9499_s27  ;;  %6194 = vrot.lane.b32.xlu0 %v11324_v19, %s9499_s27  ;;  %v8738_v18 = vld [vmem:[%s9554_s30 + $0x90] sm:$0xff] }
 0x4e5   : > { %v8741_v19 = vld [vmem:[%s9554_s30 + $0xb0] sm:$0xff] }
 0x4e6   : > { %v3981_v12 = vpop.permute.xlu1 %3980  ;;  %v3979_v13 = vpop.permute.xlu0 %3978 }
 0x4e7   : > { %4314 = vst.msk [vmem:[#allocation2 + $0x198] sm:$0xff] %vm4262_vm5, %v3981_v12  ;;  %4313 = vst.msk [vmem:[#allocation2 + $0x190] sm:$0xff] %vm4262_vm5, %v3979_v13  ;;  %v9479_v12 = vld [vmem:[%s9554_s30 + $0x112] sm:$0xff]  ;;  %v9480_v13 = vld [vmem:[%s9554_s30 + $0x10a] sm:$0xff] }
 0x4e8   : > { %6200 = vrot.lane.b32.xlu1 %v11333_v22, %s9499_s27  ;;  %6198 = vrot.lane.b32.xlu0 %v11336_v23, %s9499_s27  ;;  %v8740_v22 = vld [vmem:[%s9554_s30 + $0xa8] sm:$0xff] }
 0x4ea   : > { %v3985_v17 = vpop.permute.xlu1 %3984  ;;  %v3983_v20 = vpop.permute.xlu0 %3982 }
 0x4eb   : > { %4316 = vst.msk [vmem:[#allocation2 + $0x1a8] sm:$0xff] %vm4262_vm5, %v3985_v17  ;;  %4315 = vst.msk [vmem:[#allocation2 + $0x1a0] sm:$0xff] %vm4262_vm5, %v3983_v20 }
 0x4ec   : > { %4666 = vrot.lane.b32.xlu1 %v8739_v16, %s9497_s17  ;;  %4664 = vrot.lane.b32.xlu0 %v8738_v18, %s9497_s17  ;;  %v8751_v16 = vld [vmem:[%s9554_s30 + $0x128] sm:$0xff]  ;;  %v8750_v18 = vld [vmem:[%s9554_s30 + $0x120] sm:$0xff] }
 0x4ee   : > { %v3989_v21 = vpop.permute.xlu1 %3988  ;;  %v3987_v23 = vpop.permute.xlu0 %3986 }
 0x4ef   : > { %4318 = vst.msk [vmem:[#allocation2 + $0x1b8] sm:$0xff] %vm4262_vm5, %v3989_v21  ;;  %4317 = vst.msk [vmem:[#allocation2 + $0x1b0] sm:$0xff] %vm4262_vm5, %v3987_v23 }
 0x4f0   : > { %4670 = vrot.lane.b32.xlu1 %v8741_v19, %s9497_s17  ;;  %4668 = vrot.lane.b32.xlu0 %v8740_v22, %s9497_s17  ;;  %v8753_v19 = vld [vmem:[%s9554_s30 + $0x140] sm:$0xff]  ;;  %v8752_v22 = vld [vmem:[%s9554_s30 + $0x138] sm:$0xff] }
 0x4f2   : > { %v3993_v28 = vpop.permute.xlu1 %3992  ;;  %v3991_v29 = vpop.permute.xlu0 %3990 }
 0x4f3   : > { %4320 = vst.msk [vmem:[#allocation2 + $0x1c8] sm:$0xff] %vm4262_vm5, %v3993_v28  ;;  %4319 = vst.msk [vmem:[#allocation2 + $0x1c0] sm:$0xff] %vm4262_vm5, %v3991_v29 }
 0x4f4   : > { %5435 = vrot.lane.b32.xlu1 %v8867_v24, %s9498_s22  ;;  %5433 = vrot.lane.b32.xlu0 %v8866_v25, %s9498_s22  ;;  %v8879_v24 = vld [vmem:[%s9554_s30 + $0x129] sm:$0xff]  ;;  %v8878_v25 = vld [vmem:[%s9554_s30 + $0x121] sm:$0xff] }
 0x4f6   : > { %v3997_v36 = vpop.permute.xlu1 %3996  ;;  %v3995_v37 = vpop.permute.xlu0 %3994 }
 0x4f7   : > { %4322 = vst.msk [vmem:[#allocation2 + $0x1d8] sm:$0xff] %vm4262_vm5, %v3997_v36  ;;  %4321 = vst.msk [vmem:[#allocation2 + $0x1d0] sm:$0xff] %vm4262_vm5, %v3995_v37 }
 0x4f8   : > { %5439 = vrot.lane.b32.xlu1 %v8869_v32, %s9498_s22  ;;  %5437 = vrot.lane.b32.xlu0 %v8868_v33, %s9498_s22  ;;  %v8881_v32 = vld [vmem:[%s9554_s30 + $0x141] sm:$0xff]  ;;  %v8880_v33 = vld [vmem:[%s9554_s30 + $0x139] sm:$0xff] }
 0x4fa   : > { %v4001_v40 = vpop.permute.xlu1 %4000  ;;  %v3999_v41 = vpop.permute.xlu0 %3998 }
 0x4fb   : > { %4324 = vst.msk [vmem:[#allocation2 + $0x1e8] sm:$0xff] %vm4262_vm5, %v4001_v40  ;;  %4323 = vst.msk [vmem:[#allocation2 + $0x1e0] sm:$0xff] %vm4262_vm5, %v3999_v41  ;;  %v9007_v40 = vld [vmem:[%s9554_s30 + $0x12a] sm:$0xff]  ;;  %v9006_v41 = vld [vmem:[%s9554_s30 + $0x122] sm:$0xff] }
 0x4fc   : > { %6204 = vrot.lane.b32.xlu1 %v11345_v26, %s9499_s27  ;;  %6202 = vrot.lane.b32.xlu0 %v11348_v27, %s9499_s27  ;;  %v8742_v26 = vld [vmem:[%s9554_s30 + $0xc0] sm:$0xff] }
 0x4fd   : > { %v8745_v27 = vld [vmem:[%s9554_s30 + $0xe0] sm:$0xff] }
 0x4fe   : > { %v4005_v42 = vpop.permute.xlu1 %4004  ;;  %v4003_v43 = vpop.permute.xlu0 %4002 }
 0x4ff   : > { %4326 = vst.msk [vmem:[#allocation2 + $0x1f8] sm:$0xff] %vm4262_vm5, %v4005_v42  ;;  %4325 = vst.msk [vmem:[#allocation2 + $0x1f0] sm:$0xff] %vm4262_vm5, %v4003_v43 }
 0x500   : > { %6208 = vrot.lane.b32.xlu1 %v11357_v30, %s9499_s27  ;;  %6206 = vrot.lane.b32.xlu0 %v11360_v31, %s9499_s27  ;;  %v8744_v30 = vld [vmem:[%s9554_s30 + $0xd8] sm:$0xff] }
 0x502   : > { %v4009_v45 = vpop.permute.xlu1 %4008  ;;  %v4007_v46 = vpop.permute.xlu0 %4006 }
 0x503   : > { %4328 = vst.msk [vmem:[#allocation2 + $0x208] sm:$0xff] %vm4262_vm5, %v4009_v45  ;;  %4327 = vst.msk [vmem:[#allocation2 + $0x200] sm:$0xff] %vm4262_vm5, %v4007_v46 }
 0x504   : > { %4674 = vrot.lane.b32.xlu1 %v8743_v44, %s9497_s17  ;;  %4672 = vrot.lane.b32.xlu0 %v8742_v26, %s9497_s17  ;;  %v9009_v44 = vld [vmem:[%s9554_s30 + $0x142] sm:$0xff]  ;;  %v9008_v26 = vld [vmem:[%s9554_s30 + $0x13a] sm:$0xff] }
 0x506   : > { %v4013_v47 = vpop.permute.xlu1 %4012  ;;  %v4011_v31 = vpop.permute.xlu0 %4010 }
 0x507   : > { %4330 = vst.msk [vmem:[#allocation2 + $0x218] sm:$0xff] %vm4262_vm5, %v4013_v47  ;;  %4329 = vst.msk [vmem:[#allocation2 + $0x210] sm:$0xff] %vm4262_vm5, %v4011_v31  ;;  %v8755_v31 = vld [vmem:[%s9554_s30 + $0x158] sm:$0xff] }
 0x508   : > { %4678 = vrot.lane.b32.xlu1 %v8745_v27, %s9497_s17  ;;  %4676 = vrot.lane.b32.xlu0 %v8744_v30, %s9497_s17 }
 0x50a   : > { %v4017_v50 = vpop.permute.xlu1 %4016  ;;  %v4015_v51 = vpop.permute.xlu0 %4014 }
 0x50b   : > { %4332 = vst.msk [vmem:[#allocation2 + $0x228] sm:$0xff] %vm4262_vm5, %v4017_v50  ;;  %4331 = vst.msk [vmem:[#allocation2 + $0x220] sm:$0xff] %vm4262_vm5, %v4015_v51 }
 0x50c   : > { %5443 = vrot.lane.b32.xlu1 %v8871_v48, %s9498_s22  ;;  %5441 = vrot.lane.b32.xlu0 %v8870_v49, %s9498_s22  ;;  %v8754_v48 = vld [vmem:[%s9554_s30 + $0x150] sm:$0xff] }
 0x50e   : > { %v4021_v54 = vpop.permute.xlu1 %4020  ;;  %v4019_v55 = vpop.permute.xlu0 %4018 }
 0x50f   : > { %4334 = vst.msk [vmem:[#allocation2 + $0x238] sm:$0xff] %vm4262_vm5, %v4021_v54  ;;  %4333 = vst.msk [vmem:[#allocation2 + $0x230] sm:$0xff] %vm4262_vm5, %v4019_v55  ;;  %v8757_v54 = vld [vmem:[%s9554_s30 + $0x170] sm:$0xff]  ;;  %v8756_v55 = vld [vmem:[%s9554_s30 + $0x168] sm:$0xff] }
 0x510   : > { %5447 = vrot.lane.b32.xlu1 %v8873_v52, %s9498_s22  ;;  %5445 = vrot.lane.b32.xlu0 %v8872_v53, %s9498_s22 }
 0x512   : > { %v4025_v56 = vpop.permute.xlu1 %4024  ;;  %v4023_v57 = vpop.permute.xlu0 %4022 }
 0x513   : > { %4336 = vst.msk [vmem:[#allocation2 + $0x248] sm:$0xff] %vm4262_vm5, %v4025_v56  ;;  %4335 = vst.msk [vmem:[#allocation2 + $0x240] sm:$0xff] %vm4262_vm5, %v4023_v57 }
 0x514   : > { %6212 = vrot.lane.b32.xlu1 %v11369_v34, %s9499_s27  ;;  %6210 = vrot.lane.b32.xlu0 %v11372_v35, %s9499_s27  ;;  %v8746_v34 = vld [vmem:[%s9554_s30 + $0xf0] sm:$0xff] }
 0x515   : > { %v8749_v35 = vld [vmem:[%s9554_s30 + $0x110] sm:$0xff] }
 0x516   : > { %v4029_v58 = vpop.permute.xlu1 %4028  ;;  %v4027_v59 = vpop.permute.xlu0 %4026 }
 0x517   : > { %4338 = vst.msk [vmem:[#allocation2 + $0x258] sm:$0xff] %vm4262_vm5, %v4029_v58  ;;  %4337 = vst.msk [vmem:[#allocation2 + $0x250] sm:$0xff] %vm4262_vm5, %v4027_v59  ;;  %v8883_v58 = vld [vmem:[%s9554_s30 + $0x159] sm:$0xff]  ;;  %v8882_v59 = vld [vmem:[%s9554_s30 + $0x151] sm:$0xff] }
 0x518   : > { %6216 = vrot.lane.b32.xlu1 %v11381_v38, %s9499_s27  ;;  %6214 = vrot.lane.b32.xlu0 %v11384_v39, %s9499_s27  ;;  %v8748_v38 = vld [vmem:[%s9554_s30 + $0x108] sm:$0xff] }
 0x51a   : > { %v4033_v10 = vpop.permute.xlu1 %4032  ;;  %v4031_v61 = vpop.permute.xlu0 %4030 }
 0x51b   : > { %4340 = vst.msk [vmem:[#allocation2 + $0x268] sm:$0xff] %vm4262_vm5, %v4033_v10  ;;  %4339 = vst.msk [vmem:[#allocation2 + $0x260] sm:$0xff] %vm4262_vm5, %v4031_v61  ;;  %v8885_v10 = vld [vmem:[%s9554_s30 + $0x171] sm:$0xff]  ;;  %v8884_v61 = vld [vmem:[%s9554_s30 + $0x169] sm:$0xff] }
 0x51c   : > { %4682 = vrot.lane.b32.xlu1 %v8747_v60, %s9497_s17  ;;  %4680 = vrot.lane.b32.xlu0 %v8746_v34, %s9497_s17 }
 0x51e   : > { %v4037_v62 = vpop.permute.xlu1 %4036  ;;  %v4035_v39 = vpop.permute.xlu0 %4034 }
 0x51f   : > { %4342 = vst.msk [vmem:[#allocation2 + $0x278] sm:$0xff] %vm4262_vm5, %v4037_v62  ;;  %4341 = vst.msk [vmem:[#allocation2 + $0x270] sm:$0xff] %vm4262_vm5, %v4035_v39  ;;  %v9011_v62 = vld [vmem:[%s9554_s30 + $0x15a] sm:$0xff]  ;;  %v9010_v39 = vld [vmem:[%s9554_s30 + $0x152] sm:$0xff] }
 0x520   : > { %4686 = vrot.lane.b32.xlu1 %v8749_v35, %s9497_s17  ;;  %4684 = vrot.lane.b32.xlu0 %v8748_v38, %s9497_s17 }
 0x522   : > { %v4041_v63 = vpop.permute.xlu1 %4040  ;;  %v4039_v15 = vpop.permute.xlu0 %4038 }
 0x523   : > { %4344 = vst.msk [vmem:[#allocation2 + $0x288] sm:$0xff] %vm4262_vm5, %v4041_v63  ;;  %4343 = vst.msk [vmem:[#allocation2 + $0x280] sm:$0xff] %vm4262_vm5, %v4039_v15  ;;  %v9013_v63 = vld [vmem:[%s9554_s30 + $0x172] sm:$0xff]  ;;  %v9012_v15 = vld [vmem:[%s9554_s30 + $0x16a] sm:$0xff] }
 0x524   : > { %5451 = vrot.lane.b32.xlu1 %v8875_v11, %s9498_s22  ;;  %5449 = vrot.lane.b32.xlu0 %v8874_v14, %s9498_s22 }
 0x526   : > { %v4045_v2 = vpop.permute.xlu1 %4044  ;;  %v4043_v3 = vpop.permute.xlu0 %4042 }
 0x527   : > { %4346 = vst.msk [vmem:[#allocation2 + $0x298] sm:$0xff] %vm4262_vm5, %v4045_v2  ;;  %4345 = vst.msk [vmem:[#allocation2 + $0x290] sm:$0xff] %vm4262_vm5, %v4043_v3 }
 0x528   : > { %5455 = vrot.lane.b32.xlu1 %v8877_v0, %s9498_s22  ;;  %5453 = vrot.lane.b32.xlu0 %v8876_v1, %s9498_s22 }
 0x52a   : > { %v4049_v4 = vpop.permute.xlu1 %4048  ;;  %v4047_v5 = vpop.permute.xlu0 %4046 }
 0x52b   : > { %4348 = vst.msk [vmem:[#allocation2 + $0x2a8] sm:$0xff] %vm4262_vm5, %v4049_v4  ;;  %4347 = vst.msk [vmem:[#allocation2 + $0x2a0] sm:$0xff] %vm4262_vm5, %v4047_v5  ;;  %v8759_v5 = vld [vmem:[%s9554_s30 + $0x188] sm:$0xff] }
 0x52c   : > { %6220 = vrot.lane.b32.xlu1 %v9477_v6, %s9499_s27  ;;  %6218 = vrot.lane.b32.xlu0 %v9478_v7, %s9499_s27  ;;  %v8758_v6 = vld [vmem:[%s9554_s30 + $0x180] sm:$0xff] }
 0x52e   : > { %v4651_v8 = vpop.permute.xlu1 %4650  ;;  %v4649_v9 = vpop.permute.xlu0 %4648 }
 0x52f   : > { %5034 = vst.msk [vmem:[#allocation2 + $0x8] sm:$0xff] %vm5032_vm7, %v4651_v8  ;;  %5033 = vst.msk [vmem:[#allocation2] sm:$0xff] %vm5032_vm7, %v4649_v9 }
 0x530   : > { %6224 = vrot.lane.b32.xlu1 %v9479_v12, %s9499_s27  ;;  %6222 = vrot.lane.b32.xlu0 %v9480_v13, %s9499_s27 }
 0x532   : > { %v4655_v17 = vpop.permute.xlu1 %4654  ;;  %v4653_v20 = vpop.permute.xlu0 %4652 }
 0x533   : > { %5036 = vst.msk [vmem:[#allocation2 + $0x18] sm:$0xff] %vm5032_vm7, %v4655_v17  ;;  %5035 = vst.msk [vmem:[#allocation2 + $0x10] sm:$0xff] %vm5032_vm7, %v4653_v20 }
 0x534   : > { %4690 = vrot.lane.b32.xlu1 %v8751_v16, %s9497_s17  ;;  %4688 = vrot.lane.b32.xlu0 %v8750_v18, %s9497_s17  ;;  %v8761_v16 = vld [vmem:[%s9554_s30 + $0x1a0] sm:$0xff]  ;;  %v8760_v18 = vld [vmem:[%s9554_s30 + $0x198] sm:$0xff] }
 0x536   : > { %v5420_v21 = vpop.permute.xlu1 %5419  ;;  %v5418_v23 = vpop.permute.xlu0 %5417 }
 0x537   : > { %5803 = vst.msk [vmem:[#allocation2 + $0x8] sm:$0xff] %vm5801_vm8, %v5420_v21  ;;  %5802 = vst.msk [vmem:[#allocation2] sm:$0xff] %vm5801_vm8, %v5418_v23 }
 0x538   : > { %4694 = vrot.lane.b32.xlu1 %v8753_v19, %s9497_s17  ;;  %4692 = vrot.lane.b32.xlu0 %v8752_v22, %s9497_s17  ;;  %v8803_v19 = vld [vmem:[%s9554_s30 + $0x3f8] sm:$0xff]  ;;  %v8802_v22 = vld [vmem:[%s9554_s30 + $0x3f0] sm:$0xff] }
 0x53a   : > { %v5424_v28 = vpop.permute.xlu1 %5423  ;;  %v5422_v29 = vpop.permute.xlu0 %5421 }
 0x53b   : > { %5805 = vst.msk [vmem:[#allocation2 + $0x18] sm:$0xff] %vm5801_vm8, %v5424_v28  ;;  %5804 = vst.msk [vmem:[#allocation2 + $0x10] sm:$0xff] %vm5801_vm8, %v5422_v29 }
 0x53c   : > { %5459 = vrot.lane.b32.xlu1 %v8879_v24, %s9498_s22  ;;  %5457 = vrot.lane.b32.xlu0 %v8878_v25, %s9498_s22  ;;  %v8887_v24 = vld [vmem:[%s9554_s30 + $0x189] sm:$0xff]  ;;  %v8886_v25 = vld [vmem:[%s9554_s30 + $0x181] sm:$0xff] }
 0x53e   : > { %v6189_v36 = vpop.permute.xlu1 %6188  ;;  %v6187_v37 = vpop.permute.xlu0 %6186 }
 0x53f   : > { %6572 = vst.msk [vmem:[#allocation2 + $0x8] sm:$0xff] %vm6570_vm9, %v6189_v36  ;;  %6571 = vst.msk [vmem:[#allocation2] sm:$0xff] %vm6570_vm9, %v6187_v37 }
 0x540   : > { %5463 = vrot.lane.b32.xlu1 %v8881_v32, %s9498_s22  ;;  %5461 = vrot.lane.b32.xlu0 %v8880_v33, %s9498_s22  ;;  %v8805_v32 = vld [vmem:[%s9554_s30 + $0x410] sm:$0xff]  ;;  %v8804_v33 = vld [vmem:[%s9554_s30 + $0x408] sm:$0xff] }
 0x542   : > { %v6193_v42 = vpop.permute.xlu1 %6192  ;;  %v6191_v43 = vpop.permute.xlu0 %6190 }
 0x543   : > { %6574 = vst.msk [vmem:[#allocation2 + $0x18] sm:$0xff] %vm6570_vm9, %v6193_v42  ;;  %6573 = vst.msk [vmem:[#allocation2 + $0x10] sm:$0xff] %vm6570_vm9, %v6191_v43 }
 0x544   : > { %6228 = vrot.lane.b32.xlu1 %v9007_v40, %s9499_s27  ;;  %6226 = vrot.lane.b32.xlu0 %v9006_v41, %s9499_s27  ;;  %v8889_v40 = vld [vmem:[%s9554_s30 + $0x1a1] sm:$0xff]  ;;  %v8888_v41 = vld [vmem:[%s9554_s30 + $0x199] sm:$0xff] }
 0x546   : > { %v4659_v45 = vpop.permute.xlu1 %4658  ;;  %v4657_v46 = vpop.permute.xlu0 %4656  ;;  %v6699_v27 = vld [vmem:[#allocation2] sm:$0xff]  ;;  %v6700_v30 = vld [vmem:[#allocation2 + $0x8] sm:$0xff] }
 0x547   : > { %5038 = vst.msk [vmem:[#allocation2 + $0x28] sm:$0xff] %vm5032_vm7, %v4659_v45  ;;  %5037 = vst.msk [vmem:[#allocation2 + $0x20] sm:$0xff] %vm5032_vm7, %v4657_v46  ;;  %v6827_v47 = vpack.c.bf16 %v6700_v30, %v6699_v27  ;;  %v8931_v46 = vld [vmem:[%s9554_s30 + $0x3f9] sm:$0xff]  ;;  %v8930_v27 = vld [vmem:[%s9554_s30 + $0x3f1] sm:$0xff] }
 0x548   : > { %6232 = vrot.lane.b32.xlu1 %v9009_v44, %s9499_s27  ;;  %6230 = vrot.lane.b32.xlu0 %v9008_v26, %s9499_s27 }
 0x549   : > { %9290 = vmatprep.mubr.msk.bf16.mxu0 %vm6934_vm10, %v6827_v47 }
 0x54a   : > { %v4663_v49 = vpop.permute.xlu1 %4662  ;;  %v4661_v50 = vpop.permute.xlu0 %4660  ;;  %v6701_v51 = vld [vmem:[#allocation2 + $0x10] sm:$0xff]  ;;  %v6702_v52 = vld [vmem:[#allocation2 + $0x18] sm:$0xff] }
 0x54b   : > { %5040 = vst.msk [vmem:[#allocation2 + $0x38] sm:$0xff] %vm5032_vm7, %v4663_v49  ;;  %5039 = vst.msk [vmem:[#allocation2 + $0x30] sm:$0xff] %vm5032_vm7, %v4661_v50  ;;  %v6828_v53 = vpack.c.bf16 %v6702_v52, %v6701_v51  ;;  %v9015_v50 = vld [vmem:[%s9554_s30 + $0x18a] sm:$0xff]  ;;  %v9014_v51 = vld [vmem:[%s9554_s30 + $0x182] sm:$0xff] }
 0x54c   : > { %4698 = vrot.lane.b32.xlu1 %v8755_v31, %s9497_s17  ;;  %4696 = vrot.lane.b32.xlu0 %v8754_v48, %s9497_s17 }
 0x54d   : > { %9291 = vmatmul.mubr.msk.bf16.vlgmr.msra.gmra.mxu0 %vm6934_vm10, %v6828_v53 }
 0x54e   : > { %v5428_v56 = vpop.permute.xlu1 %5427  ;;  %v5426_v57 = vpop.permute.xlu0 %5425 }
 0x54f   : > { %5807 = vst.msk [vmem:[#allocation2 + $0x28] sm:$0xff] %vm5801_vm8, %v5428_v56  ;;  %5806 = vst.msk [vmem:[#allocation2 + $0x20] sm:$0xff] %vm5801_vm8, %v5426_v57 }
 0x550   : > { %4702 = vrot.lane.b32.xlu1 %v8757_v54, %s9497_s17  ;;  %4700 = vrot.lane.b32.xlu0 %v8756_v55, %s9497_s17  ;;  %v8933_v54 = vld [vmem:[%s9554_s30 + $0x411] sm:$0xff]  ;;  %v8932_v55 = vld [vmem:[%s9554_s30 + $0x409] sm:$0xff] }
 0x552   : > { %v5432_v60 = vpop.permute.xlu1 %5431  ;;  %v5430_v34 = vpop.permute.xlu0 %5429 }
 0x553   : > { %5809 = vst.msk [vmem:[#allocation2 + $0x38] sm:$0xff] %vm5801_vm8, %v5432_v60  ;;  %5808 = vst.msk [vmem:[#allocation2 + $0x30] sm:$0xff] %vm5801_vm8, %v5430_v34 }
 0x554   : > { %5467 = vrot.lane.b32.xlu1 %v8883_v58, %s9498_s22  ;;  %5465 = vrot.lane.b32.xlu0 %v8882_v59, %s9498_s22  ;;  %v9017_v58 = vld [vmem:[%s9554_s30 + $0x1a2] sm:$0xff]  ;;  %v9016_v59 = vld [vmem:[%s9554_s30 + $0x19a] sm:$0xff] }
 0x556   : > { %v6197_v35 = vpop.permute.xlu1 %6196  ;;  %v6195_v38 = vpop.permute.xlu0 %6194 }
 0x557   : > { %6576 = vst.msk [vmem:[#allocation2 + $0x28] sm:$0xff] %vm6570_vm9, %v6197_v35  ;;  %6575 = vst.msk [vmem:[#allocation2 + $0x20] sm:$0xff] %vm6570_vm9, %v6195_v38 }
 0x558   : > { %5471 = vrot.lane.b32.xlu1 %v8885_v10, %s9498_s22  ;;  %5469 = vrot.lane.b32.xlu0 %v8884_v61, %s9498_s22  ;;  %v9059_v10 = vld [vmem:[%s9554_s30 + $0x3fa] sm:$0xff]  ;;  %v9058_v61 = vld [vmem:[%s9554_s30 + $0x3f2] sm:$0xff] }
 0x55a   : > { %v6201_v11 = vpop.permute.xlu1 %6200  ;;  %v6199_v14 = vpop.permute.xlu0 %6198 }
 0x55b   : > { %6578 = vst.msk [vmem:[#allocation2 + $0x38] sm:$0xff] %vm6570_vm9, %v6201_v11  ;;  %6577 = vst.msk [vmem:[#allocation2 + $0x30] sm:$0xff] %vm6570_vm9, %v6199_v14 }
 0x55c   : > { %6236 = vrot.lane.b32.xlu1 %v9011_v62, %s9499_s27  ;;  %6234 = vrot.lane.b32.xlu0 %v9010_v39, %s9499_s27  ;;  %v9061_v62 = vld [vmem:[%s9554_s30 + $0x412] sm:$0xff]  ;;  %v9060_v39 = vld [vmem:[%s9554_s30 + $0x40a] sm:$0xff] }
 0x55e   : > { %v4667_v0 = vpop.permute.xlu1 %4666  ;;  %v4665_v1 = vpop.permute.xlu0 %4664  ;;  %v6703_v2 = vld [vmem:[#allocation2 + $0x20] sm:$0xff]  ;;  %v6704_v3 = vld [vmem:[#allocation2 + $0x28] sm:$0xff] }
 0x55f   : > { %5042 = vst.msk [vmem:[#allocation2 + $0x48] sm:$0xff] %vm5032_vm7, %v4667_v0  ;;  %5041 = vst.msk [vmem:[#allocation2 + $0x40] sm:$0xff] %vm5032_vm7, %v4665_v1  ;;  %v6829_v4 = vpack.c.bf16 %v6704_v3, %v6703_v2  ;;  %v8763_v1 = vld [vmem:[%s9554_s30 + $0x1e8] sm:$0xff]  ;;  %v8762_v2 = vld [vmem:[%s9554_s30 + $0x1e0] sm:$0xff] }
 0x560   : > { %6240 = vrot.lane.b32.xlu1 %v9013_v63, %s9499_s27  ;;  %6238 = vrot.lane.b32.xlu0 %v9012_v15, %s9499_s27 }
 0x561   : > { %9294 = vmatprep.mubr.msk.bf16.mxu0 %vm6934_vm10, %v6829_v4 }
 0x562   : > { %v4671_v7 = vpop.permute.xlu1 %4670  ;;  %v4669_v8 = vpop.permute.xlu0 %4668  ;;  %v6705_v9 = vld [vmem:[#allocation2 + $0x30] sm:$0xff]  ;;  %v6706_v12 = vld [vmem:[#allocation2 + $0x38] sm:$0xff] }
 0x563   : > { %5044 = vst.msk [vmem:[#allocation2 + $0x58] sm:$0xff] %vm5032_vm7, %v4671_v7  ;;  %5043 = vst.msk [vmem:[#allocation2 + $0x50] sm:$0xff] %vm5032_vm7, %v4669_v8  ;;  %v6830_v13 = vpack.c.bf16 %v6706_v12, %v6705_v9  ;;  %v8765_v8 = vld [vmem:[%s9554_s30 + $0x200] sm:$0xff]  ;;  %v8764_v9 = vld [vmem:[%s9554_s30 + $0x1f8] sm:$0xff] }
 0x564   : > { %4706 = vrot.lane.b32.xlu1 %v8759_v5, %s9497_s17  ;;  %4704 = vrot.lane.b32.xlu0 %v8758_v6, %s9497_s17 }
 0x565   : > { %9295 = vmatmul.mubr.msk.bf16.gmra.mxu0 %vm6934_vm10, %v6830_v13 }
 0x566   : > { %v5436_v17 = vpop.permute.xlu1 %5435  ;;  %v5434_v20 = vpop.permute.xlu0 %5433 }
 0x567   : > { %5811 = vst.msk [vmem:[#allocation2 + $0x48] sm:$0xff] %vm5801_vm8, %v5436_v17  ;;  %5810 = vst.msk [vmem:[#allocation2 + $0x40] sm:$0xff] %vm5801_vm8, %v5434_v20 }
 0x568   : > { %4710 = vrot.lane.b32.xlu1 %v8761_v16, %s9497_s17  ;;  %4708 = vrot.lane.b32.xlu0 %v8760_v18, %s9497_s17  ;;  %v8807_v16 = vld [vmem:[%s9554_s30 + $0x428] sm:$0xff]  ;;  %v8806_v18 = vld [vmem:[%s9554_s30 + $0x420] sm:$0xff] }
 0x56a   : > { %v5440_v21 = vpop.permute.xlu1 %5439  ;;  %v5438_v23 = vpop.permute.xlu0 %5437 }
 0x56b   : > { %5813 = vst.msk [vmem:[#allocation2 + $0x58] sm:$0xff] %vm5801_vm8, %v5440_v21  ;;  %5812 = vst.msk [vmem:[#allocation2 + $0x50] sm:$0xff] %vm5801_vm8, %v5438_v23 }
 0x56c   : > { %4794 = vrot.lane.b32.xlu1 %v8803_v19, %s9497_s17  ;;  %4792 = vrot.lane.b32.xlu0 %v8802_v22, %s9497_s17  ;;  %v8891_v19 = vld [vmem:[%s9554_s30 + $0x1e9] sm:$0xff]  ;;  %v8890_v22 = vld [vmem:[%s9554_s30 + $0x1e1] sm:$0xff] }
 0x56e   : > { %v6205_v28 = vpop.permute.xlu1 %6204  ;;  %v6203_v29 = vpop.permute.xlu0 %6202 }
 0x56f   : > { %6580 = vst.msk [vmem:[#allocation2 + $0x48] sm:$0xff] %vm6570_vm9, %v6205_v28  ;;  %6579 = vst.msk [vmem:[#allocation2 + $0x40] sm:$0xff] %vm6570_vm9, %v6203_v29 }
 0x570   : > { %5475 = vrot.lane.b32.xlu1 %v8887_v24, %s9498_s22  ;;  %5473 = vrot.lane.b32.xlu0 %v8886_v25, %s9498_s22  ;;  %v8809_v24 = vld [vmem:[%s9554_s30 + $0x440] sm:$0xff]  ;;  %v8808_v25 = vld [vmem:[%s9554_s30 + $0x438] sm:$0xff] }
 0x572   : > { %v6209_v36 = vpop.permute.xlu1 %6208  ;;  %v6207_v37 = vpop.permute.xlu0 %6206 }
 0x573   : > { %6582 = vst.msk [vmem:[#allocation2 + $0x58] sm:$0xff] %vm6570_vm9, %v6209_v36  ;;  %6581 = vst.msk [vmem:[#allocation2 + $0x50] sm:$0xff] %vm6570_vm9, %v6207_v37 }
 0x574   : > { %4798 = vrot.lane.b32.xlu1 %v8805_v32, %s9497_s17  ;;  %4796 = vrot.lane.b32.xlu0 %v8804_v33, %s9497_s17  ;;  %v8893_v32 = vld [vmem:[%s9554_s30 + $0x201] sm:$0xff]  ;;  %v8892_v33 = vld [vmem:[%s9554_s30 + $0x1f9] sm:$0xff] }
 0x576   : > { %v4675_v42 = vpop.permute.xlu1 %4674  ;;  %v4673_v43 = vpop.permute.xlu0 %4672  ;;  %v6707_v44 = vld [vmem:[#allocation2 + $0x40] sm:$0xff]  ;;  %v6708_v26 = vld [vmem:[#allocation2 + $0x48] sm:$0xff] }
 0x577   : > { %5046 = vst.msk [vmem:[#allocation2 + $0x68] sm:$0xff] %vm5032_vm7, %v4675_v42  ;;  %5045 = vst.msk [vmem:[#allocation2 + $0x60] sm:$0xff] %vm5032_vm7, %v4673_v43  ;;  %v6831_v45 = vpack.c.bf16 %v6708_v26, %v6707_v44  ;;  %v8935_v43 = vld [vmem:[%s9554_s30 + $0x429] sm:$0xff]  ;;  %v8934_v44 = vld [vmem:[%s9554_s30 + $0x421] sm:$0xff] }
 0x578   : > { %5479 = vrot.lane.b32.xlu1 %v8889_v40, %s9498_s22  ;;  %5477 = vrot.lane.b32.xlu0 %v8888_v41, %s9498_s22 }
 0x579   : > { %9298 = vmatprep.mubr.msk.bf16.mxu0 %vm6934_vm10, %v6831_v45 }
 0x57a   : > { %v4679_v30 = vpop.permute.xlu1 %4678  ;;  %v4677_v47 = vpop.permute.xlu0 %4676  ;;  %v6709_v31 = vld [vmem:[#allocation2 + $0x50] sm:$0xff]  ;;  %v6710_v48 = vld [vmem:[#allocation2 + $0x58] sm:$0xff] }
 0x57b   : > { %5048 = vst.msk [vmem:[#allocation2 + $0x78] sm:$0xff] %vm5032_vm7, %v4679_v30  ;;  %5047 = vst.msk [vmem:[#allocation2 + $0x70] sm:$0xff] %vm5032_vm7, %v4677_v47  ;;  %v6832_v49 = vpack.c.bf16 %v6710_v48, %v6709_v31  ;;  %v9019_v47 = vld [vmem:[%s9554_s30 + $0x1ea] sm:$0xff]  ;;  %v9018_v31 = vld [vmem:[%s9554_s30 + $0x1e2] sm:$0xff] }
 0x57c   : > { %5563 = vrot.lane.b32.xlu1 %v8931_v46, %s9498_s22  ;;  %5561 = vrot.lane.b32.xlu0 %v8930_v27, %s9498_s22 }
 0x57d   : > { %9299 = vmatmul.mubr.msk.bf16.gmra.mxu0 %vm6934_vm10, %v6832_v49 }
 0x57e   : > { %v5444_v52 = vpop.permute.xlu1 %5443  ;;  %v5442_v53 = vpop.permute.xlu0 %5441 }
 0x57f   : > { %5815 = vst.msk [vmem:[#allocation2 + $0x68] sm:$0xff] %vm5801_vm8, %v5444_v52  ;;  %5814 = vst.msk [vmem:[#allocation2 + $0x60] sm:$0xff] %vm5801_vm8, %v5442_v53 }
 0x580   : > { %6244 = vrot.lane.b32.xlu1 %v9015_v50, %s9499_s27  ;;  %6242 = vrot.lane.b32.xlu0 %v9014_v51, %s9499_s27  ;;  %v8937_v50 = vld [vmem:[%s9554_s30 + $0x441] sm:$0xff]  ;;  %v8936_v51 = vld [vmem:[%s9554_s30 + $0x439] sm:$0xff] }
 0x582   : > { %v5448_v56 = vpop.permute.xlu1 %5447  ;;  %v5446_v57 = vpop.permute.xlu0 %5445 }
 0x583   : > { %5817 = vst.msk [vmem:[#allocation2 + $0x78] sm:$0xff] %vm5801_vm8, %v5448_v56  ;;  %5816 = vst.msk [vmem:[#allocation2 + $0x70] sm:$0xff] %vm5801_vm8, %v5446_v57 }
 0x584   : > { %5567 = vrot.lane.b32.xlu1 %v8933_v54, %s9498_s22  ;;  %5565 = vrot.lane.b32.xlu0 %v8932_v55, %s9498_s22  ;;  %v9021_v54 = vld [vmem:[%s9554_s30 + $0x202] sm:$0xff]  ;;  %v9020_v55 = vld [vmem:[%s9554_s30 + $0x1fa] sm:$0xff] }
 0x586   : > { %v6213_v60 = vpop.permute.xlu1 %6212  ;;  %v6211_v34 = vpop.permute.xlu0 %6210 }
 0x587   : > { %6584 = vst.msk [vmem:[#allocation2 + $0x68] sm:$0xff] %vm6570_vm9, %v6213_v60  ;;  %6583 = vst.msk [vmem:[#allocation2 + $0x60] sm:$0xff] %vm6570_vm9, %v6211_v34 }
 0x588   : > { %6248 = vrot.lane.b32.xlu1 %v9017_v58, %s9499_s27  ;;  %6246 = vrot.lane.b32.xlu0 %v9016_v59, %s9499_s27  ;;  %v9063_v58 = vld [vmem:[%s9554_s30 + $0x42a] sm:$0xff]  ;;  %v9062_v59 = vld [vmem:[%s9554_s30 + $0x422] sm:$0xff] }
 0x58a   : > { %v6217_v35 = vpop.permute.xlu1 %6216  ;;  %v6215_v38 = vpop.permute.xlu0 %6214 }
 0x58b   : > { %6586 = vst.msk [vmem:[#allocation2 + $0x78] sm:$0xff] %vm6570_vm9, %v6217_v35  ;;  %6585 = vst.msk [vmem:[#allocation2 + $0x70] sm:$0xff] %vm6570_vm9, %v6215_v38 }
 0x58c   : > { %6332 = vrot.lane.b32.xlu1 %v9059_v10, %s9499_s27  ;;  %6330 = vrot.lane.b32.xlu0 %v9058_v61, %s9499_s27  ;;  %v9065_v10 = vld [vmem:[%s9554_s30 + $0x442] sm:$0xff]  ;;  %v9064_v61 = vld [vmem:[%s9554_s30 + $0x43a] sm:$0xff] }
 0x58e   : > { %v4683_v11 = vpop.permute.xlu1 %4682  ;;  %v4681_v14 = vpop.permute.xlu0 %4680  ;;  %v6711_v63 = vld [vmem:[#allocation2 + $0x60] sm:$0xff]  ;;  %v6712_v15 = vld [vmem:[#allocation2 + $0x68] sm:$0xff] }
 0x58f   : > { %5050 = vst.msk [vmem:[#allocation2 + $0x88] sm:$0xff] %vm5032_vm7, %v4683_v11  ;;  %5049 = vst.msk [vmem:[#allocation2 + $0x80] sm:$0xff] %vm5032_vm7, %v4681_v14  ;;  %v6833_v0 = vpack.c.bf16 %v6712_v15, %v6711_v63  ;;  %v8767_v14 = vld [vmem:[%s9554_s30 + $0x218] sm:$0xff]  ;;  %v8766_v63 = vld [vmem:[%s9554_s30 + $0x210] sm:$0xff] }
 0x590   : > { %6336 = vrot.lane.b32.xlu1 %v9061_v62, %s9499_s27  ;;  %6334 = vrot.lane.b32.xlu0 %v9060_v39, %s9499_s27 }
 0x591   : > { %9302 = vmatprep.mubr.msk.bf16.mxu0 %vm6934_vm10, %v6833_v0 }
 0x592   : > { %v4687_v3 = vpop.permute.xlu1 %4686  ;;  %v4685_v4 = vpop.permute.xlu0 %4684  ;;  %v6713_v5 = vld [vmem:[#allocation2 + $0x70] sm:$0xff]  ;;  %v6714_v6 = vld [vmem:[#allocation2 + $0x78] sm:$0xff] }
 0x593   : > { %5052 = vst.msk [vmem:[#allocation2 + $0x98] sm:$0xff] %vm5032_vm7, %v4687_v3  ;;  %5051 = vst.msk [vmem:[#allocation2 + $0x90] sm:$0xff] %vm5032_vm7, %v4685_v4  ;;  %v6834_v7 = vpack.c.bf16 %v6714_v6, %v6713_v5  ;;  %v8769_v4 = vld [vmem:[%s9554_s30 + $0x230] sm:$0xff]  ;;  %v8768_v5 = vld [vmem:[%s9554_s30 + $0x228] sm:$0xff] }
 0x594   : > { %4714 = vrot.lane.b32.xlu1 %v8763_v1, %s9497_s17  ;;  %4712 = vrot.lane.b32.xlu0 %v8762_v2, %s9497_s17 }
 0x595   : > { %9303 = vmatmul.mubr.msk.bf16.gmra.mxu0 %vm6934_vm10, %v6834_v7 }
 0x596   : > { %v5452_v12 = vpop.permute.xlu1 %5451  ;;  %v5450_v13 = vpop.permute.xlu0 %5449 }
 0x597   : > { %5819 = vst.msk [vmem:[#allocation2 + $0x88] sm:$0xff] %vm5801_vm8, %v5452_v12  ;;  %5818 = vst.msk [vmem:[#allocation2 + $0x80] sm:$0xff] %vm5801_vm8, %v5450_v13 }
 0x598   : > { %4718 = vrot.lane.b32.xlu1 %v8765_v8, %s9497_s17  ;;  %4716 = vrot.lane.b32.xlu0 %v8764_v9, %s9497_s17  ;;  %v8811_v8 = vld [vmem:[%s9554_s30 + $0x458] sm:$0xff]  ;;  %v8810_v9 = vld [vmem:[%s9554_s30 + $0x450] sm:$0xff] }
 0x59a   : > { %v5456_v17 = vpop.permute.xlu1 %5455  ;;  %v5454_v20 = vpop.permute.xlu0 %5453 }
 0x59b   : > { %5821 = vst.msk [vmem:[#allocation2 + $0x98] sm:$0xff] %vm5801_vm8, %v5456_v17  ;;  %5820 = vst.msk [vmem:[#allocation2 + $0x90] sm:$0xff] %vm5801_vm8, %v5454_v20 }
 0x59c   : > { %4802 = vrot.lane.b32.xlu1 %v8807_v16, %s9497_s17  ;;  %4800 = vrot.lane.b32.xlu0 %v8806_v18, %s9497_s17  ;;  %v8895_v16 = vld [vmem:[%s9554_s30 + $0x219] sm:$0xff]  ;;  %v8894_v18 = vld [vmem:[%s9554_s30 + $0x211] sm:$0xff] }
 0x59e   : > { %v6221_v21 = vpop.permute.xlu1 %6220  ;;  %v6219_v23 = vpop.permute.xlu0 %6218 }
 0x59f   : > { %6588 = vst.msk [vmem:[#allocation2 + $0x88] sm:$0xff] %vm6570_vm9, %v6221_v21  ;;  %6587 = vst.msk [vmem:[#allocation2 + $0x80] sm:$0xff] %vm6570_vm9, %v6219_v23 }
 0x5a0   : > { %5483 = vrot.lane.b32.xlu1 %v8891_v19, %s9498_s22  ;;  %5481 = vrot.lane.b32.xlu0 %v8890_v22, %s9498_s22  ;;  %v8813_v19 = vld [vmem:[%s9554_s30 + $0x470] sm:$0xff]  ;;  %v8812_v22 = vld [vmem:[%s9554_s30 + $0x468] sm:$0xff] }
 0x5a2   : > { %v6225_v28 = vpop.permute.xlu1 %6224  ;;  %v6223_v29 = vpop.permute.xlu0 %6222 }
 0x5a3   : > { %6590 = vst.msk [vmem:[#allocation2 + $0x98] sm:$0xff] %vm6570_vm9, %v6225_v28  ;;  %6589 = vst.msk [vmem:[#allocation2 + $0x90] sm:$0xff] %vm6570_vm9, %v6223_v29 }
 0x5a4   : > { %4806 = vrot.lane.b32.xlu1 %v8809_v24, %s9497_s17  ;;  %4804 = vrot.lane.b32.xlu0 %v8808_v25, %s9497_s17  ;;  %v8897_v24 = vld [vmem:[%s9554_s30 + $0x231] sm:$0xff]  ;;  %v8896_v25 = vld [vmem:[%s9554_s30 + $0x229] sm:$0xff] }
 0x5a6   : > { %v4691_v36 = vpop.permute.xlu1 %4690  ;;  %v4689_v37 = vpop.permute.xlu0 %4688  ;;  %v6715_v40 = vld [vmem:[#allocation2 + $0x80] sm:$0xff]  ;;  %v6716_v41 = vld [vmem:[#allocation2 + $0x88] sm:$0xff] }
 0x5a7   : > { %5054 = vst.msk [vmem:[#allocation2 + $0xa8] sm:$0xff] %vm5032_vm7, %v4691_v36  ;;  %5053 = vst.msk [vmem:[#allocation2 + $0xa0] sm:$0xff] %vm5032_vm7, %v4689_v37  ;;  %v6835_v42 = vpack.c.bf16 %v6716_v41, %v6715_v40  ;;  %v8939_v37 = vld [vmem:[%s9554_s30 + $0x459] sm:$0xff]  ;;  %v8938_v40 = vld [vmem:[%s9554_s30 + $0x451] sm:$0xff] }
 0x5a8   : > { %5487 = vrot.lane.b32.xlu1 %v8893_v32, %s9498_s22  ;;  %5485 = vrot.lane.b32.xlu0 %v8892_v33, %s9498_s22 }
 0x5a9   : > { %9306 = vmatprep.mubr.msk.bf16.mxu0 %vm6934_vm10, %v6835_v42 }
 0x5aa   : > { %v4695_v26 = vpop.permute.xlu1 %4694  ;;  %v4693_v45 = vpop.permute.xlu0 %4692  ;;  %v6717_v46 = vld [vmem:[#allocation2 + $0x90] sm:$0xff]  ;;  %v6718_v27 = vld [vmem:[#allocation2 + $0x98] sm:$0xff] }
 0x5ab   : > { %5056 = vst.msk [vmem:[#allocation2 + $0xb8] sm:$0xff] %vm5032_vm7, %v4695_v26  ;;  %5055 = vst.msk [vmem:[#allocation2 + $0xb0] sm:$0xff] %vm5032_vm7, %v4693_v45  ;;  %v6836_v30 = vpack.c.bf16 %v6718_v27, %v6717_v46  ;;  %v9023_v45 = vld [vmem:[%s9554_s30 + $0x21a] sm:$0xff]  ;;  %v9022_v46 = vld [vmem:[%s9554_s30 + $0x212] sm:$0xff] }
 0x5ac   : > { %5571 = vrot.lane.b32.xlu1 %v8935_v43, %s9498_s22  ;;  %5569 = vrot.lane.b32.xlu0 %v8934_v44, %s9498_s22 }
 0x5ad   : > { %9307 = vmatmul.mubr.msk.bf16.gmra.mxu0 %vm6934_vm10, %v6836_v30 }
 0x5ae   : > { %v5460_v48 = vpop.permute.xlu1 %5459  ;;  %v5458_v49 = vpop.permute.xlu0 %5457 }
 0x5af   : > { %5823 = vst.msk [vmem:[#allocation2 + $0xa8] sm:$0xff] %vm5801_vm8, %v5460_v48  ;;  %5822 = vst.msk [vmem:[#allocation2 + $0xa0] sm:$0xff] %vm5801_vm8, %v5458_v49 }
 0x5b0   : > { %6252 = vrot.lane.b32.xlu1 %v9019_v47, %s9499_s27  ;;  %6250 = vrot.lane.b32.xlu0 %v9018_v31, %s9499_s27  ;;  %v8941_v47 = vld [vmem:[%s9554_s30 + $0x471] sm:$0xff]  ;;  %v8940_v31 = vld [vmem:[%s9554_s30 + $0x469] sm:$0xff] }
 0x5b2   : > { %v5464_v52 = vpop.permute.xlu1 %5463  ;;  %v5462_v53 = vpop.permute.xlu0 %5461 }
 0x5b3   : > { %5825 = vst.msk [vmem:[#allocation2 + $0xb8] sm:$0xff] %vm5801_vm8, %v5464_v52  ;;  %5824 = vst.msk [vmem:[#allocation2 + $0xb0] sm:$0xff] %vm5801_vm8, %v5462_v53 }
 0x5b4   : > { %5575 = vrot.lane.b32.xlu1 %v8937_v50, %s9498_s22  ;;  %5573 = vrot.lane.b32.xlu0 %v8936_v51, %s9498_s22  ;;  %v9025_v50 = vld [vmem:[%s9554_s30 + $0x232] sm:$0xff]  ;;  %v9024_v51 = vld [vmem:[%s9554_s30 + $0x22a] sm:$0xff] }
 0x5b6   : > { %v6229_v56 = vpop.permute.xlu1 %6228  ;;  %v6227_v57 = vpop.permute.xlu0 %6226 }
 0x5b7   : > { %6592 = vst.msk [vmem:[#allocation2 + $0xa8] sm:$0xff] %vm6570_vm9, %v6229_v56  ;;  %6591 = vst.msk [vmem:[#allocation2 + $0xa0] sm:$0xff] %vm6570_vm9, %v6227_v57 }
 0x5b8   : > { %6256 = vrot.lane.b32.xlu1 %v9021_v54, %s9499_s27  ;;  %6254 = vrot.lane.b32.xlu0 %v9020_v55, %s9499_s27  ;;  %v9067_v54 = vld [vmem:[%s9554_s30 + $0x45a] sm:$0xff]  ;;  %v9066_v55 = vld [vmem:[%s9554_s30 + $0x452] sm:$0xff] }
 0x5ba   : > { %v6233_v60 = vpop.permute.xlu1 %6232  ;;  %v6231_v34 = vpop.permute.xlu0 %6230 }
 0x5bb   : > { %6594 = vst.msk [vmem:[#allocation2 + $0xb8] sm:$0xff] %vm6570_vm9, %v6233_v60  ;;  %6593 = vst.msk [vmem:[#allocation2 + $0xb0] sm:$0xff] %vm6570_vm9, %v6231_v34 }
 0x5bc   : > { %6340 = vrot.lane.b32.xlu1 %v9063_v58, %s9499_s27  ;;  %6338 = vrot.lane.b32.xlu0 %v9062_v59, %s9499_s27  ;;  %v9069_v58 = vld [vmem:[%s9554_s30 + $0x472] sm:$0xff]  ;;  %v9068_v59 = vld [vmem:[%s9554_s30 + $0x46a] sm:$0xff] }
 0x5be   : > { %v4699_v35 = vpop.permute.xlu1 %4698  ;;  %v4697_v38 = vpop.permute.xlu0 %4696  ;;  %v6719_v62 = vld [vmem:[#allocation2 + $0xa0] sm:$0xff]  ;;  %v6720_v39 = vld [vmem:[#allocation2 + $0xa8] sm:$0xff] }
 0x5bf   : > { %5058 = vst.msk [vmem:[#allocation2 + $0xc8] sm:$0xff] %vm5032_vm7, %v4699_v35  ;;  %5057 = vst.msk [vmem:[#allocation2 + $0xc0] sm:$0xff] %vm5032_vm7, %v4697_v38  ;;  %v6837_v11 = vpack.c.bf16 %v6720_v39, %v6719_v62  ;;  %v12100_v62 = vld [vmem:[%s9554_s30 + $0x48a] sm:$0xff]  ;;  %v12103_v39 = vld [vmem:[%s9554_s30 + $0x482] sm:$0xff] }
 0x5c0   : > { %6344 = vrot.lane.b32.xlu1 %v9065_v10, %s9499_s27  ;;  %6342 = vrot.lane.b32.xlu0 %v9064_v61, %s9499_s27  ;;  %v8771_v10 = vld [vmem:[%s9554_s30 + $0x248] sm:$0xff]  ;;  %v8770_v61 = vld [vmem:[%s9554_s30 + $0x240] sm:$0xff] }
 0x5c1   : > { %9310 = vmatprep.mubr.msk.bf16.mxu0 %vm6934_vm10, %v6837_v11 }
 0x5c2   : > { %v4703_v15 = vpop.permute.xlu1 %4702  ;;  %v4701_v0 = vpop.permute.xlu0 %4700  ;;  %v6721_v1 = vld [vmem:[#allocation2 + $0xb0] sm:$0xff]  ;;  %v6722_v2 = vld [vmem:[#allocation2 + $0xb8] sm:$0xff] }
 0x5c3   : > { %5060 = vst.msk [vmem:[#allocation2 + $0xd8] sm:$0xff] %vm5032_vm7, %v4703_v15  ;;  %5059 = vst.msk [vmem:[#allocation2 + $0xd0] sm:$0xff] %vm5032_vm7, %v4701_v0  ;;  %v6838_v3 = vpack.c.bf16 %v6722_v2, %v6721_v1  ;;  %v8772_v15 = vld [vmem:[%s9554_s30 + $0x258] sm:$0xff] }
 0x5c4   : > { %4722 = vrot.lane.b32.xlu1 %v8767_v14, %s9497_s17  ;;  %4720 = vrot.lane.b32.xlu0 %v8766_v63, %s9497_s17  ;;  %v8773_v63 = vld [vmem:[%s9554_s30 + $0x260] sm:$0xff] }
 0x5c5   : > { %9311 = vmatmul.mubr.msk.bf16.gmra.mxu0 %vm6934_vm10, %v6838_v3 }
 0x5c6   : > { %v5468_v6 = vpop.permute.xlu1 %5467  ;;  %v5466_v7 = vpop.permute.xlu0 %5465 }
 0x5c7   : > { %5827 = vst.msk [vmem:[#allocation2 + $0xc8] sm:$0xff] %vm5801_vm8, %v5468_v6  ;;  %5826 = vst.msk [vmem:[#allocation2 + $0xc0] sm:$0xff] %vm5801_vm8, %v5466_v7  ;;  %v8814_v6 = vld [vmem:[%s9554_s30 + $0x480] sm:$0xff] }
 0x5c8   : > { %4726 = vrot.lane.b32.xlu1 %v8769_v4, %s9497_s17  ;;  %4724 = vrot.lane.b32.xlu0 %v8768_v5, %s9497_s17  ;;  %v8815_v5 = vld [vmem:[%s9554_s30 + $0x488] sm:$0xff] }
 0x5ca   : > { %v5472_v12 = vpop.permute.xlu1 %5471  ;;  %v5470_v13 = vpop.permute.xlu0 %5469 }
 0x5cb   : > { %5829 = vst.msk [vmem:[#allocation2 + $0xd8] sm:$0xff] %vm5801_vm8, %v5472_v12  ;;  %5828 = vst.msk [vmem:[#allocation2 + $0xd0] sm:$0xff] %vm5801_vm8, %v5470_v13  ;;  %v8898_v12 = vld [vmem:[%s9554_s30 + $0x241] sm:$0xff] }
 0x5cc   : > { %4810 = vrot.lane.b32.xlu1 %v8811_v8, %s9497_s17  ;;  %4808 = vrot.lane.b32.xlu0 %v8810_v9, %s9497_s17  ;;  %v8899_v9 = vld [vmem:[%s9554_s30 + $0x249] sm:$0xff] }
 0x5ce   : > { %v6237_v17 = vpop.permute.xlu1 %6236  ;;  %v6235_v20 = vpop.permute.xlu0 %6234 }
 0x5cf   : > { %6596 = vst.msk [vmem:[#allocation2 + $0xc8] sm:$0xff] %vm6570_vm9, %v6237_v17  ;;  %6595 = vst.msk [vmem:[#allocation2 + $0xc0] sm:$0xff] %vm6570_vm9, %v6235_v20 }
 0x5d0   : > { %5491 = vrot.lane.b32.xlu1 %v8895_v16, %s9498_s22  ;;  %5489 = vrot.lane.b32.xlu0 %v8894_v18, %s9498_s22 }
 0x5d2   : > { %v6241_v21 = vpop.permute.xlu1 %6240  ;;  %v6239_v23 = vpop.permute.xlu0 %6238 }
 0x5d3   : > { %6598 = vst.msk [vmem:[#allocation2 + $0xd8] sm:$0xff] %vm6570_vm9, %v6241_v21  ;;  %6597 = vst.msk [vmem:[#allocation2 + $0xd0] sm:$0xff] %vm6570_vm9, %v6239_v23 }
 0x5d4   : > { %4814 = vrot.lane.b32.xlu1 %v8813_v19, %s9497_s17  ;;  %4812 = vrot.lane.b32.xlu0 %v8812_v22, %s9497_s17  ;;  %v8817_v19 = vld [vmem:[%s9554_s30 + $0x4a0] sm:$0xff]  ;;  %v8816_v22 = vld [vmem:[%s9554_s30 + $0x498] sm:$0xff] }
 0x5d6   : > { %v4707_v28 = vpop.permute.xlu1 %4706  ;;  %v4705_v29 = vpop.permute.xlu0 %4704  ;;  %v6723_v32 = vld [vmem:[#allocation2 + $0xc0] sm:$0xff]  ;;  %v6724_v33 = vld [vmem:[#allocation2 + $0xc8] sm:$0xff] }
 0x5d7   : > { %5062 = vst.msk [vmem:[#allocation2 + $0xe8] sm:$0xff] %vm5032_vm7, %v4707_v28  ;;  %5061 = vst.msk [vmem:[#allocation2 + $0xe0] sm:$0xff] %vm5032_vm7, %v4705_v29  ;;  %v6839_v36 = vpack.c.bf16 %v6724_v33, %v6723_v32  ;;  %v8901_v29 = vld [vmem:[%s9554_s30 + $0x261] sm:$0xff]  ;;  %v8900_v32 = vld [vmem:[%s9554_s30 + $0x259] sm:$0xff] }
 0x5d8   : > { %5495 = vrot.lane.b32.xlu1 %v8897_v24, %s9498_s22  ;;  %5493 = vrot.lane.b32.xlu0 %v8896_v25, %s9498_s22 }
 0x5d9   : > { %9314 = vmatprep.mubr.msk.bf16.mxu0 %vm6934_vm10, %v6839_v36 }
 0x5da   : > { %v4711_v41 = vpop.permute.xlu1 %4710  ;;  %v4709_v42 = vpop.permute.xlu0 %4708  ;;  %v6725_v43 = vld [vmem:[#allocation2 + $0xd0] sm:$0xff]  ;;  %v6726_v44 = vld [vmem:[#allocation2 + $0xd8] sm:$0xff] }
 0x5db   : > { %5064 = vst.msk [vmem:[#allocation2 + $0xf8] sm:$0xff] %vm5032_vm7, %v4711_v41  ;;  %5063 = vst.msk [vmem:[#allocation2 + $0xf0] sm:$0xff] %vm5032_vm7, %v4709_v42  ;;  %v6840_v26 = vpack.c.bf16 %v6726_v44, %v6725_v43  ;;  %v12145_v41 = vld [vmem:[%s13537_s2] ss:$0 sm:$0xff]  ;;  %v8943_v44 = vld [vmem:[%s9554_s30 + $0x489] sm:$0xff] }
 0x5dc   : > { %5579 = vrot.lane.b32.xlu1 %v8939_v37, %s9498_s22  ;;  %5577 = vrot.lane.b32.xlu0 %v8938_v40, %s9498_s22 }
 0x5dd   : > { %9315 = vmatmul.mubr.msk.bf16.gmra.mxu0 %vm6934_vm10, %v6840_v26  ;;  %v8942_v26 = vld [vmem:[%s9554_s30 + $0x481] sm:$0xff] }
 0x5de   : > { %v4795_v27 = vpop.permute.xlu1 %4794  ;;  %v4793_v30 = vpop.permute.xlu0 %4792 }
 0x5df   : > { %5106 = vst.msk [vmem:[#allocation2 + $0x248] sm:$0xff] %vm5032_vm7, %v4795_v27  ;;  %5105 = vst.msk [vmem:[#allocation2 + $0x240] sm:$0xff] %vm5032_vm7, %v4793_v30 }
 0x5e0   : > { %6260 = vrot.lane.b32.xlu1 %v9023_v45, %s9499_s27  ;;  %6258 = vrot.lane.b32.xlu0 %v9022_v46, %s9499_s27 }
 0x5e2   : > { %v5476_v48 = vpop.permute.xlu1 %5475  ;;  %v5474_v49 = vpop.permute.xlu0 %5473 }
 0x5e3   : > { %5831 = vst.msk [vmem:[#allocation2 + $0xe8] sm:$0xff] %vm5801_vm8, %v5476_v48  ;;  %5830 = vst.msk [vmem:[#allocation2 + $0xe0] sm:$0xff] %vm5801_vm8, %v5474_v49  ;;  %v9027_v49 = vld [vmem:[%s9554_s30 + $0x24a] sm:$0xff] }
 0x5e4   : > { %5583 = vrot.lane.b32.xlu1 %v8941_v47, %s9498_s22  ;;  %5581 = vrot.lane.b32.xlu0 %v8940_v31, %s9498_s22 }
 0x5e6   : > { %v4799_v52 = vpop.permute.xlu1 %4798  ;;  %v4797_v53 = vpop.permute.xlu0 %4796 }
 0x5e7   : > { %5108 = vst.msk [vmem:[#allocation2 + $0x258] sm:$0xff] %vm5032_vm7, %v4799_v52  ;;  %5107 = vst.msk [vmem:[#allocation2 + $0x250] sm:$0xff] %vm5032_vm7, %v4797_v53 }
 0x5e8   : > { %6264 = vrot.lane.b32.xlu1 %v9025_v50, %s9499_s27  ;;  %6262 = vrot.lane.b32.xlu0 %v9024_v51, %s9499_s27  ;;  %v9026_v50 = vld [vmem:[%s9554_s30 + $0x242] sm:$0xff] }
 0x5ea   : > { %v5480_v56 = vpop.permute.xlu1 %5479  ;;  %v5478_v57 = vpop.permute.xlu0 %5477 }
 0x5eb   : > { %5833 = vst.msk [vmem:[#allocation2 + $0xf8] sm:$0xff] %vm5801_vm8, %v5480_v56  ;;  %5832 = vst.msk [vmem:[#allocation2 + $0xf0] sm:$0xff] %vm5801_vm8, %v5478_v57 }
 0x5ec   : > { %6348 = vrot.lane.b32.xlu1 %v9067_v54, %s9499_s27  ;;  %6346 = vrot.lane.b32.xlu0 %v9066_v55, %s9499_s27 }
 0x5ee   : > { %v5564_v60 = vpop.permute.xlu1 %5563  ;;  %v5562_v34 = vpop.permute.xlu0 %5561 }
 0x5ef   : > { %5875 = vst.msk [vmem:[#allocation2 + $0x248] sm:$0xff] %vm5801_vm8, %v5564_v60  ;;  %5874 = vst.msk [vmem:[#allocation2 + $0x240] sm:$0xff] %vm5801_vm8, %v5562_v34  ;;  %v8945_v34 = vld [vmem:[%s9554_s30 + $0x4a1] sm:$0xff] }
 0x5f0   : > { %6352 = vrot.lane.b32.xlu1 %v9069_v58, %s9499_s27  ;;  %6350 = vrot.lane.b32.xlu0 %v9068_v59, %s9499_s27 }
 0x5f2   : > { %v6245_v35 = vpop.permute.xlu1 %6244  ;;  %v6243_v38 = vpop.permute.xlu0 %6242 }
 0x5f3   : > { %6600 = vst.msk [vmem:[#allocation2 + $0xe8] sm:$0xff] %vm6570_vm9, %v6245_v35  ;;  %6599 = vst.msk [vmem:[#allocation2 + $0xe0] sm:$0xff] %vm6570_vm9, %v6243_v38 }
 0x5f4   : > { %4730 = vrot.lane.b32.xlu1 %v8771_v10, %s9497_s17  ;;  %4728 = vrot.lane.b32.xlu0 %v8770_v61, %s9497_s17  ;;  %v8944_v10 = vld [vmem:[%s9554_s30 + $0x499] sm:$0xff] }
 0x5f6   : > { %v5568_v11 = vpop.permute.xlu1 %5567  ;;  %v5566_v14 = vpop.permute.xlu0 %5565 }
 0x5f7   : > { %5877 = vst.msk [vmem:[#allocation2 + $0x258] sm:$0xff] %vm5801_vm8, %v5568_v11  ;;  %5876 = vst.msk [vmem:[#allocation2 + $0x250] sm:$0xff] %vm5801_vm8, %v5566_v14 }
 0x5f8   : > { %4052 = vrot.lane.b32.xlu1 %v12100_v62, %s9496_s12  ;;  %4050 = vrot.lane.b32.xlu0 %v12103_v39, %s9496_s12 }
 0x5fa   : > { %v6249_v0 = vpop.permute.xlu1 %6248  ;;  %v6247_v1 = vpop.permute.xlu0 %6246  ;;  %v6727_v2 = vld [vmem:[#allocation2 + $0xe0] sm:$0xff]  ;;  %v6728_v3 = vld [vmem:[#allocation2 + $0xe8] sm:$0xff] }
 0x5fb   : > { %6602 = vst.msk [vmem:[#allocation2 + $0xf8] sm:$0xff] %vm6570_vm9, %v6249_v0  ;;  %6601 = vst.msk [vmem:[#allocation2 + $0xf0] sm:$0xff] %vm6570_vm9, %v6247_v1  ;;  %v6841_v4 = vpack.c.bf16 %v6728_v3, %v6727_v2  ;;  %v9028_v0 = vld [vmem:[%s9554_s30 + $0x25a] sm:$0xff] }
 0x5fc   : > { %4734 = vrot.lane.b32.xlu1 %v8773_v63, %s9497_s17  ;;  %4732 = vrot.lane.b32.xlu0 %v8772_v15, %s9497_s17  ;;  %v9029_v15 = vld [vmem:[%s9554_s30 + $0x262] sm:$0xff] }
 0x5fd   : > { %9318 = vmatprep.mubr.msk.bf16.mxu0 %vm6934_vm10, %v6841_v4 }
 0x5fe   : > { %v6333_v7 = vpop.permute.xlu1 %6332  ;;  %v6331_v8 = vpop.permute.xlu0 %6330 }
 0x5ff   : > { %6644 = vst.msk [vmem:[#allocation2 + $0x248] sm:$0xff] %vm6570_vm9, %v6333_v7  ;;  %6643 = vst.msk [vmem:[#allocation2 + $0x240] sm:$0xff] %vm6570_vm9, %v6331_v8 }
 0x600   : > { %4818 = vrot.lane.b32.xlu1 %v8815_v5, %s9497_s17  ;;  %4816 = vrot.lane.b32.xlu0 %v8814_v6, %s9497_s17  ;;  %v9073_v5 = vld [vmem:[%s9554_s30 + $0x4a2] sm:$0xff]  ;;  %v9072_v6 = vld [vmem:[%s9554_s30 + $0x49a] sm:$0xff] }
 0x602   : > { %v6337_v13 = vpop.permute.xlu1 %6336  ;;  %v6335_v16 = vpop.permute.xlu0 %6334  ;;  %v6729_v18 = vld [vmem:[#allocation2 + $0xf0] sm:$0xff]  ;;  %v6730_v17 = vld [vmem:[#allocation2 + $0xf8] sm:$0xff] }
 0x603   : > { %6646 = vst.msk [vmem:[#allocation2 + $0x258] sm:$0xff] %vm6570_vm9, %v6337_v13  ;;  %6645 = vst.msk [vmem:[#allocation2 + $0x250] sm:$0xff] %vm6570_vm9, %v6335_v16  ;;  %v6842_v20 = vpack.c.bf16 %v6730_v17, %v6729_v18  ;;  %v8775_v17 = vld [vmem:[%s9554_s30 + $0x278] sm:$0xff] }
 0x604   : > { %5499 = vrot.lane.b32.xlu1 %v8899_v9, %s9498_s22  ;;  %5497 = vrot.lane.b32.xlu0 %v8898_v12, %s9498_s22 }
 0x605   : > { %9319 = vmatmul.mubr.msk.bf16.gmra.mxu0 %vm6934_vm10, %v6842_v20  ;;  %v8774_v20 = vld [vmem:[%s9554_s30 + $0x270] sm:$0xff] }
 0x606   : > { %v4715_v21 = vpop.permute.xlu1 %4714  ;;  %v4713_v23 = vpop.permute.xlu0 %4712  ;;  %v6771_v24 = vld [vmem:[#allocation2 + $0x240] sm:$0xff]  ;;  %v6772_v25 = vld [vmem:[#allocation2 + $0x248] sm:$0xff] }
 0x607   : > { %5066 = vst.msk [vmem:[#allocation2 + $0x108] sm:$0xff] %vm5032_vm7, %v4715_v21  ;;  %5065 = vst.msk [vmem:[#allocation2 + $0x100] sm:$0xff] %vm5032_vm7, %v4713_v23  ;;  %v6863_v28 = vpack.c.bf16 %v6772_v25, %v6771_v24 }
 0x608   : > { %4822 = vrot.lane.b32.xlu1 %v8817_v19, %s9497_s17  ;;  %4820 = vrot.lane.b32.xlu0 %v8816_v22, %s9497_s17 }
 0x609   : > { %9362 = vmatprep.mubr.msk.bf16.mxu1 %vm6934_vm10, %v6863_v28 }
 0x60a   : > { %v4719_v33 = vpop.permute.xlu1 %4718  ;;  %v4717_v36 = vpop.permute.xlu0 %4716  ;;  %v6773_v37 = vld [vmem:[#allocation2 + $0x250] sm:$0xff]  ;;  %v6774_v40 = vld [vmem:[#allocation2 + $0x258] sm:$0xff] }
 0x60b   : > { %5068 = vst.msk [vmem:[#allocation2 + $0x118] sm:$0xff] %vm5032_vm7, %v4719_v33  ;;  %5067 = vst.msk [vmem:[#allocation2 + $0x110] sm:$0xff] %vm5032_vm7, %v4717_v36  ;;  %v6864_v42 = vpack.c.bf16 %v6774_v40, %v6773_v37  ;;  %v12216_v40 = vld [vmem:[%s9554_s30 + $0x4ba] sm:$0xff] }
 0x60c   : > { %5503 = vrot.lane.b32.xlu1 %v8901_v29, %s9498_s22  ;;  %5501 = vrot.lane.b32.xlu0 %v8900_v32, %s9498_s22 }
 0x60d   : > { %v9292_v43 = vpop.f32.mrf.mxu0  ;;  %9363 = vmatmul.mubr.msk.bf16.vlgmr.msra.gmra.mxu1 %vm6934_vm10, %v6864_v42  ;;  %v12219_v42 = vld [vmem:[%s9554_s30 + $0x4b2] sm:$0xff] }
 0x60e   : > { %v7174_v45 = vadd.f32 %v9292_v43, %v12145_v41  ;;  %v4803_v46 = vpop.permute.xlu1 %4802  ;;  %v4801_v27 = vpop.permute.xlu0 %4800 }
 0x60f   : > { %5110 = vst.msk [vmem:[#allocation2 + $0x268] sm:$0xff] %vm5032_vm7, %v4803_v46  ;;  %5109 = vst.msk [vmem:[#allocation2 + $0x260] sm:$0xff] %vm5032_vm7, %v4801_v27  ;;  %v7165_v30 = vpop.f32.mrf.mxu0 }
 0x610   : > { %v7678_v47 = vmax.f32 %v7174_v45, 0.0  ;;  %v7166_v31 = vadd.f32 %v12145_v41, %v7165_v30  ;;  %5587 = vrot.lane.b32.xlu1 %v8943_v44, %s9498_s22  ;;  %5585 = vrot.lane.b32.xlu0 %v8942_v26, %s9498_s22 }
 0x611   : > { %v9293_v48 = vpop.f32.mrf.mxu0 }
 0x612   : > { %v7676_v51 = vmax.f32 %v7166_v31, 0.0  ;;  %v7177_v52 = vadd.f32 %v9293_v48, %v12145_v41  ;;  %v5484_v53 = vpop.permute.xlu1 %5483  ;;  %v5482_v54 = vpop.permute.xlu0 %5481  ;;  %v7806_v56 = vsel %vm7804_vm11, %v7678_v47, 0.0  ;;  %v8777_v31 = vld [vmem:[%s9554_s30 + $0x290] sm:$0xff]  ;;  %v8776_v48 = vld [vmem:[%s9554_s30 + $0x288] sm:$0xff] }
 0x613   : > { %5835 = vst.msk [vmem:[#allocation2 + $0x108] sm:$0xff] %vm5801_vm8, %v5484_v53  ;;  %5834 = vst.msk [vmem:[#allocation2 + $0x100] sm:$0xff] %vm5801_vm8, %v5482_v54  ;;  %v7168_v55 = vpop.f32.mrf.mxu0 }
 0x614   : > { %v7805_v57 = vsel %vm7804_vm11, %v7676_v51, 0.0  ;;  %v7679_v58 = vmax.f32 %v7177_v52, 0.0  ;;  %v7169_v59 = vadd.f32 %v12145_v41, %v7168_v55  ;;  %6268 = vrot.lane.b32.xlu1 %v9027_v49, %s9499_s27  ;;  %6266 = vrot.lane.b32.xlu0 %v9026_v50, %s9499_s27 }
 0x615   : > { %v12168_v60 = vadd.f32 %v7806_v56, %v7805_v57  ;;  %v8819_v56 = vld [vmem:[%s9554_s30 + $0x4b8] sm:$0xff]  ;;  %v8818_v57 = vld [vmem:[%s9554_s30 + $0x4b0] sm:$0xff] }
 0x616   : > { %v7677_v61 = vmax.f32 %v7169_v59, 0.0  ;;  %v4807_v35 = vpop.permute.xlu1 %4806  ;;  %v4805_v38 = vpop.permute.xlu0 %4804  ;;  %v7837_v11 = vsel %vm7804_vm11, %v7679_v58, 0.0 }
 0x617   : > { %5112 = vst.msk [vmem:[#allocation2 + $0x278] sm:$0xff] %vm5032_vm7, %v4807_v35  ;;  %5111 = vst.msk [vmem:[#allocation2 + $0x270] sm:$0xff] %vm5032_vm7, %v4805_v38  ;;  %v8902_v35 = vld [vmem:[%s9554_s30 + $0x271] sm:$0xff] }
 0x618   : > { %v7836_v14 = vsel %vm7804_vm11, %v7677_v61, 0.0  ;;  %5591 = vrot.lane.b32.xlu1 %v8945_v34, %s9498_s22  ;;  %5589 = vrot.lane.b32.xlu0 %v8944_v10, %s9498_s22  ;;  %v8903_v61 = vld [vmem:[%s9554_s30 + $0x279] sm:$0xff] }
 0x619   : > { %v12178_v63 = vadd.f32 %v7837_v11, %v7836_v14 }
 0x61a   : > { %v5488_v1 = vpop.permute.xlu1 %5487  ;;  %v5486_v2 = vpop.permute.xlu0 %5485 }
 0x61b   : > { %5837 = vst.msk [vmem:[#allocation2 + $0x118] sm:$0xff] %vm5801_vm8, %v5488_v1  ;;  %5836 = vst.msk [vmem:[#allocation2 + $0x110] sm:$0xff] %vm5801_vm8, %v5486_v2  ;;  %v8821_v1 = vld [vmem:[%s9554_s30 + $0x4d0] sm:$0xff]  ;;  %v8820_v2 = vld [vmem:[%s9554_s30 + $0x4c8] sm:$0xff] }
 0x61c   : > { %6272 = vrot.lane.b32.xlu1 %v9029_v15, %s9499_s27  ;;  %6270 = vrot.lane.b32.xlu0 %v9028_v0, %s9499_s27 }
 0x61e   : > { %v5572_v3 = vpop.permute.xlu1 %5571  ;;  %v5570_v4 = vpop.permute.xlu0 %5569 }
 0x61f   : > { %5879 = vst.msk [vmem:[#allocation2 + $0x268] sm:$0xff] %vm5801_vm8, %v5572_v3  ;;  %5878 = vst.msk [vmem:[#allocation2 + $0x260] sm:$0xff] %vm5801_vm8, %v5570_v4 }
 0x620   : > { %6356 = vrot.lane.b32.xlu1 %v12100_v62, %s9499_s27  ;;  %6354 = vrot.lane.b32.xlu0 %v12103_v39, %s9499_s27 }
 0x622   : > { %v6253_v7 = vpop.permute.xlu1 %6252  ;;  %v6251_v8 = vpop.permute.xlu0 %6250 }
 0x623   : > { %6604 = vst.msk [vmem:[#allocation2 + $0x108] sm:$0xff] %vm6570_vm9, %v6253_v7  ;;  %6603 = vst.msk [vmem:[#allocation2 + $0x100] sm:$0xff] %vm6570_vm9, %v6251_v8 }
 0x624   : > { %6360 = vrot.lane.b32.xlu1 %v9073_v5, %s9499_s27  ;;  %6358 = vrot.lane.b32.xlu0 %v9072_v6, %s9499_s27 }
 0x625   : > { %v9296_v9 = vpop.f32.mrf.mxu0 }
 0x626   : > { %v7190_v62 = vadd.f32 %v9296_v9, %v12145_v41  ;;  %v5576_v12 = vpop.permute.xlu1 %5575  ;;  %v5574_v13 = vpop.permute.xlu0 %5573  ;;  %v8905_v9 = vld [vmem:[%s9554_s30 + $0x291] sm:$0xff] }
 0x627   : > { %5881 = vst.msk [vmem:[#allocation2 + $0x278] sm:$0xff] %vm5801_vm8, %v5576_v12  ;;  %5880 = vst.msk [vmem:[#allocation2 + $0x270] sm:$0xff] %vm5801_vm8, %v5574_v13  ;;  %v7181_v39 = vpop.f32.mrf.mxu0 }
 0x628   : > { %v7182_v16 = vadd.f32 %v12145_v41, %v7181_v39  ;;  %4056 = vrot.lane.b32.xlu1 %v9073_v5, %s9496_s12  ;;  %4054 = vrot.lane.b32.xlu0 %v9072_v6, %s9496_s12  ;;  %v7682_v19 = vmax.f32 %v7190_v62, 0.0  ;;  %v8904_v62 = vld [vmem:[%s9554_s30 + $0x289] sm:$0xff] }
 0x629   : > { %v9297_v18 = vpop.f32.mrf.mxu0 }
 0x62a   : > { %v7680_v22 = vmax.f32 %v7182_v16, 0.0  ;;  %v7193_v21 = vadd.f32 %v9297_v18, %v12145_v41  ;;  %v6257_v23 = vpop.permute.xlu1 %6256  ;;  %v6255_v24 = vpop.permute.xlu0 %6254  ;;  %v6731_v25 = vld [vmem:[#allocation2 + $0x100] sm:$0xff]  ;;  %v6732_v28 = vld [vmem:[#allocation2 + $0x108] sm:$0xff]  ;;  %v7810_v43 = vsel %vm7804_vm11, %v7682_v19, 0.0 }
 0x62b   : > { %6606 = vst.msk [vmem:[#allocation2 + $0x118] sm:$0xff] %vm6570_vm9, %v6257_v23  ;;  %6605 = vst.msk [vmem:[#allocation2 + $0x110] sm:$0xff] %vm6570_vm9, %v6255_v24  ;;  %v7184_v29 = vpop.f32.mrf.mxu0  ;;  %v6843_v32 = vpack.c.bf16 %v6732_v28, %v6731_v25  ;;  %v8946_v23 = vld [vmem:[%s9554_s30 + $0x4b1] sm:$0xff] }
 0x62c   : > { %v7808_v33 = vsel %vm7804_vm11, %v7680_v22, 0.0  ;;  %v7185_v36 = vadd.f32 %v12145_v41, %v7184_v29  ;;  %4738 = vrot.lane.b32.xlu1 %v8775_v17, %s9497_s17  ;;  %4736 = vrot.lane.b32.xlu0 %v8774_v20, %s9497_s17  ;;  %v7683_v44 = vmax.f32 %v7193_v21, 0.0  ;;  %v8947_v21 = vld [vmem:[%s9554_s30 + $0x4b9] sm:$0xff] }
 0x62d   : > { %v7809_v37 = vadd.f32 %v7808_v33, %v12168_v60  ;;  %9322 = vmatprep.mubr.msk.bf16.mxu0 %vm6934_vm10, %v6843_v32 }
 0x62e   : > { %v7681_v26 = vmax.f32 %v7185_v36, 0.0  ;;  %v6341_v45 = vpop.permute.xlu1 %6340  ;;  %v6339_v46 = vpop.permute.xlu0 %6338  ;;  %v7841_v49 = vsel %vm7804_vm11, %v7683_v44, 0.0  ;;  %v9030_v44 = vld [vmem:[%s9554_s30 + $0x272] sm:$0xff] }
 0x62f   : > { %6648 = vst.msk [vmem:[#allocation2 + $0x268] sm:$0xff] %vm6570_vm9, %v6341_v45  ;;  %6647 = vst.msk [vmem:[#allocation2 + $0x260] sm:$0xff] %vm6570_vm9, %v6339_v46  ;;  %v12224_v27 = vadd.f32 %v7810_v43, %v7809_v37  ;;  %v9031_v43 = vld [vmem:[%s9554_s30 + $0x27a] sm:$0xff] }
 0x630   : > { %v7839_v30 = vsel %vm7804_vm11, %v7681_v26, 0.0  ;;  %4060 = vrot.lane.b32.xlu1 %v12216_v40, %s9496_s12  ;;  %4058 = vrot.lane.b32.xlu0 %v12219_v42, %s9496_s12 }
 0x631   : > { %v7840_v47 = vadd.f32 %v7839_v30, %v12178_v63  ;;  %v8949_v30 = vld [vmem:[%s9554_s30 + $0x4d1] sm:$0xff] }
 0x632   : > { %v6345_v50 = vpop.permute.xlu1 %6344  ;;  %v6343_v51 = vpop.permute.xlu0 %6342  ;;  %v6733_v52 = vld [vmem:[#allocation2 + $0x110] sm:$0xff]  ;;  %v6734_v53 = vld [vmem:[#allocation2 + $0x118] sm:$0xff] }
 0x633   : > { %6650 = vst.msk [vmem:[#allocation2 + $0x278] sm:$0xff] %vm6570_vm9, %v6345_v50  ;;  %6649 = vst.msk [vmem:[#allocation2 + $0x270] sm:$0xff] %vm6570_vm9, %v6343_v51  ;;  %v6844_v54 = vpack.c.bf16 %v6734_v53, %v6733_v52  ;;  %v12237_v55 = vadd.f32 %v7841_v49, %v7840_v47  ;;  %v8948_v47 = vld [vmem:[%s9554_s30 + $0x4c9] sm:$0xff]  ;;  %v9033_v49 = vld [vmem:[%s9554_s30 + $0x292] sm:$0xff] }
 0x634   : > { %4742 = vrot.lane.b32.xlu1 %v8777_v31, %s9497_s17  ;;  %4740 = vrot.lane.b32.xlu0 %v8776_v48, %s9497_s17  ;;  %v9032_v50 = vld [vmem:[%s9554_s30 + $0x28a] sm:$0xff] }
 0x635   : > { %9323 = vmatmul.mubr.msk.bf16.gmra.mxu0 %vm6934_vm10, %v6844_v54 }
 0x636   : > { %v4723_v58 = vpop.permute.xlu1 %4722  ;;  %v4721_v59 = vpop.permute.xlu0 %4720  ;;  %v6775_v60 = vld [vmem:[#allocation2 + $0x260] sm:$0xff]  ;;  %v6776_v34 = vld [vmem:[#allocation2 + $0x268] sm:$0xff] }
 0x637   : > { %5070 = vst.msk [vmem:[#allocation2 + $0x128] sm:$0xff] %vm5032_vm7, %v4723_v58  ;;  %5069 = vst.msk [vmem:[#allocation2 + $0x120] sm:$0xff] %vm5032_vm7, %v4721_v59  ;;  %v6865_v10 = vpack.c.bf16 %v6776_v34, %v6775_v60  ;;  %v9077_v60 = vld [vmem:[%s9554_s30 + $0x4d2] sm:$0xff]  ;;  %v9076_v34 = vld [vmem:[%s9554_s30 + $0x4ca] sm:$0xff] }
 0x638   : > { %4826 = vrot.lane.b32.xlu1 %v8819_v56, %s9497_s17  ;;  %4824 = vrot.lane.b32.xlu0 %v8818_v57, %s9497_s17 }
 0x639   : > { %9366 = vmatprep.mubr.msk.bf16.mxu1 %vm6934_vm10, %v6865_v10 }
 0x63a   : > { %v4727_v38 = vpop.permute.xlu1 %4726  ;;  %v4725_v11 = vpop.permute.xlu0 %4724  ;;  %v6777_v14 = vld [vmem:[#allocation2 + $0x270] sm:$0xff]  ;;  %v6778_v63 = vld [vmem:[#allocation2 + $0x278] sm:$0xff] }
 0x63b   : > { %5072 = vst.msk [vmem:[#allocation2 + $0x138] sm:$0xff] %vm5032_vm7, %v4727_v38  ;;  %5071 = vst.msk [vmem:[#allocation2 + $0x130] sm:$0xff] %vm5032_vm7, %v4725_v11  ;;  %v6866_v15 = vpack.c.bf16 %v6778_v63, %v6777_v14 }
 0x63c   : > { %5507 = vrot.lane.b32.xlu1 %v8903_v61, %s9498_s22  ;;  %5505 = vrot.lane.b32.xlu0 %v8902_v35, %s9498_s22 }
 0x63d   : > { %v9300_v0 = vpop.f32.mrf.mxu0  ;;  %9367 = vmatmul.mubr.msk.bf16.gmra.mxu1 %vm6934_vm10, %v6866_v15 }
 0x63e   : > { %v7206_v3 = vadd.f32 %v9300_v0, %v12145_v41  ;;  %v4811_v4 = vpop.permute.xlu1 %4810  ;;  %v4809_v5 = vpop.permute.xlu0 %4808 }
 0x63f   : > { %5114 = vst.msk [vmem:[#allocation2 + $0x288] sm:$0xff] %vm5032_vm7, %v4811_v4  ;;  %5113 = vst.msk [vmem:[#allocation2 + $0x280] sm:$0xff] %vm5032_vm7, %v4809_v5  ;;  %v7197_v6 = vpop.f32.mrf.mxu0 }
 0x640   : > { %v7198_v7 = vadd.f32 %v12145_v41, %v7197_v6  ;;  %4830 = vrot.lane.b32.xlu1 %v8821_v1, %s9497_s17  ;;  %4828 = vrot.lane.b32.xlu0 %v8820_v2, %s9497_s17  ;;  %v7686_v12 = vmax.f32 %v7206_v3, 0.0 }
 0x641   : > { %v9301_v8 = vpop.f32.mrf.mxu0 }
 0x642   : > { %v7684_v13 = vmax.f32 %v7198_v7, 0.0  ;;  %v7209_v39 = vadd.f32 %v9301_v8, %v12145_v41  ;;  %v5492_v16 = vpop.permute.xlu1 %5491  ;;  %v5490_v18 = vpop.permute.xlu0 %5489  ;;  %v7814_v24 = vsel %vm7804_vm11, %v7686_v12, 0.0  ;;  %v8778_v12 = vld [vmem:[%s9554_s30 + $0x2a0] sm:$0xff] }
 0x643   : > { %5839 = vst.msk [vmem:[#allocation2 + $0x128] sm:$0xff] %vm5801_vm8, %v5492_v16  ;;  %5838 = vst.msk [vmem:[#allocation2 + $0x120] sm:$0xff] %vm5801_vm8, %v5490_v18  ;;  %v7200_v17 = vpop.f32.mrf.mxu0 }
 0x644   : > { %v7812_v20 = vsel %vm7804_vm11, %v7684_v13, 0.0  ;;  %v7201_v19 = vadd.f32 %v12145_v41, %v7200_v17  ;;  %5511 = vrot.lane.b32.xlu1 %v8905_v9, %s9498_s22  ;;  %5509 = vrot.lane.b32.xlu0 %v8904_v62, %s9498_s22  ;;  %v7687_v25 = vmax.f32 %v7209_v39, 0.0  ;;  %v8779_v62 = vld [vmem:[%s9554_s30 + $0x2a8] sm:$0xff] }
 0x645   : > { %v7813_v22 = vadd.f32 %v7812_v20, %v12224_v27 }
 0x646   : > { %v7685_v28 = vmax.f32 %v7201_v19, 0.0  ;;  %v4815_v29 = vpop.permute.xlu1 %4814  ;;  %v4813_v32 = vpop.permute.xlu0 %4812  ;;  %v7845_v26 = vsel %vm7804_vm11, %v7687_v25, 0.0 }
 0x647   : > { %5116 = vst.msk [vmem:[#allocation2 + $0x298] sm:$0xff] %vm5032_vm7, %v4815_v29  ;;  %5115 = vst.msk [vmem:[#allocation2 + $0x290] sm:$0xff] %vm5032_vm7, %v4813_v32  ;;  %v7815_v33 = vadd.f32 %v7814_v24, %v7813_v22  ;;  %v12339_v22 = vld [vmem:[%s9554_s30 + $0x4ea] sm:$0xff]  ;;  %v8781_v32 = vld [vmem:[%s9554_s30 + $0x2c0] sm:$0xff] }
 0x648   : > { %v7843_v36 = vsel %vm7804_vm11, %v7685_v28, 0.0  ;;  %5595 = vrot.lane.b32.xlu1 %v8947_v21, %s9498_s22  ;;  %5593 = vrot.lane.b32.xlu0 %v8946_v23, %s9498_s22  ;;  %v12342_v21 = vld [vmem:[%s9554_s30 + $0x4e2] sm:$0xff] }
 0x649   : > { %v7844_v37 = vadd.f32 %v7843_v36, %v12237_v55 }
 0x64a   : > { %v5496_v45 = vpop.permute.xlu1 %5495  ;;  %v5494_v46 = vpop.permute.xlu0 %5493 }
 0x64b   : > { %5841 = vst.msk [vmem:[#allocation2 + $0x138] sm:$0xff] %vm5801_vm8, %v5496_v45  ;;  %5840 = vst.msk [vmem:[#allocation2 + $0x130] sm:$0xff] %vm5801_vm8, %v5494_v46  ;;  %v7846_v27 = vadd.f32 %v7845_v26, %v7844_v37  ;;  %v8823_v46 = vld [vmem:[%s9554_s30 + $0x4e8] sm:$0xff] }
 0x64c   : > { %6276 = vrot.lane.b32.xlu1 %v9031_v43, %s9499_s27  ;;  %6274 = vrot.lane.b32.xlu0 %v9030_v44, %s9499_s27 }
 0x64e   : > { %v5580_v31 = vpop.permute.xlu1 %5579  ;;  %v5578_v48 = vpop.permute.xlu0 %5577 }
 0x64f   : > { %5883 = vst.msk [vmem:[#allocation2 + $0x288] sm:$0xff] %vm5801_vm8, %v5580_v31  ;;  %5882 = vst.msk [vmem:[#allocation2 + $0x280] sm:$0xff] %vm5801_vm8, %v5578_v48 }
 0x650   : > { %5599 = vrot.lane.b32.xlu1 %v8949_v30, %s9498_s22  ;;  %5597 = vrot.lane.b32.xlu0 %v8948_v47, %s9498_s22 }
 0x652   : > { %v6261_v51 = vpop.permute.xlu1 %6260  ;;  %v6259_v52 = vpop.permute.xlu0 %6258 }
 0x653   : > { %6608 = vst.msk [vmem:[#allocation2 + $0x128] sm:$0xff] %vm6570_vm9, %v6261_v51  ;;  %6607 = vst.msk [vmem:[#allocation2 + $0x120] sm:$0xff] %vm6570_vm9, %v6259_v52  ;;  %v8907_v51 = vld [vmem:[%s9554_s30 + $0x2a9] sm:$0xff]  ;;  %v8906_v52 = vld [vmem:[%s9554_s30 + $0x2a1] sm:$0xff] }
 0x654   : > { %6280 = vrot.lane.b32.xlu1 %v9033_v49, %s9499_s27  ;;  %6278 = vrot.lane.b32.xlu0 %v9032_v50, %s9499_s27 }
 0x655   : > { %v9304_v53 = vpop.f32.mrf.mxu0 }
 0x656   : > { %v7222_v54 = vadd.f32 %v9304_v53, %v12145_v41  ;;  %v5584_v55 = vpop.permute.xlu1 %5583  ;;  %v5582_v56 = vpop.permute.xlu0 %5581 }
 0x657   : > { %5885 = vst.msk [vmem:[#allocation2 + $0x298] sm:$0xff] %vm5801_vm8, %v5584_v55  ;;  %5884 = vst.msk [vmem:[#allocation2 + $0x290] sm:$0xff] %vm5801_vm8, %v5582_v56  ;;  %v7213_v57 = vpop.f32.mrf.mxu0 }
 0x658   : > { %v7214_v58 = vadd.f32 %v12145_v41, %v7213_v57  ;;  %6364 = vrot.lane.b32.xlu1 %v12216_v40, %s9499_s27  ;;  %6362 = vrot.lane.b32.xlu0 %v12219_v42, %s9499_s27  ;;  %v7690_v10 = vmax.f32 %v7222_v54, 0.0 }
 0x659   : > { %v9305_v59 = vpop.f32.mrf.mxu0 }
 0x65a   : > { %v7688_v61 = vmax.f32 %v7214_v58, 0.0  ;;  %v7225_v35 = vadd.f32 %v9305_v59, %v12145_v41  ;;  %v6265_v38 = vpop.permute.xlu1 %6264  ;;  %v6263_v11 = vpop.permute.xlu0 %6262  ;;  %v6735_v14 = vld [vmem:[#allocation2 + $0x120] sm:$0xff]  ;;  %v6736_v63 = vld [vmem:[#allocation2 + $0x128] sm:$0xff]  ;;  %v7818_v2 = vsel %vm7804_vm11, %v7690_v10, 0.0 }
 0x65b   : > { %6610 = vst.msk [vmem:[#allocation2 + $0x138] sm:$0xff] %vm6570_vm9, %v6265_v38  ;;  %6609 = vst.msk [vmem:[#allocation2 + $0x130] sm:$0xff] %vm6570_vm9, %v6263_v11  ;;  %v7216_v15 = vpop.f32.mrf.mxu0  ;;  %v6845_v40 = vpack.c.bf16 %v6736_v63, %v6735_v14  ;;  %v8825_v10 = vld [vmem:[%s9554_s30 + $0x500] sm:$0xff] }
 0x65c   : > { %v7816_v0 = vsel %vm7804_vm11, %v7688_v61, 0.0  ;;  %v7217_v42 = vadd.f32 %v12145_v41, %v7216_v15  ;;  %6368 = vrot.lane.b32.xlu1 %v9077_v60, %s9499_s27  ;;  %6366 = vrot.lane.b32.xlu0 %v9076_v34, %s9499_s27  ;;  %v7691_v3 = vmax.f32 %v7225_v35, 0.0  ;;  %v8824_v61 = vld [vmem:[%s9554_s30 + $0x4f8] sm:$0xff] }
 0x65d   : > { %v7817_v1 = vadd.f32 %v7816_v0, %v7815_v33  ;;  %9326 = vmatprep.mubr.msk.bf16.mxu0 %vm6934_vm10, %v6845_v40  ;;  %v8780_v33 = vld [vmem:[%s9554_s30 + $0x2b8] sm:$0xff] }
 0x65e   : > { %v7689_v4 = vmax.f32 %v7217_v42, 0.0  ;;  %v6349_v5 = vpop.permute.xlu1 %6348  ;;  %v6347_v6 = vpop.permute.xlu0 %6346  ;;  %v7849_v13 = vsel %vm7804_vm11, %v7691_v3, 0.0  ;;  %v8909_v42 = vld [vmem:[%s9554_s30 + $0x2c1] sm:$0xff] }
 0x65f   : > { %6652 = vst.msk [vmem:[#allocation2 + $0x288] sm:$0xff] %vm6570_vm9, %v6349_v5  ;;  %6651 = vst.msk [vmem:[#allocation2 + $0x280] sm:$0xff] %vm6570_vm9, %v6347_v6  ;;  %v12323_v7 = vadd.f32 %v7818_v2, %v7817_v1  ;;  %v8908_v1 = vld [vmem:[%s9554_s30 + $0x2b9] sm:$0xff]  ;;  %v8951_v6 = vld [vmem:[%s9554_s30 + $0x4e9] sm:$0xff] }
 0x660   : > { %v7847_v8 = vsel %vm7804_vm11, %v7689_v4, 0.0  ;;  %4064 = vrot.lane.b32.xlu1 %v9077_v60, %s9496_s12  ;;  %4062 = vrot.lane.b32.xlu0 %v9076_v34, %s9496_s12 }
 0x661   : > { %v7848_v9 = vadd.f32 %v7847_v8, %v7846_v27  ;;  %v8822_v27 = vld [vmem:[%s9554_s30 + $0x4e0] sm:$0xff] }
 0x662   : > { %v6353_v39 = vpop.permute.xlu1 %6352  ;;  %v6351_v16 = vpop.permute.xlu0 %6350  ;;  %v6737_v18 = vld [vmem:[#allocation2 + $0x130] sm:$0xff]  ;;  %v6738_v17 = vld [vmem:[#allocation2 + $0x138] sm:$0xff] }
 0x663   : > { %6654 = vst.msk [vmem:[#allocation2 + $0x298] sm:$0xff] %vm6570_vm9, %v6353_v39  ;;  %6653 = vst.msk [vmem:[#allocation2 + $0x290] sm:$0xff] %vm6570_vm9, %v6351_v16  ;;  %v6846_v20 = vpack.c.bf16 %v6738_v17, %v6737_v18  ;;  %v12333_v19 = vadd.f32 %v7849_v13, %v7848_v9  ;;  %v8953_v18 = vld [vmem:[%s9554_s30 + $0x501] sm:$0xff]  ;;  %v8952_v17 = vld [vmem:[%s9554_s30 + $0x4f9] sm:$0xff] }
 0x664   : > { %4746 = vrot.lane.b32.xlu1 %v8779_v62, %s9497_s17  ;;  %4744 = vrot.lane.b32.xlu0 %v8778_v12, %s9497_s17  ;;  %v9035_v62 = vld [vmem:[%s9554_s30 + $0x2aa] sm:$0xff]  ;;  %v9034_v12 = vld [vmem:[%s9554_s30 + $0x2a2] sm:$0xff] }
 0x665   : > { %9327 = vmatmul.mubr.msk.bf16.gmra.mxu0 %vm6934_vm10, %v6846_v20 }
 0x666   : > { %v4731_v23 = vpop.permute.xlu1 %4730  ;;  %v4729_v24 = vpop.permute.xlu0 %4728  ;;  %v6779_v25 = vld [vmem:[#allocation2 + $0x280] sm:$0xff]  ;;  %v6780_v28 = vld [vmem:[#allocation2 + $0x288] sm:$0xff] }
 0x667   : > { %5074 = vst.msk [vmem:[#allocation2 + $0x148] sm:$0xff] %vm5032_vm7, %v4731_v23  ;;  %5073 = vst.msk [vmem:[#allocation2 + $0x140] sm:$0xff] %vm5032_vm7, %v4729_v24  ;;  %v6867_v29 = vpack.c.bf16 %v6780_v28, %v6779_v25 }
 0x668   : > { %4068 = vrot.lane.b32.xlu1 %v12339_v22, %s9496_s12  ;;  %4066 = vrot.lane.b32.xlu0 %v12342_v21, %s9496_s12 }
 0x669   : > { %9370 = vmatprep.mubr.msk.bf16.mxu1 %vm6934_vm10, %v6867_v29  ;;  %v9037_v29 = vld [vmem:[%s9554_s30 + $0x2c2] sm:$0xff] }
 0x66a   : > { %v4053_v36 = vpop.permute.xlu1 %4052  ;;  %v4051_v37 = vpop.permute.xlu0 %4050  ;;  %v6781_v43 = vld [vmem:[#allocation2 + $0x290] sm:$0xff]  ;;  %v6782_v44 = vld [vmem:[#allocation2 + $0x298] sm:$0xff] }
 0x66b   : > { %4350 = vst.msk [vmem:[#allocation2 + $0x2b8] sm:$0xff] %vm4262_vm5, %v4053_v36  ;;  %4349 = vst.msk [vmem:[#allocation2 + $0x2b0] sm:$0xff] %vm4262_vm5, %v4051_v37  ;;  %v6868_v26 = vpack.c.bf16 %v6782_v44, %v6781_v43 }
 0x66c   : > { %4750 = vrot.lane.b32.xlu1 %v8781_v32, %s9497_s17  ;;  %4748 = vrot.lane.b32.xlu0 %v8780_v33, %s9497_s17  ;;  %v9036_v32 = vld [vmem:[%s9554_s30 + $0x2ba] sm:$0xff] }
 0x66d   : > { %v9308_v45 = vpop.f32.mrf.mxu0  ;;  %9371 = vmatmul.mubr.msk.bf16.gmra.mxu1 %vm6934_vm10, %v6868_v26 }
 0x66e   : > { %v7238_v30 = vadd.f32 %v9308_v45, %v12145_v41  ;;  %v4735_v47 = vpop.permute.xlu1 %4734  ;;  %v4733_v31 = vpop.permute.xlu0 %4732 }
 0x66f   : > { %5076 = vst.msk [vmem:[#allocation2 + $0x158] sm:$0xff] %vm5032_vm7, %v4735_v47  ;;  %5075 = vst.msk [vmem:[#allocation2 + $0x150] sm:$0xff] %vm5032_vm7, %v4733_v31  ;;  %v7229_v48 = vpop.f32.mrf.mxu0 }
 0x670   : > { %v7230_v49 = vadd.f32 %v12145_v41, %v7229_v48  ;;  %4834 = vrot.lane.b32.xlu1 %v8823_v46, %s9497_s17  ;;  %4832 = vrot.lane.b32.xlu0 %v8822_v27, %s9497_s17  ;;  %v7694_v53 = vmax.f32 %v7238_v30, 0.0 }
 0x671   : > { %v9309_v50 = vpop.f32.mrf.mxu0 }
 0x672   : > { %v7692_v54 = vmax.f32 %v7230_v49, 0.0  ;;  %v7241_v55 = vadd.f32 %v9309_v50, %v12145_v41  ;;  %v4819_v56 = vpop.permute.xlu1 %4818  ;;  %v4817_v57 = vpop.permute.xlu0 %4816  ;;  %v7822_v35 = vsel %vm7804_vm11, %v7694_v53, 0.0 }
 0x673   : > { %5118 = vst.msk [vmem:[#allocation2 + $0x2a8] sm:$0xff] %vm5032_vm7, %v4819_v56  ;;  %5117 = vst.msk [vmem:[#allocation2 + $0x2a0] sm:$0xff] %vm5032_vm7, %v4817_v57  ;;  %v7232_v58 = vpop.f32.mrf.mxu0  ;;  %v9081_v56 = vld [vmem:[%s9554_s30 + $0x502] sm:$0xff]  ;;  %v9080_v57 = vld [vmem:[%s9554_s30 + $0x4fa] sm:$0xff] }
 0x674   : > { %v7820_v59 = vsel %vm7804_vm11, %v7692_v54, 0.0  ;;  %v7233_v60 = vadd.f32 %v12145_v41, %v7232_v58  ;;  %5515 = vrot.lane.b32.xlu1 %v8907_v51, %s9498_s22  ;;  %5513 = vrot.lane.b32.xlu0 %v8906_v52, %s9498_s22  ;;  %v7695_v38 = vmax.f32 %v7241_v55, 0.0 }
 0x675   : > { %v7821_v34 = vadd.f32 %v7820_v59, %v12323_v7  ;;  %v8950_v7 = vld [vmem:[%s9554_s30 + $0x4e1] sm:$0xff] }
 0x676   : > { %v7693_v11 = vmax.f32 %v7233_v60, 0.0  ;;  %v5500_v14 = vpop.permute.xlu1 %5499  ;;  %v5498_v63 = vpop.permute.xlu0 %5497  ;;  %v7853_v2 = vsel %vm7804_vm11, %v7695_v38, 0.0 }
 0x677   : > { %5843 = vst.msk [vmem:[#allocation2 + $0x148] sm:$0xff] %vm5801_vm8, %v5500_v14  ;;  %5842 = vst.msk [vmem:[#allocation2 + $0x140] sm:$0xff] %vm5801_vm8, %v5498_v63  ;;  %v7823_v15 = vadd.f32 %v7822_v35, %v7821_v34  ;;  %v8783_v14 = vld [vmem:[%s9554_s30 + $0x2d8] sm:$0xff]  ;;  %v8782_v63 = vld [vmem:[%s9554_s30 + $0x2d0] sm:$0xff] }
 0x678   : > { %v7851_v40 = vsel %vm7804_vm11, %v7693_v11, 0.0  ;;  %4838 = vrot.lane.b32.xlu1 %v8825_v10, %s9497_s17  ;;  %4836 = vrot.lane.b32.xlu0 %v8824_v61, %s9497_s17 }
 0x679   : > { %v7852_v0 = vadd.f32 %v7851_v40, %v12333_v19 }
 0x67a   : > { %v4823_v3 = vpop.permute.xlu1 %4822  ;;  %v4821_v4 = vpop.permute.xlu0 %4820 }
 0x67b   : > { %5120 = vst.msk [vmem:[#allocation2 + $0x2b8] sm:$0xff] %vm5032_vm7, %v4823_v3  ;;  %5119 = vst.msk [vmem:[#allocation2 + $0x2b0] sm:$0xff] %vm5032_vm7, %v4821_v4  ;;  %v7854_v5 = vadd.f32 %v7853_v2, %v7852_v0  ;;  %v12456_v3 = vld [vmem:[%s9554_s30 + $0x54a] sm:$0xff]  ;;  %v12459_v4 = vld [vmem:[%s9554_s30 + $0x542] sm:$0xff] }
 0x67c   : > { %5519 = vrot.lane.b32.xlu1 %v8909_v42, %s9498_s22  ;;  %5517 = vrot.lane.b32.xlu0 %v8908_v1, %s9498_s22 }
 0x67e   : > { %v5504_v8 = vpop.permute.xlu1 %5503  ;;  %v5502_v9 = vpop.permute.xlu0 %5501 }
 0x67f   : > { %5845 = vst.msk [vmem:[#allocation2 + $0x158] sm:$0xff] %vm5801_vm8, %v5504_v8  ;;  %5844 = vst.msk [vmem:[#allocation2 + $0x150] sm:$0xff] %vm5801_vm8, %v5502_v9 }
 0x680   : > { %5603 = vrot.lane.b32.xlu1 %v8951_v6, %s9498_s22  ;;  %5601 = vrot.lane.b32.xlu0 %v8950_v7, %s9498_s22 }
 0x682   : > { %v5588_v13 = vpop.permute.xlu1 %5587  ;;  %v5586_v39 = vpop.permute.xlu0 %5585 }
 0x683   : > { %5887 = vst.msk [vmem:[#allocation2 + $0x2a8] sm:$0xff] %vm5801_vm8, %v5588_v13  ;;  %5886 = vst.msk [vmem:[#allocation2 + $0x2a0] sm:$0xff] %vm5801_vm8, %v5586_v39 }
 0x684   : > { %6284 = vrot.lane.b32.xlu1 %v9035_v62, %s9499_s27  ;;  %6282 = vrot.lane.b32.xlu0 %v9034_v12, %s9499_s27 }
 0x685   : > { %v9312_v16 = vpop.f32.mrf.mxu0 }
 0x686   : > { %v7254_v20 = vadd.f32 %v9312_v16, %v12145_v41  ;;  %v6269_v19 = vpop.permute.xlu1 %6268  ;;  %v6267_v23 = vpop.permute.xlu0 %6266  ;;  %v8785_v16 = vld [vmem:[%s9554_s30 + $0x2f0] sm:$0xff] }
 0x687   : > { %6612 = vst.msk [vmem:[#allocation2 + $0x148] sm:$0xff] %vm6570_vm9, %v6269_v19  ;;  %6611 = vst.msk [vmem:[#allocation2 + $0x140] sm:$0xff] %vm6570_vm9, %v6267_v23  ;;  %v7245_v24 = vpop.f32.mrf.mxu0 }
 0x688   : > { %v7246_v25 = vadd.f32 %v12145_v41, %v7245_v24  ;;  %5607 = vrot.lane.b32.xlu1 %v8953_v18, %s9498_s22  ;;  %5605 = vrot.lane.b32.xlu0 %v8952_v17, %s9498_s22  ;;  %v7698_v33 = vmax.f32 %v7254_v20, 0.0  ;;  %v8784_v18 = vld [vmem:[%s9554_s30 + $0x2e8] sm:$0xff] }
 0x689   : > { %v9313_v28 = vpop.f32.mrf.mxu0 }
 0x68a   : > { %v7696_v36 = vmax.f32 %v7246_v25, 0.0  ;;  %v7257_v37 = vadd.f32 %v9313_v28, %v12145_v41  ;;  %v5592_v43 = vpop.permute.xlu1 %5591  ;;  %v5590_v44 = vpop.permute.xlu0 %5589  ;;  %v7826_v30 = vsel %vm7804_vm11, %v7698_v33, 0.0  ;;  %v8827_v33 = vld [vmem:[%s9554_s30 + $0x548] sm:$0xff] }
 0x68b   : > { %5889 = vst.msk [vmem:[#allocation2 + $0x2b8] sm:$0xff] %vm5801_vm8, %v5592_v43  ;;  %5888 = vst.msk [vmem:[#allocation2 + $0x2b0] sm:$0xff] %vm5801_vm8, %v5590_v44  ;;  %v7248_v26 = vpop.f32.mrf.mxu0 }
 0x68c   : > { %v7824_v45 = vsel %vm7804_vm11, %v7696_v36, 0.0  ;;  %v7249_v46 = vadd.f32 %v12145_v41, %v7248_v26  ;;  %6288 = vrot.lane.b32.xlu1 %v9037_v29, %s9499_s27  ;;  %6286 = vrot.lane.b32.xlu0 %v9036_v32, %s9499_s27  ;;  %v7699_v47 = vmax.f32 %v7257_v37, 0.0  ;;  %v8826_v36 = vld [vmem:[%s9554_s30 + $0x540] sm:$0xff] }
 0x68d   : > { %v7825_v27 = vadd.f32 %v7824_v45, %v7823_v15 }
 0x68e   : > { %v7697_v31 = vmax.f32 %v7249_v46, 0.0  ;;  %v6273_v48 = vpop.permute.xlu1 %6272  ;;  %v6271_v49 = vpop.permute.xlu0 %6270  ;;  %v6739_v50 = vld [vmem:[#allocation2 + $0x140] sm:$0xff]  ;;  %v6740_v51 = vld [vmem:[#allocation2 + $0x148] sm:$0xff]  ;;  %v7857_v58 = vsel %vm7804_vm11, %v7699_v47, 0.0  ;;  %v8910_v47 = vld [vmem:[%s9554_s30 + $0x2d1] sm:$0xff] }
 0x68f   : > { %6614 = vst.msk [vmem:[#allocation2 + $0x158] sm:$0xff] %vm6570_vm9, %v6273_v48  ;;  %6613 = vst.msk [vmem:[#allocation2 + $0x150] sm:$0xff] %vm6570_vm9, %v6271_v49  ;;  %v6847_v52 = vpack.c.bf16 %v6740_v51, %v6739_v50  ;;  %v12424_v53 = vadd.f32 %v7826_v30, %v7825_v27  ;;  %v8911_v30 = vld [vmem:[%s9554_s30 + $0x2d9] sm:$0xff] }
 0x690   : > { %v7855_v54 = vsel %vm7804_vm11, %v7697_v31, 0.0  ;;  %6372 = vrot.lane.b32.xlu1 %v12339_v22, %s9499_s27  ;;  %6370 = vrot.lane.b32.xlu0 %v12342_v21, %s9499_s27  ;;  %v8699_v22 = vld [vmem:[%s9554_s30 + $0x532] sm:$0xff]  ;;  %v8698_v21 = vld [vmem:[%s9554_s30 + $0x52a] sm:$0xff] }
 0x691   : > { %v7856_v55 = vadd.f32 %v7855_v54, %v7854_v5  ;;  %9330 = vmatprep.mubr.msk.bf16.mxu0 %vm6934_vm10, %v6847_v52  ;;  %v8829_v51 = vld [vmem:[%s9554_s30 + $0x560] sm:$0xff]  ;;  %v8828_v52 = vld [vmem:[%s9554_s30 + $0x558] sm:$0xff] }
 0x692   : > { %v6357_v59 = vpop.permute.xlu1 %6356  ;;  %v6355_v60 = vpop.permute.xlu0 %6354 }
 0x693   : > { %6656 = vst.msk [vmem:[#allocation2 + $0x2a8] sm:$0xff] %vm6570_vm9, %v6357_v59  ;;  %6655 = vst.msk [vmem:[#allocation2 + $0x2a0] sm:$0xff] %vm6570_vm9, %v6355_v60  ;;  %v12437_v34 = vadd.f32 %v7857_v58, %v7856_v55  ;;  %v8913_v55 = vld [vmem:[%s9554_s30 + $0x2f1] sm:$0xff]  ;;  %v8955_v59 = vld [vmem:[%s9554_s30 + $0x549] sm:$0xff] }
 0x694   : > { %6376 = vrot.lane.b32.xlu1 %v9081_v56, %s9499_s27  ;;  %6374 = vrot.lane.b32.xlu0 %v9080_v57, %s9499_s27  ;;  %v8912_v56 = vld [vmem:[%s9554_s30 + $0x2e9] sm:$0xff]  ;;  %v8954_v60 = vld [vmem:[%s9554_s30 + $0x541] sm:$0xff] }
 0x696   : > { %v6361_v10 = vpop.permute.xlu1 %6360  ;;  %v6359_v61 = vpop.permute.xlu0 %6358  ;;  %v6741_v35 = vld [vmem:[#allocation2 + $0x150] sm:$0xff]  ;;  %v6742_v38 = vld [vmem:[#allocation2 + $0x158] sm:$0xff] }
 0x697   : > { %6658 = vst.msk [vmem:[#allocation2 + $0x2b8] sm:$0xff] %vm6570_vm9, %v6361_v10  ;;  %6657 = vst.msk [vmem:[#allocation2 + $0x2b0] sm:$0xff] %vm6570_vm9, %v6359_v61  ;;  %v6848_v11 = vpack.c.bf16 %v6742_v38, %v6741_v35  ;;  %v9038_v10 = vld [vmem:[%s9554_s30 + $0x2d2] sm:$0xff]  ;;  %v8957_v38 = vld [vmem:[%s9554_s30 + $0x561] sm:$0xff] }
 0x698   : > { %4072 = vrot.lane.b32.xlu1 %v8699_v22, %s9496_s12  ;;  %4070 = vrot.lane.b32.xlu0 %v8698_v21, %s9496_s12  ;;  %v9039_v21 = vld [vmem:[%s9554_s30 + $0x2da] sm:$0xff] }
 0x699   : > { %9331 = vmatmul.mubr.msk.bf16.gmra.mxu0 %vm6934_vm10, %v6848_v11  ;;  %v8956_v11 = vld [vmem:[%s9554_s30 + $0x559] sm:$0xff] }
 0x69a   : > { %v4057_v15 = vpop.permute.xlu1 %4056  ;;  %v4055_v40 = vpop.permute.xlu0 %4054  ;;  %v6783_v0 = vld [vmem:[#allocation2 + $0x2a0] sm:$0xff]  ;;  %v6784_v42 = vld [vmem:[#allocation2 + $0x2a8] sm:$0xff] }
 0x69b   : > { %4352 = vst.msk [vmem:[#allocation2 + $0x2c8] sm:$0xff] %vm4262_vm5, %v4057_v15  ;;  %4351 = vst.msk [vmem:[#allocation2 + $0x2c0] sm:$0xff] %vm4262_vm5, %v4055_v40  ;;  %v6869_v1 = vpack.c.bf16 %v6784_v42, %v6783_v0  ;;  %v9041_v15 = vld [vmem:[%s9554_s30 + $0x2f2] sm:$0xff]  ;;  %v9040_v40 = vld [vmem:[%s9554_s30 + $0x2ea] sm:$0xff] }
 0x69c   : > { %4754 = vrot.lane.b32.xlu1 %v8783_v14, %s9497_s17  ;;  %4752 = vrot.lane.b32.xlu0 %v8782_v63, %s9497_s17 }
 0x69d   : > { %v9316_v2 = vpop.f32.mrf.mxu0  ;;  %9374 = vmatprep.mubr.msk.bf16.mxu1 %vm6934_vm10, %v6869_v1 }
 0x69e   : > { %v7270_v5 = vadd.f32 %v9316_v2, %v12145_v41  ;;  %v4739_v6 = vpop.permute.xlu1 %4738  ;;  %v4737_v7 = vpop.permute.xlu0 %4736  ;;  %v6785_v8 = vld [vmem:[#allocation2 + $0x2b0] sm:$0xff]  ;;  %v6786_v9 = vld [vmem:[#allocation2 + $0x2b8] sm:$0xff]  ;;  %v9481_v2 = vld [vmem:[%s13537_s2] ss:$0 sm:$0xff] }
 0x69f   : > { %5078 = vst.msk [vmem:[#allocation2 + $0x168] sm:$0xff] %vm5032_vm7, %v4739_v6  ;;  %5077 = vst.msk [vmem:[#allocation2 + $0x160] sm:$0xff] %vm5032_vm7, %v4737_v7  ;;  %v7261_v62 = vpop.f32.mrf.mxu0  ;;  %v6870_v12 = vpack.c.bf16 %v6786_v9, %v6785_v8 }
 0x6a0   : > { %v7262_v13 = vadd.f32 %v12145_v41, %v7261_v62  ;;  %4076 = vrot.lane.b32.xlu1 %v12456_v3, %s9496_s12  ;;  %4074 = vrot.lane.b32.xlu0 %v12459_v4, %s9496_s12  ;;  %v7702_v17 = vmax.f32 %v7270_v5, 0.0 }
 0x6a1   : > { %v9317_v39 = vpop.f32.mrf.mxu0  ;;  %9375 = vmatmul.mubr.msk.bf16.gmra.mxu1 %vm6934_vm10, %v6870_v12 }
 0x6a2   : > { %v7700_v20 = vmax.f32 %v7262_v13, 0.0  ;;  %v7273_v19 = vadd.f32 %v9317_v39, %v12145_v41  ;;  %v4061_v23 = vpop.permute.xlu1 %4060  ;;  %v4059_v24 = vpop.permute.xlu0 %4058  ;;  %v7830_v37 = vsel %vm7804_vm11, %v7702_v17, 0.0 }
 0x6a3   : > { %4354 = vst.msk [vmem:[#allocation2 + $0x2d8] sm:$0xff] %vm4262_vm5, %v4061_v23  ;;  %4353 = vst.msk [vmem:[#allocation2 + $0x2d0] sm:$0xff] %vm4262_vm5, %v4059_v24  ;;  %v7264_v25 = vpop.f32.mrf.mxu0 }
 0x6a4   : > { %v7828_v28 = vsel %vm7804_vm11, %v7700_v20, 0.0  ;;  %v7265_v29 = vadd.f32 %v12145_v41, %v7264_v25  ;;  %4758 = vrot.lane.b32.xlu1 %v8785_v16, %s9497_s17  ;;  %4756 = vrot.lane.b32.xlu0 %v8784_v18, %s9497_s17  ;;  %v7703_v43 = vmax.f32 %v7273_v19, 0.0  ;;  %v9085_v16 = vld [vmem:[%s9554_s30 + $0x562] sm:$0xff]  ;;  %v9084_v18 = vld [vmem:[%s9554_s30 + $0x55a] sm:$0xff] }
 0x6a5   : > { %v7829_v32 = vadd.f32 %v7828_v28, %v12424_v53 }
 0x6a6   : > { %v7701_v44 = vmax.f32 %v7265_v29, 0.0  ;;  %v4743_v26 = vpop.permute.xlu1 %4742  ;;  %v4741_v45 = vpop.permute.xlu0 %4740  ;;  %v7861_v31 = vsel %vm7804_vm11, %v7703_v43, 0.0 }
 0x6a7   : > { %5080 = vst.msk [vmem:[#allocation2 + $0x178] sm:$0xff] %vm5032_vm7, %v4743_v26  ;;  %5079 = vst.msk [vmem:[#allocation2 + $0x170] sm:$0xff] %vm5032_vm7, %v4741_v45  ;;  %v12485_v41 = vadd.f32 %v7830_v37, %v7829_v32 }
 0x6a8   : > { %v7859_v46 = vsel %vm7804_vm11, %v7701_v44, 0.0  ;;  %4842 = vrot.lane.b32.xlu1 %v8827_v33, %s9497_s17  ;;  %4840 = vrot.lane.b32.xlu0 %v8826_v36, %s9497_s17 }
 0x6a9   : > { %v7860_v27 = vadd.f32 %v7859_v46, %v12437_v34 }
 0x6aa   : > { %v4827_v48 = vpop.permute.xlu1 %4826  ;;  %v4825_v49 = vpop.permute.xlu0 %4824 }
 0x6ab   : > { %5122 = vst.msk [vmem:[#allocation2 + $0x2c8] sm:$0xff] %vm5032_vm7, %v4827_v48  ;;  %5121 = vst.msk [vmem:[#allocation2 + $0x2c0] sm:$0xff] %vm5032_vm7, %v4825_v49  ;;  %v12496_v50 = vadd.f32 %v7861_v31, %v7860_v27  ;;  %v8787_v27 = vld [vmem:[%s9554_s30 + $0x308] sm:$0xff] }
 0x6ac   : > { %5523 = vrot.lane.b32.xlu1 %v8911_v30, %s9498_s22  ;;  %5521 = vrot.lane.b32.xlu0 %v8910_v47, %s9498_s22  ;;  %v8786_v30 = vld [vmem:[%s9554_s30 + $0x300] sm:$0xff] }
 0x6ae   : > { %v5508_v53 = vpop.permute.xlu1 %5507  ;;  %v5506_v54 = vpop.permute.xlu0 %5505 }
 0x6af   : > { %5847 = vst.msk [vmem:[#allocation2 + $0x168] sm:$0xff] %vm5801_vm8, %v5508_v53  ;;  %5846 = vst.msk [vmem:[#allocation2 + $0x160] sm:$0xff] %vm5801_vm8, %v5506_v54 }
 0x6b0   : > { %4846 = vrot.lane.b32.xlu1 %v8829_v51, %s9497_s17  ;;  %4844 = vrot.lane.b32.xlu0 %v8828_v52, %s9497_s17 }
 0x6b2   : > { %v4831_v57 = vpop.permute.xlu1 %4830  ;;  %v4829_v58 = vpop.permute.xlu0 %4828 }
 0x6b3   : > { %5124 = vst.msk [vmem:[#allocation2 + $0x2d8] sm:$0xff] %vm5032_vm7, %v4831_v57  ;;  %5123 = vst.msk [vmem:[#allocation2 + $0x2d0] sm:$0xff] %vm5032_vm7, %v4829_v58 }
 0x6b4   : > { %5527 = vrot.lane.b32.xlu1 %v8913_v55, %s9498_s22  ;;  %5525 = vrot.lane.b32.xlu0 %v8912_v56, %s9498_s22  ;;  %v12575_v55 = vld [vmem:[%s9554_s30 + $0x57a] sm:$0xff]  ;;  %v12578_v56 = vld [vmem:[%s9554_s30 + $0x572] sm:$0xff] }
 0x6b6   : > { %v5512_v34 = vpop.permute.xlu1 %5511  ;;  %v5510_v22 = vpop.permute.xlu0 %5509 }
 0x6b7   : > { %5849 = vst.msk [vmem:[#allocation2 + $0x178] sm:$0xff] %vm5801_vm8, %v5512_v34  ;;  %5848 = vst.msk [vmem:[#allocation2 + $0x170] sm:$0xff] %vm5801_vm8, %v5510_v22 }
 0x6b8   : > { %5611 = vrot.lane.b32.xlu1 %v8955_v59, %s9498_s22  ;;  %5609 = vrot.lane.b32.xlu0 %v8954_v60, %s9498_s22 }
 0x6ba   : > { %v5596_v61 = vpop.permute.xlu1 %5595  ;;  %v5594_v35 = vpop.permute.xlu0 %5593 }
 0x6bb   : > { %5891 = vst.msk [vmem:[#allocation2 + $0x2c8] sm:$0xff] %vm5801_vm8, %v5596_v61  ;;  %5890 = vst.msk [vmem:[#allocation2 + $0x2c0] sm:$0xff] %vm5801_vm8, %v5594_v35 }
 0x6bc   : > { %6292 = vrot.lane.b32.xlu1 %v9039_v21, %s9499_s27  ;;  %6290 = vrot.lane.b32.xlu0 %v9038_v10, %s9499_s27  ;;  %v8789_v21 = vld [vmem:[%s9554_s30 + $0x320] sm:$0xff]  ;;  %v8788_v10 = vld [vmem:[%s9554_s30 + $0x318] sm:$0xff] }
 0x6be   : > { %v6277_v14 = vpop.permute.xlu1 %6276  ;;  %v6275_v63 = vpop.permute.xlu0 %6274 }
 0x6bf   : > { %6616 = vst.msk [vmem:[#allocation2 + $0x168] sm:$0xff] %vm6570_vm9, %v6277_v14  ;;  %6615 = vst.msk [vmem:[#allocation2 + $0x160] sm:$0xff] %vm6570_vm9, %v6275_v63 }
 0x6c0   : > { %5615 = vrot.lane.b32.xlu1 %v8957_v38, %s9498_s22  ;;  %5613 = vrot.lane.b32.xlu0 %v8956_v11, %s9498_s22  ;;  %v8831_v38 = vld [vmem:[%s9554_s30 + $0x578] sm:$0xff]  ;;  %v8830_v11 = vld [vmem:[%s9554_s30 + $0x570] sm:$0xff] }
 0x6c2   : > { %v5600_v0 = vpop.permute.xlu1 %5599  ;;  %v5598_v42 = vpop.permute.xlu0 %5597 }
 0x6c3   : > { %5893 = vst.msk [vmem:[#allocation2 + $0x2d8] sm:$0xff] %vm5801_vm8, %v5600_v0  ;;  %5892 = vst.msk [vmem:[#allocation2 + $0x2d0] sm:$0xff] %vm5801_vm8, %v5598_v42 }
 0x6c4   : > { %6296 = vrot.lane.b32.xlu1 %v9041_v15, %s9499_s27  ;;  %6294 = vrot.lane.b32.xlu0 %v9040_v40, %s9499_s27  ;;  %v8915_v15 = vld [vmem:[%s9554_s30 + $0x309] sm:$0xff]  ;;  %v8914_v40 = vld [vmem:[%s9554_s30 + $0x301] sm:$0xff] }
 0x6c5   : > { %v9320_v1 = vpop.f32.mrf.mxu0 }
 0x6c6   : > { %v7286_v5 = vadd.f32 %v9481_v2, %v9320_v1  ;;  %v6281_v6 = vpop.permute.xlu1 %6280  ;;  %v6279_v7 = vpop.permute.xlu0 %6278  ;;  %v6743_v8 = vld [vmem:[#allocation2 + $0x160] sm:$0xff]  ;;  %v6744_v9 = vld [vmem:[#allocation2 + $0x168] sm:$0xff]  ;;  %v8833_v1 = vld [vmem:[%s9554_s30 + $0x590] sm:$0xff] }
 0x6c7   : > { %6618 = vst.msk [vmem:[#allocation2 + $0x178] sm:$0xff] %vm6570_vm9, %v6281_v6  ;;  %6617 = vst.msk [vmem:[#allocation2 + $0x170] sm:$0xff] %vm6570_vm9, %v6279_v7  ;;  %v7277_v62 = vpop.f32.mrf.mxu0  ;;  %v6849_v12 = vpack.c.bf16 %v6744_v9, %v6743_v8  ;;  %v8917_v7 = vld [vmem:[%s9554_s30 + $0x321] sm:$0xff]  ;;  %v8916_v8 = vld [vmem:[%s9554_s30 + $0x319] sm:$0xff] }
 0x6c8   : > { %v7278_v13 = vadd.f32 %v9481_v2, %v7277_v62  ;;  %6380 = vrot.lane.b32.xlu1 %v12456_v3, %s9499_s27  ;;  %6378 = vrot.lane.b32.xlu0 %v12459_v4, %s9499_s27  ;;  %v7706_v17 = vmax.f32 %v7286_v5, 0.0 }
 0x6c9   : > { %v9321_v39 = vpop.f32.mrf.mxu0  ;;  %9334 = vmatprep.mubr.msk.bf16.mxu0 %vm6934_vm10, %v6849_v12  ;;  %v8959_v12 = vld [vmem:[%s9554_s30 + $0x579] sm:$0xff] }
 0x6ca   : > { %v7704_v20 = vmax.f32 %v7278_v13, 0.0  ;;  %v7289_v19 = vadd.f32 %v9481_v2, %v9321_v39  ;;  %v6365_v23 = vpop.permute.xlu1 %6364  ;;  %v6363_v24 = vpop.permute.xlu0 %6362  ;;  %v7834_v29 = vsel %vm7804_vm11, %v7706_v17, 0.0  ;;  %v8958_v13 = vld [vmem:[%s9554_s30 + $0x571] sm:$0xff]  ;;  %v9042_v17 = vld [vmem:[%s9554_s30 + $0x302] sm:$0xff] }
 0x6cb   : > { %6660 = vst.msk [vmem:[#allocation2 + $0x2c8] sm:$0xff] %vm6570_vm9, %v6365_v23  ;;  %6659 = vst.msk [vmem:[#allocation2 + $0x2c0] sm:$0xff] %vm6570_vm9, %v6363_v24  ;;  %v7280_v25 = vpop.f32.mrf.mxu0  ;;  %v8961_v23 = vld [vmem:[%s9554_s30 + $0x591] sm:$0xff]  ;;  %v8960_v24 = vld [vmem:[%s9554_s30 + $0x589] sm:$0xff] }
 0x6cc   : > { %v7832_v3 = vsel %vm7804_vm11, %v7704_v20, 0.0  ;;  %v7281_v28 = vadd.f32 %v9481_v2, %v7280_v25  ;;  %6384 = vrot.lane.b32.xlu1 %v9085_v16, %s9499_s27  ;;  %6382 = vrot.lane.b32.xlu0 %v9084_v18, %s9499_s27  ;;  %v7707_v32 = vmax.f32 %v7289_v19, 0.0  ;;  %v8832_v2 = vld [vmem:[%s9554_s30 + $0x588] sm:$0xff] }
 0x6cd   : > { %v7833_v4 = vadd.f32 %v7832_v3, %v12485_v41 }
 0x6ce   : > { %v7705_v33 = vmax.f32 %v7281_v28, 0.0  ;;  %v6369_v36 = vpop.permute.xlu1 %6368  ;;  %v6367_v37 = vpop.permute.xlu0 %6366  ;;  %v6745_v43 = vld [vmem:[#allocation2 + $0x170] sm:$0xff]  ;;  %v6746_v44 = vld [vmem:[#allocation2 + $0x178] sm:$0xff]  ;;  %v7865_v47 = vsel %vm7804_vm11, %v7707_v32, 0.0  ;;  %v9045_v28 = vld [vmem:[%s9554_s30 + $0x322] sm:$0xff] }
 0x6cf   : > { %v7835_v26 = vadd.f32 %v7834_v29, %v7833_v4  ;;  %6662 = vst.msk [vmem:[#allocation2 + $0x2d8] sm:$0xff] %vm6570_vm9, %v6369_v36  ;;  %6661 = vst.msk [vmem:[#allocation2 + $0x2d0] sm:$0xff] %vm6570_vm9, %v6367_v37  ;;  %v6850_v45 = vpack.c.bf16 %v6746_v44, %v6745_v43  ;;  %v9044_v4 = vld [vmem:[%s9554_s30 + $0x31a] sm:$0xff] }
 0x6d0   : > { %v7863_v46 = vsel %vm7804_vm11, %v7705_v33, 0.0  ;;  %4080 = vrot.lane.b32.xlu1 %v9085_v16, %s9496_s12  ;;  %4078 = vrot.lane.b32.xlu0 %v9084_v18, %s9496_s12  ;;  %v9043_v18 = vld [vmem:[%s9554_s30 + $0x30a] sm:$0xff] }
 0x6d1   : > { %v7864_v41 = vadd.f32 %v7863_v46, %v12496_v50  ;;  %9335 = vmatmul.mubr.msk.bf16.gmra.mxu0 %vm6934_vm10, %v6850_v45  ;;  %v12569_v50 = vmul.f32 0.0625, %v7835_v26  ;;  %v9089_v26 = vld [vmem:[%s9554_s30 + $0x592] sm:$0xff]  ;;  %v9088_v45 = vld [vmem:[%s9554_s30 + $0x58a] sm:$0xff] }
 0x6d2   : > { %v4065_v31 = vpop.permute.xlu1 %4064  ;;  %v4063_v48 = vpop.permute.xlu0 %4062  ;;  %v6787_v49 = vld [vmem:[#allocation2 + $0x2c0] sm:$0xff]  ;;  %v6788_v51 = vld [vmem:[#allocation2 + $0x2c8] sm:$0xff] }
 0x6d3   : > { %v7866_v52 = vadd.f32 %v7865_v47, %v7864_v41  ;;  %4356 = vst.msk [vmem:[#allocation2 + $0x2e8] sm:$0xff] %vm4262_vm5, %v4065_v31  ;;  %4355 = vst.msk [vmem:[#allocation2 + $0x2e0] sm:$0xff] %vm4262_vm5, %v4063_v48  ;;  %v6871_v53 = vpack.c.bf16 %v6788_v51, %v6787_v49  ;;  %v8791_v49 = vld [vmem:[%s9554_s30 + $0x338] sm:$0xff]  ;;  %v8790_v51 = vld [vmem:[%s9554_s30 + $0x330] sm:$0xff] }
 0x6d4   : > { %4762 = vrot.lane.b32.xlu1 %v8787_v27, %s9497_s17  ;;  %4760 = vrot.lane.b32.xlu0 %v8786_v30, %s9497_s17 }
 0x6d5   : > { %v12571_v54 = vmul.f32 0.0625, %v7866_v52  ;;  %9378 = vmatprep.mubr.msk.bf16.mxu1 %vm6934_vm10, %v6871_v53 }
 0x6d6   : > { %v4747_v57 = vpop.permute.xlu1 %4746  ;;  %v4745_v58 = vpop.permute.xlu0 %4744  ;;  %v6789_v59 = vld [vmem:[#allocation2 + $0x2d0] sm:$0xff]  ;;  %v6790_v60 = vld [vmem:[#allocation2 + $0x2d8] sm:$0xff] }
 0x6d7   : > { %5082 = vst.msk [vmem:[#allocation2 + $0x188] sm:$0xff] %vm5032_vm7, %v4747_v57  ;;  %5081 = vst.msk [vmem:[#allocation2 + $0x180] sm:$0xff] %vm5032_vm7, %v4745_v58  ;;  %v6872_v34 = vpack.c.bf16 %v6790_v60, %v6789_v59  ;;  %v8061_v22 = vpack.c.bf16 %v12571_v54, %v12569_v50  ;;  %v12669_v58 = vld [vmem:[%s9554_s30 + $0x5aa] sm:$0xff]  ;;  %v12672_v59 = vld [vmem:[%s9554_s30 + $0x5a2] sm:$0xff] }
 0x6d8   : > { %4084 = vrot.lane.b32.xlu1 %v12575_v55, %s9496_s12  ;;  %4082 = vrot.lane.b32.xlu0 %v12578_v56, %s9496_s12 }
 0x6d9   : > { %9379 = vmatmul.mubr.msk.bf16.gmra.mxu1 %vm6934_vm10, %v6872_v34 }
 0x6da   : > { %v4069_v61 = vpop.permute.xlu1 %4068  ;;  %v4067_v35 = vpop.permute.xlu0 %4066 }
 0x6db   : > { %4358 = vst.msk [vmem:[#allocation2 + $0x2f8] sm:$0xff] %vm4262_vm5, %v4069_v61  ;;  %4357 = vst.msk [vmem:[#allocation2 + $0x2f0] sm:$0xff] %vm4262_vm5, %v4067_v35  ;;  %v8793_v35 = vld [vmem:[%s9554_s30 + $0x350] sm:$0xff] }
 0x6dc   : > { %4766 = vrot.lane.b32.xlu1 %v8789_v21, %s9497_s17  ;;  %4764 = vrot.lane.b32.xlu0 %v8788_v10, %s9497_s17 }
 0x6de   : > { %v4751_v14 = vpop.permute.xlu1 %4750  ;;  %v4749_v63 = vpop.permute.xlu0 %4748 }
 0x6df   : > { %5084 = vst.msk [vmem:[#allocation2 + $0x198] sm:$0xff] %vm5032_vm7, %v4751_v14  ;;  %5083 = vst.msk [vmem:[#allocation2 + $0x190] sm:$0xff] %vm5032_vm7, %v4749_v63  ;;  %v8835_v63 = vld [vmem:[%s9554_s30 + $0x5a8] sm:$0xff] }
 0x6e0   : > { %4850 = vrot.lane.b32.xlu1 %v8831_v38, %s9497_s17  ;;  %4848 = vrot.lane.b32.xlu0 %v8830_v11, %s9497_s17  ;;  %v8792_v38 = vld [vmem:[%s9554_s30 + $0x348] sm:$0xff] }
 0x6e2   : > { %v4835_v0 = vpop.permute.xlu1 %4834  ;;  %v4833_v42 = vpop.permute.xlu0 %4832 }
 0x6e3   : > { %5126 = vst.msk [vmem:[#allocation2 + $0x2e8] sm:$0xff] %vm5032_vm7, %v4835_v0  ;;  %5125 = vst.msk [vmem:[#allocation2 + $0x2e0] sm:$0xff] %vm5032_vm7, %v4833_v42  ;;  %v8919_v42 = vld [vmem:[%s9554_s30 + $0x339] sm:$0xff] }
 0x6e4   : > { %5531 = vrot.lane.b32.xlu1 %v8915_v15, %s9498_s22  ;;  %5529 = vrot.lane.b32.xlu0 %v8914_v40, %s9498_s22  ;;  %v8834_v15 = vld [vmem:[%s9554_s30 + $0x5a0] sm:$0xff] }
 0x6e6   : > { %v5516_v5 = vpop.permute.xlu1 %5515  ;;  %v5514_v6 = vpop.permute.xlu0 %5513 }
 0x6e7   : > { %5851 = vst.msk [vmem:[#allocation2 + $0x188] sm:$0xff] %vm5801_vm8, %v5516_v5  ;;  %5850 = vst.msk [vmem:[#allocation2 + $0x180] sm:$0xff] %vm5801_vm8, %v5514_v6  ;;  %v8837_v6 = vld [vmem:[%s9554_s30 + $0x5c0] sm:$0xff] }
 0x6e8   : > { %4854 = vrot.lane.b32.xlu1 %v8833_v1, %s9497_s17  ;;  %4852 = vrot.lane.b32.xlu0 %v8832_v2, %s9497_s17  ;;  %v8918_v1 = vld [vmem:[%s9554_s30 + $0x331] sm:$0xff] }
 0x6ea   : > { %v4839_v9 = vpop.permute.xlu1 %4838  ;;  %v4837_v62 = vpop.permute.xlu0 %4836 }
 0x6eb   : > { %5128 = vst.msk [vmem:[#allocation2 + $0x2f8] sm:$0xff] %vm5032_vm7, %v4839_v9  ;;  %5127 = vst.msk [vmem:[#allocation2 + $0x2f0] sm:$0xff] %vm5032_vm7, %v4837_v62  ;;  %v8921_v62 = vld [vmem:[%s9554_s30 + $0x351] sm:$0xff] }
 0x6ec   : > { %5535 = vrot.lane.b32.xlu1 %v8917_v7, %s9498_s22  ;;  %5533 = vrot.lane.b32.xlu0 %v8916_v8, %s9498_s22  ;;  %v8836_v7 = vld [vmem:[%s9554_s30 + $0x5b8] sm:$0xff] }
 0x6ee   : > { %v5520_v39 = vpop.permute.xlu1 %5519  ;;  %v5518_v16 = vpop.permute.xlu0 %5517 }
 0x6ef   : > { %5853 = vst.msk [vmem:[#allocation2 + $0x198] sm:$0xff] %vm5801_vm8, %v5520_v39  ;;  %5852 = vst.msk [vmem:[#allocation2 + $0x190] sm:$0xff] %vm5801_vm8, %v5518_v16  ;;  %v8963_v16 = vld [vmem:[%s9554_s30 + $0x5a9] sm:$0xff] }
 0x6f0   : > { %5619 = vrot.lane.b32.xlu1 %v8959_v12, %s9498_s22  ;;  %5617 = vrot.lane.b32.xlu0 %v8958_v13, %s9498_s22  ;;  %v8920_v12 = vld [vmem:[%s9554_s30 + $0x349] sm:$0xff] }
 0x6f2   : > { %v5604_v20 = vpop.permute.xlu1 %5603  ;;  %v5602_v19 = vpop.permute.xlu0 %5601 }
 0x6f3   : > { %5895 = vst.msk [vmem:[#allocation2 + $0x2e8] sm:$0xff] %vm5801_vm8, %v5604_v20  ;;  %5894 = vst.msk [vmem:[#allocation2 + $0x2e0] sm:$0xff] %vm5801_vm8, %v5602_v19  ;;  %v9047_v19 = vld [vmem:[%s9554_s30 + $0x33a] sm:$0xff] }
 0x6f4   : > { %6300 = vrot.lane.b32.xlu1 %v9043_v18, %s9499_s27  ;;  %6298 = vrot.lane.b32.xlu0 %v9042_v17, %s9499_s27  ;;  %v8962_v18 = vld [vmem:[%s9554_s30 + $0x5a1] sm:$0xff] }
 0x6f6   : > { %v6285_v25 = vpop.permute.xlu1 %6284  ;;  %v6283_v3 = vpop.permute.xlu0 %6282 }
 0x6f7   : > { %6620 = vst.msk [vmem:[#allocation2 + $0x188] sm:$0xff] %vm6570_vm9, %v6285_v25  ;;  %6619 = vst.msk [vmem:[#allocation2 + $0x180] sm:$0xff] %vm6570_vm9, %v6283_v3  ;;  %v8965_v3 = vld [vmem:[%s9554_s30 + $0x5c1] sm:$0xff] }
 0x6f8   : > { %5623 = vrot.lane.b32.xlu1 %v8961_v23, %s9498_s22  ;;  %5621 = vrot.lane.b32.xlu0 %v8960_v24, %s9498_s22  ;;  %v9046_v23 = vld [vmem:[%s9554_s30 + $0x332] sm:$0xff] }
 0x6fa   : > { %v5608_v29 = vpop.permute.xlu1 %5607  ;;  %v5606_v32 = vpop.permute.xlu0 %5605 }
 0x6fb   : > { %5897 = vst.msk [vmem:[#allocation2 + $0x2f8] sm:$0xff] %vm5801_vm8, %v5608_v29  ;;  %5896 = vst.msk [vmem:[#allocation2 + $0x2f0] sm:$0xff] %vm5801_vm8, %v5606_v32  ;;  %v9049_v32 = vld [vmem:[%s9554_s30 + $0x352] sm:$0xff] }
 0x6fc   : > { %6304 = vrot.lane.b32.xlu1 %v9045_v28, %s9499_s27  ;;  %6302 = vrot.lane.b32.xlu0 %v9044_v4, %s9499_s27  ;;  %v8964_v28 = vld [vmem:[%s9554_s30 + $0x5b9] sm:$0xff] }
 0x6fe   : > { %v6289_v33 = vpop.permute.xlu1 %6288  ;;  %v6287_v36 = vpop.permute.xlu0 %6286  ;;  %v6747_v37 = vld [vmem:[#allocation2 + $0x180] sm:$0xff]  ;;  %v6748_v43 = vld [vmem:[#allocation2 + $0x188] sm:$0xff] }
 0x6ff   : > { %6622 = vst.msk [vmem:[#allocation2 + $0x198] sm:$0xff] %vm6570_vm9, %v6289_v33  ;;  %6621 = vst.msk [vmem:[#allocation2 + $0x190] sm:$0xff] %vm6570_vm9, %v6287_v36  ;;  %v6851_v44 = vpack.c.bf16 %v6748_v43, %v6747_v37  ;;  %v9048_v33 = vld [vmem:[%s9554_s30 + $0x34a] sm:$0xff] }
 0x700   : > { %6388 = vrot.lane.b32.xlu1 %v12575_v55, %s9499_s27  ;;  %6386 = vrot.lane.b32.xlu0 %v12578_v56, %s9499_s27 }
 0x701   : > { %9338 = vmatprep.mubr.msk.bf16.mxu0 %vm6934_vm10, %v6851_v44 }
 0x702   : > { %v6373_v46 = vpop.permute.xlu1 %6372  ;;  %v6371_v41 = vpop.permute.xlu0 %6370 }
 0x703   : > { %6664 = vst.msk [vmem:[#allocation2 + $0x2e8] sm:$0xff] %vm6570_vm9, %v6373_v46  ;;  %6663 = vst.msk [vmem:[#allocation2 + $0x2e0] sm:$0xff] %vm6570_vm9, %v6371_v41  ;;  %v9093_v41 = vld [vmem:[%s9554_s30 + $0x5c2] sm:$0xff] }
 0x704   : > { %6392 = vrot.lane.b32.xlu1 %v9089_v26, %s9499_s27  ;;  %6390 = vrot.lane.b32.xlu0 %v9088_v45, %s9499_s27 }
 0x706   : > { %v6377_v27 = vpop.permute.xlu1 %6376  ;;  %v6375_v30 = vpop.permute.xlu0 %6374  ;;  %v6749_v47 = vld [vmem:[#allocation2 + $0x190] sm:$0xff]  ;;  %v6750_v31 = vld [vmem:[#allocation2 + $0x198] sm:$0xff] }
 0x707   : > { %6666 = vst.msk [vmem:[#allocation2 + $0x2f8] sm:$0xff] %vm6570_vm9, %v6377_v27  ;;  %6665 = vst.msk [vmem:[#allocation2 + $0x2f0] sm:$0xff] %vm6570_vm9, %v6375_v30  ;;  %v6852_v48 = vpack.c.bf16 %v6750_v31, %v6749_v47  ;;  %v9092_v27 = vld [vmem:[%s9554_s30 + $0x5ba] sm:$0xff] }
 0x708   : > { %4088 = vrot.lane.b32.xlu1 %v9089_v26, %s9496_s12  ;;  %4086 = vrot.lane.b32.xlu0 %v9088_v45, %s9496_s12 }
 0x709   : > { %9339 = vmatmul.mubr.msk.bf16.gmra.mxu0 %vm6934_vm10, %v6852_v48 }
 0x70a   : > { %v4073_v52 = vpop.permute.xlu1 %4072  ;;  %v4071_v53 = vpop.permute.xlu0 %4070  ;;  %v6791_v55 = vld [vmem:[#allocation2 + $0x2e0] sm:$0xff]  ;;  %v6792_v56 = vld [vmem:[#allocation2 + $0x2e8] sm:$0xff] }
 0x70b   : > { %4360 = vst.msk [vmem:[#allocation2 + $0x308] sm:$0xff] %vm4262_vm5, %v4073_v52  ;;  %4359 = vst.msk [vmem:[#allocation2 + $0x300] sm:$0xff] %vm4262_vm5, %v4071_v53  ;;  %v6873_v57 = vpack.c.bf16 %v6792_v56, %v6791_v55  ;;  %v8795_v53 = vld [vmem:[%s9554_s30 + $0x398] sm:$0xff]  ;;  %v8794_v55 = vld [vmem:[%s9554_s30 + $0x390] sm:$0xff] }
 0x70c   : > { %4770 = vrot.lane.b32.xlu1 %v8791_v49, %s9497_s17  ;;  %4768 = vrot.lane.b32.xlu0 %v8790_v51, %s9497_s17 }
 0x70d   : > { %9382 = vmatprep.mubr.msk.bf16.mxu1 %vm6934_vm10, %v6873_v57 }
 0x70e   : > { %v4755_v60 = vpop.permute.xlu1 %4754  ;;  %v4753_v34 = vpop.permute.xlu0 %4752  ;;  %v6793_v21 = vld [vmem:[#allocation2 + $0x2f0] sm:$0xff]  ;;  %v6794_v10 = vld [vmem:[#allocation2 + $0x2f8] sm:$0xff] }
 0x70f   : > { %5086 = vst.msk [vmem:[#allocation2 + $0x1a8] sm:$0xff] %vm5032_vm7, %v4755_v60  ;;  %5085 = vst.msk [vmem:[#allocation2 + $0x1a0] sm:$0xff] %vm5032_vm7, %v4753_v34  ;;  %v6874_v61 = vpack.c.bf16 %v6794_v10, %v6793_v21  ;;  %v12761_v34 = vld [vmem:[%s9554_s30 + $0x5da] sm:$0xff]  ;;  %v12764_v21 = vld [vmem:[%s9554_s30 + $0x5d2] sm:$0xff] }
 0x710   : > { %4092 = vrot.lane.b32.xlu1 %v12669_v58, %s9496_s12  ;;  %4090 = vrot.lane.b32.xlu0 %v12672_v59, %s9496_s12 }
 0x711   : > { %9383 = vmatmul.mubr.msk.bf16.gmra.mxu1 %vm6934_vm10, %v6874_v61 }
 0x712   : > { %v4077_v11 = vpop.permute.xlu1 %4076  ;;  %v4075_v14 = vpop.permute.xlu0 %4074 }
 0x713   : > { %4362 = vst.msk [vmem:[#allocation2 + $0x318] sm:$0xff] %vm4262_vm5, %v4077_v11  ;;  %4361 = vst.msk [vmem:[#allocation2 + $0x310] sm:$0xff] %vm4262_vm5, %v4075_v14  ;;  %v8797_v14 = vld [vmem:[%s9554_s30 + $0x3b0] sm:$0xff] }
 0x714   : > { %4774 = vrot.lane.b32.xlu1 %v8793_v35, %s9497_s17  ;;  %4772 = vrot.lane.b32.xlu0 %v8792_v38, %s9497_s17 }
 0x716   : > { %v4759_v40 = vpop.permute.xlu1 %4758  ;;  %v4757_v0 = vpop.permute.xlu0 %4756 }
 0x717   : > { %5088 = vst.msk [vmem:[#allocation2 + $0x1b8] sm:$0xff] %vm5032_vm7, %v4759_v40  ;;  %5087 = vst.msk [vmem:[#allocation2 + $0x1b0] sm:$0xff] %vm5032_vm7, %v4757_v0  ;;  %v8839_v0 = vld [vmem:[%s9554_s30 + $0x5d8] sm:$0xff] }
 0x718   : > { %4858 = vrot.lane.b32.xlu1 %v8835_v63, %s9497_s17  ;;  %4856 = vrot.lane.b32.xlu0 %v8834_v15, %s9497_s17  ;;  %v8796_v63 = vld [vmem:[%s9554_s30 + $0x3a8] sm:$0xff] }
 0x71a   : > { %v4843_v2 = vpop.permute.xlu1 %4842  ;;  %v4841_v5 = vpop.permute.xlu0 %4840 }
 0x71b   : > { %5130 = vst.msk [vmem:[#allocation2 + $0x308] sm:$0xff] %vm5032_vm7, %v4843_v2  ;;  %5129 = vst.msk [vmem:[#allocation2 + $0x300] sm:$0xff] %vm5032_vm7, %v4841_v5  ;;  %v8923_v5 = vld [vmem:[%s9554_s30 + $0x399] sm:$0xff] }
 0x71c   : > { %5539 = vrot.lane.b32.xlu1 %v8919_v42, %s9498_s22  ;;  %5537 = vrot.lane.b32.xlu0 %v8918_v1, %s9498_s22  ;;  %v8838_v42 = vld [vmem:[%s9554_s30 + $0x5d0] sm:$0xff] }
 0x71e   : > { %v5524_v8 = vpop.permute.xlu1 %5523  ;;  %v5522_v9 = vpop.permute.xlu0 %5521 }
 0x71f   : > { %5855 = vst.msk [vmem:[#allocation2 + $0x1a8] sm:$0xff] %vm5801_vm8, %v5524_v8  ;;  %5854 = vst.msk [vmem:[#allocation2 + $0x1a0] sm:$0xff] %vm5801_vm8, %v5522_v9  ;;  %v8841_v9 = vld [vmem:[%s9554_s30 + $0x5f0] sm:$0xff] }
 0x720   : > { %4862 = vrot.lane.b32.xlu1 %v8837_v6, %s9497_s17  ;;  %4860 = vrot.lane.b32.xlu0 %v8836_v7, %s9497_s17  ;;  %v8922_v6 = vld [vmem:[%s9554_s30 + $0x391] sm:$0xff] }
 0x722   : > { %v4847_v13 = vpop.permute.xlu1 %4846  ;;  %v4845_v39 = vpop.permute.xlu0 %4844 }
 0x723   : > { %5132 = vst.msk [vmem:[#allocation2 + $0x318] sm:$0xff] %vm5032_vm7, %v4847_v13  ;;  %5131 = vst.msk [vmem:[#allocation2 + $0x310] sm:$0xff] %vm5032_vm7, %v4845_v39  ;;  %v8925_v39 = vld [vmem:[%s9554_s30 + $0x3b1] sm:$0xff] }
 0x724   : > { %5543 = vrot.lane.b32.xlu1 %v8921_v62, %s9498_s22  ;;  %5541 = vrot.lane.b32.xlu0 %v8920_v12, %s9498_s22  ;;  %v8840_v62 = vld [vmem:[%s9554_s30 + $0x5e8] sm:$0xff] }
 0x726   : > { %v5528_v17 = vpop.permute.xlu1 %5527  ;;  %v5526_v20 = vpop.permute.xlu0 %5525 }
 0x727   : > { %5857 = vst.msk [vmem:[#allocation2 + $0x1b8] sm:$0xff] %vm5801_vm8, %v5528_v17  ;;  %5856 = vst.msk [vmem:[#allocation2 + $0x1b0] sm:$0xff] %vm5801_vm8, %v5526_v20  ;;  %v8967_v20 = vld [vmem:[%s9554_s30 + $0x5d9] sm:$0xff] }
 0x728   : > { %5627 = vrot.lane.b32.xlu1 %v8963_v16, %s9498_s22  ;;  %5625 = vrot.lane.b32.xlu0 %v8962_v18, %s9498_s22  ;;  %v8924_v16 = vld [vmem:[%s9554_s30 + $0x3a9] sm:$0xff] }
 0x72a   : > { %v5612_v24 = vpop.permute.xlu1 %5611  ;;  %v5610_v25 = vpop.permute.xlu0 %5609 }
 0x72b   : > { %5899 = vst.msk [vmem:[#allocation2 + $0x308] sm:$0xff] %vm5801_vm8, %v5612_v24  ;;  %5898 = vst.msk [vmem:[#allocation2 + $0x300] sm:$0xff] %vm5801_vm8, %v5610_v25  ;;  %v9051_v25 = vld [vmem:[%s9554_s30 + $0x39a] sm:$0xff] }
 0x72c   : > { %6308 = vrot.lane.b32.xlu1 %v9047_v19, %s9499_s27  ;;  %6306 = vrot.lane.b32.xlu0 %v9046_v23, %s9499_s27  ;;  %v8966_v19 = vld [vmem:[%s9554_s30 + $0x5d1] sm:$0xff] }
 0x72e   : > { %v6293_v4 = vpop.permute.xlu1 %6292  ;;  %v6291_v29 = vpop.permute.xlu0 %6290 }
 0x72f   : > { %6624 = vst.msk [vmem:[#allocation2 + $0x1a8] sm:$0xff] %vm6570_vm9, %v6293_v4  ;;  %6623 = vst.msk [vmem:[#allocation2 + $0x1a0] sm:$0xff] %vm6570_vm9, %v6291_v29  ;;  %v8969_v29 = vld [vmem:[%s9554_s30 + $0x5f1] sm:$0xff] }
 0x730   : > { %5631 = vrot.lane.b32.xlu1 %v8965_v3, %s9498_s22  ;;  %5629 = vrot.lane.b32.xlu0 %v8964_v28, %s9498_s22  ;;  %v9050_v3 = vld [vmem:[%s9554_s30 + $0x392] sm:$0xff] }
 0x732   : > { %v5616_v36 = vpop.permute.xlu1 %5615  ;;  %v5614_v37 = vpop.permute.xlu0 %5613 }
 0x733   : > { %5901 = vst.msk [vmem:[#allocation2 + $0x318] sm:$0xff] %vm5801_vm8, %v5616_v36  ;;  %5900 = vst.msk [vmem:[#allocation2 + $0x310] sm:$0xff] %vm5801_vm8, %v5614_v37  ;;  %v9053_v37 = vld [vmem:[%s9554_s30 + $0x3b2] sm:$0xff] }
 0x734   : > { %6312 = vrot.lane.b32.xlu1 %v9049_v32, %s9499_s27  ;;  %6310 = vrot.lane.b32.xlu0 %v9048_v33, %s9499_s27  ;;  %v8968_v32 = vld [vmem:[%s9554_s30 + $0x5e9] sm:$0xff] }
 0x736   : > { %v6297_v43 = vpop.permute.xlu1 %6296  ;;  %v6295_v44 = vpop.permute.xlu0 %6294  ;;  %v6751_v26 = vld [vmem:[#allocation2 + $0x1a0] sm:$0xff]  ;;  %v6752_v45 = vld [vmem:[#allocation2 + $0x1a8] sm:$0xff] }
 0x737   : > { %6626 = vst.msk [vmem:[#allocation2 + $0x1b8] sm:$0xff] %vm6570_vm9, %v6297_v43  ;;  %6625 = vst.msk [vmem:[#allocation2 + $0x1b0] sm:$0xff] %vm6570_vm9, %v6295_v44  ;;  %v6853_v46 = vpack.c.bf16 %v6752_v45, %v6751_v26  ;;  %v9052_v43 = vld [vmem:[%s9554_s30 + $0x3aa] sm:$0xff] }
 0x738   : > { %6396 = vrot.lane.b32.xlu1 %v12669_v58, %s9499_s27  ;;  %6394 = vrot.lane.b32.xlu0 %v12672_v59, %s9499_s27 }
 0x739   : > { %9342 = vmatprep.mubr.msk.bf16.mxu0 %vm6934_vm10, %v6853_v46 }
 0x73a   : > { %v6381_v30 = vpop.permute.xlu1 %6380  ;;  %v6379_v47 = vpop.permute.xlu0 %6378 }
 0x73b   : > { %6668 = vst.msk [vmem:[#allocation2 + $0x308] sm:$0xff] %vm6570_vm9, %v6381_v30  ;;  %6667 = vst.msk [vmem:[#allocation2 + $0x300] sm:$0xff] %vm6570_vm9, %v6379_v47  ;;  %v9097_v47 = vld [vmem:[%s9554_s30 + $0x5f2] sm:$0xff] }
 0x73c   : > { %6400 = vrot.lane.b32.xlu1 %v9093_v41, %s9499_s27  ;;  %6398 = vrot.lane.b32.xlu0 %v9092_v27, %s9499_s27 }
 0x73e   : > { %v6385_v31 = vpop.permute.xlu1 %6384  ;;  %v6383_v48 = vpop.permute.xlu0 %6382  ;;  %v6753_v49 = vld [vmem:[#allocation2 + $0x1b0] sm:$0xff]  ;;  %v6754_v51 = vld [vmem:[#allocation2 + $0x1b8] sm:$0xff] }
 0x73f   : > { %6670 = vst.msk [vmem:[#allocation2 + $0x318] sm:$0xff] %vm6570_vm9, %v6385_v31  ;;  %6669 = vst.msk [vmem:[#allocation2 + $0x310] sm:$0xff] %vm6570_vm9, %v6383_v48  ;;  %v6854_v52 = vpack.c.bf16 %v6754_v51, %v6753_v49  ;;  %v9096_v31 = vld [vmem:[%s9554_s30 + $0x5ea] sm:$0xff] }
 0x740   : > { %4096 = vrot.lane.b32.xlu1 %v9093_v41, %s9496_s12  ;;  %4094 = vrot.lane.b32.xlu0 %v9092_v27, %s9496_s12 }
 0x741   : > { %9343 = vmatmul.mubr.msk.bf16.gmra.mxu0 %vm6934_vm10, %v6854_v52 }
 0x742   : > { %v4081_v56 = vpop.permute.xlu1 %4080  ;;  %v4079_v57 = vpop.permute.xlu0 %4078  ;;  %v6795_v58 = vld [vmem:[#allocation2 + $0x300] sm:$0xff]  ;;  %v6796_v59 = vld [vmem:[#allocation2 + $0x308] sm:$0xff] }
 0x743   : > { %4364 = vst.msk [vmem:[#allocation2 + $0x328] sm:$0xff] %vm4262_vm5, %v4081_v56  ;;  %4363 = vst.msk [vmem:[#allocation2 + $0x320] sm:$0xff] %vm4262_vm5, %v4079_v57  ;;  %v6875_v60 = vpack.c.bf16 %v6796_v59, %v6795_v58  ;;  %v8799_v57 = vld [vmem:[%s9554_s30 + $0x3c8] sm:$0xff]  ;;  %v8798_v58 = vld [vmem:[%s9554_s30 + $0x3c0] sm:$0xff] }
 0x744   : > { %4778 = vrot.lane.b32.xlu1 %v8795_v53, %s9497_s17  ;;  %4776 = vrot.lane.b32.xlu0 %v8794_v55, %s9497_s17 }
 0x745   : > { %9386 = vmatprep.mubr.msk.bf16.mxu1 %vm6934_vm10, %v6875_v60 }
 0x746   : > { %v4763_v10 = vpop.permute.xlu1 %4762  ;;  %v4761_v61 = vpop.permute.xlu0 %4760  ;;  %v6797_v35 = vld [vmem:[#allocation2 + $0x310] sm:$0xff]  ;;  %v6798_v38 = vld [vmem:[#allocation2 + $0x318] sm:$0xff] }
 0x747   : > { %5090 = vst.msk [vmem:[#allocation2 + $0x1c8] sm:$0xff] %vm5032_vm7, %v4763_v10  ;;  %5089 = vst.msk [vmem:[#allocation2 + $0x1c0] sm:$0xff] %vm5032_vm7, %v4761_v61  ;;  %v6876_v11 = vpack.c.bf16 %v6798_v38, %v6797_v35  ;;  %v12853_v61 = vld [vmem:[%s9554_s30 + $0x60a] sm:$0xff]  ;;  %v12856_v35 = vld [vmem:[%s9554_s30 + $0x602] sm:$0xff] }
 0x748   : > { %4100 = vrot.lane.b32.xlu1 %v12761_v34, %s9496_s12  ;;  %4098 = vrot.lane.b32.xlu0 %v12764_v21, %s9496_s12 }
 0x749   : > { %9387 = vmatmul.mubr.msk.bf16.gmra.mxu1 %vm6934_vm10, %v6876_v11 }
 0x74a   : > { %v4085_v15 = vpop.permute.xlu1 %4084  ;;  %v4083_v40 = vpop.permute.xlu0 %4082 }
 0x74b   : > { %4366 = vst.msk [vmem:[#allocation2 + $0x338] sm:$0xff] %vm4262_vm5, %v4085_v15  ;;  %4365 = vst.msk [vmem:[#allocation2 + $0x330] sm:$0xff] %vm4262_vm5, %v4083_v40  ;;  %v8801_v40 = vld [vmem:[%s9554_s30 + $0x3e0] sm:$0xff] }
 0x74c   : > { %4782 = vrot.lane.b32.xlu1 %v8797_v14, %s9497_s17  ;;  %4780 = vrot.lane.b32.xlu0 %v8796_v63, %s9497_s17 }
 0x74e   : > { %v4767_v1 = vpop.permute.xlu1 %4766  ;;  %v4765_v2 = vpop.permute.xlu0 %4764 }
 0x74f   : > { %5092 = vst.msk [vmem:[#allocation2 + $0x1d8] sm:$0xff] %vm5032_vm7, %v4767_v1  ;;  %5091 = vst.msk [vmem:[#allocation2 + $0x1d0] sm:$0xff] %vm5032_vm7, %v4765_v2  ;;  %v8843_v2 = vld [vmem:[%s9554_s30 + $0x608] sm:$0xff] }
 0x750   : > { %4866 = vrot.lane.b32.xlu1 %v8839_v0, %s9497_s17  ;;  %4864 = vrot.lane.b32.xlu0 %v8838_v42, %s9497_s17  ;;  %v8800_v0 = vld [vmem:[%s9554_s30 + $0x3d8] sm:$0xff] }
 0x752   : > { %v4851_v7 = vpop.permute.xlu1 %4850  ;;  %v4849_v8 = vpop.permute.xlu0 %4848 }
 0x753   : > { %5134 = vst.msk [vmem:[#allocation2 + $0x328] sm:$0xff] %vm5032_vm7, %v4851_v7  ;;  %5133 = vst.msk [vmem:[#allocation2 + $0x320] sm:$0xff] %vm5032_vm7, %v4849_v8  ;;  %v8927_v8 = vld [vmem:[%s9554_s30 + $0x3c9] sm:$0xff] }
 0x754   : > { %5547 = vrot.lane.b32.xlu1 %v8923_v5, %s9498_s22  ;;  %5545 = vrot.lane.b32.xlu0 %v8922_v6, %s9498_s22  ;;  %v8842_v5 = vld [vmem:[%s9554_s30 + $0x600] sm:$0xff] }
 0x756   : > { %v5532_v12 = vpop.permute.xlu1 %5531  ;;  %v5530_v13 = vpop.permute.xlu0 %5529 }
 0x757   : > { %5859 = vst.msk [vmem:[#allocation2 + $0x1c8] sm:$0xff] %vm5801_vm8, %v5532_v12  ;;  %5858 = vst.msk [vmem:[#allocation2 + $0x1c0] sm:$0xff] %vm5801_vm8, %v5530_v13  ;;  %v8845_v13 = vld [vmem:[%s9554_s30 + $0x620] sm:$0xff] }
 0x758   : > { %4870 = vrot.lane.b32.xlu1 %v8841_v9, %s9497_s17  ;;  %4868 = vrot.lane.b32.xlu0 %v8840_v62, %s9497_s17  ;;  %v8926_v9 = vld [vmem:[%s9554_s30 + $0x3c1] sm:$0xff] }
 0x75a   : > { %v4855_v18 = vpop.permute.xlu1 %4854  ;;  %v4853_v17 = vpop.permute.xlu0 %4852 }
 0x75b   : > { %5136 = vst.msk [vmem:[#allocation2 + $0x338] sm:$0xff] %vm5032_vm7, %v4855_v18  ;;  %5135 = vst.msk [vmem:[#allocation2 + $0x330] sm:$0xff] %vm5032_vm7, %v4853_v17  ;;  %v8929_v17 = vld [vmem:[%s9554_s30 + $0x3e1] sm:$0xff] }
 0x75c   : > { %5551 = vrot.lane.b32.xlu1 %v8925_v39, %s9498_s22  ;;  %5549 = vrot.lane.b32.xlu0 %v8924_v16, %s9498_s22  ;;  %v8844_v39 = vld [vmem:[%s9554_s30 + $0x618] sm:$0xff] }
 0x75e   : > { %v5536_v23 = vpop.permute.xlu1 %5535  ;;  %v5534_v24 = vpop.permute.xlu0 %5533 }
 0x75f   : > { %5861 = vst.msk [vmem:[#allocation2 + $0x1d8] sm:$0xff] %vm5801_vm8, %v5536_v23  ;;  %5860 = vst.msk [vmem:[#allocation2 + $0x1d0] sm:$0xff] %vm5801_vm8, %v5534_v24  ;;  %v8971_v24 = vld [vmem:[%s9554_s30 + $0x609] sm:$0xff] }
 0x760   : > { %5635 = vrot.lane.b32.xlu1 %v8967_v20, %s9498_s22  ;;  %5633 = vrot.lane.b32.xlu0 %v8966_v19, %s9498_s22  ;;  %v8928_v20 = vld [vmem:[%s9554_s30 + $0x3d9] sm:$0xff] }
 0x762   : > { %v5620_v28 = vpop.permute.xlu1 %5619  ;;  %v5618_v4 = vpop.permute.xlu0 %5617 }
 0x763   : > { %5903 = vst.msk [vmem:[#allocation2 + $0x328] sm:$0xff] %vm5801_vm8, %v5620_v28  ;;  %5902 = vst.msk [vmem:[#allocation2 + $0x320] sm:$0xff] %vm5801_vm8, %v5618_v4  ;;  %v9055_v4 = vld [vmem:[%s9554_s30 + $0x3ca] sm:$0xff] }
 0x764   : > { %6316 = vrot.lane.b32.xlu1 %v9051_v25, %s9499_s27  ;;  %6314 = vrot.lane.b32.xlu0 %v9050_v3, %s9499_s27  ;;  %v8970_v25 = vld [vmem:[%s9554_s30 + $0x601] sm:$0xff] }
 0x766   : > { %v6301_v33 = vpop.permute.xlu1 %6300  ;;  %v6299_v36 = vpop.permute.xlu0 %6298 }
 0x767   : > { %6628 = vst.msk [vmem:[#allocation2 + $0x1c8] sm:$0xff] %vm6570_vm9, %v6301_v33  ;;  %6627 = vst.msk [vmem:[#allocation2 + $0x1c0] sm:$0xff] %vm6570_vm9, %v6299_v36  ;;  %v8973_v36 = vld [vmem:[%s9554_s30 + $0x621] sm:$0xff] }
 0x768   : > { %5639 = vrot.lane.b32.xlu1 %v8969_v29, %s9498_s22  ;;  %5637 = vrot.lane.b32.xlu0 %v8968_v32, %s9498_s22  ;;  %v9054_v29 = vld [vmem:[%s9554_s30 + $0x3c2] sm:$0xff] }
 0x76a   : > { %v5624_v44 = vpop.permute.xlu1 %5623  ;;  %v5622_v26 = vpop.permute.xlu0 %5621 }
 0x76b   : > { %5905 = vst.msk [vmem:[#allocation2 + $0x338] sm:$0xff] %vm5801_vm8, %v5624_v44  ;;  %5904 = vst.msk [vmem:[#allocation2 + $0x330] sm:$0xff] %vm5801_vm8, %v5622_v26  ;;  %v9057_v26 = vld [vmem:[%s9554_s30 + $0x3e2] sm:$0xff] }
 0x76c   : > { %6320 = vrot.lane.b32.xlu1 %v9053_v37, %s9499_s27  ;;  %6318 = vrot.lane.b32.xlu0 %v9052_v43, %s9499_s27  ;;  %v8972_v37 = vld [vmem:[%s9554_s30 + $0x619] sm:$0xff] }
 0x76e   : > { %v6305_v45 = vpop.permute.xlu1 %6304  ;;  %v6303_v46 = vpop.permute.xlu0 %6302  ;;  %v6755_v41 = vld [vmem:[#allocation2 + $0x1c0] sm:$0xff]  ;;  %v6756_v27 = vld [vmem:[#allocation2 + $0x1c8] sm:$0xff] }
 0x76f   : > { %6630 = vst.msk [vmem:[#allocation2 + $0x1d8] sm:$0xff] %vm6570_vm9, %v6305_v45  ;;  %6629 = vst.msk [vmem:[#allocation2 + $0x1d0] sm:$0xff] %vm6570_vm9, %v6303_v46  ;;  %v6855_v30 = vpack.c.bf16 %v6756_v27, %v6755_v41  ;;  %v9056_v45 = vld [vmem:[%s9554_s30 + $0x3da] sm:$0xff] }
 0x770   : > { %6404 = vrot.lane.b32.xlu1 %v12761_v34, %s9499_s27  ;;  %6402 = vrot.lane.b32.xlu0 %v12764_v21, %s9499_s27 }
 0x771   : > { %9346 = vmatprep.mubr.msk.bf16.mxu0 %vm6934_vm10, %v6855_v30 }
 0x772   : > { %v6389_v48 = vpop.permute.xlu1 %6388  ;;  %v6387_v49 = vpop.permute.xlu0 %6386 }
 0x773   : > { %6672 = vst.msk [vmem:[#allocation2 + $0x328] sm:$0xff] %vm6570_vm9, %v6389_v48  ;;  %6671 = vst.msk [vmem:[#allocation2 + $0x320] sm:$0xff] %vm6570_vm9, %v6387_v49  ;;  %v9101_v49 = vld [vmem:[%s9554_s30 + $0x622] sm:$0xff] }
 0x774   : > { %6408 = vrot.lane.b32.xlu1 %v9097_v47, %s9499_s27  ;;  %6406 = vrot.lane.b32.xlu0 %v9096_v31, %s9499_s27 }
 0x776   : > { %v6393_v51 = vpop.permute.xlu1 %6392  ;;  %v6391_v52 = vpop.permute.xlu0 %6390  ;;  %v6757_v53 = vld [vmem:[#allocation2 + $0x1d0] sm:$0xff]  ;;  %v6758_v55 = vld [vmem:[#allocation2 + $0x1d8] sm:$0xff] }
 0x777   : > { %6674 = vst.msk [vmem:[#allocation2 + $0x338] sm:$0xff] %vm6570_vm9, %v6393_v51  ;;  %6673 = vst.msk [vmem:[#allocation2 + $0x330] sm:$0xff] %vm6570_vm9, %v6391_v52  ;;  %v6856_v56 = vpack.c.bf16 %v6758_v55, %v6757_v53  ;;  %v9100_v51 = vld [vmem:[%s9554_s30 + $0x61a] sm:$0xff] }
 0x778   : > { %4104 = vrot.lane.b32.xlu1 %v9097_v47, %s9496_s12  ;;  %4102 = vrot.lane.b32.xlu0 %v9096_v31, %s9496_s12 }
 0x779   : > { %9347 = vmatmul.mubr.msk.bf16.gmra.mxu0 %vm6934_vm10, %v6856_v56 }
 0x77a   : > { %v4089_v59 = vpop.permute.xlu1 %4088  ;;  %v4087_v60 = vpop.permute.xlu0 %4086  ;;  %v6799_v34 = vld [vmem:[#allocation2 + $0x320] sm:$0xff]  ;;  %v6800_v21 = vld [vmem:[#allocation2 + $0x328] sm:$0xff] }
 0x77b   : > { %4368 = vst.msk [vmem:[#allocation2 + $0x348] sm:$0xff] %vm4262_vm5, %v4089_v59  ;;  %4367 = vst.msk [vmem:[#allocation2 + $0x340] sm:$0xff] %vm4262_vm5, %v4087_v60  ;;  %v6877_v10 = vpack.c.bf16 %v6800_v21, %v6799_v34  ;;  %v8721_v60 = vld [vmem:[%s9554_s30 + $0x63a] sm:$0xff]  ;;  %v8720_v34 = vld [vmem:[%s9554_s30 + $0x632] sm:$0xff] }
 0x77c   : > { %4786 = vrot.lane.b32.xlu1 %v8799_v57, %s9497_s17  ;;  %4784 = vrot.lane.b32.xlu0 %v8798_v58, %s9497_s17 }
 0x77d   : > { %9390 = vmatprep.mubr.msk.bf16.mxu1 %vm6934_vm10, %v6877_v10 }
 0x77e   : > { %v4771_v38 = vpop.permute.xlu1 %4770  ;;  %v4769_v11 = vpop.permute.xlu0 %4768  ;;  %v6801_v14 = vld [vmem:[#allocation2 + $0x330] sm:$0xff]  ;;  %v6802_v63 = vld [vmem:[#allocation2 + $0x338] sm:$0xff] }
 0x77f   : > { %5094 = vst.msk [vmem:[#allocation2 + $0x1e8] sm:$0xff] %vm5032_vm7, %v4771_v38  ;;  %5093 = vst.msk [vmem:[#allocation2 + $0x1e0] sm:$0xff] %vm5032_vm7, %v4769_v11  ;;  %v6878_v15 = vpack.c.bf16 %v6802_v63, %v6801_v14  ;;  %v8847_v11 = vld [vmem:[%s9554_s30 + $0x638] sm:$0xff]  ;;  %v8846_v14 = vld [vmem:[%s9554_s30 + $0x630] sm:$0xff] }
 0x780   : > { %4108 = vrot.lane.b32.xlu1 %v12853_v61, %s9496_s12  ;;  %4106 = vrot.lane.b32.xlu0 %v12856_v35, %s9496_s12 }
 0x781   : > { %9391 = vmatmul.mubr.msk.bf16.gmra.mxu1 %vm6934_vm10, %v6878_v15 }
 0x782   : > { %v4093_v42 = vpop.permute.xlu1 %4092  ;;  %v4091_v1 = vpop.permute.xlu0 %4090 }
 0x783   : > { %4370 = vst.msk [vmem:[#allocation2 + $0x358] sm:$0xff] %vm4262_vm5, %v4093_v42  ;;  %4369 = vst.msk [vmem:[#allocation2 + $0x350] sm:$0xff] %vm4262_vm5, %v4091_v1  ;;  %v8849_v1 = vld [vmem:[%s9554_s30 + $0x650] sm:$0xff] }
 0x784   : > { %4790 = vrot.lane.b32.xlu1 %v8801_v40, %s9497_s17  ;;  %4788 = vrot.lane.b32.xlu0 %v8800_v0, %s9497_s17 }
 0x786   : > { %v4775_v6 = vpop.permute.xlu1 %4774  ;;  %v4773_v7 = vpop.permute.xlu0 %4772 }
 0x787   : > { %5096 = vst.msk [vmem:[#allocation2 + $0x1f8] sm:$0xff] %vm5032_vm7, %v4775_v6  ;;  %5095 = vst.msk [vmem:[#allocation2 + $0x1f0] sm:$0xff] %vm5032_vm7, %v4773_v7  ;;  %v8975_v7 = vld [vmem:[%s9554_s30 + $0x639] sm:$0xff] }
 0x788   : > { %4874 = vrot.lane.b32.xlu1 %v8843_v2, %s9497_s17  ;;  %4872 = vrot.lane.b32.xlu0 %v8842_v5, %s9497_s17  ;;  %v8848_v2 = vld [vmem:[%s9554_s30 + $0x648] sm:$0xff] }
 0x78a   : > { %v4859_v62 = vpop.permute.xlu1 %4858  ;;  %v4857_v12 = vpop.permute.xlu0 %4856 }
 0x78b   : > { %5138 = vst.msk [vmem:[#allocation2 + $0x348] sm:$0xff] %vm5032_vm7, %v4859_v62  ;;  %5137 = vst.msk [vmem:[#allocation2 + $0x340] sm:$0xff] %vm5032_vm7, %v4857_v12  ;;  %v8977_v12 = vld [vmem:[%s9554_s30 + $0x651] sm:$0xff] }
 0x78c   : > { %5555 = vrot.lane.b32.xlu1 %v8927_v8, %s9498_s22  ;;  %5553 = vrot.lane.b32.xlu0 %v8926_v9, %s9498_s22  ;;  %v8974_v8 = vld [vmem:[%s9554_s30 + $0x631] sm:$0xff] }
 0x78e   : > { %v5540_v16 = vpop.permute.xlu1 %5539  ;;  %v5538_v18 = vpop.permute.xlu0 %5537 }
 0x78f   : > { %5863 = vst.msk [vmem:[#allocation2 + $0x1e8] sm:$0xff] %vm5801_vm8, %v5540_v16  ;;  %5862 = vst.msk [vmem:[#allocation2 + $0x1e0] sm:$0xff] %vm5801_vm8, %v5538_v18 }
 0x790   : > { %4878 = vrot.lane.b32.xlu1 %v8845_v13, %s9497_s17  ;;  %4876 = vrot.lane.b32.xlu0 %v8844_v39, %s9497_s17  ;;  %v8976_v13 = vld [vmem:[%s9554_s30 + $0x649] sm:$0xff] }
 0x792   : > { %v4863_v19 = vpop.permute.xlu1 %4862  ;;  %v4861_v23 = vpop.permute.xlu0 %4860 }
 0x793   : > { %5140 = vst.msk [vmem:[#allocation2 + $0x358] sm:$0xff] %vm5032_vm7, %v4863_v19  ;;  %5139 = vst.msk [vmem:[#allocation2 + $0x350] sm:$0xff] %vm5032_vm7, %v4861_v23  ;;  %v9104_v19 = vld [vmem:[%s9554_s30 + $0x64a] sm:$0xff] }
 0x794   : > { %5559 = vrot.lane.b32.xlu1 %v8929_v17, %s9498_s22  ;;  %5557 = vrot.lane.b32.xlu0 %v8928_v20, %s9498_s22  ;;  %v9105_v20 = vld [vmem:[%s9554_s30 + $0x652] sm:$0xff] }
 0x796   : > { %v5544_v3 = vpop.permute.xlu1 %5543  ;;  %v5542_v28 = vpop.permute.xlu0 %5541 }
 0x797   : > { %5865 = vst.msk [vmem:[#allocation2 + $0x1f8] sm:$0xff] %vm5801_vm8, %v5544_v3  ;;  %5864 = vst.msk [vmem:[#allocation2 + $0x1f0] sm:$0xff] %vm5801_vm8, %v5542_v28  ;;  %v8725_v28 = vld [vmem:[%s9554_s30 + $0x66a] sm:$0xff] }
 0x798   : > { %5643 = vrot.lane.b32.xlu1 %v8971_v24, %s9498_s22  ;;  %5641 = vrot.lane.b32.xlu0 %v8970_v25, %s9498_s22 }
 0x79a   : > { %v5628_v32 = vpop.permute.xlu1 %5627  ;;  %v5626_v33 = vpop.permute.xlu0 %5625 }
 0x79b   : > { %5907 = vst.msk [vmem:[#allocation2 + $0x348] sm:$0xff] %vm5801_vm8, %v5628_v32  ;;  %5906 = vst.msk [vmem:[#allocation2 + $0x340] sm:$0xff] %vm5801_vm8, %v5626_v33  ;;  %v8851_v33 = vld [vmem:[%s9554_s30 + $0x668] sm:$0xff] }
 0x79c   : > { %6324 = vrot.lane.b32.xlu1 %v9055_v4, %s9499_s27  ;;  %6322 = vrot.lane.b32.xlu0 %v9054_v29, %s9499_s27  ;;  %v8724_v4 = vld [vmem:[%s9554_s30 + $0x662] sm:$0xff] }
 0x79e   : > { %v6309_v43 = vpop.permute.xlu1 %6308  ;;  %v6307_v44 = vpop.permute.xlu0 %6306 }
 0x79f   : > { %6632 = vst.msk [vmem:[#allocation2 + $0x1e8] sm:$0xff] %vm6570_vm9, %v6309_v43  ;;  %6631 = vst.msk [vmem:[#allocation2 + $0x1e0] sm:$0xff] %vm6570_vm9, %v6307_v44  ;;  %v8853_v44 = vld [vmem:[%s9554_s30 + $0x680] sm:$0xff] }
 0x7a0   : > { %5647 = vrot.lane.b32.xlu1 %v8973_v36, %s9498_s22  ;;  %5645 = vrot.lane.b32.xlu0 %v8972_v37, %s9498_s22  ;;  %v8850_v36 = vld [vmem:[%s9554_s30 + $0x660] sm:$0xff] }
 0x7a2   : > { %v5632_v46 = vpop.permute.xlu1 %5631  ;;  %v5630_v41 = vpop.permute.xlu0 %5629 }
 0x7a3   : > { %5909 = vst.msk [vmem:[#allocation2 + $0x358] sm:$0xff] %vm5801_vm8, %v5632_v46  ;;  %5908 = vst.msk [vmem:[#allocation2 + $0x350] sm:$0xff] %vm5801_vm8, %v5630_v41  ;;  %v8979_v41 = vld [vmem:[%s9554_s30 + $0x669] sm:$0xff] }
 0x7a4   : > { %6328 = vrot.lane.b32.xlu1 %v9057_v26, %s9499_s27  ;;  %6326 = vrot.lane.b32.xlu0 %v9056_v45, %s9499_s27  ;;  %v8852_v26 = vld [vmem:[%s9554_s30 + $0x678] sm:$0xff] }
 0x7a6   : > { %v6313_v27 = vpop.permute.xlu1 %6312  ;;  %v6311_v30 = vpop.permute.xlu0 %6310  ;;  %v6759_v47 = vld [vmem:[#allocation2 + $0x1e0] sm:$0xff]  ;;  %v6760_v31 = vld [vmem:[#allocation2 + $0x1e8] sm:$0xff] }
 0x7a7   : > { %6634 = vst.msk [vmem:[#allocation2 + $0x1f8] sm:$0xff] %vm6570_vm9, %v6313_v27  ;;  %6633 = vst.msk [vmem:[#allocation2 + $0x1f0] sm:$0xff] %vm6570_vm9, %v6311_v30  ;;  %v6857_v48 = vpack.c.bf16 %v6760_v31, %v6759_v47  ;;  %v8978_v27 = vld [vmem:[%s9554_s30 + $0x661] sm:$0xff] }
 0x7a8   : > { %6412 = vrot.lane.b32.xlu1 %v12853_v61, %s9499_s27  ;;  %6410 = vrot.lane.b32.xlu0 %v12856_v35, %s9499_s27 }
 0x7a9   : > { %9350 = vmatprep.mubr.msk.bf16.mxu0 %vm6934_vm10, %v6857_v48 }
 0x7aa   : > { %v6397_v52 = vpop.permute.xlu1 %6396  ;;  %v6395_v53 = vpop.permute.xlu0 %6394 }
 0x7ab   : > { %6676 = vst.msk [vmem:[#allocation2 + $0x348] sm:$0xff] %vm6570_vm9, %v6397_v52  ;;  %6675 = vst.msk [vmem:[#allocation2 + $0x340] sm:$0xff] %vm6570_vm9, %v6395_v53  ;;  %v8980_v52 = vld [vmem:[%s9554_s30 + $0x679] sm:$0xff] }
 0x7ac   : > { %6416 = vrot.lane.b32.xlu1 %v9101_v49, %s9499_s27  ;;  %6414 = vrot.lane.b32.xlu0 %v9100_v51, %s9499_s27 }
 0x7ae   : > { %v6401_v55 = vpop.permute.xlu1 %6400  ;;  %v6399_v56 = vpop.permute.xlu0 %6398  ;;  %v6761_v57 = vld [vmem:[#allocation2 + $0x1f0] sm:$0xff]  ;;  %v6762_v58 = vld [vmem:[#allocation2 + $0x1f8] sm:$0xff] }
 0x7af   : > { %6678 = vst.msk [vmem:[#allocation2 + $0x358] sm:$0xff] %vm6570_vm9, %v6401_v55  ;;  %6677 = vst.msk [vmem:[#allocation2 + $0x350] sm:$0xff] %vm6570_vm9, %v6399_v56  ;;  %v6858_v59 = vpack.c.bf16 %v6762_v58, %v6761_v57 }
 0x7b0   : > { %4112 = vrot.lane.b32.xlu1 %v9101_v49, %s9496_s12  ;;  %4110 = vrot.lane.b32.xlu0 %v9100_v51, %s9496_s12  ;;  %v8981_v51 = vld [vmem:[%s9554_s30 + $0x681] sm:$0xff] }
 0x7b1   : > { %9351 = vmatmul.mubr.msk.bf16.gmra.mxu0 %vm6934_vm10, %v6858_v59 }
 0x7b2   : > { %v4097_v21 = vpop.permute.xlu1 %4096  ;;  %v4095_v10 = vpop.permute.xlu0 %4094  ;;  %v6803_v61 = vld [vmem:[#allocation2 + $0x340] sm:$0xff]  ;;  %v6804_v35 = vld [vmem:[#allocation2 + $0x348] sm:$0xff] }
 0x7b3   : > { %4372 = vst.msk [vmem:[#allocation2 + $0x368] sm:$0xff] %vm4262_vm5, %v4097_v21  ;;  %4371 = vst.msk [vmem:[#allocation2 + $0x360] sm:$0xff] %vm4262_vm5, %v4095_v10  ;;  %v6879_v38 = vpack.c.bf16 %v6804_v35, %v6803_v61  ;;  %v9108_v21 = vld [vmem:[%s9554_s30 + $0x67a] sm:$0xff] }
 0x7b4   : > { %4116 = vrot.lane.b32.xlu1 %v8721_v60, %s9496_s12  ;;  %4114 = vrot.lane.b32.xlu0 %v8720_v34, %s9496_s12 }
 0x7b5   : > { %9394 = vmatprep.mubr.msk.bf16.mxu1 %vm6934_vm10, %v6879_v38 }
 0x7b6   : > { %v4779_v63 = vpop.permute.xlu1 %4778  ;;  %v4777_v15 = vpop.permute.xlu0 %4776  ;;  %v6805_v40 = vld [vmem:[#allocation2 + $0x350] sm:$0xff]  ;;  %v6806_v0 = vld [vmem:[#allocation2 + $0x358] sm:$0xff] }
 0x7b7   : > { %5098 = vst.msk [vmem:[#allocation2 + $0x208] sm:$0xff] %vm5032_vm7, %v4779_v63  ;;  %5097 = vst.msk [vmem:[#allocation2 + $0x200] sm:$0xff] %vm5032_vm7, %v4777_v15  ;;  %v6880_v42 = vpack.c.bf16 %v6806_v0, %v6805_v40 }
 0x7b8   : > { %4882 = vrot.lane.b32.xlu1 %v8847_v11, %s9497_s17  ;;  %4880 = vrot.lane.b32.xlu0 %v8846_v14, %s9497_s17 }
 0x7b9   : > { %9395 = vmatmul.mubr.msk.bf16.gmra.mxu1 %vm6934_vm10, %v6880_v42  ;;  %v8729_v42 = vld [vmem:[%s9554_s30 + $0x69a] sm:$0xff] }
 0x7ba   : > { %v4101_v5 = vpop.permute.xlu1 %4100  ;;  %v4099_v6 = vpop.permute.xlu0 %4098 }
 0x7bb   : > { %4374 = vst.msk [vmem:[#allocation2 + $0x378] sm:$0xff] %vm4262_vm5, %v4101_v5  ;;  %4373 = vst.msk [vmem:[#allocation2 + $0x370] sm:$0xff] %vm4262_vm5, %v4099_v6  ;;  %v8855_v6 = vld [vmem:[%s9554_s30 + $0x698] sm:$0xff] }
 0x7bc   : > { %4886 = vrot.lane.b32.xlu1 %v8849_v1, %s9497_s17  ;;  %4884 = vrot.lane.b32.xlu0 %v8848_v2, %s9497_s17  ;;  %v8728_v1 = vld [vmem:[%s9554_s30 + $0x692] sm:$0xff] }
 0x7be   : > { %v4783_v9 = vpop.permute.xlu1 %4782  ;;  %v4781_v62 = vpop.permute.xlu0 %4780 }
 0x7bf   : > { %5100 = vst.msk [vmem:[#allocation2 + $0x218] sm:$0xff] %vm5032_vm7, %v4783_v9  ;;  %5099 = vst.msk [vmem:[#allocation2 + $0x210] sm:$0xff] %vm5032_vm7, %v4781_v62  ;;  %v8857_v62 = vld [vmem:[%s9554_s30 + $0x6b0] sm:$0xff] }
 0x7c0   : > { %5651 = vrot.lane.b32.xlu1 %v8975_v7, %s9498_s22  ;;  %5649 = vrot.lane.b32.xlu0 %v8974_v8, %s9498_s22  ;;  %v8854_v7 = vld [vmem:[%s9554_s30 + $0x690] sm:$0xff] }
 0x7c2   : > { %v4867_v39 = vpop.permute.xlu1 %4866  ;;  %v4865_v16 = vpop.permute.xlu0 %4864 }
 0x7c3   : > { %5142 = vst.msk [vmem:[#allocation2 + $0x368] sm:$0xff] %vm5032_vm7, %v4867_v39  ;;  %5141 = vst.msk [vmem:[#allocation2 + $0x360] sm:$0xff] %vm5032_vm7, %v4865_v16  ;;  %v8983_v16 = vld [vmem:[%s9554_s30 + $0x699] sm:$0xff] }
 0x7c4   : > { %5655 = vrot.lane.b32.xlu1 %v8977_v12, %s9498_s22  ;;  %5653 = vrot.lane.b32.xlu0 %v8976_v13, %s9498_s22  ;;  %v8856_v12 = vld [vmem:[%s9554_s30 + $0x6a8] sm:$0xff] }
 0x7c6   : > { %v5548_v18 = vpop.permute.xlu1 %5547  ;;  %v5546_v17 = vpop.permute.xlu0 %5545 }
 0x7c7   : > { %5867 = vst.msk [vmem:[#allocation2 + $0x208] sm:$0xff] %vm5801_vm8, %v5548_v18  ;;  %5866 = vst.msk [vmem:[#allocation2 + $0x200] sm:$0xff] %vm5801_vm8, %v5546_v17  ;;  %v8982_v18 = vld [vmem:[%s9554_s30 + $0x691] sm:$0xff] }
 0x7c8   : > { %6420 = vrot.lane.b32.xlu1 %v8721_v60, %s9499_s27  ;;  %6418 = vrot.lane.b32.xlu0 %v8720_v34, %s9499_s27  ;;  %v9109_v34 = vld [vmem:[%s9554_s30 + $0x682] sm:$0xff] }
 0x7ca   : > { %v4871_v23 = vpop.permute.xlu1 %4870  ;;  %v4869_v24 = vpop.permute.xlu0 %4868 }
 0x7cb   : > { %5144 = vst.msk [vmem:[#allocation2 + $0x378] sm:$0xff] %vm5032_vm7, %v4871_v23  ;;  %5143 = vst.msk [vmem:[#allocation2 + $0x370] sm:$0xff] %vm5032_vm7, %v4869_v24  ;;  %v8984_v23 = vld [vmem:[%s9554_s30 + $0x6a9] sm:$0xff] }
 0x7cc   : > { %6424 = vrot.lane.b32.xlu1 %v9105_v20, %s9499_s27  ;;  %6422 = vrot.lane.b32.xlu0 %v9104_v19, %s9499_s27 }
 0x7ce   : > { %v5552_v25 = vpop.permute.xlu1 %5551  ;;  %v5550_v3 = vpop.permute.xlu0 %5549 }
 0x7cf   : > { %5869 = vst.msk [vmem:[#allocation2 + $0x218] sm:$0xff] %vm5801_vm8, %v5552_v25  ;;  %5868 = vst.msk [vmem:[#allocation2 + $0x210] sm:$0xff] %vm5801_vm8, %v5550_v3 }
 0x7d0   : > { %4120 = vrot.lane.b32.xlu1 %v9105_v20, %s9496_s12  ;;  %4118 = vrot.lane.b32.xlu0 %v9104_v19, %s9496_s12  ;;  %v8985_v19 = vld [vmem:[%s9554_s30 + $0x6b1] sm:$0xff] }
 0x7d2   : > { %v5636_v29 = vpop.permute.xlu1 %5635  ;;  %v5634_v32 = vpop.permute.xlu0 %5633 }
 0x7d3   : > { %5911 = vst.msk [vmem:[#allocation2 + $0x368] sm:$0xff] %vm5801_vm8, %v5636_v29  ;;  %5910 = vst.msk [vmem:[#allocation2 + $0x360] sm:$0xff] %vm5801_vm8, %v5634_v32  ;;  %v9112_v29 = vld [vmem:[%s9554_s30 + $0x6aa] sm:$0xff] }
 0x7d4   : > { %4124 = vrot.lane.b32.xlu1 %v8725_v28, %s9496_s12  ;;  %4122 = vrot.lane.b32.xlu0 %v8724_v4, %s9496_s12 }
 0x7d6   : > { %v6317_v37 = vpop.permute.xlu1 %6316  ;;  %v6315_v43 = vpop.permute.xlu0 %6314 }
 0x7d7   : > { %6636 = vst.msk [vmem:[#allocation2 + $0x208] sm:$0xff] %vm6570_vm9, %v6317_v37  ;;  %6635 = vst.msk [vmem:[#allocation2 + $0x200] sm:$0xff] %vm6570_vm9, %v6315_v43 }
 0x7d8   : > { %4890 = vrot.lane.b32.xlu1 %v8851_v33, %s9497_s17  ;;  %4888 = vrot.lane.b32.xlu0 %v8850_v36, %s9497_s17  ;;  %v9474_v36 = vld [vmem:[%s13538_s3] sm:$0xff]  }
 0x7d9   : > { %9418 = vmatprep.subr.bf16.mxu1 %v9474_v36 }
 0x7da   : > { %v5640_v45 = vpop.permute.xlu1 %5639  ;;  %v5638_v46 = vpop.permute.xlu0 %5637  ;;  %9419 = vmatpush3.bf16.msra.mxu1 %v9474_v36 }
 0x7db   : > { %5913 = vst.msk [vmem:[#allocation2 + $0x378] sm:$0xff] %vm5801_vm8, %v5640_v45  ;;  %5912 = vst.msk [vmem:[#allocation2 + $0x370] sm:$0xff] %vm5801_vm8, %v5638_v46 }
 0x7dc   : > { %4894 = vrot.lane.b32.xlu1 %v8853_v44, %s9497_s17  ;;  %4892 = vrot.lane.b32.xlu0 %v8852_v26, %s9497_s17  ;;  %v13074_v44 = vpop.f32.mrf.mxu0 }
 0x7de   : > { %v6321_v30 = vpop.permute.xlu1 %6320  ;;  %v6319_v47 = vpop.permute.xlu0 %6318  ;;  %v6763_v31 = vld [vmem:[#allocation2 + $0x200] sm:$0xff]  ;;  %v6764_v48 = vld [vmem:[#allocation2 + $0x208] sm:$0xff] }
 0x7df   : > { %6638 = vst.msk [vmem:[#allocation2 + $0x218] sm:$0xff] %vm6570_vm9, %v6321_v30  ;;  %6637 = vst.msk [vmem:[#allocation2 + $0x210] sm:$0xff] %vm6570_vm9, %v6319_v47  ;;  %v6859_v49 = vpack.c.bf16 %v6764_v48, %v6763_v31  ;;  %v13078_v46 = vpop.f32.mrf.mxu0 }
 0x7e0   : > { %5659 = vrot.lane.b32.xlu1 %v8979_v41, %s9498_s22  ;;  %5657 = vrot.lane.b32.xlu0 %v8978_v27, %s9498_s22 }
 0x7e1   : > { %9354 = vmatprep.mubr.msk.bf16.mxu0 %vm6934_vm10, %v6859_v49  ;;  %v13082_v31 = vpop.f32.mrf.mxu0 }
 0x7e2   : > { %v6405_v53 = vpop.permute.xlu1 %6404  ;;  %v6403_v55 = vpop.permute.xlu0 %6402 }
 0x7e3   : > { %6680 = vst.msk [vmem:[#allocation2 + $0x368] sm:$0xff] %vm6570_vm9, %v6405_v53  ;;  %6679 = vst.msk [vmem:[#allocation2 + $0x360] sm:$0xff] %vm6570_vm9, %v6403_v55 }
 0x7e4   : > { %5663 = vrot.lane.b32.xlu1 %v8981_v51, %s9498_s22  ;;  %5661 = vrot.lane.b32.xlu0 %v8980_v52, %s9498_s22  ;;  %v13087_v52 = vpop.f32.mrf.mxu0 }
 0x7e6   : > { %v6409_v56 = vpop.permute.xlu1 %6408  ;;  %v6407_v57 = vpop.permute.xlu0 %6406  ;;  %v6765_v58 = vld [vmem:[#allocation2 + $0x210] sm:$0xff]  ;;  %v6766_v59 = vld [vmem:[#allocation2 + $0x218] sm:$0xff] }
 0x7e7   : > { %6682 = vst.msk [vmem:[#allocation2 + $0x378] sm:$0xff] %vm6570_vm9, %v6409_v56  ;;  %6681 = vst.msk [vmem:[#allocation2 + $0x370] sm:$0xff] %vm6570_vm9, %v6407_v57  ;;  %v6860_v60 = vpack.c.bf16 %v6766_v59, %v6765_v58  ;;  %v13091_v53 = vpop.f32.mrf.mxu0 }
 0x7e8   : > { %6428 = vrot.lane.b32.xlu1 %v8725_v28, %s9499_s27  ;;  %6426 = vrot.lane.b32.xlu0 %v8724_v4, %s9499_s27  ;;  %v9113_v4 = vld [vmem:[%s9554_s30 + $0x6b2] sm:$0xff] }
 0x7e9   : > { %9355 = vmatmul.mubr.msk.bf16.gmra.mxu0 %vm6934_vm10, %v6860_v60  ;;  %v13095_v60 = vpop.f32.mrf.mxu0 }
 0x7ea   : > { %v4105_v10 = vpop.permute.xlu1 %4104  ;;  %v4103_v61 = vpop.permute.xlu0 %4102  ;;  %v6807_v35 = vld [vmem:[#allocation2 + $0x360] sm:$0xff]  ;;  %v6808_v38 = vld [vmem:[#allocation2 + $0x368] sm:$0xff] }
 0x7eb   : > { %4376 = vst.msk [vmem:[#allocation2 + $0x388] sm:$0xff] %vm4262_vm5, %v4105_v10  ;;  %4375 = vst.msk [vmem:[#allocation2 + $0x380] sm:$0xff] %vm4262_vm5, %v4103_v61  ;;  %v6881_v11 = vpack.c.bf16 %v6808_v38, %v6807_v35  ;;  %v13100_v38 = vpop.f32.mrf.mxu0 }
 0x7ec   : > { %6432 = vrot.lane.b32.xlu1 %v9109_v34, %s9499_s27  ;;  %6430 = vrot.lane.b32.xlu0 %v9108_v21, %s9499_s27 }
 0x7ed   : > { %9398 = vmatprep.mubr.msk.bf16.mxu1 %vm6934_vm10, %v6881_v11 }
 0x7ee   : > { %v4787_v14 = vpop.permute.xlu1 %4786  ;;  %v4785_v63 = vpop.permute.xlu0 %4784  ;;  %v6809_v15 = vld [vmem:[#allocation2 + $0x370] sm:$0xff]  ;;  %v6810_v40 = vld [vmem:[#allocation2 + $0x378] sm:$0xff] }
 0x7ef   : > { %5102 = vst.msk [vmem:[#allocation2 + $0x228] sm:$0xff] %vm5032_vm7, %v4787_v14  ;;  %5101 = vst.msk [vmem:[#allocation2 + $0x220] sm:$0xff] %vm5032_vm7, %v4785_v63  ;;  %v6882_v0 = vpack.c.bf16 %v6810_v40, %v6809_v15 }
 0x7f0   : > { %4128 = vrot.lane.b32.xlu1 %v9109_v34, %s9496_s12  ;;  %4126 = vrot.lane.b32.xlu0 %v9108_v21, %s9496_s12 }
 0x7f1   : > { %9399 = vmatmul.mubr.msk.bf16.gmra.mxu1 %vm6934_vm10, %v6882_v0  ;;  %v13105_v0 = vpop.f32.mrf.mxu0 }
 0x7f2   : > { %v4109_v2 = vpop.permute.xlu1 %4108  ;;  %v4107_v5 = vpop.permute.xlu0 %4106 }
 0x7f3   : > { %4378 = vst.msk [vmem:[#allocation2 + $0x398] sm:$0xff] %vm4262_vm5, %v4109_v2  ;;  %4377 = vst.msk [vmem:[#allocation2 + $0x390] sm:$0xff] %vm4262_vm5, %v4107_v5  ;;  %v13108_v2 = vpop.f32.mrf.mxu0 }
 0x7f4   : > { %4132 = vrot.lane.b32.xlu1 %v8729_v42, %s9496_s12  ;;  %4130 = vrot.lane.b32.xlu0 %v8728_v1, %s9496_s12 }
 0x7f6   : > { %v4791_v8 = vpop.permute.xlu1 %4790  ;;  %v4789_v9 = vpop.permute.xlu0 %4788 }
 0x7f7   : > { %5104 = vst.msk [vmem:[#allocation2 + $0x238] sm:$0xff] %vm5032_vm7, %v4791_v8  ;;  %5103 = vst.msk [vmem:[#allocation2 + $0x230] sm:$0xff] %vm5032_vm7, %v4789_v9 }
 0x7f8   : > { %4898 = vrot.lane.b32.xlu1 %v8855_v6, %s9497_s17  ;;  %4896 = vrot.lane.b32.xlu0 %v8854_v7, %s9497_s17  ;;  %v13112_v7 = vpop.f32.mrf.mxu0 }
 0x7fa   : > { %v4875_v13 = vpop.permute.xlu1 %4874  ;;  %v4873_v39 = vpop.permute.xlu0 %4872 }
 0x7fb   : > { %5146 = vst.msk [vmem:[#allocation2 + $0x388] sm:$0xff] %vm5032_vm7, %v4875_v13  ;;  %5145 = vst.msk [vmem:[#allocation2 + $0x380] sm:$0xff] %vm5032_vm7, %v4873_v39 }
 0x7fc   : > { %4902 = vrot.lane.b32.xlu1 %v8857_v62, %s9497_s17  ;;  %4900 = vrot.lane.b32.xlu0 %v8856_v12, %s9497_s17  ;;  %v13116_v62 = vpop.f32.mrf.mxu0 }
 0x7fe   : > { %v5556_v17 = vpop.permute.xlu1 %5555  ;;  %v5554_v20 = vpop.permute.xlu0 %5553 }
 0x7ff   : > { %5871 = vst.msk [vmem:[#allocation2 + $0x228] sm:$0xff] %vm5801_vm8, %v5556_v17  ;;  %5870 = vst.msk [vmem:[#allocation2 + $0x220] sm:$0xff] %vm5801_vm8, %v5554_v20  ;;  %v13120_v39 = vpop.f32.mrf.mxu0 }
 0x800   : > { %5667 = vrot.lane.b32.xlu1 %v8983_v16, %s9498_s22  ;;  %5665 = vrot.lane.b32.xlu0 %v8982_v18, %s9498_s22 }
 0x801   : > { %v13124_v16 = vpop.f32.mrf.mxu0 }
 0x802   : > { %v4879_v24 = vpop.permute.xlu1 %4878  ;;  %v4877_v25 = vpop.permute.xlu0 %4876 }
 0x803   : > { %5148 = vst.msk [vmem:[#allocation2 + $0x398] sm:$0xff] %vm5032_vm7, %v4879_v24  ;;  %5147 = vst.msk [vmem:[#allocation2 + $0x390] sm:$0xff] %vm5032_vm7, %v4877_v25  ;;  %v13128_v20 = vpop.f32.mrf.mxu0 }
 0x804   : > { %5671 = vrot.lane.b32.xlu1 %v8985_v19, %s9498_s22  ;;  %5669 = vrot.lane.b32.xlu0 %v8984_v23, %s9498_s22 }
 0x805   : > { %v13132_v24 = vpop.f32.mrf.mxu0 }
 0x806   : > { %v5560_v3 = vpop.permute.xlu1 %5559  ;;  %v5558_v28 = vpop.permute.xlu0 %5557 }
 0x807   : > { %5873 = vst.msk [vmem:[#allocation2 + $0x238] sm:$0xff] %vm5801_vm8, %v5560_v3  ;;  %5872 = vst.msk [vmem:[#allocation2 + $0x230] sm:$0xff] %vm5801_vm8, %v5558_v28 }
 0x808   : > { %6436 = vrot.lane.b32.xlu1 %v8729_v42, %s9499_s27  ;;  %6434 = vrot.lane.b32.xlu0 %v8728_v1, %s9499_s27 }
 0x80a   : > { %v5644_v32 = vpop.permute.xlu1 %5643  ;;  %v5642_v33 = vpop.permute.xlu0 %5641 }
 0x80b   : > { %5915 = vst.msk [vmem:[#allocation2 + $0x388] sm:$0xff] %vm5801_vm8, %v5644_v32  ;;  %5914 = vst.msk [vmem:[#allocation2 + $0x380] sm:$0xff] %vm5801_vm8, %v5642_v33  ;;  %v13136_v32 = vpop.f32.mrf.mxu0 }
 0x80c   : > { %6440 = vrot.lane.b32.xlu1 %v9113_v4, %s9499_s27  ;;  %6438 = vrot.lane.b32.xlu0 %v9112_v29, %s9499_s27 }
 0x80e   : > { %v6325_v37 = vpop.permute.xlu1 %6324  ;;  %v6323_v43 = vpop.permute.xlu0 %6322 }
 0x80f   : > { %6640 = vst.msk [vmem:[#allocation2 + $0x228] sm:$0xff] %vm6570_vm9, %v6325_v37  ;;  %6639 = vst.msk [vmem:[#allocation2 + $0x220] sm:$0xff] %vm6570_vm9, %v6323_v43 }
 0x812   : > { %v5648_v26 = vpop.permute.xlu1 %5647  ;;  %v5646_v45 = vpop.permute.xlu0 %5645 }
 0x813   : > { %5917 = vst.msk [vmem:[#allocation2 + $0x398] sm:$0xff] %vm5801_vm8, %v5648_v26  ;;  %5916 = vst.msk [vmem:[#allocation2 + $0x390] sm:$0xff] %vm5801_vm8, %v5646_v45  ;;  %v13139_v26 = vpop.f32.mrf.mxu0 }
 0x816   : > { %v6329_v41 = vpop.permute.xlu1 %6328  ;;  %v6327_v27 = vpop.permute.xlu0 %6326  ;;  %v6767_v30 = vld [vmem:[#allocation2 + $0x220] sm:$0xff]  ;;  %v6768_v47 = vld [vmem:[#allocation2 + $0x228] sm:$0xff] }
 0x817   : > { %6642 = vst.msk [vmem:[#allocation2 + $0x238] sm:$0xff] %vm6570_vm9, %v6329_v41  ;;  %6641 = vst.msk [vmem:[#allocation2 + $0x230] sm:$0xff] %vm6570_vm9, %v6327_v27  ;;  %v6861_v48 = vpack.c.bf16 %v6768_v47, %v6767_v30  ;;  %v13144_v30 = vpop.f32.mrf.mxu0 }
 0x819   : > { %9358 = vmatprep.mubr.msk.bf16.mxu0 %vm6934_vm10, %v6861_v48 }
 0x81a   : > { %v6413_v49 = vpop.permute.xlu1 %6412  ;;  %v6411_v51 = vpop.permute.xlu0 %6410 }
 0x81b   : > { %6684 = vst.msk [vmem:[#allocation2 + $0x388] sm:$0xff] %vm6570_vm9, %v6413_v49  ;;  %6683 = vst.msk [vmem:[#allocation2 + $0x380] sm:$0xff] %vm6570_vm9, %v6411_v51  ;;  %v13148_v49 = vpop.f32.mrf.mxu0  ;;  %v13155_v51 = vld [vmem:[%s13537_s2] ss:$0 sm:$0xff] }
 0x81e   : > { %v6417_v55 = vpop.permute.xlu1 %6416  ;;  %v6415_v56 = vpop.permute.xlu0 %6414  ;;  %v6769_v57 = vld [vmem:[#allocation2 + $0x230] sm:$0xff]  ;;  %v6770_v58 = vld [vmem:[#allocation2 + $0x238] sm:$0xff] }
 0x81f   : > { %6686 = vst.msk [vmem:[#allocation2 + $0x398] sm:$0xff] %vm6570_vm9, %v6417_v55  ;;  %6685 = vst.msk [vmem:[#allocation2 + $0x390] sm:$0xff] %vm6570_vm9, %v6415_v56  ;;  %v6862_v59 = vpack.c.bf16 %v6770_v58, %v6769_v57  ;;  %v7297_v55 = vadd.f32 %v13155_v51, %v13087_v52  ;;  %v7294_v58 = vadd.f32 %v13155_v51, %v13078_v46 }
 0x820   : > { %v7302_v52 = vadd.f32 %v13155_v51, %v13074_v44  ;;  %v7310_v46 = vadd.f32 %v13155_v51, %v13095_v60  ;;  %v7329_v60 = vadd.f32 %v13155_v51, %v13120_v39 }
 0x821   : > { %9359 = vmatmul.mubr.msk.bf16.gmra.mxu0 %vm6934_vm10, %v6862_v59  ;;  %v13161_v59 = vpop.f32.mrf.mxu0 }
 0x822   : > { %v4113_v34 = vpop.permute.xlu1 %4112  ;;  %v4111_v21 = vpop.permute.xlu0 %4110  ;;  %v6811_v10 = vld [vmem:[#allocation2 + $0x380] sm:$0xff]  ;;  %v6812_v61 = vld [vmem:[#allocation2 + $0x388] sm:$0xff] }
 0x823   : > { %4380 = vst.msk [vmem:[#allocation2 + $0x3a8] sm:$0xff] %vm4262_vm5, %v4113_v34  ;;  %4379 = vst.msk [vmem:[#allocation2 + $0x3a0] sm:$0xff] %vm4262_vm5, %v4111_v21  ;;  %v6883_v35 = vpack.c.bf16 %v6812_v61, %v6811_v10  ;;  %v7305_v34 = vadd.f32 %v13155_v51, %v13082_v31  ;;  %v7313_v21 = vadd.f32 %v13155_v51, %v13105_v0  ;;  %v13171_v10 = vpop.f32.mrf.mxu0  ;;  %v7709_v61 = vmax.f32 %v7297_v55, 0.0 }
 0x824   : > { %v7712_v0 = vmax.f32 %v7310_v46, 0.0 }
 0x825   : > { %9402 = vmatprep.mubr.msk.bf16.mxu1 %vm6934_vm10, %v6883_v35  ;;  %v7711_v31 = vmax.f32 %v7305_v34, 0.0  ;;  %v7898_v44 = vsel %vm7804_vm11, %v7709_v61, 0.0 }
 0x826   : > { %v4117_v11 = vpop.permute.xlu1 %4116  ;;  %v4115_v14 = vpop.permute.xlu0 %4114  ;;  %v6813_v63 = vld [vmem:[#allocation2 + $0x390] sm:$0xff]  ;;  %v6814_v15 = vld [vmem:[#allocation2 + $0x398] sm:$0xff] }
 0x827   : > { %4382 = vst.msk [vmem:[#allocation2 + $0x3b8] sm:$0xff] %vm4262_vm5, %v4117_v11  ;;  %4381 = vst.msk [vmem:[#allocation2 + $0x3b0] sm:$0xff] %vm4262_vm5, %v4115_v14  ;;  %v6884_v40 = vpack.c.bf16 %v6814_v15, %v6813_v63  ;;  %v7708_v14 = vmax.f32 %v7294_v58, 0.0  ;;  %v7713_v63 = vmax.f32 %v7313_v21, 0.0  ;;  %v7710_v15 = vmax.f32 %v7302_v52, 0.0 }
 0x829   : > { %9403 = vmatmul.mubr.msk.bf16.gmra.mxu1 %vm6934_vm10, %v6884_v40  ;;  %v13177_v40 = vpop.f32.mrf.mxu0 }
 0x82a   : > { %v4883_v42 = vpop.permute.xlu1 %4882  ;;  %v4881_v1 = vpop.permute.xlu0 %4880 }
 0x82b   : > { %5150 = vst.msk [vmem:[#allocation2 + $0x3a8] sm:$0xff] %vm5032_vm7, %v4883_v42  ;;  %5149 = vst.msk [vmem:[#allocation2 + $0x3a0] sm:$0xff] %vm5032_vm7, %v4881_v1  ;;  %v7321_v42 = vadd.f32 %v13155_v51, %v13100_v38  ;;  %v7326_v38 = vadd.f32 %v13155_v51, %v13112_v7  ;;  %v13193_v39 = vpop.f32.mrf.mxu0  ;;  %v7337_v7 = vadd.f32 %v13155_v51, %v13116_v62 }
 0x82d   : > { %v7719_v34 = vmax.f32 %v7337_v7, 0.0 }
 0x82e   : > { %v4887_v5 = vpop.permute.xlu1 %4886  ;;  %v4885_v6 = vpop.permute.xlu0 %4884 }
 0x82f   : > { %5152 = vst.msk [vmem:[#allocation2 + $0x3b8] sm:$0xff] %vm5032_vm7, %v4887_v5  ;;  %5151 = vst.msk [vmem:[#allocation2 + $0x3b0] sm:$0xff] %vm5032_vm7, %v4885_v6  ;;  %v7867_v6 = vsel %vm7804_vm11, %v7708_v14, 0.0 }
 0x832   : > { %v5652_v8 = vpop.permute.xlu1 %5651  ;;  %v5650_v9 = vpop.permute.xlu0 %5649 }
 0x833   : > { %5919 = vst.msk [vmem:[#allocation2 + $0x3a8] sm:$0xff] %vm5801_vm8, %v5652_v8  ;;  %5918 = vst.msk [vmem:[#allocation2 + $0x3a0] sm:$0xff] %vm5801_vm8, %v5650_v9  ;;  %v7899_v8 = vsel %vm7804_vm11, %v7711_v31, 0.0  ;;  %v7318_v9 = vadd.f32 %v13155_v51, %v13091_v53 }
 0x835   : > { %v7714_v53 = vmax.f32 %v7318_v9, 0.0 }
 0x836   : > { %v5656_v12 = vpop.permute.xlu1 %5655  ;;  %v5654_v13 = vpop.permute.xlu0 %5653 }
 0x837   : > { %5921 = vst.msk [vmem:[#allocation2 + $0x3b8] sm:$0xff] %vm5801_vm8, %v5656_v12  ;;  %5920 = vst.msk [vmem:[#allocation2 + $0x3b0] sm:$0xff] %vm5801_vm8, %v5654_v13  ;;  %v7901_v12 = vsel %vm7804_vm11, %v7713_v63, 0.0  ;;  %v7900_v13 = vadd.f32 %v7899_v8, %v7898_v44  ;;  %v7872_v58 = vsel %vm7804_vm11, %v7714_v53, 0.0 }
 0x83a   : > { %v6421_v18 = vpop.permute.xlu1 %6420  ;;  %v6419_v17 = vpop.permute.xlu0 %6418 }
 0x83b   : > { %6688 = vst.msk [vmem:[#allocation2 + $0x3a8] sm:$0xff] %vm6570_vm9, %v6421_v18  ;;  %6687 = vst.msk [vmem:[#allocation2 + $0x3a0] sm:$0xff] %vm6570_vm9, %v6419_v17  ;;  %v7868_v18 = vsel %vm7804_vm11, %v7710_v15, 0.0  ;;  %v7870_v17 = vsel %vm7804_vm11, %v7712_v0, 0.0 }
 0x83e   : > { %v6425_v19 = vpop.permute.xlu1 %6424  ;;  %v6423_v23 = vpop.permute.xlu0 %6422 }
 0x83f   : > { %6690 = vst.msk [vmem:[#allocation2 + $0x3b8] sm:$0xff] %vm6570_vm9, %v6425_v19  ;;  %6689 = vst.msk [vmem:[#allocation2 + $0x3b0] sm:$0xff] %vm6570_vm9, %v6423_v23  ;;  %v7715_v19 = vmax.f32 %v7321_v42, 0.0  ;;  %v7717_v23 = vmax.f32 %v7329_v60, 0.0  ;;  %v7907_v60 = vsel %vm7804_vm11, %v7719_v34, 0.0 }
 0x842   : > { %v4121_v25 = vpop.permute.xlu1 %4120  ;;  %v4119_v3 = vpop.permute.xlu0 %4118  ;;  %v6815_v28 = vld [vmem:[#allocation2 + $0x3a0] sm:$0xff]  ;;  %v6816_v4 = vld [vmem:[#allocation2 + $0x3a8] sm:$0xff] }
 0x843   : > { %4384 = vst.msk [vmem:[#allocation2 + $0x3c8] sm:$0xff] %vm4262_vm5, %v4121_v25  ;;  %4383 = vst.msk [vmem:[#allocation2 + $0x3c0] sm:$0xff] %vm4262_vm5, %v4119_v3  ;;  %v6885_v29 = vpack.c.bf16 %v6816_v4, %v6815_v28  ;;  %v7869_v28 = vadd.f32 %v7868_v18, %v7867_v6  ;;  %v7902_v4 = vadd.f32 %v7901_v12, %v7900_v13 }
 0x845   : > { %9406 = vmatprep.mubr.msk.bf16.mxu1 %vm6934_vm10, %v6885_v29  ;;  %v7716_v29 = vmax.f32 %v7326_v38, 0.0 }
 0x846   : > { %v4125_v33 = vpop.permute.xlu1 %4124  ;;  %v4123_v36 = vpop.permute.xlu0 %4122  ;;  %v6817_v37 = vld [vmem:[#allocation2 + $0x3b0] sm:$0xff]  ;;  %v6818_v43 = vld [vmem:[#allocation2 + $0x3b8] sm:$0xff] }
 0x847   : > { %4386 = vst.msk [vmem:[#allocation2 + $0x3d8] sm:$0xff] %vm4262_vm5, %v4125_v33  ;;  %4385 = vst.msk [vmem:[#allocation2 + $0x3d0] sm:$0xff] %vm4262_vm5, %v4123_v36  ;;  %v6886_v45 = vpack.c.bf16 %v6818_v43, %v6817_v37  ;;  %v7345_v33 = vadd.f32 %v13155_v51, %v13136_v32  ;;  %v7871_v36 = vadd.f32 %v7870_v17, %v7869_v28  ;;  %v7376_v37 = vpop.f32.mrf.mxu0  ;;  %v7903_v43 = vsel %vm7804_vm11, %v7715_v19, 0.0 }
 0x848   : > { %v7904_v62 = vadd.f32 %v7903_v43, %v7902_v4  ;;  %v7366_v4 = vadd.f32 %v13155_v51, %v13139_v26 }
 0x849   : > { %9407 = vmatmul.mubr.msk.bf16.gmra.mxu1 %vm6934_vm10, %v6886_v45  ;;  %v7334_v45 = vadd.f32 %v13155_v51, %v13108_v2  ;;  %v7874_v2 = vsel %vm7804_vm11, %v7716_v29, 0.0  ;;  %v7721_v21 = vmax.f32 %v7345_v33, 0.0  ;;  %v7873_v52 = vadd.f32 %v7872_v58, %v7871_v36 }
 0x84a   : > { %v4891_v41 = vpop.permute.xlu1 %4890  ;;  %v4889_v27 = vpop.permute.xlu0 %4888  ;;  %v7374_v29 = vadd.f32 %v13155_v51, %v13177_v40  ;;  %v7385_v40 = vadd.f32 %v13155_v51, %v13193_v39 }
 0x84b   : > { %5154 = vst.msk [vmem:[#allocation2 + $0x3c8] sm:$0xff] %vm5032_vm7, %v4891_v41  ;;  %5153 = vst.msk [vmem:[#allocation2 + $0x3c0] sm:$0xff] %vm5032_vm7, %v4889_v27  ;;  %v7905_v41 = vsel %vm7804_vm11, %v7717_v23, 0.0  ;;  %v7342_v27 = vadd.f32 %v13155_v51, %v13128_v20  ;;  %v7718_v61 = vmax.f32 %v7334_v45, 0.0  ;;  %v7875_v44 = vadd.f32 %v7874_v2, %v7873_v52 }
 0x84c   : > { %v7906_v20 = vadd.f32 %v7905_v41, %v7904_v62  ;;  %v7369_v23 = vadd.f32 %v13155_v51, %v13148_v49 }
 0x84d   : > { %v7720_v46 = vmax.f32 %v7342_v27, 0.0  ;;  %v7876_v6 = vsel %vm7804_vm11, %v7718_v61, 0.0 }
 0x84e   : > { %v4895_v47 = vpop.permute.xlu1 %4894  ;;  %v4893_v48 = vpop.permute.xlu0 %4892  ;;  %v7877_v18 = vadd.f32 %v7876_v6, %v7875_v44  ;;  %v7727_v45 = vmax.f32 %v7369_v23, 0.0 }
 0x84f   : > { %5156 = vst.msk [vmem:[#allocation2 + $0x3d8] sm:$0xff] %vm5032_vm7, %v4895_v47  ;;  %5155 = vst.msk [vmem:[#allocation2 + $0x3d0] sm:$0xff] %vm5032_vm7, %v4893_v48  ;;  %v7878_v8 = vsel %vm7804_vm11, %v7720_v46, 0.0 }
 0x850   : > { %v7915_v34 = vsel %vm7804_vm11, %v7727_v45, 0.0 }
 0x852   : > { %v5660_v56 = vpop.permute.xlu1 %5659  ;;  %v5658_v57 = vpop.permute.xlu0 %5657 }
 0x853   : > { %5923 = vst.msk [vmem:[#allocation2 + $0x3c8] sm:$0xff] %vm5801_vm8, %v5660_v56  ;;  %5922 = vst.msk [vmem:[#allocation2 + $0x3c0] sm:$0xff] %vm5801_vm8, %v5658_v57  ;;  %v13209_v57 = vpop.f32.mrf.mxu0 }
 0x855   : > { %v7389_v0 = vpop.f32.mrf.mxu0 }
 0x856   : > { %v5664_v35 = vpop.permute.xlu1 %5663  ;;  %v5662_v11 = vpop.permute.xlu0 %5661 }
 0x857   : > { %5925 = vst.msk [vmem:[#allocation2 + $0x3d8] sm:$0xff] %vm5801_vm8, %v5664_v35  ;;  %5924 = vst.msk [vmem:[#allocation2 + $0x3d0] sm:$0xff] %vm5801_vm8, %v5662_v11  ;;  %v7353_v35 = vadd.f32 %v13155_v51, %v13132_v24  ;;  %v7361_v11 = vadd.f32 %v13155_v51, %v13161_v59  ;;  %v7909_v24 = vsel %vm7804_vm11, %v7721_v21, 0.0  ;;  %v7358_v59 = vadd.f32 %v13155_v51, %v13144_v30  ;;  %v9349_v19 = vpop.f32.mrf.mxu0 }
 0x858   : > { %v7382_v21 = vadd.f32 %v13155_v51, %v13171_v10 }
 0x859   : > { %v7723_v9 = vmax.f32 %v7353_v35, 0.0  ;;  %v7725_v12 = vmax.f32 %v7361_v11, 0.0  ;;  %v7724_v30 = vmax.f32 %v7358_v59, 0.0  ;;  %v7392_v43 = vpop.f32.mrf.mxu0  ;;  %v7731_v11 = vmax.f32 %v7385_v40, 0.0 }
 0x85a   : > { %v6429_v1 = vpop.permute.xlu1 %6428  ;;  %v6427_v5 = vpop.permute.xlu0 %6426 }
 0x85b   : > { %6692 = vst.msk [vmem:[#allocation2 + $0x3c8] sm:$0xff] %vm6570_vm9, %v6429_v1  ;;  %6691 = vst.msk [vmem:[#allocation2 + $0x3c0] sm:$0xff] %vm6570_vm9, %v6427_v5  ;;  %v7350_v1 = vadd.f32 %v13155_v51, %v13124_v16  ;;  %v7908_v5 = vadd.f32 %v7907_v60, %v7906_v20  ;;  %v7911_v28 = vsel %vm7804_vm11, %v7723_v9, 0.0  ;;  %v7913_v53 = vsel %vm7804_vm11, %v7725_v12, 0.0 }
 0x85c   : > { %v7390_v20 = vadd.f32 %v13155_v51, %v7389_v0  ;;  %v7401_v0 = vadd.f32 %v13155_v51, %v9349_v19  ;;  %v7919_v59 = vsel %vm7804_vm11, %v7731_v11, 0.0 }
 0x85d   : > { %v7910_v17 = vadd.f32 %v7909_v24, %v7908_v5  ;;  %v7722_v16 = vmax.f32 %v7350_v1, 0.0  ;;  %v7398_v5 = vadd.f32 %v13155_v51, %v13209_v57 }
 0x85e   : > { %v6433_v25 = vpop.permute.xlu1 %6432  ;;  %v6431_v3 = vpop.permute.xlu0 %6430  ;;  %v7732_v60 = vmax.f32 %v7390_v20, 0.0 }
 0x85f   : > { %6694 = vst.msk [vmem:[#allocation2 + $0x3d8] sm:$0xff] %vm6570_vm9, %v6433_v25  ;;  %6693 = vst.msk [vmem:[#allocation2 + $0x3d0] sm:$0xff] %vm6570_vm9, %v6431_v3  ;;  %v7377_v25 = vadd.f32 %v13155_v51, %v7376_v37  ;;  %v7879_v3 = vadd.f32 %v7878_v8, %v7877_v18  ;;  %v7912_v36 = vadd.f32 %v7911_v28, %v7910_v17  ;;  %v7880_v49 = vsel %vm7804_vm11, %v7722_v16, 0.0 }
 0x860   : > { %v7882_v37 = vsel %vm7804_vm11, %v7724_v30, 0.0  ;;  %v7890_v18 = vsel %vm7804_vm11, %v7732_v60, 0.0  ;;  %v7735_v17 = vmax.f32 %v7401_v0, 0.0  ;;  %v7734_v57 = vmax.f32 %v7398_v5, 0.0 }
 0x861   : > { %v7729_v41 = vmax.f32 %v7377_v25, 0.0  ;;  %v7881_v26 = vadd.f32 %v7880_v49, %v7879_v3  ;;  %v7914_v27 = vadd.f32 %v7913_v53, %v7912_v36 }
 0x862   : > { %v4129_v47 = vpop.permute.xlu1 %4128  ;;  %v4127_v48 = vpop.permute.xlu0 %4126  ;;  %v6819_v55 = vld [vmem:[#allocation2 + $0x3c0] sm:$0xff]  ;;  %v6820_v56 = vld [vmem:[#allocation2 + $0x3c8] sm:$0xff]  ;;  %v7923_v53 = vsel %vm7804_vm11, %v7735_v17, 0.0  ;;  %v7892_v36 = vsel %vm7804_vm11, %v7734_v57, 0.0 }
 0x863   : > { %4388 = vst.msk [vmem:[#allocation2 + $0x3e8] sm:$0xff] %vm4262_vm5, %v4129_v47  ;;  %4387 = vst.msk [vmem:[#allocation2 + $0x3e0] sm:$0xff] %vm4262_vm5, %v4127_v48  ;;  %v6887_v32 = vpack.c.bf16 %v6820_v56, %v6819_v55  ;;  %v7726_v48 = vmax.f32 %v7366_v4, 0.0  ;;  %v7728_v55 = vmax.f32 %v7374_v29, 0.0  ;;  %v7393_v56 = vadd.f32 %v13155_v51, %v7392_v43 }
 0x864   : > { %v7883_v58 = vadd.f32 %v7882_v37, %v7881_v26  ;;  %v7917_v52 = vsel %vm7804_vm11, %v7729_v41, 0.0  ;;  %v7916_v39 = vadd.f32 %v7915_v34, %v7914_v27 }
 0x865   : > { %9410 = vmatprep.mubr.msk.bf16.mxu1 %vm6934_vm10, %v6887_v32  ;;  %v7884_v46 = vsel %vm7804_vm11, %v7726_v48, 0.0  ;;  %v7886_v35 = vsel %vm7804_vm11, %v7728_v55, 0.0 }
 0x866   : > { %v4133_v14 = vpop.permute.xlu1 %4132  ;;  %v4131_v31 = vpop.permute.xlu0 %4130  ;;  %v6821_v63 = vld [vmem:[#allocation2 + $0x3d0] sm:$0xff]  ;;  %v6822_v15 = vld [vmem:[#allocation2 + $0x3d8] sm:$0xff]  ;;  %v7918_v44 = vadd.f32 %v7917_v52, %v7916_v39 }
 0x867   : > { %4390 = vst.msk [vmem:[#allocation2 + $0x3f8] sm:$0xff] %vm4262_vm5, %v4133_v14  ;;  %4389 = vst.msk [vmem:[#allocation2 + $0x3f0] sm:$0xff] %vm4262_vm5, %v4131_v31  ;;  %v6888_v42 = vpack.c.bf16 %v6822_v15, %v6821_v63  ;;  %v7733_v14 = vmax.f32 %v7393_v56, 0.0  ;;  %v7885_v15 = vadd.f32 %v7884_v46, %v7883_v58 }
 0x869   : > { %9411 = vmatmul.mubr.msk.bf16.gmra.mxu1 %vm6934_vm10, %v6888_v42  ;;  %v7730_v42 = vmax.f32 %v7382_v21, 0.0  ;;  %v7887_v24 = vadd.f32 %v7886_v35, %v7885_v15  ;;  %v7921_v6 = vsel %vm7804_vm11, %v7733_v14, 0.0  ;;  %v9364_v21 = vpop.f32.mrf.mxu1 }
 0x86a   : > { %v4899_v38 = vpop.permute.xlu1 %4898  ;;  %v4897_v13 = vpop.permute.xlu0 %4896 }
 0x86b   : > { %5158 = vst.msk [vmem:[#allocation2 + $0x3e8] sm:$0xff] %vm5032_vm7, %v4899_v38  ;;  %5157 = vst.msk [vmem:[#allocation2 + $0x3e0] sm:$0xff] %vm5032_vm7, %v4897_v13  ;;  %v7920_v38 = vadd.f32 %v7919_v59, %v7918_v44  ;;  %v7888_v13 = vsel %vm7804_vm11, %v7730_v42, 0.0  ;;  %v7453_v39 = vpop.f32.mrf.mxu1 }
 0x86c   : > { %v7889_v16 = vadd.f32 %v7888_v13, %v7887_v24 }
 0x86d   : > { %v7922_v30 = vadd.f32 %v7921_v6, %v7920_v38  ;;  %v9475_v38 = vld [vmem:[%s13540_s5 + $0x8] sm:$0xff]  }
 0x86e   : > { %v4903_v7 = vpop.permute.xlu1 %4902  ;;  %v4901_v33 = vpop.permute.xlu0 %4900  ;;  %v7891_v4 = vadd.f32 %v7890_v18, %v7889_v16  ;;  %9428 = vmatprep.subr.bf16.mxu1 %v9475_v38 }
 0x86f   : > { %5160 = vst.msk [vmem:[#allocation2 + $0x3f8] sm:$0xff] %vm5032_vm7, %v4903_v7  ;;  %5159 = vst.msk [vmem:[#allocation2 + $0x3f0] sm:$0xff] %vm5032_vm7, %v4901_v33  ;;  %v7924_v33 = vadd.f32 %v7923_v53, %v7922_v30 }
 0x870   : > { %v7893_v41 = vadd.f32 %v7892_v36, %v7891_v4 }
 0x871   : > { %v9352_v47 = vpop.f32.mrf.mxu0 }
 0x872   : > { %v5668_v62 = vpop.permute.xlu1 %5667  ;;  %v5666_v32 = vpop.permute.xlu0 %5665  ;;  %v7414_v29 = vadd.f32 %v13155_v51, %v9352_v47 }
 0x873   : > { %5927 = vst.msk [vmem:[#allocation2 + $0x3e8] sm:$0xff] %vm5801_vm8, %v5668_v62  ;;  %5926 = vst.msk [vmem:[#allocation2 + $0x3e0] sm:$0xff] %vm5801_vm8, %v5666_v32  ;;  %v7405_v2 = vpop.f32.mrf.mxu0 }
 0x874   : > { %v7406_v8 = vadd.f32 %v13155_v51, %v7405_v2  ;;  %v7738_v48 = vmax.f32 %v7414_v29, 0.0  ;;  %v7454_v29 = vadd.f32 %v13155_v51, %v7453_v39 }
 0x875   : > { %v9353_v61 = vpop.f32.mrf.mxu0 }
 0x876   : > { %v5672_v31 = vpop.permute.xlu1 %5671  ;;  %v5670_v63 = vpop.permute.xlu0 %5669  ;;  %v7736_v23 = vmax.f32 %v7406_v8, 0.0  ;;  %v7417_v25 = vadd.f32 %v13155_v51, %v9353_v61  ;;  %v7896_v58 = vsel %vm7804_vm11, %v7738_v48, 0.0 }
 0x877   : > { %5929 = vst.msk [vmem:[#allocation2 + $0x3f8] sm:$0xff] %vm5801_vm8, %v5672_v31  ;;  %5928 = vst.msk [vmem:[#allocation2 + $0x3f0] sm:$0xff] %vm5801_vm8, %v5670_v63  ;;  %v7408_v10 = vpop.f32.mrf.mxu0  ;;  %v13288_v61 = vpop.f32.mrf.mxu1 }
 0x878   : > { %v7409_v1 = vadd.f32 %v13155_v51, %v7408_v10  ;;  %v7894_v43 = vsel %vm7804_vm11, %v7736_v23, 0.0  ;;  %v7739_v49 = vmax.f32 %v7417_v25, 0.0 }
 0x879   : > { %v7895_v55 = vadd.f32 %v7894_v43, %v7893_v41  ;;  %v7456_v46 = vpop.f32.mrf.mxu1  ;;  %v7462_v43 = vadd.f32 %v13155_v51, %v9364_v21  ;;  %v7465_v21 = vadd.f32 %v13155_v51, %v13288_v61 }
 0x87a   : > { %v6437_v9 = vpop.permute.xlu1 %6436  ;;  %v6435_v12 = vpop.permute.xlu0 %6434  ;;  %v7737_v19 = vmax.f32 %v7409_v1, 0.0  ;;  %v7927_v40 = vsel %vm7804_vm11, %v7739_v49, 0.0 }
 0x87b   : > { %6696 = vst.msk [vmem:[#allocation2 + $0x3e8] sm:$0xff] %vm6570_vm9, %v6437_v9  ;;  %6695 = vst.msk [vmem:[#allocation2 + $0x3e0] sm:$0xff] %vm6570_vm9, %v6435_v12  ;;  %v7897_v2 = vadd.f32 %v7896_v58, %v7895_v55  ;;  %v9368_v35 = vpop.f32.mrf.mxu1  ;;  %v7457_v55 = vadd.f32 %v13155_v51, %v7456_v46 }
 0x87c   : > { %v7925_v7 = vsel %vm7804_vm11, %v7737_v19, 0.0  ;;  %v9476_v19 = vld [vmem:[%s13540_s5] sm:$0xff]  }
 0x87d   : > { %v7926_v26 = vadd.f32 %v7925_v7, %v7924_v33  ;;  %v8055_v52 = vmul.f32 0.0625, %v7897_v2  ;;  %v7469_v11 = vpop.f32.mrf.mxu1 }
 0x87e   : > { %v6441_v3 = vpop.permute.xlu1 %6440  ;;  %v6439_v28 = vpop.permute.xlu0 %6438 }
 0x87f   : > { %6698 = vst.msk [vmem:[#allocation2 + $0x3f8] sm:$0xff] %vm6570_vm9, %v6441_v3  ;;  %6697 = vst.msk [vmem:[#allocation2 + $0x3f0] sm:$0xff] %vm6570_vm9, %v6439_v28  ;;  %v7928_v62 = vadd.f32 %v7927_v40, %v7926_v26  ;;  %v13290_v14 = vpop.f32.mrf.mxu1  ;;  %v7470_v40 = vadd.f32 %v13155_v51, %v7469_v11 }
 0x881   : > { %v8056_v34 = vmul.f32 0.0625, %v7928_v62  ;;  %v13292_v31 = vpop.f32.mrf.mxu1  ;;  %v7748_v62 = vmax.f32 %v7454_v29, 0.0 }
 0x882   : > { %v6823_v37 = vld [vmem:[#allocation2 + $0x3e0] sm:$0xff]  ;;  %v6824_v45 = vld [vmem:[#allocation2 + $0x3e8] sm:$0xff]  ;;  %v7473_v61 = vadd.f32 %v13155_v51, %v13292_v31 }
 0x883   : > { %v6889_v27 = vpack.c.bf16 %v6824_v45, %v6823_v37  ;;  %v8062_v20 = vpack.c.bf16 %v8056_v34, %v8055_v52  ;;  %v13294_v63 = vpop.f32.mrf.mxu1  ;;  %v7750_v34 = vmax.f32 %v7462_v43, 0.0  ;;  %v7478_v52 = vadd.f32 %v13155_v51, %v9368_v35 }
 0x884   : > { %v7494_v29 = vadd.f32 %v13155_v51, %v13294_v63 }
 0x885   : > { %9414 = vmatprep.mubr.msk.bf16.mxu1 %vm6934_vm10, %v6889_v27  ;;  %v13296_v50 = vpop.f32.mrf.mxu1 }
 0x886   : > { %v6825_v47 = vld [vmem:[#allocation2 + $0x3f0] sm:$0xff]  ;;  %v6826_v56 = vld [vmem:[#allocation2 + $0x3f8] sm:$0xff]  ;;  %v7486_v35 = vadd.f32 %v13155_v51, %v13296_v50 }
 0x887   : > { %v6890_v32 = vpack.c.bf16 %v6826_v56, %v6825_v47  ;;  %v13298_v54 = vpop.f32.mrf.mxu1 }
 0x888   : > { %v7497_v63 = vadd.f32 %v13155_v51, %v13298_v54 }
 0x889   : > { %9415 = vmatmul.mubr.msk.bf16.gmra.mxu1 %vm6934_vm10, %v6890_v32 }
 0x88a   : > { %9420 = vmatprep.mubr.msk.bf16.mxu1 %vm7804_vm11, %v8061_v22  ;;  %v13300_v22 = vpop.f32.mrf.mxu1 }
 0x88c   : > { %v13302_v15 = vpop.f32.mrf.mxu1 }
 0x88e   : > { %v13304_v44 = vpop.f32.mrf.mxu1 }
 0x890   : > { %v13306_v10 = vpop.f32.mrf.mxu1 }
 0x891   : > { %9421 = vmatmul.mubr.msk.bf16.vlgmr.msra.gmra.mxu1 %vm7804_vm11, %v8062_v20 }
 0x892   : > { %v13308_v42 = vpop.f32.mrf.mxu1  ;;  %9429 = vmatpush3.bf16.msra.mxu1 %v9475_v38  ;;  %v7752_v38 = vmax.f32 %v7470_v40, 0.0 }
 0x893   : > { %9430 = vmatprep.subr.bf16.mxu1 %v9476_v19 }
 0x894   : > { %v13310_v60 = vpop.f32.mrf.mxu1 }
 0x896   : > { %v13312_v0 = vpop.f32.mrf.mxu1  ;;  %9431 = vmatpush3.bf16.msra.mxu1 %v9476_v19 }
 0x898   : > { %v13314_v1 = vpop.f32.mrf.mxu1 }
 0x89a   : > { %v13316_v24 = vpop.f32.mrf.mxu1 }
 0x89c   : > { %v13318_v5 = vpop.f32.mrf.mxu1 }
 0x89e   : > { %v13320_v8 = vpop.f32.mrf.mxu1 }
 0x8a0   : > { %v13322_v12 = vpop.f32.mrf.mxu1 }
 0x8a2   : > { %v13332_v16 = vpop.f32.mrf.mxu1 }
 0x8a4   : > { %v13335_v23 = vpop.f32.mrf.mxu1 }
 0x8a6   : > { %v13343_v49 = vpop.f32.mrf.mxu1 }
 0x8a8   : > { %v13355_v20 = vpop.f32.mrf.mxu1 }
 0x8a9   : > { %v9356_v59 = vpop.f32.mrf.mxu0 }
 0x8aa   : > { %v7430_v18 = vadd.f32 %v13155_v51, %v9356_v59 }
 0x8ab   : > { %v7421_v6 = vpop.f32.mrf.mxu0 }
 0x8ac   : > { %v7422_v13 = vadd.f32 %v13155_v51, %v7421_v6  ;;  %v7742_v25 = vmax.f32 %v7430_v18, 0.0 }
 0x8ad   : > { %v9357_v9 = vpop.f32.mrf.mxu0 }
 0x8ae   : > { %v7740_v30 = vmax.f32 %v7422_v13, 0.0  ;;  %v7433_v28 = vadd.f32 %v13155_v51, %v9357_v9  ;;  %v7930_v37 = vsel %vm7804_vm11, %v7742_v25, 0.0  ;;  %v7749_v9 = vmax.f32 %v7457_v55, 0.0  ;;  %v13368_v25 = vpop.f32.mrf.mxu1 }
 0x8af   : > { %v7424_v17 = vpop.f32.mrf.mxu0 }
 0x8b0   : > { %v7425_v57 = vadd.f32 %v13155_v51, %v7424_v17  ;;  %v7929_v7 = vsel %vm7804_vm11, %v7740_v30, 0.0  ;;  %v7743_v41 = vmax.f32 %v7433_v28, 0.0  ;;  %v7936_v17 = vsel %vm7804_vm11, %v7748_v62, 0.0 }
 0x8b1   : > { %v7931_v47 = vadd.f32 %v7930_v37, %v7929_v7  ;;  %v7938_v30 = vsel %vm7804_vm11, %v7750_v34, 0.0  ;;  %v7967_v50 = vsel %vm7804_vm11, %v7749_v9, 0.0  ;;  %v7940_v7 = vsel %vm7804_vm11, %v7752_v38, 0.0 }
 0x8b2   : > { %v7741_v33 = vmax.f32 %v7425_v57, 0.0  ;;  %v7961_v46 = vsel %vm7804_vm11, %v7743_v41, 0.0  ;;  %v7481_v57 = vadd.f32 %v13155_v51, %v13290_v14  ;;  %v7753_v14 = vmax.f32 %v7473_v61, 0.0 }
 0x8b3   : > { %v7756_v37 = vmax.f32 %v7486_v35, 0.0  ;;  %v7502_v41 = vadd.f32 %v13155_v51, %v13304_v44  ;;  %v7518_v44 = vadd.f32 %v13155_v51, %v13312_v0  ;;  %v7513_v0 = vadd.f32 %v13155_v51, %v13306_v10 }
 0x8b4   : > { %v7960_v32 = vsel %vm7804_vm11, %v7741_v33, 0.0  ;;  %v13375_v33 = vpop.f32.mrf.mxu1  ;;  %v7521_v35 = vadd.f32 %v13155_v51, %v13316_v24 }
 0x8b5   : > { %v7962_v13 = vadd.f32 %v7961_v46, %v7960_v32  ;;  %v7764_v9 = vmax.f32 %v7518_v44, 0.0 }
 0x8b6   : > { %v13391_v62 = vpop.f32.mrf.mxu1 }
 0x8b8   : > { %v13401_v38 = vpop.f32.mrf.mxu1 }
 0x8e1   : > { %v9360_v3 = vpop.f32.mrf.mxu0 }
 0x8e2   : > { %v7446_v4 = vadd.f32 %v13155_v51, %v9360_v3 }
 0x8e3   : > { %v7437_v53 = vpop.f32.mrf.mxu0 }
 0x8e4   : > { %v7438_v36 = vadd.f32 %v13155_v51, %v7437_v53  ;;  %v7746_v26 = vmax.f32 %v7446_v4, 0.0  ;;  %v7751_v4 = vmax.f32 %v7465_v21, 0.0  ;;  %v7754_v53 = vmax.f32 %v7478_v52, 0.0 }
 0x8e5   : > { %v9361_v45 = vpop.f32.mrf.mxu0  ;;  %v7760_v21 = vmax.f32 %v7502_v41, 0.0 }
 0x8e6   : > { %v7744_v27 = vmax.f32 %v7438_v36, 0.0  ;;  %v7449_v48 = vadd.f32 %v13155_v51, %v9361_v45  ;;  %v7934_v11 = vsel %vm7804_vm11, %v7746_v26, 0.0  ;;  %v7489_v45 = vadd.f32 %v13155_v51, %v13300_v22 }
 0x8e7   : > { %v7440_v56 = vpop.f32.mrf.mxu0  ;;  %v7755_v26 = vmax.f32 %v7481_v57, 0.0  ;;  %v7969_v55 = vsel %vm7804_vm11, %v7751_v4, 0.0  ;;  %v7942_v40 = vsel %vm7804_vm11, %v7754_v53, 0.0  ;;  %v7505_v22 = vadd.f32 %v13155_v51, %v13308_v42 }
 0x8e8   : > { %v7932_v58 = vsel %vm7804_vm11, %v7744_v27, 0.0  ;;  %v7441_v2 = vadd.f32 %v13155_v51, %v7440_v56  ;;  %v7747_v59 = vmax.f32 %v7449_v48, 0.0  ;;  %v7510_v56 = vadd.f32 %v13155_v51, %v13302_v15 }
 0x8e9   : > { %v7933_v39 = vadd.f32 %v7932_v58, %v7931_v47  ;;  %v7758_v47 = vmax.f32 %v7494_v29, 0.0  ;;  %v7971_v58 = vsel %vm7804_vm11, %v7753_v14, 0.0  ;;  %v7757_v34 = vmax.f32 %v7489_v45, 0.0 }
 0x8ea   : > { %v7745_v6 = vmax.f32 %v7441_v2, 0.0  ;;  %v7965_v31 = vsel %vm7804_vm11, %v7747_v59, 0.0  ;;  %v7944_v2 = vsel %vm7804_vm11, %v7756_v37, 0.0  ;;  %v7973_v52 = vsel %vm7804_vm11, %v7755_v26, 0.0 }
 0x8eb   : > { %v7935_v18 = vadd.f32 %v7934_v11, %v7933_v39  ;;  %v7759_v39 = vmax.f32 %v7497_v63, 0.0  ;;  %v7946_v42 = vsel %vm7804_vm11, %v7758_v47, 0.0  ;;  %v7762_v11 = vmax.f32 %v7510_v56, 0.0 }
 0x8ec   : > { %v7963_v19 = vsel %vm7804_vm11, %v7745_v6, 0.0  ;;  %v7526_v59 = vadd.f32 %v13155_v51, %v13310_v60  ;;  %v7761_v6 = vmax.f32 %v7505_v22, 0.0  ;;  %v7948_v61 = vsel %vm7804_vm11, %v7760_v21, 0.0 }
 0x8ed   : > { %v7937_v3 = vadd.f32 %v7936_v17, %v7935_v18  ;;  %v7964_v28 = vadd.f32 %v7963_v19, %v7962_v13  ;;  %v7975_v17 = vsel %vm7804_vm11, %v7757_v34, 0.0  ;;  %v7534_v19 = vadd.f32 %v13155_v51, %v13320_v8 }
 0x8ee   : > { %v7977_v10 = vsel %vm7804_vm11, %v7759_v39, 0.0  ;;  %v7950_v57 = vsel %vm7804_vm11, %v7762_v11, 0.0  ;;  %v7529_v4 = vadd.f32 %v13155_v51, %v13314_v1  ;;  %v7979_v53 = vsel %vm7804_vm11, %v7761_v6, 0.0 }
 0x8ef   : > { %v7939_v36 = vadd.f32 %v7938_v30, %v7937_v3  ;;  %v7966_v43 = vadd.f32 %v7965_v31, %v7964_v28  ;;  %v7763_v3 = vmax.f32 %v7513_v0, 0.0  ;;  %v7766_v28 = vmax.f32 %v7526_v59, 0.0  ;;  %v7568_v31 = vpop.f32.mrf.mxu1 }
 0x8f0   : > { %v7952_v29 = vsel %vm7804_vm11, %v7764_v9, 0.0  ;;  %v7542_v8 = vadd.f32 %v13155_v51, %v13318_v5  ;;  %v7767_v26 = vmax.f32 %v7529_v4, 0.0  ;;  %v7545_v63 = vadd.f32 %v13155_v51, %v13322_v12 }
 0x8f1   : > { %v7941_v27 = vadd.f32 %v7940_v7, %v7939_v36  ;;  %v7968_v48 = vadd.f32 %v7967_v50, %v7966_v43  ;;  %v7765_v7 = vmax.f32 %v7521_v35, 0.0  ;;  %v7768_v36 = vmax.f32 %v7534_v19, 0.0  ;;  %v13419_v14 = vpop.f32.mrf.mxu1 }
 0x8f2   : > { %v7537_v43 = vadd.f32 %v13155_v51, %v13332_v16  ;;  %v7981_v1 = vsel %vm7804_vm11, %v7763_v3, 0.0  ;;  %v7954_v41 = vsel %vm7804_vm11, %v7766_v28, 0.0  ;;  %v7985_v44 = vsel %vm7804_vm11, %v7767_v26, 0.0 }
 0x8f3   : > { %v7943_v32 = vadd.f32 %v7942_v40, %v7941_v27  ;;  %v7970_v54 = vadd.f32 %v7969_v55, %v7968_v48  ;;  %v7983_v5 = vsel %vm7804_vm11, %v7765_v7, 0.0  ;;  %v7770_v55 = vmax.f32 %v7542_v8, 0.0  ;;  %v7581_v47 = vpop.f32.mrf.mxu1 }
 0x8f4   : > { %v7956_v40 = vsel %vm7804_vm11, %v7768_v36, 0.0  ;;  %v7769_v16 = vmax.f32 %v7537_v43, 0.0  ;;  %v7558_v35 = vadd.f32 %v13155_v51, %v13335_v23  ;;  %v7566_v19 = vadd.f32 %v13155_v51, %v13391_v62 }
 0x8f5   : > { %v7945_v15 = vadd.f32 %v7944_v2, %v7943_v32  ;;  %v7972_v46 = vadd.f32 %v7971_v58, %v7970_v54  ;;  %v7771_v32 = vmax.f32 %v7545_v63, 0.0  ;;  %v7958_v58 = vsel %vm7804_vm11, %v7770_v55, 0.0  ;;  %v9397_v12 = vpop.f32.mrf.mxu1 }
 0x8f6   : > { %v7987_v2 = vsel %vm7804_vm11, %v7769_v16, 0.0  ;;  %v7561_v3 = vadd.f32 %v13155_v51, %v13355_v20  ;;  %v7776_v28 = vmax.f32 %v7566_v19, 0.0  ;;  %v7574_v62 = vadd.f32 %v13155_v51, %v13375_v33 }
 0x8f7   : > { %v7947_v13 = vadd.f32 %v7946_v42, %v7945_v15  ;;  %v7974_v18 = vadd.f32 %v7973_v52, %v7972_v46  ;;  %v7989_v52 = vsel %vm7804_vm11, %v7771_v32, 0.0  ;;  %v7584_v15 = vpop.f32.mrf.mxu1  ;;  %v7577_v43 = vadd.f32 %v13155_v51, %v13401_v38 }
 0x8f8   : > { %v7778_v36 = vmax.f32 %v7574_v62, 0.0  ;;  %v7590_v26 = vadd.f32 %v13155_v51, %v13419_v14 }
 0x8f9   : > { %v7976_v30 = vadd.f32 %v7975_v17, %v7974_v18  ;;  %v7949_v60 = vadd.f32 %v7948_v61, %v7947_v13  ;;  %v9400_v11 = vpop.f32.mrf.mxu1  ;;  %v7550_v17 = vadd.f32 %v13155_v51, %v13343_v49  ;;  %v7569_v49 = vadd.f32 %v13155_v51, %v7568_v31 }
 0x8fa   : > { %v7779_v55 = vmax.f32 %v7577_v43, 0.0 }
 0x8fb   : > { %v7978_v24 = vadd.f32 %v7977_v10, %v7976_v30  ;;  %v7951_v50 = vadd.f32 %v7950_v57, %v7949_v60  ;;  %v7597_v59 = vpop.f32.mrf.mxu1  ;;  %v7553_v10 = vadd.f32 %v13155_v51, %v13368_v25  ;;  %v7772_v30 = vmax.f32 %v7550_v17, 0.0 }
 0x8fc   : > { %v7774_v57 = vmax.f32 %v7558_v35, 0.0  ;;  %v7777_v7 = vmax.f32 %v7569_v49, 0.0  ;;  %v7598_v63 = vadd.f32 %v13155_v51, %v7597_v59 }
 0x8fd   : > { %v7953_v37 = vadd.f32 %v7952_v29, %v7951_v50  ;;  %v7980_v45 = vadd.f32 %v7979_v53, %v7978_v24  ;;  %v13432_v6 = vpop.f32.mrf.mxu1  ;;  %v7773_v4 = vmax.f32 %v7553_v10, 0.0  ;;  %v7991_v23 = vsel %vm7804_vm11, %v7772_v30, 0.0 }
 0x8fe   : > { %v7582_v29 = vadd.f32 %v13155_v51, %v7581_v47  ;;  %v7992_v25 = vsel %vm7804_vm11, %v7774_v57, 0.0  ;;  %v7775_v24 = vmax.f32 %v7561_v3, 0.0  ;;  %v7994_v50 = vsel %vm7804_vm11, %v7776_v28, 0.0 }
 0x8ff   : > { %v7955_v27 = vadd.f32 %v7954_v41, %v7953_v37  ;;  %v7982_v48 = vadd.f32 %v7981_v1, %v7980_v45  ;;  %v7600_v9 = vpop.f32.mrf.mxu1  ;;  %v7993_v20 = vadd.f32 %v7992_v25, %v7991_v23  ;;  %v8022_v8 = vsel %vm7804_vm11, %v7773_v4, 0.0 }
 0x900   : > { %v7780_v37 = vmax.f32 %v7582_v29, 0.0  ;;  %v7585_v45 = vadd.f32 %v13155_v51, %v7584_v15  ;;  %v8023_v1 = vsel %vm7804_vm11, %v7775_v24, 0.0  ;;  %v8025_v41 = vsel %vm7804_vm11, %v7777_v7, 0.0 }
 0x901   : > { %v7957_v56 = vadd.f32 %v7956_v40, %v7955_v27  ;;  %v7984_v22 = vadd.f32 %v7983_v5, %v7982_v48  ;;  %v13434_v13 = vpop.f32.mrf.mxu1  ;;  %v7995_v33 = vadd.f32 %v7994_v50, %v7993_v20  ;;  %v8024_v27 = vadd.f32 %v8023_v1, %v8022_v8 }
 0x902   : > { %v7996_v5 = vsel %vm7804_vm11, %v7778_v36, 0.0  ;;  %v7998_v38 = vsel %vm7804_vm11, %v7780_v37, 0.0  ;;  %v7781_v40 = vmax.f32 %v7585_v45, 0.0  ;;  %v7601_v32 = vadd.f32 %v13155_v51, %v7600_v9 }
 0x903   : > { %v7986_v54 = vadd.f32 %v7985_v44, %v7984_v22  ;;  %v7959_v34 = vadd.f32 %v7958_v58, %v7957_v56  ;;  %v7613_v18 = vpop.f32.mrf.mxu1  ;;  %v8026_v16 = vadd.f32 %v8025_v41, %v8024_v27  ;;  %v7997_v47 = vadd.f32 %v7996_v5, %v7995_v33 }
 0x904   : > { %v7782_v56 = vmax.f32 %v7590_v26, 0.0  ;;  %v7593_v22 = vadd.f32 %v13155_v51, %v9397_v12  ;;  %v7784_v44 = vmax.f32 %v7598_v63, 0.0  ;;  %v8027_v58 = vsel %vm7804_vm11, %v7779_v55, 0.0 }
 0x905   : > { %v7988_v21 = vadd.f32 %v7987_v2, %v7986_v54  ;;  %v8057_v46 = vmul.f32 0.0625, %v7959_v34  ;;  %v13438_v61 = vpop.f32.mrf.mxu1  ;;  %v7999_v54 = vadd.f32 %v7998_v38, %v7997_v47  ;;  %v8029_v2 = vsel %vm7804_vm11, %v7781_v40, 0.0 }
 0x906   : > { %v7606_v34 = vadd.f32 %v13155_v51, %v9400_v11  ;;  %v8000_v15 = vsel %vm7804_vm11, %v7782_v56, 0.0  ;;  %v8002_v12 = vsel %vm7804_vm11, %v7784_v44, 0.0  ;;  %v7609_v17 = vadd.f32 %v13155_v51, %v13432_v6 }
 0x907   : > { %v7990_v39 = vadd.f32 %v7989_v52, %v7988_v21  ;;  %v7616_v60 = vpop.f32.mrf.mxu1  ;;  %v7614_v21 = vadd.f32 %v13155_v51, %v7613_v18  ;;  %v8028_v52 = vadd.f32 %v8027_v58, %v8026_v16  ;;  %v8001_v59 = vadd.f32 %v8000_v15, %v7999_v54 }
 0x908   : > { %v7786_v9 = vmax.f32 %v7606_v34, 0.0  ;;  %v7617_v19 = vadd.f32 %v13155_v51, %v7616_v60  ;;  %v7622_v57 = vadd.f32 %v13155_v51, %v13434_v13  ;;  %v7787_v4 = vmax.f32 %v7609_v17, 0.0  ;;  %v9483_v17 = vld [vmem:[%s13537_s2] ss:$0 sm:$0xff] }
 0x909   : > { %v8058_v42 = vmul.f32 0.0625, %v7990_v39  ;;  %v13449_v53 = vpop.f32.mrf.mxu1  ;;  %v7788_v35 = vmax.f32 %v7614_v21, 0.0  ;;  %v8003_v11 = vadd.f32 %v8002_v12, %v8001_v59  ;;  %v7625_v24 = vadd.f32 %v13155_v51, %v13438_v61 }
 0x90a   : > { %v8004_v49 = vsel %vm7804_vm11, %v7786_v9, 0.0  ;;  %v7789_v23 = vmax.f32 %v7617_v19, 0.0  ;;  %v7790_v25 = vmax.f32 %v7622_v57, 0.0  ;;  %v8035_v20 = vsel %vm7804_vm11, %v7787_v4, 0.0 }
 0x90b   : > { %v8063_v0 = vpack.c.bf16 %v8058_v42, %v8057_v46  ;;  %v7629_v31 = vpop.f32.mrf.mxu1  ;;  %v7783_v46 = vmax.f32 %v7593_v22, 0.0  ;;  %v7785_v42 = vmax.f32 %v7601_v32, 0.0  ;;  %v8006_v6 = vsel %vm7804_vm11, %v7788_v35, 0.0 }
 0x90c   : > { %v7630_v3 = vadd.f32 %v13155_v51, %v7629_v31  ;;  %v8005_v60 = vadd.f32 %v8004_v49, %v8003_v11  ;;  %v8037_v8 = vsel %vm7804_vm11, %v7789_v23, 0.0  ;;  %v7638_v31 = vadd.f32 %v13155_v51, %v13449_v53 }
 0x90d   : > { %9424 = vmatprep.mubr.msk.bf16.mxu1 %vm7804_vm11, %v8063_v0  ;;  %v9409_v48 = vpop.f32.mrf.mxu1  ;;  %v8030_v0 = vadd.f32 %v8029_v2, %v8028_v52  ;;  %v8031_v18 = vsel %vm7804_vm11, %v7783_v46, 0.0  ;;  %v8033_v30 = vsel %vm7804_vm11, %v7785_v42, 0.0  ;;  %v8008_v45 = vsel %vm7804_vm11, %v7790_v25, 0.0 }
 0x90e   : > { %v7792_v50 = vmax.f32 %v7630_v3, 0.0  ;;  %v8007_v13 = vadd.f32 %v8006_v6, %v8005_v60  ;;  %v7791_v33 = vmax.f32 %v7625_v24, 0.0  ;;  %v7794_v63 = vmax.f32 %v7638_v31, 0.0  ;;  %v9184_v24 = vld [vmem:[%s13539_s4] ss:$0 sm:$0xff] }
 0x90f   : > { %v7632_v14 = vpop.f32.mrf.mxu1  ;;  %v8032_v28 = vadd.f32 %v8031_v18, %v8030_v0  ;;  %v7641_v27 = vadd.f32 %v13155_v51, %v9409_v48 }
 0x910   : > { %v7633_v7 = vadd.f32 %v13155_v51, %v7632_v14  ;;  %v8010_v61 = vsel %vm7804_vm11, %v7792_v50, 0.0  ;;  %v8009_v26 = vadd.f32 %v8008_v45, %v8007_v13  ;;  %v8039_v53 = vsel %vm7804_vm11, %v7791_v33, 0.0 }
 0x911   : > { %v8034_v62 = vadd.f32 %v8033_v30, %v8032_v28  ;;  %v8012_v56 = vsel %vm7804_vm11, %v7794_v63, 0.0  ;;  %v7795_v22 = vmax.f32 %v7641_v27, 0.0 }
 0x912   : > { %v7793_v1 = vmax.f32 %v7633_v7, 0.0  ;;  %v8011_v38 = vadd.f32 %v8010_v61, %v8009_v26 }
 0x913   : > { %v8036_v43 = vadd.f32 %v8035_v20, %v8034_v62  ;;  %v8043_v52 = vsel %vm7804_vm11, %v7795_v22, 0.0 }
 0x914   : > { %v8041_v40 = vsel %vm7804_vm11, %v7793_v1, 0.0  ;;  %v8013_v14 = vadd.f32 %v8012_v56, %v8011_v38 }
 0x915   : > { %v8038_v41 = vadd.f32 %v8037_v8, %v8036_v43 }
 0x917   : > { %v8040_v47 = vadd.f32 %v8039_v53, %v8038_v41 }
 0x919   : > { %v8042_v54 = vadd.f32 %v8041_v40, %v8040_v47 }
 0x91b   : > { %v8044_v12 = vadd.f32 %v8043_v52, %v8042_v54 }
 0x929   : > { %v9412_v39 = vpop.f32.mrf.mxu1 }
 0x92a   : > { %v7654_v16 = vadd.f32 %v13155_v51, %v9412_v39 }
 0x92b   : > { %v7645_v10 = vpop.f32.mrf.mxu1 }
 0x92c   : > { %v7646_v36 = vadd.f32 %v13155_v51, %v7645_v10  ;;  %v7798_v58 = vmax.f32 %v7654_v16, 0.0 }
 0x92d   : > { %v9413_v29 = vpop.f32.mrf.mxu1 }
 0x92e   : > { %v7796_v5 = vmax.f32 %v7646_v36, 0.0  ;;  %v7657_v2 = vadd.f32 %v13155_v51, %v9413_v29  ;;  %v8016_v0 = vsel %vm7804_vm11, %v7798_v58, 0.0 }
 0x92f   : > { %v7648_v37 = vpop.f32.mrf.mxu1 }
 0x930   : > { %v7649_v55 = vadd.f32 %v13155_v51, %v7648_v37  ;;  %v8014_v44 = vsel %vm7804_vm11, %v7796_v5, 0.0  ;;  %v7799_v59 = vmax.f32 %v7657_v2, 0.0 }
 0x931   : > { %v8015_v34 = vadd.f32 %v8014_v44, %v8013_v14  ;;  %v9190_v14 = vld [vmem:[%s13541_s6] ss:$0 sm:$0xff] }
 0x932   : > { %v7797_v32 = vmax.f32 %v7649_v55, 0.0  ;;  %v8047_v28 = vsel %vm7804_vm11, %v7799_v59, 0.0 }
 0x933   : > { %v8017_v11 = vadd.f32 %v8016_v0, %v8015_v34 }
 0x934   : > { %v8045_v15 = vsel %vm7804_vm11, %v7797_v32, 0.0 }
 0x935   : > { %v8046_v19 = vadd.f32 %v8045_v15, %v8044_v12 }
 0x937   : > { %v8048_v6 = vadd.f32 %v8047_v28, %v8046_v19 }
 0x949   : > { %v9416_v48 = vpop.f32.mrf.mxu1 }
 0x94a   : > { %v7670_v39 = vadd.f32 %v13155_v51, %v9416_v48 }
 0x94b   : > { %v7661_v21 = vpop.f32.mrf.mxu1 }
 0x94c   : > { %v7662_v46 = vadd.f32 %v13155_v51, %v7661_v21  ;;  %v7802_v18 = vmax.f32 %v7670_v39, 0.0 }
 0x94d   : > { %v9417_v42 = vpop.f32.mrf.mxu1 }
 0x94e   : > { %v7800_v9 = vmax.f32 %v7662_v46, 0.0  ;;  %v7673_v35 = vadd.f32 %v9483_v17, %v9417_v42  ;;  %v8020_v62 = vsel %vm7804_vm11, %v7802_v18, 0.0 }
 0x94f   : > { %v7664_v10 = vpop.f32.mrf.mxu1 }
 0x950   : > { %v8018_v30 = vsel %vm7804_vm11, %v7800_v9, 0.0  ;;  %v7665_v57 = vadd.f32 %v9483_v17, %v7664_v10  ;;  %v7803_v49 = vmax.f32 %v7673_v35, 0.0 }
 0x951   : > { %v8019_v3 = vadd.f32 %v8018_v30, %v8017_v11  ;;  %v9422_v51 = vpop.f32.mrf.mxu1 }
 0x952   : > { %v7801_v4 = vmax.f32 %v7665_v57, 0.0  ;;  %v8051_v7 = vsel %vm7804_vm11, %v7803_v49, 0.0  ;;  %v8135_v41 = vadd.f32 %v9422_v51, %v9184_v24 }
 0x953   : > { %v8126_v23 = vpop.f32.mrf.mxu1  ;;  %v8021_v29 = vadd.f32 %v8020_v62, %v8019_v3 }
 0x954   : > { %v8049_v60 = vsel %vm7804_vm11, %v7801_v4, 0.0  ;;  %v8127_v13 = vadd.f32 %v9184_v24, %v8126_v23  ;;  %v8159_v63 = vmax.f32 %v8135_v41, 0.0 }
 0x955   : > { %v8050_v25 = vadd.f32 %v8049_v60, %v8048_v6  ;;  %v9423_v50 = vpop.f32.mrf.mxu1  ;;  %v8059_v36 = vmul.f32 0.0625, %v8021_v29 }
 0x956   : > { %v8157_v37 = vmax.f32 %v8127_v13, 0.0  ;;  %v8138_v33 = vadd.f32 %v9423_v50, %v9184_v24 }
 0x957   : > { %v8052_v20 = vadd.f32 %v8051_v7, %v8050_v25  ;;  %v8129_v8 = vpop.f32.mrf.mxu1 }
 0x958   : > { %v8130_v31 = vadd.f32 %v9184_v24, %v8129_v8  ;;  %v8160_v26 = vmax.f32 %v8138_v33, 0.0 }
 0x959   : > { %v8060_v43 = vmul.f32 0.0625, %v8052_v20 }
 0x95a   : > { %v8158_v45 = vmax.f32 %v8130_v31, 0.0  ;;  %v8166_v27 = vpack.c.bf16 %v8160_v26, %v8159_v63 }
 0x95b   : > { %v8064_v61 = vpack.c.bf16 %v8060_v43, %v8059_v36 }
 0x95c   : > { %v8165_v1 = vpack.c.bf16 %v8158_v45, %v8157_v37 }
 0x95d   : > { %9425 = vmatmul.mubr.msk.bf16.gmra.mxu1 %vm7804_vm11, %v8064_v61 }
 0x95e   : > { %9432 = vmatprep.mubr.msk.bf16.mxu1 %vm8192_vm12, %v8165_v1 }
 0x965   : > { %9433 = vmatmul.mubr.msk.bf16.vlgmr.msra.gmra.mxu1 %vm8192_vm12, %v8166_v27 }
 0xa1d   : > { %v9426_v5 = vpop.f32.mrf.mxu1 }
 0xa1e   : > { %v8151_v16 = vadd.f32 %v9426_v5, %v9184_v24 }
 0xa1f   : > { %v8142_v55 = vpop.f32.mrf.mxu1 }
 0xa20   : > { %v8143_v53 = vadd.f32 %v9184_v24, %v8142_v55  ;;  %v8163_v48 = vmax.f32 %v8151_v16, 0.0 }
 0xa21   : > { %v9427_v38 = vpop.f32.mrf.mxu1 }
 0xa22   : > { %v8154_v40 = vadd.f32 %v9427_v38, %v9184_v24  ;;  %v8161_v32 = vmax.f32 %v8143_v53, 0.0 }
 0xa23   : > { %v8145_v47 = vpop.f32.mrf.mxu1 }
 0xa24   : > { %v8146_v56 = vadd.f32 %v9184_v24, %v8145_v47  ;;  %v8164_v22 = vmax.f32 %v8154_v40, 0.0 }
 0xa25   : > { %v9434_v44 = vpop.f32.mrf.mxu1 }
 0xa26   : > { %v8162_v54 = vmax.f32 %v8146_v56, 0.0  ;;  %v8168_v21 = vpack.c.bf16 %v8164_v22, %v8163_v48  ;;  %v8248_v52 = vadd.f32 %v9434_v44, %v9190_v14 }
 0xa27   : > { %v8239_v58 = vpop.f32.mrf.mxu1 }
 0xa28   : > { %v8167_v2 = vpack.c.bf16 %v8162_v54, %v8161_v32  ;;  %v8240_v34 = vadd.f32 %v9190_v14, %v8239_v58  ;;  %8272 = vst [vmem:[%s285_s28 + $0x10] sm:$0xff] %v8248_v52 }
 0xa29   : > { %v9435_v15 = vpop.f32.mrf.mxu1 }
 0xa2a   : > { %8270 = vst [vmem:[%s285_s28] sm:$0xff] %v8240_v34  ;;  %9436 = vmatprep.mubr.msk.bf16.mxu1 %vm8192_vm12, %v8167_v2  ;;  %v8251_v12 = vadd.f32 %v9435_v15, %v9190_v14 }
 0xa2b   : > { %v8242_v39 = vpop.f32.mrf.mxu1  ;;  %9437 = vmatmul.mubr.msk.bf16.gmra.mxu1 %vm8192_vm12, %v8168_v21 }
 0xa2c   : > { %v8243_v46 = vadd.f32 %v9190_v14, %v8242_v39  ;;  %8273 = vst [vmem:[%s285_s28 + $0x18] sm:$0xff] %v8251_v12 }
 0xa2e   : > { %8271 = vst [vmem:[%s285_s28 + $0x8] sm:$0xff] %v8243_v46 }
 0xaeb   : > { %v9438_v42 = vpop.f32.mrf.mxu1 }
 0xaec   : > { %v8264_v9 = vadd.f32 %v9438_v42, %v9190_v14 }
 0xaed   : > { %v8255_v0 = vpop.f32.mrf.mxu1 }
 0xaee   : > { %v8256_v59 = vadd.f32 %v9190_v14, %v8255_v0  ;;  %8276 = vst [vmem:[%s285_s28 + $0x30] sm:$0xff] %v8264_v9 }
 0xaef   : > { %v9439_v17 = vpop.f32.mrf.mxu1 }
 0xaf0   : > { %8274 = vst [vmem:[%s285_s28 + $0x20] sm:$0xff] %v8256_v59  ;;  %v8267_v11 = vadd.f32 %v9439_v17, %v9190_v14 }
 0xaf1   : > { %v8258_v35 = vpop.f32.mrf.mxu1 }
 0xaf2   : > { %v8259_v19 = vadd.f32 %v9190_v14, %v8258_v35  ;;  %8277 = vst [vmem:[%s285_s28 + $0x38] sm:$0xff] %v8267_v11 }
 0xaf4   : > { %8275 = vst [vmem:[%s285_s28 + $0x28] sm:$0xff] %v8259_v19 }
 0xaf5 PF: > { %s17_s24 = sadd.s32 1, %s9490_s24  }
 0xaf6   : > { %p14_p4 = scmp.ge.s32.totalorder %s17_s24, 4  }
 0xaf8   :  { %16 = sbr.rel (!%p14_p4) target bundleno = 1 (0x1), region = 80 }

</bundles_post_ra>
